<compile_context>
chip_gen: v7x
topology: tpu7x:2x2x1
jax: 0.10.0
libtpu: 0.0.40
codegen_flags: <defaults>
</compile_context>

<pallas_src>
import math

import jax
import jax.numpy as jnp
from jax.experimental import pallas as pl
from jax.experimental.pallas import tpu as pltpu

# ----------------------------- model dims ---------------------------------
B = 2                    # batch (must be even: forward uses .chunk(2, 0))
IMG = 32
PATCH = 16
NPATCH = (IMG // PATCH) ** 2          # 4 patches
NTOK_IMG = NPATCH + 1                 # 5 real image tokens (CLS + patches)
S_IMG_PAD = 8                         # padded to a sublane multiple of 8
D = 128
HEADS = 4
DH = D // HEADS
MLP = 4 * D
VIT_DEPTH = 2
BERT_LAYERS = 8                       # >= 8 so hidden_states[6], [7] exist
S_TEXT = 8
VOCAB = 64
LATENT = 32
LN_EPS_VIT = 1e-6
LN_EPS_BERT = 1e-12
NEG_INF = -1e9


# ------------------------ packed-parameter layouts --------------------------
def _offsets(segs):
    out, off = {}, 0
    for name, w in segs:
        out[name] = (off, off + w)
        off += w
    return out, off


# ViT per-layer packed layouts (all lane offsets are multiples of 128).
VIT_W_SEGS = (("wqkv", 3 * D), ("wo", D), ("w1", MLP))
VIT_B_SEGS = (("ln1_g", D), ("ln1_b", D), ("bqkv", 3 * D), ("bo", D),
              ("ln2_g", D), ("ln2_b", D), ("b1", MLP), ("b2", D))
VIT_W_OFF, VIT_W_TOT = _offsets(VIT_W_SEGS)
VIT_B_OFF, VIT_B_TOT = _offsets(VIT_B_SEGS)

# BERT per-layer packed layouts.
BERT_W_SEGS = (("sa_wqkv", 3 * D), ("sa_wo", D), ("ca_wq", D),
               ("ca_wkv", 2 * D), ("ca_wo", D), ("fc1_w", MLP))
BERT_B_SEGS = (("sa_bqkv", 3 * D), ("sa_bo", D), ("sa_ln_g", D), ("sa_ln_b", D),
               ("ca_bq", D), ("ca_bkv", 2 * D), ("ca_bo", D),
               ("ca_ln_g", D), ("ca_ln_b", D),
               ("fc1_b", MLP), ("fc2_b", D), ("ffn_ln_g", D), ("ffn_ln_b", D))
BERT_W_OFF, BERT_W_TOT = _offsets(BERT_W_SEGS)
BERT_B_OFF, BERT_B_TOT = _offsets(BERT_B_SEGS)


# ----------------------------- spec helpers --------------------------------
def _full_spec(shape):
    """Whole-array block, no grid."""
    return pl.BlockSpec(shape, lambda: (0,) * len(shape))


def _const_spec(a):
    """Whole-array block, constant block index across a 1-D grid (resident)."""
    nd = a.ndim
    return pl.BlockSpec(a.shape, lambda l: (0,) * nd)


def _layer_spec(a):
    """Per-layer block of a (L, X, Y)-stacked parameter, streamed by layer."""
    return pl.BlockSpec((1,) + a.shape[1:], lambda l: (l, 0, 0))


# -------------------------- in-kernel math helpers --------------------------
def _ln(x, g, b, eps):
    x = x.astype(jnp.float32)
    mean = jnp.mean(x, axis=-1, keepdims=True)
    var = jnp.mean((x - mean) ** 2, axis=-1, keepdims=True)
    return (x - mean) * jax.lax.rsqrt(var + eps) * g + b


def _mm(x, w):
    """bf16 MXU matmul with f32 accumulation (w is stored in bf16)."""
    return jnp.dot(x.astype(jnp.bfloat16), w, preferred_element_type=jnp.float32)


def _wslice(ref, off, name):
    """Static, 128-aligned lane slice of a packed (1, R, W) parameter Ref."""
    a, b = off[name]
    return ref[0, :, a:b]


def _heads_attention(q, k, v, bias, nb, sq, sk):
    """q: (nb*sq, D), k/v: (nb*sk, D) f32; bias broadcastable to (nb, sq, sk).

    Static loop over the HEADS heads (lane slices of the fused projection);
    softmax in f32 with the EUP approx-reciprocal for the denominator."""
    q3 = q.reshape(nb, sq, D).astype(jnp.bfloat16)
    k3 = k.reshape(nb, sk, D).astype(jnp.bfloat16)
    v3 = v.reshape(nb, sk, D).astype(jnp.bfloat16)
    scale = 1.0 / math.sqrt(DH)
    outs = []
    for h in range(HEADS):
        sl = slice(h * DH, (h + 1) * DH)
        s = jnp.einsum("bqd,bkd->bqk", q3[:, :, sl], k3[:, :, sl],
                       preferred_element_type=jnp.float32)
        s = s * scale + bias
        m = jnp.max(s, axis=-1, keepdims=True)
        p = jnp.exp(s - m)
        p = p * pl.reciprocal(jnp.sum(p, axis=-1, keepdims=True), approx=True)
        outs.append(jnp.einsum("bqk,bkd->bqd", p.astype(jnp.bfloat16),
                               v3[:, :, sl], preferred_element_type=jnp.float32))
    return jnp.concatenate(outs, axis=-1).reshape(nb * sq, D)


def _img_key_bias(sq):
    """Additive mask for padded image-key positions (>= NTOK_IMG)."""
    kidx = jax.lax.broadcasted_iota(jnp.int32, (sq, S_IMG_PAD), 1)
    return jnp.where(kidx < NTOK_IMG, 0.0, NEG_INF).astype(jnp.float32)[None]


# ------------------------------ ViT stack kernel ----------------------------
def _vit_stack_kernel(patches_ref, pw_ref, pb_ref, cls_ref, pos_ref,
                      wcat_ref, w2_ref, bcat_ref, lnfg_ref, lnfb_ref, out_ref):
    l = pl.program_id(0)
    last = pl.num_programs(0) - 1

    @pl.when(l == 0)
    def _():
        # Patch-embed (conv stride=patch == per-patch matmul) + CLS + pos,
        # padded with zero rows to S_IMG_PAD tokens per image.
        pe = jnp.dot(patches_ref[...].astype(jnp.bfloat16), pw_ref[...],
                     preferred_element_type=jnp.float32) + pb_ref[...]
        pe = pe.reshape(B, NPATCH, D)
        cls = cls_ref[...]                       # (1, D)
        pos = pos_ref[...]                       # (NTOK_IMG, D)
        pad = jnp.zeros((S_IMG_PAD - NTOK_IMG, D), jnp.float32)
        rows = []
        for b in range(B):
            tok = jnp.concatenate([cls, pe[b]], axis=0) + pos
            rows.append(jnp.concatenate([tok, pad], axis=0))
        out_ref[...] = jnp.concatenate(rows, axis=0)     # (B*S_IMG_PAD, D)

    x = out_ref[...]                                     # resident carry (f32)

    wseg = lambda n: _wslice(wcat_ref, VIT_W_OFF, n)     # (D, w) bf16
    bseg = lambda n: _wslice(bcat_ref, VIT_B_OFF, n)     # (1, w) f32

    # ---- attention sub-layer (pre-LN, fused QKV) ----
    h = _ln(x, bseg("ln1_g"), bseg("ln1_b"), LN_EPS_VIT)
    qkv = _mm(h, wseg("wqkv")) + bseg("bqkv")
    q = qkv[:, 0:D]
    k = qkv[:, D:2 * D]
    v = qkv[:, 2 * D:3 * D]
    att = _heads_attention(q, k, v, _img_key_bias(S_IMG_PAD),
                           B, S_IMG_PAD, S_IMG_PAD)
    att = _mm(att, wseg("wo")) + bseg("bo")
    x = x + att

    # ---- MLP sub-layer (pre-LN) ----
    h = _ln(x, bseg("ln2_g"), bseg("ln2_b"), LN_EPS_VIT)
    # TODO(synk): nn.GELU default is exact erf; tanh approximation used here.
    h = jax.nn.gelu(_mm(h, wseg("w1")) + bseg("b1"), approximate=True)
    h = _mm(h, w2_ref[0]) + bseg("b2")
    x = x + h

    @pl.when(l == last)
    def _():
        out_ref[...] = _ln(x, lnfg_ref[...], lnfb_ref[...], LN_EPS_VIT)

    @pl.when(l != last)
    def _():
        out_ref[...] = x


def vit_stack(p, patches):
    args = [patches, p["patch_w"], p["patch_b"], p["cls"], p["pos"],
            p["wcat"], p["w2"], p["bcat"], p["lnf_g"], p["lnf_b"]]
    in_specs = [_const_spec(patches), _const_spec(p["patch_w"]),
                _const_spec(p["patch_b"]), _const_spec(p["cls"]),
                _const_spec(p["pos"]),
                _layer_spec(p["wcat"]), _layer_spec(p["w2"]),
                _layer_spec(p["bcat"]),
                _const_spec(p["lnf_g"]), _const_spec(p["lnf_b"])]
    return pl.pallas_call(
        _vit_stack_kernel,
        out_shape=jax.ShapeDtypeStruct((B * S_IMG_PAD, D), jnp.float32),
        grid=(VIT_DEPTH,),
        in_specs=in_specs,
        out_specs=pl.BlockSpec((B * S_IMG_PAD, D), lambda l: (0, 0)),
        compiler_params=pltpu.CompilerParams(dimension_semantics=("arbitrary",)),
    )(*args)


# ------------------------------ BERT stack kernel ---------------------------
def _bert_stack_kernel(emb_ref, img_ref, tbias_ref, embg_ref, embb_ref,
                       wcat_ref, fc2w_ref, bcat_ref, hs_ref, x_scr):
    l = pl.program_id(0)

    @pl.when(l == 0)
    def _():
        # Embedding LayerNorm fused into the first grid step.
        x_scr[...] = _ln(emb_ref[...], embg_ref[...], embb_ref[...], LN_EPS_BERT)

    x = x_scr[...]
    img = img_ref[...]                                  # (B*S_IMG_PAD, D)

    wseg = lambda n: _wslice(wcat_ref, BERT_W_OFF, n)   # (D, w) bf16
    bseg = lambda n: _wslice(bcat_ref, BERT_B_OFF, n)   # (1, w) f32

    # ---- self-attention (fused QKV), post-LN ----
    qkv = _mm(x, wseg("sa_wqkv")) + bseg("sa_bqkv")
    q = qkv[:, 0:D]
    k = qkv[:, D:2 * D]
    v = qkv[:, 2 * D:3 * D]
    sa_bias = tbias_ref[...][:, None, :]                # (B, 1, S_TEXT)
    sa = _heads_attention(q, k, v, sa_bias, B, S_TEXT, S_TEXT)
    sa = _mm(sa, wseg("sa_wo")) + bseg("sa_bo")
    x = _ln(x + sa, bseg("sa_ln_g"), bseg("sa_ln_b"), LN_EPS_BERT)

    # ---- cross-attention to image tokens (fused KV), post-LN ----
    cq = _mm(x, wseg("ca_wq")) + bseg("ca_bq")
    kv = _mm(img, wseg("ca_wkv")) + bseg("ca_bkv")
    ck = kv[:, 0:D]
    cv = kv[:, D:2 * D]
    ca = _heads_attention(cq, ck, cv, _img_key_bias(S_TEXT),
                          B, S_TEXT, S_IMG_PAD)
    ca = _mm(ca, wseg("ca_wo")) + bseg("ca_bo")
    x = _ln(x + ca, bseg("ca_ln_g"), bseg("ca_ln_b"), LN_EPS_BERT)

    # ---- FFN, post-LN ----
    h = jax.nn.gelu(_mm(x, wseg("fc1_w")) + bseg("fc1_b"), approximate=True)
    h = _mm(h, fc2w_ref[0]) + bseg("fc2_b")
    x = _ln(x + h, bseg("ffn_ln_g"), bseg("ffn_ln_b"), LN_EPS_BERT)

    x_scr[...] = x
    hs_ref[...] = x[None]                               # layer-l hidden state


def bert_stack(p, emb, img, txt_bias):
    args = [emb, img, txt_bias, p["emb_ln_g"], p["emb_ln_b"],
            p["wcat"], p["fc2_w"], p["bcat"]]
    in_specs = [_const_spec(emb), _const_spec(img), _const_spec(txt_bias),
                _const_spec(p["emb_ln_g"]), _const_spec(p["emb_ln_b"]),
                _layer_spec(p["wcat"]), _layer_spec(p["fc2_w"]),
                _layer_spec(p["bcat"])]
    return pl.pallas_call(
        _bert_stack_kernel,
        out_shape=jax.ShapeDtypeStruct((BERT_LAYERS, B * S_TEXT, D), jnp.float32),
        grid=(BERT_LAYERS,),
        in_specs=in_specs,
        out_specs=pl.BlockSpec((1, B * S_TEXT, D), lambda l: (l, 0, 0)),
        scratch_shapes=[pltpu.VMEM((B * S_TEXT, D), jnp.float32)],
        compiler_params=pltpu.CompilerParams(dimension_semantics=("arbitrary",)),
    )(*args)


# --------------------------------- tail kernel ------------------------------
def _tail_kernel(img_cls_ref, h6_ref, last_ref,
                 dh_wi, dh_bi, dh_wt, dh_bt,
                 dt_wi, dt_bi, dt_wt, dt_bt,
                 ch_w1, ch_b1, ch_w2, ch_b2,
                 ct_w1, ct_b1, ct_w2, ct_b2,
                 hh_ref, hhs_ref, ht_ref, hts_ref, hd_ref, td_ref):
    half = B // 2
    img = img_cls_ref[...].astype(jnp.float32)
    h6 = h6_ref[...].astype(jnp.float32)
    last = last_ref[...].astype(jnp.float32)

    def lin(x, w, b):
        return jnp.dot(x, w[...], preferred_element_type=jnp.float32) + b[...]

    def bce(x, y):
        # binary_cross_entropy_with_logits(mean) * labels.size(1)
        per = jnp.maximum(x, 0.0) - x * y + jnp.log1p(jnp.exp(-jnp.abs(x)))
        s = jnp.sum(per, axis=1, keepdims=True)
        s = jnp.sum(s, axis=0, keepdims=True)               # (1, 1)
        return s / (x.shape[0] * x.shape[1]) * x.shape[1]

    # TODO(synk): Latent_Bert_H / Latent_Bert_T are not defined in the reference
    # source; modeled as CLS-token linear heads (image->logits, text->sigmoid labels).
    hd_ref[...] = bce(lin(img[:half], dh_wi, dh_bi),
                      jax.nn.sigmoid(lin(h6[:half], dh_wt, dh_bt)))
    td_ref[...] = bce(lin(img[half:], dt_wi, dt_bi),
                      jax.nn.sigmoid(lin(h6[half:], dt_wt, dt_bt)))

    def head(x, w1, b1, w2, b2):
        h = jnp.maximum(lin(x, w1, b1), 0.0)
        return lin(h, w2, b2)

    def softmax(z):
        m = jnp.max(z, axis=-1, keepdims=True)
        e = jnp.exp(z - m)
        return e / jnp.sum(e, axis=-1, keepdims=True)

    hh = head(last, ch_w1, ch_b1, ch_w2, ch_b2)
    ht = head(last, ct_w1, ct_b1, ct_w2, ct_b2)
    hh_ref[...] = hh
    hhs_ref[...] = softmax(hh)
    ht_ref[...] = ht
    hts_ref[...] = softmax(ht)


def albef_tail(params, img_cls, h6_cls, last_cls):
    dh, dt = params["dis_H"], params["dis_T"]
    ch, ct = params["cls_hateful"], params["cls_twitter"]
    args = [img_cls, h6_cls, last_cls,
            dh["w_i"], dh["b_i"], dh["w_t"], dh["b_t"],
            dt["w_i"], dt["b_i"], dt["w_t"], dt["b_t"],
            ch["w1"], ch["b1"], ch["w2"], ch["b2"],
            ct["w1"], ct["b1"], ct["w2"], ct["b2"]]
    out_shapes = (jax.ShapeDtypeStruct((B, 2), jnp.float32),
                  jax.ShapeDtypeStruct((B, 2), jnp.float32),
                  jax.ShapeDtypeStruct((B, 2), jnp.float32),
                  jax.ShapeDtypeStruct((B, 2), jnp.float32),
                  jax.ShapeDtypeStruct((1, 1), jnp.float32),
                  jax.ShapeDtypeStruct((1, 1), jnp.float32))
    return pl.pallas_call(
        _tail_kernel,
        out_shape=out_shapes,
        in_specs=[_full_spec(a.shape) for a in args],
        out_specs=tuple(_full_spec(s.shape) for s in out_shapes),
    )(*args)


# ----------------------------- eval-only cls head ---------------------------
def _cls_head_kernel(x_ref, w1, b1, w2, b2, o_ref):
    h = jnp.maximum(jnp.dot(x_ref[...], w1[...],
                            preferred_element_type=jnp.float32) + b1[...], 0.0)
    o_ref[...] = jnp.dot(h, w2[...], preferred_element_type=jnp.float32) + b2[...]


def cls_head_eval(p, x):
    args = [x, p["w1"], p["b1"], p["w2"], p["b2"]]
    return pl.pallas_call(
        _cls_head_kernel,
        out_shape=jax.ShapeDtypeStruct((x.shape[0], 2), jnp.float32),
        in_specs=[_full_spec(a.shape) for a in args],
        out_specs=_full_spec((x.shape[0], 2)),
    )(*args)


# --------------------------------- forward ----------------------------------
def albef_forward(params, image, input_ids, attention_mask, train=True):
    Bi, C, H, W = image.shape
    nh, nw = H // PATCH, W // PATCH
    # Patch extraction (JAX glue); flatten order (C, ph, pw) matches Conv2d.
    patches = image.reshape(Bi, C, nh, PATCH, nw, PATCH)
    patches = patches.transpose(0, 2, 4, 1, 3, 5).reshape(Bi * nh * nw, C * PATCH * PATCH)

    image_x = vit_stack(params["vit"], patches)          # (B*S_IMG_PAD, D)
    image_embeds = image_x.reshape(Bi, S_IMG_PAD, D)     # rows >= NTOK_IMG are padding

    bp = params["bert"]
    emb = jnp.take(bp["word_emb"], input_ids, axis=0) + bp["pos_emb"][None, :S_TEXT, :]
    emb = emb.reshape(Bi * S_TEXT, D)
    txt_bias = (1.0 - attention_mask.astype(jnp.float32)) * jnp.float32(NEG_INF)

    hs = bert_stack(bp, emb, image_x, txt_bias)          # (L, B*S, D)
    hs = hs.reshape(BERT_LAYERS, Bi, S_TEXT, D)
    last_cls = hs[BERT_LAYERS - 1, :, 0, :]              # last_hidden_state CLS

    if not train:
        return cls_head_eval(params["cls_hateful"], last_cls)

    img_cls = image_embeds[:, 0, :]                      # image CLS tokens
    h6_cls = hs[5, :, 0, :]                              # hidden_states[6] CLS
    text_embed = hs[6, :, 0, :]                          # hidden_states[7] CLS

    hh, hh_sm, ht, ht_sm, hd, td = albef_tail(params, img_cls, h6_cls, last_cls)

    return {
        "last_hidden_state": last_cls,
        "head_hateful": hh,
        "head_hateful_softmax": hh_sm,
        "head_twitter": ht,
        "head_twitter_softmax": ht_sm,
        "image_embed": img_cls,
        "text_embed": text_embed,
        "hateful_dis": hd[0, 0],
        "twitter_dis": td[0, 0],
    }


# ------------------------------ parameter init ------------------------------
class KeyGen:
    def __init__(self, key):
        self.key = key

    def __call__(self):
        self.key, sub = jax.random.split(self.key)
        return sub


def nrm(key, shape, scale=0.02):
    return scale * jax.random.normal(key, shape, jnp.float32)


def kaiming(key, shape):  # weight used as x @ W, fan_in = shape[0]
    return jax.random.normal(key, shape, jnp.float32) * math.sqrt(2.0 / shape[0])


def init_params(seed=0):
    kg = KeyGen(jax.random.PRNGKey(seed))
    bf = lambda a: a.astype(jnp.bfloat16)   # matmul weights stored in bf16

    # ---- ViT ----
    L = VIT_DEPTH
    vit_w = {"wqkv": nrm(kg(), (L, D, 3 * D)),
             "wo": nrm(kg(), (L, D, D)),
             "w1": nrm(kg(), (L, D, MLP))}
    vit_b = {"ln1_g": jnp.ones((L, 1, D), jnp.float32),
             "ln1_b": jnp.zeros((L, 1, D), jnp.float32),
             "bqkv": jnp.zeros((L, 1, 3 * D), jnp.float32),
             "bo": jnp.zeros((L, 1, D), jnp.float32),
             "ln2_g": jnp.ones((L, 1, D), jnp.float32),
             "ln2_b": jnp.zeros((L, 1, D), jnp.float32),
             "b1": jnp.zeros((L, 1, MLP), jnp.float32),
             "b2": jnp.zeros((L, 1, D), jnp.float32)}
    vit = {
        "patch_w": bf(nrm(kg(), (3 * PATCH * PATCH, D))),
        "patch_b": jnp.zeros((1, D), jnp.float32),
        "cls": nrm(kg(), (1, D)),
        "pos": nrm(kg(), (NTOK_IMG, D)),
        "wcat": bf(jnp.concatenate([vit_w[n] for n, _ in VIT_W_SEGS], axis=-1)),
        "w2": bf(nrm(kg(), (L, MLP, D))),
        "bcat": jnp.concatenate([vit_b[n] for n, _ in VIT_B_SEGS], axis=-1),
        "lnf_g": jnp.ones((1, D), jnp.float32),
        "lnf_b": jnp.zeros((1, D), jnp.float32),
    }
    assert vit["wcat"].shape == (L, D, VIT_W_TOT)
    assert vit["bcat"].shape == (L, 1, VIT_B_TOT)

    # ---- BERT ----
    L = BERT_LAYERS
    bert_w = {"sa_wqkv": nrm(kg(), (L, D, 3 * D)),
              "sa_wo": nrm(kg(), (L, D, D)),
              "ca_wq": nrm(kg(), (L, D, D)),
              "ca_wkv": nrm(kg(), (L, D, 2 * D)),
              "ca_wo": nrm(kg(), (L, D, D)),
              "fc1_w": nrm(kg(), (L, D, MLP))}
    ones_ld = lambda: jnp.ones((L, 1, D), jnp.float32)
    zeros_ld = lambda: jnp.zeros((L, 1, D), jnp.float32)
    bert_b = {"sa_bqkv": jnp.zeros((L, 1, 3 * D), jnp.float32),
              "sa_bo": zeros_ld(), "sa_ln_g": ones_ld(), "sa_ln_b": zeros_ld(),
              "ca_bq": zeros_ld(),
              "ca_bkv": jnp.zeros((L, 1, 2 * D), jnp.float32),
              "ca_bo": zeros_ld(), "ca_ln_g": ones_ld(), "ca_ln_b": zeros_ld(),
              "fc1_b": jnp.zeros((L, 1, MLP), jnp.float32),
              "fc2_b": zeros_ld(), "ffn_ln_g": ones_ld(), "ffn_ln_b": zeros_ld()}
    bert = {
        "word_emb": nrm(kg(), (VOCAB, D)),
        "pos_emb": nrm(kg(), (S_TEXT, D)),
        "emb_ln_g": jnp.ones((1, D), jnp.float32),
        "emb_ln_b": jnp.zeros((1, D), jnp.float32),
        "wcat": bf(jnp.concatenate([bert_w[n] for n, _ in BERT_W_SEGS], axis=-1)),
        "fc2_w": bf(nrm(kg(), (L, MLP, D))),
        "bcat": jnp.concatenate([bert_b[n] for n, _ in BERT_B_SEGS], axis=-1),
    }
    assert bert["wcat"].shape == (L, D, BERT_W_TOT)
    assert bert["bcat"].shape == (L, 1, BERT_B_TOT)

    dis_h = {"w_i": nrm(kg(), (D, LATENT)), "b_i": jnp.zeros((1, LATENT), jnp.float32),
             "w_t": nrm(kg(), (D, LATENT)), "b_t": jnp.zeros((1, LATENT), jnp.float32)}
    dis_t = {"w_i": nrm(kg(), (D, LATENT)), "b_i": jnp.zeros((1, LATENT), jnp.float32),
             "w_t": nrm(kg(), (D, LATENT)), "b_t": jnp.zeros((1, LATENT), jnp.float32)}
    cls_h = {"w1": kaiming(kg(), (D, D)), "b1": jnp.zeros((1, D), jnp.float32),
             "w2": kaiming(kg(), (D, 2)), "b2": jnp.zeros((1, 2), jnp.float32)}
    cls_t = {"w1": kaiming(kg(), (D, D)), "b1": jnp.zeros((1, D), jnp.float32),
             "w2": kaiming(kg(), (D, 2)), "b2": jnp.zeros((1, 2), jnp.float32)}
    # NOTE: distill=False -> momentum (_m) copies are never used in forward().
    return {"vit": vit, "bert": bert, "dis_H": dis_h, "dis_T": dis_t,
            "cls_hateful": cls_h, "cls_twitter": cls_t}


# --------------------------------- main -------------------------------------
if __name__ == "__main__":
    params = init_params(seed=0)

    key = jax.random.PRNGKey(0)
    k_img, k_ids = jax.random.split(key)
    image = jax.random.normal(k_img, (B, 3, IMG, IMG), jnp.float32)   # NCHW
    input_ids = jax.random.randint(k_ids, (B, S_TEXT), 0, VOCAB, jnp.int32)
    attention_mask = jnp.ones((B, S_TEXT), jnp.int32)

    fwd = jax.jit(albef_forward, static_argnames=("train",))
    out = fwd(params, image, input_ids, attention_mask, train=True)
    jax.block_until_ready(out)

    # Light sanity checks on output structure / values.
    assert out["head_hateful"].shape == (B, 2)
    assert out["head_twitter_softmax"].shape == (B, 2)
    assert out["last_hidden_state"].shape == (B, D)
    assert out["image_embed"].shape == (B, D)
    assert out["text_embed"].shape == (B, D)
    assert out["hateful_dis"].shape == ()
    assert out["twitter_dis"].shape == ()
    assert bool(jnp.isfinite(out["hateful_dis"]))
    assert bool(jnp.isfinite(out["twitter_dis"]))
    assert bool(jnp.all(jnp.isfinite(out["head_hateful"])))

    print("KERNEL_OK")
</pallas_src>

<mosaic_0001>
module attributes {stable_mosaic.version = 11 : i64} {
  func.func @_vit_stack_kernel(%arg0: i32, %arg1: memref<8x768xf32, #tpu.memory_space<vmem>>, %arg2: memref<768x128xbf16, #tpu.memory_space<vmem>>, %arg3: memref<1x128xf32, #tpu.memory_space<vmem>>, %arg4: memref<1x128xf32, #tpu.memory_space<vmem>>, %arg5: memref<5x128xf32, #tpu.memory_space<vmem>>, %arg6: memref<1x128x1024xbf16, #tpu.memory_space<vmem>>, %arg7: memref<1x512x128xbf16, #tpu.memory_space<vmem>>, %arg8: memref<1x1x1664xf32, #tpu.memory_space<vmem>>, %arg9: memref<1x128xf32, #tpu.memory_space<vmem>>, %arg10: memref<1x128xf32, #tpu.memory_space<vmem>>, %arg11: memref<16x128xf32, #tpu.memory_space<vmem>>) attributes {dimension_semantics = [#tpu.dimension_semantics<arbitrary>], iteration_bounds = array<i64: 2>, scalar_prefetch = 0 : i64, scratch_operands = 0 : i64, tpu.core_type = #tpu.core_type<tc>, window_params = [{pipeline_mode = #tpu.pipeline_mode<synchronous>, transform_indices = @transform_0, window_bounds = array<i64: 8, 768>}, {pipeline_mode = #tpu.pipeline_mode<synchronous>, transform_indices = @transform_1, window_bounds = array<i64: 768, 128>}, {pipeline_mode = #tpu.pipeline_mode<synchronous>, transform_indices = @transform_2, window_bounds = array<i64: 1, 128>}, {pipeline_mode = #tpu.pipeline_mode<synchronous>, transform_indices = @transform_3, window_bounds = array<i64: 1, 128>}, {pipeline_mode = #tpu.pipeline_mode<synchronous>, transform_indices = @transform_4, window_bounds = array<i64: 5, 128>}, {transform_indices = @transform_5, window_bounds = array<i64: 1, 128, 1024>}, {transform_indices = @transform_6, window_bounds = array<i64: 1, 512, 128>}, {transform_indices = @transform_7, window_bounds = array<i64: 1, 1, 1664>}, {pipeline_mode = #tpu.pipeline_mode<synchronous>, transform_indices = @transform_8, window_bounds = array<i64: 1, 128>}, {pipeline_mode = #tpu.pipeline_mode<synchronous>, transform_indices = @transform_9, window_bounds = array<i64: 1, 128>}, {pipeline_mode = #tpu.pipeline_mode<synchronous>, transform_indices = @transform_10, window_bounds = array<i64: 16, 128>}]} {
    %c0_i32 = arith.constant 0 : i32
    %0 = arith.cmpi eq, %arg0, %c0_i32 : i32
    %1 = arith.extui %0 : i1 to i32
    %c0_i32_0 = arith.constant 0 : i32
    %2 = arith.cmpi ne, %1, %c0_i32_0 : i32
    scf.if %2 {
      %c0_71 = arith.constant 0 : index
      %c0_72 = arith.constant 0 : index
      %207 = vector.load %arg1[%c0_71, %c0_72] : memref<8x768xf32, #tpu.memory_space<vmem>>, vector<8x768xf32>
      %208 = arith.truncf %207 : vector<8x768xf32> to vector<8x768xbf16>
      %c0_73 = arith.constant 0 : index
      %c0_74 = arith.constant 0 : index
      %209 = vector.load %arg2[%c0_73, %c0_74] : memref<768x128xbf16, #tpu.memory_space<vmem>>, vector<768x128xbf16>
      %cst_75 = arith.constant dense<0.000000e+00> : vector<8x128xf32>
      %210 = tpu.matmul %208, %209, %cst_75 {dimension_numbers = #tpu.dot_dimension_numbers<[1], [0], [0], [1], [0, 0, 1, 1], [], []>} : vector<8x768xbf16>, vector<768x128xbf16>, vector<8x128xf32> -> vector<8x128xf32>
      %c0_76 = arith.constant 0 : index
      %c0_77 = arith.constant 0 : index
      %211 = vector.load %arg3[%c0_76, %c0_77] : memref<1x128xf32, #tpu.memory_space<vmem>>, vector<1x128xf32>
      %212 = vector.broadcast %211 : vector<1x128xf32> to vector<8x128xf32>
      %213 = arith.addf %210, %212 : vector<8x128xf32>
      %214 = vector.shape_cast %213 : vector<8x128xf32> to vector<2x4x128xf32>
      %c0_78 = arith.constant 0 : index
      %c0_79 = arith.constant 0 : index
      %215 = vector.load %arg4[%c0_78, %c0_79] : memref<1x128xf32, #tpu.memory_space<vmem>>, vector<1x128xf32>
      %c0_80 = arith.constant 0 : index
      %c0_81 = arith.constant 0 : index
      %216 = vector.load %arg5[%c0_80, %c0_81] : memref<5x128xf32, #tpu.memory_space<vmem>>, vector<5x128xf32>
      %cst_82 = arith.constant 0.000000e+00 : f32
      %217 = vector.broadcast %cst_82 : f32 to vector<3x128xf32>
      %218 = vector.extract_strided_slice %214 {offsets = [0, 0, 0], sizes = [1, 4, 128], strides = [1, 1, 1]} : vector<2x4x128xf32> to vector<1x4x128xf32>
      %219 = vector.shape_cast %218 : vector<1x4x128xf32> to vector<4x128xf32>
      %220 = tpu.concatenate %215, %219 in 0 : vector<1x128xf32>, vector<4x128xf32> -> vector<5x128xf32>
      %221 = arith.addf %220, %216 : vector<5x128xf32>
      %222 = tpu.concatenate %221, %217 in 0 : vector<5x128xf32>, vector<3x128xf32> -> vector<8x128xf32>
      %223 = vector.extract_strided_slice %214 {offsets = [1, 0, 0], sizes = [1, 4, 128], strides = [1, 1, 1]} : vector<2x4x128xf32> to vector<1x4x128xf32>
      %224 = vector.shape_cast %223 : vector<1x4x128xf32> to vector<4x128xf32>
      %225 = tpu.concatenate %215, %224 in 0 : vector<1x128xf32>, vector<4x128xf32> -> vector<5x128xf32>
      %226 = arith.addf %225, %216 : vector<5x128xf32>
      %227 = tpu.concatenate %226, %217 in 0 : vector<5x128xf32>, vector<3x128xf32> -> vector<8x128xf32>
      %228 = tpu.concatenate %222, %227 in 0 : vector<8x128xf32>, vector<8x128xf32> -> vector<16x128xf32>
      %c0_83 = arith.constant 0 : index
      %c0_84 = arith.constant 0 : index
      %229 = vector.load %arg11[%c0_83, %c0_84] : memref<16x128xf32, #tpu.memory_space<vmem>>, vector<16x128xf32>
      tpu.vector_store %arg11[%c0_83, %c0_84], %228 {strides = array<i32>} : memref<16x128xf32, #tpu.memory_space<vmem>>, vector<16x128xf32>,
    } else {
    }
    %c0 = arith.constant 0 : index
    %c0_1 = arith.constant 0 : index
    %3 = vector.load %arg11[%c0, %c0_1] : memref<16x128xf32, #tpu.memory_space<vmem>>, vector<16x128xf32>
    %c0_2 = arith.constant 0 : index
    %c0_3 = arith.constant 0 : index
    %c0_4 = arith.constant 0 : index
    %4 = vector.load %arg8[%c0_2, %c0_3, %c0_4] : memref<1x1x1664xf32, #tpu.memory_space<vmem>>, vector<1x1x128xf32>
    %5 = vector.shape_cast %4 : vector<1x1x128xf32> to vector<1x128xf32>
    %c0_5 = arith.constant 0 : index
    %c0_6 = arith.constant 0 : index
    %c128 = arith.constant 128 : index
    %6 = vector.load %arg8[%c0_5, %c0_6, %c128] : memref<1x1x1664xf32, #tpu.memory_space<vmem>>, vector<1x1x128xf32>
    %7 = vector.shape_cast %6 : vector<1x1x128xf32> to vector<1x128xf32>
    %cst = arith.constant dense<0.000000e+00> : vector<16xf32>
    %8 = vector.multi_reduction <add>, %3, %cst [1] : vector<16x128xf32> to vector<16xf32>
    %9 = vector.shape_cast %8 : vector<16xf32> to vector<16x1xf32>
    %cst_7 = arith.constant 1.280000e+02 : f32
    %10 = vector.broadcast %cst_7 : f32 to vector<16x1xf32>
    %11 = arith.divf %9, %10 : vector<16x1xf32>
    %12 = vector.broadcast %11 : vector<16x1xf32> to vector<16x128xf32>
    %13 = arith.subf %3, %12 : vector<16x128xf32>
    %14 = arith.mulf %13, %13 : vector<16x128xf32>
    %cst_8 = arith.constant dense<0.000000e+00> : vector<16xf32>
    %15 = vector.multi_reduction <add>, %14, %cst_8 [1] : vector<16x128xf32> to vector<16xf32>
    %16 = vector.shape_cast %15 : vector<16xf32> to vector<16x1xf32>
    %cst_9 = arith.constant 1.280000e+02 : f32
    %17 = vector.broadcast %cst_9 : f32 to vector<16x1xf32>
    %18 = arith.divf %16, %17 : vector<16x1xf32>
    %19 = vector.broadcast %11 : vector<16x1xf32> to vector<16x128xf32>
    %20 = arith.subf %3, %19 : vector<16x128xf32>
    %cst_10 = arith.constant 9.99999997E-7 : f32
    %21 = vector.broadcast %cst_10 : f32 to vector<16x1xf32>
    %22 = arith.addf %18, %21 : vector<16x1xf32>
    %23 = math.rsqrt %22 : vector<16x1xf32>
    %24 = vector.broadcast %23 : vector<16x1xf32> to vector<16x128xf32>
    %25 = arith.mulf %20, %24 : vector<16x128xf32>
    %26 = vector.broadcast %5 : vector<1x128xf32> to vector<16x128xf32>
    %27 = arith.mulf %25, %26 : vector<16x128xf32>
    %28 = vector.broadcast %7 : vector<1x128xf32> to vector<16x128xf32>
    %29 = arith.addf %27, %28 : vector<16x128xf32>
    %c0_11 = arith.constant 0 : index
    %c0_12 = arith.constant 0 : index
    %c0_13 = arith.constant 0 : index
    %30 = vector.load %arg6[%c0_11, %c0_12, %c0_13] : memref<1x128x1024xbf16, #tpu.memory_space<vmem>>, vector<1x128x384xbf16>
    %31 = vector.shape_cast %30 : vector<1x128x384xbf16> to vector<128x384xbf16>
    %32 = arith.truncf %29 : vector<16x128xf32> to vector<16x128xbf16>
    %cst_14 = arith.constant dense<0.000000e+00> : vector<16x384xf32>
    %33 = tpu.matmul %32, %31, %cst_14 {dimension_numbers = #tpu.dot_dimension_numbers<[1], [0], [0], [1], [0, 0, 1, 1], [], []>} : vector<16x128xbf16>, vector<128x384xbf16>, vector<16x384xf32> -> vector<16x384xf32>
    %c0_15 = arith.constant 0 : index
    %c0_16 = arith.constant 0 : index
    %c256 = arith.constant 256 : index
    %34 = vector.load %arg8[%c0_15, %c0_16, %c256] : memref<1x1x1664xf32, #tpu.memory_space<vmem>>, vector<1x1x384xf32>
    %35 = vector.shape_cast %34 : vector<1x1x384xf32> to vector<1x384xf32>
    %36 = vector.broadcast %35 : vector<1x384xf32> to vector<16x384xf32>
    %37 = arith.addf %33, %36 : vector<16x384xf32>
    %38 = vector.extract_strided_slice %37 {offsets = [0, 0], sizes = [16, 128], strides = [1, 1]} : vector<16x384xf32> to vector<16x128xf32>
    %39 = vector.extract_strided_slice %37 {offsets = [0, 128], sizes = [16, 128], strides = [1, 1]} : vector<16x384xf32> to vector<16x128xf32>
    %40 = vector.extract_strided_slice %37 {offsets = [0, 256], sizes = [16, 128], strides = [1, 1]} : vector<16x384xf32> to vector<16x128xf32>
    %41 = tpu.iota {dimensions = array<i32: 1>} : vector<8x8xi32>
    %c5_i32 = arith.constant 5 : i32
    %42 = vector.broadcast %c5_i32 : i32 to vector<8x8xi32>
    %43 = arith.cmpi slt, %41, %42 : vector<8x8xi32>
    %cst_17 = arith.constant 0.000000e+00 : f32
    %cst_18 = arith.constant -1.000000e+09 : f32
    %44 = vector.broadcast %cst_17 : f32 to vector<8x8xf32>
    %45 = vector.broadcast %cst_18 : f32 to vector<8x8xf32>
    %46 = arith.select %43, %44, %45 : vector<8x8xi1>, vector<8x8xf32>
    %47 = vector.shape_cast %46 : vector<8x8xf32> to vector<1x8x8xf32>
    %48 = vector.shape_cast %38 : vector<16x128xf32> to vector<2x8x128xf32>
    %49 = arith.truncf %48 : vector<2x8x128xf32> to vector<2x8x128xbf16>
    %50 = vector.shape_cast %39 : vector<16x128xf32> to vector<2x8x128xf32>
    %51 = arith.truncf %50 : vector<2x8x128xf32> to vector<2x8x128xbf16>
    %52 = vector.shape_cast %40 : vector<16x128xf32> to vector<2x8x128xf32>
    %53 = arith.truncf %52 : vector<2x8x128xf32> to vector<2x8x128xbf16>
    %54 = vector.extract_strided_slice %49 {offsets = [0, 0, 0], sizes = [2, 8, 32], strides = [1, 1, 1]} : vector<2x8x128xbf16> to vector<2x8x32xbf16>
    %55 = vector.extract_strided_slice %51 {offsets = [0, 0, 0], sizes = [2, 8, 32], strides = [1, 1, 1]} : vector<2x8x128xbf16> to vector<2x8x32xbf16>
    "tpu.trace_start"() <{level = 10 : i32, message = "bqd,bkd->bqk"}> : () -> ()
    %cst_19 = arith.constant dense<0.000000e+00> : vector<2x8x8xf32>
    %56 = tpu.matmul %54, %55, %cst_19 {dimension_numbers = #tpu.dot_dimension_numbers<[2], [2], [1], [1], [0, 0, 0, 1, 1, 1], [0], [0]>} : vector<2x8x32xbf16>, vector<2x8x32xbf16>, vector<2x8x8xf32> -> vector<2x8x8xf32>
    "tpu.trace_stop"() : () -> ()
    %cst_20 = arith.constant 0.176776692 : f32
    %57 = vector.broadcast %cst_20 : f32 to vector<2x8x8xf32>
    %58 = arith.mulf %56, %57 : vector<2x8x8xf32>
    %59 = vector.broadcast %47 : vector<1x8x8xf32> to vector<2x8x8xf32>
    %60 = arith.addf %58, %59 : vector<2x8x8xf32>
    %cst_21 = arith.constant dense<0xFF800000> : vector<2x8xf32>
    %61 = vector.multi_reduction <maximumf>, %60, %cst_21 [2] : vector<2x8x8xf32> to vector<2x8xf32>
    %62 = vector.shape_cast %61 : vector<2x8xf32> to vector<2x8x1xf32>
    %63 = vector.broadcast %62 : vector<2x8x1xf32> to vector<2x8x8xf32>
    %64 = arith.subf %60, %63 : vector<2x8x8xf32>
    %65 = math.exp %64 : vector<2x8x8xf32>
    %cst_22 = arith.constant dense<0.000000e+00> : vector<2x8xf32>
    %66 = vector.multi_reduction <add>, %65, %cst_22 [2] : vector<2x8x8xf32> to vector<2x8xf32>
    %67 = vector.shape_cast %66 : vector<2x8xf32> to vector<2x8x1xf32>
    %68 = tpu.reciprocal %67 {approx = true} : vector<2x8x1xf32> -> vector<2x8x1xf32>
    %69 = vector.broadcast %68 : vector<2x8x1xf32> to vector<2x8x8xf32>
    %70 = arith.mulf %65, %69 : vector<2x8x8xf32>
    %71 = arith.truncf %70 : vector<2x8x8xf32> to vector<2x8x8xbf16>
    %72 = vector.extract_strided_slice %53 {offsets = [0, 0, 0], sizes = [2, 8, 32], strides = [1, 1, 1]} : vector<2x8x128xbf16> to vector<2x8x32xbf16>
    "tpu.trace_start"() <{level = 10 : i32, message = "bqk,bkd->bqd"}> : () -> ()
    %cst_23 = arith.constant dense<0.000000e+00> : vector<2x8x32xf32>
    %73 = tpu.matmul %71, %72, %cst_23 {dimension_numbers = #tpu.dot_dimension_numbers<[2], [1], [1], [2], [0, 0, 0, 1, 1, 2], [0], [0]>} : vector<2x8x8xbf16>, vector<2x8x32xbf16>, vector<2x8x32xf32> -> vector<2x8x32xf32>
    "tpu.trace_stop"() : () -> ()
    %74 = vector.extract_strided_slice %49 {offsets = [0, 0, 32], sizes = [2, 8, 32], strides = [1, 1, 1]} : vector<2x8x128xbf16> to vector<2x8x32xbf16>
    %75 = vector.extract_strided_slice %51 {offsets = [0, 0, 32], sizes = [2, 8, 32], strides = [1, 1, 1]} : vector<2x8x128xbf16> to vector<2x8x32xbf16>
    "tpu.trace_start"() <{level = 10 : i32, message = "bqd,bkd->bqk"}> : () -> ()
    %cst_24 = arith.constant dense<0.000000e+00> : vector<2x8x8xf32>
    %76 = tpu.matmul %74, %75, %cst_24 {dimension_numbers = #tpu.dot_dimension_numbers<[2], [2], [1], [1], [0, 0, 0, 1, 1, 1], [0], [0]>} : vector<2x8x32xbf16>, vector<2x8x32xbf16>, vector<2x8x8xf32> -> vector<2x8x8xf32>
    "tpu.trace_stop"() : () -> ()
    %cst_25 = arith.constant 0.176776692 : f32
    %77 = vector.broadcast %cst_25 : f32 to vector<2x8x8xf32>
    %78 = arith.mulf %76, %77 : vector<2x8x8xf32>
    %79 = vector.broadcast %47 : vector<1x8x8xf32> to vector<2x8x8xf32>
    %80 = arith.addf %78, %79 : vector<2x8x8xf32>
    %cst_26 = arith.constant dense<0xFF800000> : vector<2x8xf32>
    %81 = vector.multi_reduction <maximumf>, %80, %cst_26 [2] : vector<2x8x8xf32> to vector<2x8xf32>
    %82 = vector.shape_cast %81 : vector<2x8xf32> to vector<2x8x1xf32>
    %83 = vector.broadcast %82 : vector<2x8x1xf32> to vector<2x8x8xf32>
    %84 = arith.subf %80, %83 : vector<2x8x8xf32>
    %85 = math.exp %84 : vector<2x8x8xf32>
    %cst_27 = arith.constant dense<0.000000e+00> : vector<2x8xf32>
    %86 = vector.multi_reduction <add>, %85, %cst_27 [2] : vector<2x8x8xf32> to vector<2x8xf32>
    %87 = vector.shape_cast %86 : vector<2x8xf32> to vector<2x8x1xf32>
    %88 = tpu.reciprocal %87 {approx = true} : vector<2x8x1xf32> -> vector<2x8x1xf32>
    %89 = vector.broadcast %88 : vector<2x8x1xf32> to vector<2x8x8xf32>
    %90 = arith.mulf %85, %89 : vector<2x8x8xf32>
    %91 = arith.truncf %90 : vector<2x8x8xf32> to vector<2x8x8xbf16>
    %92 = vector.extract_strided_slice %53 {offsets = [0, 0, 32], sizes = [2, 8, 32], strides = [1, 1, 1]} : vector<2x8x128xbf16> to vector<2x8x32xbf16>
    "tpu.trace_start"() <{level = 10 : i32, message = "bqk,bkd->bqd"}> : () -> ()
    %cst_28 = arith.constant dense<0.000000e+00> : vector<2x8x32xf32>
    %93 = tpu.matmul %91, %92, %cst_28 {dimension_numbers = #tpu.dot_dimension_numbers<[2], [1], [1], [2], [0, 0, 0, 1, 1, 2], [0], [0]>} : vector<2x8x8xbf16>, vector<2x8x32xbf16>, vector<2x8x32xf32> -> vector<2x8x32xf32>
    "tpu.trace_stop"() : () -> ()
    %94 = vector.extract_strided_slice %49 {offsets = [0, 0, 64], sizes = [2, 8, 32], strides = [1, 1, 1]} : vector<2x8x128xbf16> to vector<2x8x32xbf16>
    %95 = vector.extract_strided_slice %51 {offsets = [0, 0, 64], sizes = [2, 8, 32], strides = [1, 1, 1]} : vector<2x8x128xbf16> to vector<2x8x32xbf16>
    "tpu.trace_start"() <{level = 10 : i32, message = "bqd,bkd->bqk"}> : () -> ()
    %cst_29 = arith.constant dense<0.000000e+00> : vector<2x8x8xf32>
    %96 = tpu.matmul %94, %95, %cst_29 {dimension_numbers = #tpu.dot_dimension_numbers<[2], [2], [1], [1], [0, 0, 0, 1, 1, 1], [0], [0]>} : vector<2x8x32xbf16>, vector<2x8x32xbf16>, vector<2x8x8xf32> -> vector<2x8x8xf32>
    "tpu.trace_stop"() : () -> ()
    %cst_30 = arith.constant 0.176776692 : f32
    %97 = vector.broadcast %cst_30 : f32 to vector<2x8x8xf32>
    %98 = arith.mulf %96, %97 : vector<2x8x8xf32>
    %99 = vector.broadcast %47 : vector<1x8x8xf32> to vector<2x8x8xf32>
    %100 = arith.addf %98, %99 : vector<2x8x8xf32>
    %cst_31 = arith.constant dense<0xFF800000> : vector<2x8xf32>
    %101 = vector.multi_reduction <maximumf>, %100, %cst_31 [2] : vector<2x8x8xf32> to vector<2x8xf32>
    %102 = vector.shape_cast %101 : vector<2x8xf32> to vector<2x8x1xf32>
    %103 = vector.broadcast %102 : vector<2x8x1xf32> to vector<2x8x8xf32>
    %104 = arith.subf %100, %103 : vector<2x8x8xf32>
    %105 = math.exp %104 : vector<2x8x8xf32>
    %cst_32 = arith.constant dense<0.000000e+00> : vector<2x8xf32>
    %106 = vector.multi_reduction <add>, %105, %cst_32 [2] : vector<2x8x8xf32> to vector<2x8xf32>
    %107 = vector.shape_cast %106 : vector<2x8xf32> to vector<2x8x1xf32>
    %108 = tpu.reciprocal %107 {approx = true} : vector<2x8x1xf32> -> vector<2x8x1xf32>
    %109 = vector.broadcast %108 : vector<2x8x1xf32> to vector<2x8x8xf32>
    %110 = arith.mulf %105, %109 : vector<2x8x8xf32>
    %111 = arith.truncf %110 : vector<2x8x8xf32> to vector<2x8x8xbf16>
    %112 = vector.extract_strided_slice %53 {offsets = [0, 0, 64], sizes = [2, 8, 32], strides = [1, 1, 1]} : vector<2x8x128xbf16> to vector<2x8x32xbf16>
    "tpu.trace_start"() <{level = 10 : i32, message = "bqk,bkd->bqd"}> : () -> ()
    %cst_33 = arith.constant dense<0.000000e+00> : vector<2x8x32xf32>
    %113 = tpu.matmul %111, %112, %cst_33 {dimension_numbers = #tpu.dot_dimension_numbers<[2], [1], [1], [2], [0, 0, 0, 1, 1, 2], [0], [0]>} : vector<2x8x8xbf16>, vector<2x8x32xbf16>, vector<2x8x32xf32> -> vector<2x8x32xf32>
    "tpu.trace_stop"() : () -> ()
    %114 = vector.extract_strided_slice %49 {offsets = [0, 0, 96], sizes = [2, 8, 32], strides = [1, 1, 1]} : vector<2x8x128xbf16> to vector<2x8x32xbf16>
    %115 = vector.extract_strided_slice %51 {offsets = [0, 0, 96], sizes = [2, 8, 32], strides = [1, 1, 1]} : vector<2x8x128xbf16> to vector<2x8x32xbf16>
    "tpu.trace_start"() <{level = 10 : i32, message = "bqd,bkd->bqk"}> : () -> ()
    %cst_34 = arith.constant dense<0.000000e+00> : vector<2x8x8xf32>
    %116 = tpu.matmul %114, %115, %cst_34 {dimension_numbers = #tpu.dot_dimension_numbers<[2], [2], [1], [1], [0, 0, 0, 1, 1, 1], [0], [0]>} : vector<2x8x32xbf16>, vector<2x8x32xbf16>, vector<2x8x8xf32> -> vector<2x8x8xf32>
    "tpu.trace_stop"() : () -> ()
    %cst_35 = arith.constant 0.176776692 : f32
    %117 = vector.broadcast %cst_35 : f32 to vector<2x8x8xf32>
    %118 = arith.mulf %116, %117 : vector<2x8x8xf32>
    %119 = vector.broadcast %47 : vector<1x8x8xf32> to vector<2x8x8xf32>
    %120 = arith.addf %118, %119 : vector<2x8x8xf32>
    %cst_36 = arith.constant dense<0xFF800000> : vector<2x8xf32>
    %121 = vector.multi_reduction <maximumf>, %120, %cst_36 [2] : vector<2x8x8xf32> to vector<2x8xf32>
    %122 = vector.shape_cast %121 : vector<2x8xf32> to vector<2x8x1xf32>
    %123 = vector.broadcast %122 : vector<2x8x1xf32> to vector<2x8x8xf32>
    %124 = arith.subf %120, %123 : vector<2x8x8xf32>
    %125 = math.exp %124 : vector<2x8x8xf32>
    %cst_37 = arith.constant dense<0.000000e+00> : vector<2x8xf32>
    %126 = vector.multi_reduction <add>, %125, %cst_37 [2] : vector<2x8x8xf32> to vector<2x8xf32>
    %127 = vector.shape_cast %126 : vector<2x8xf32> to vector<2x8x1xf32>
    %128 = tpu.reciprocal %127 {approx = true} : vector<2x8x1xf32> -> vector<2x8x1xf32>
    %129 = vector.broadcast %128 : vector<2x8x1xf32> to vector<2x8x8xf32>
    %130 = arith.mulf %125, %129 : vector<2x8x8xf32>
    %131 = arith.truncf %130 : vector<2x8x8xf32> to vector<2x8x8xbf16>
    %132 = vector.extract_strided_slice %53 {offsets = [0, 0, 96], sizes = [2, 8, 32], strides = [1, 1, 1]} : vector<2x8x128xbf16> to vector<2x8x32xbf16>
    "tpu.trace_start"() <{level = 10 : i32, message = "bqk,bkd->bqd"}> : () -> ()
    %cst_38 = arith.constant dense<0.000000e+00> : vector<2x8x32xf32>
    %133 = tpu.matmul %131, %132, %cst_38 {dimension_numbers = #tpu.dot_dimension_numbers<[2], [1], [1], [2], [0, 0, 0, 1, 1, 2], [0], [0]>} : vector<2x8x8xbf16>, vector<2x8x32xbf16>, vector<2x8x32xf32> -> vector<2x8x32xf32>
    "tpu.trace_stop"() : () -> ()
    %134 = tpu.concatenate %73, %93, %113, %133 in 2 : vector<2x8x32xf32>, vector<2x8x32xf32>, vector<2x8x32xf32>, vector<2x8x32xf32> -> vector<2x8x128xf32>
    %135 = vector.shape_cast %134 : vector<2x8x128xf32> to vector<16x128xf32>
    %c0_39 = arith.constant 0 : index
    %c0_40 = arith.constant 0 : index
    %c384 = arith.constant 384 : index
    %136 = vector.load %arg6[%c0_39, %c0_40, %c384] : memref<1x128x1024xbf16, #tpu.memory_space<vmem>>, vector<1x128x128xbf16>
    %137 = vector.shape_cast %136 : vector<1x128x128xbf16> to vector<128x128xbf16>
    %138 = arith.truncf %135 : vector<16x128xf32> to vector<16x128xbf16>
    %cst_41 = arith.constant dense<0.000000e+00> : vector<16x128xf32>
    %139 = tpu.matmul %138, %137, %cst_41 {dimension_numbers = #tpu.dot_dimension_numbers<[1], [0], [0], [1], [0, 0, 1, 1], [], []>} : vector<16x128xbf16>, vector<128x128xbf16>, vector<16x128xf32> -> vector<16x128xf32>
    %c0_42 = arith.constant 0 : index
    %c0_43 = arith.constant 0 : index
    %c640 = arith.constant 640 : index
    %140 = vector.load %arg8[%c0_42, %c0_43, %c640] : memref<1x1x1664xf32, #tpu.memory_space<vmem>>, vector<1x1x128xf32>
    %141 = vector.shape_cast %140 : vector<1x1x128xf32> to vector<1x128xf32>
    %142 = vector.broadcast %141 : vector<1x128xf32> to vector<16x128xf32>
    %143 = arith.addf %139, %142 : vector<16x128xf32>
    %144 = arith.addf %3, %143 : vector<16x128xf32>
    %c0_44 = arith.constant 0 : index
    %c0_45 = arith.constant 0 : index
    %c768 = arith.constant 768 : index
    %145 = vector.load %arg8[%c0_44, %c0_45, %c768] : memref<1x1x1664xf32, #tpu.memory_space<vmem>>, vector<1x1x128xf32>
    %146 = vector.shape_cast %145 : vector<1x1x128xf32> to vector<1x128xf32>
    %c0_46 = arith.constant 0 : index
    %c0_47 = arith.constant 0 : index
    %c896 = arith.constant 896 : index
    %147 = vector.load %arg8[%c0_46, %c0_47, %c896] : memref<1x1x1664xf32, #tpu.memory_space<vmem>>, vector<1x1x128xf32>
    %148 = vector.shape_cast %147 : vector<1x1x128xf32> to vector<1x128xf32>
    %cst_48 = arith.constant dense<0.000000e+00> : vector<16xf32>
    %149 = vector.multi_reduction <add>, %144, %cst_48 [1] : vector<16x128xf32> to vector<16xf32>
    %150 = vector.shape_cast %149 : vector<16xf32> to vector<16x1xf32>
    %cst_49 = arith.constant 1.280000e+02 : f32
    %151 = vector.broadcast %cst_49 : f32 to vector<16x1xf32>
    %152 = arith.divf %150, %151 : vector<16x1xf32>
    %153 = vector.broadcast %152 : vector<16x1xf32> to vector<16x128xf32>
    %154 = arith.subf %144, %153 : vector<16x128xf32>
    %155 = arith.mulf %154, %154 : vector<16x128xf32>
    %cst_50 = arith.constant dense<0.000000e+00> : vector<16xf32>
    %156 = vector.multi_reduction <add>, %155, %cst_50 [1] : vector<16x128xf32> to vector<16xf32>
    %157 = vector.shape_cast %156 : vector<16xf32> to vector<16x1xf32>
    %cst_51 = arith.constant 1.280000e+02 : f32
    %158 = vector.broadcast %cst_51 : f32 to vector<16x1xf32>
    %159 = arith.divf %157, %158 : vector<16x1xf32>
    %160 = vector.broadcast %152 : vector<16x1xf32> to vector<16x128xf32>
    %161 = arith.subf %144, %160 : vector<16x128xf32>
    %cst_52 = arith.constant 9.99999997E-7 : f32
    %162 = vector.broadcast %cst_52 : f32 to vector<16x1xf32>
    %163 = arith.addf %159, %162 : vector<16x1xf32>
    %164 = math.rsqrt %163 : vector<16x1xf32>
    %165 = vector.broadcast %164 : vector<16x1xf32> to vector<16x128xf32>
    %166 = arith.mulf %161, %165 : vector<16x128xf32>
    %167 = vector.broadcast %146 : vector<1x128xf32> to vector<16x128xf32>
    %168 = arith.mulf %166, %167 : vector<16x128xf32>
    %169 = vector.broadcast %148 : vector<1x128xf32> to vector<16x128xf32>
    %170 = arith.addf %168, %169 : vector<16x128xf32>
    %c0_53 = arith.constant 0 : index
    %c0_54 = arith.constant 0 : index
    %c512 = arith.constant 512 : index
    %171 = vector.load %arg6[%c0_53, %c0_54, %c512] : memref<1x128x1024xbf16, #tpu.memory_space<vmem>>, vector<1x128x512xbf16>
    %172 = vector.shape_cast %171 : vector<1x128x512xbf16> to vector<128x512xbf16>
    %173 = arith.truncf %170 : vector<16x128xf32> to vector<16x128xbf16>
    %cst_55 = arith.constant dense<0.000000e+00> : vector<16x512xf32>
    %174 = tpu.matmul %173, %172, %cst_55 {dimension_numbers = #tpu.dot_dimension_numbers<[1], [0], [0], [1], [0, 0, 1, 1], [], []>} : vector<16x128xbf16>, vector<128x512xbf16>, vector<16x512xf32> -> vector<16x512xf32>
    %c0_56 = arith.constant 0 : index
    %c0_57 = arith.constant 0 : index
    %c1024 = arith.constant 1024 : index
    %175 = vector.load %arg8[%c0_56, %c0_57, %c1024] : memref<1x1x1664xf32, #tpu.memory_space<vmem>>, vector<1x1x512xf32>
    %176 = vector.shape_cast %175 : vector<1x1x512xf32> to vector<1x512xf32>
    %177 = vector.broadcast %176 : vector<1x512xf32> to vector<16x512xf32>
    %178 = arith.addf %174, %177 : vector<16x512xf32>
    %179 = arith.mulf %178, %178 : vector<16x512xf32>
    %180 = arith.mulf %178, %179 : vector<16x512xf32>
    %cst_58 = arith.constant 4.471500e-02 : f32
    %181 = vector.broadcast %cst_58 : f32 to vector<16x512xf32>
    %182 = arith.mulf %181, %180 : vector<16x512xf32>
    %183 = arith.addf %178, %182 : vector<16x512xf32>
    %cst_59 = arith.constant 0.797884583 : f32
    %184 = vector.broadcast %cst_59 : f32 to vector<16x512xf32>
    %185 = arith.mulf %184, %183 : vector<16x512xf32>
    %186 = math.tanh %185 : vector<16x512xf32>
    %cst_60 = arith.constant 1.000000e+00 : f32
    %187 = vector.broadcast %cst_60 : f32 to vector<16x512xf32>
    %188 = arith.addf %187, %186 : vector<16x512xf32>
    %cst_61 = arith.constant 5.000000e-01 : f32
    %189 = vector.broadcast %cst_61 : f32 to vector<16x512xf32>
    %190 = arith.mulf %189, %188 : vector<16x512xf32>
    %191 = arith.mulf %178, %190 : vector<16x512xf32>
    %c0_62 = arith.constant 0 : index
    %c0_63 = arith.constant 0 : index
    %c0_64 = arith.constant 0 : index
    %192 = vector.load %arg7[%c0_62, %c0_63, %c0_64] : memref<1x512x128xbf16, #tpu.memory_space<vmem>>, vector<1x512x128xbf16>
    %193 = vector.shape_cast %192 : vector<1x512x128xbf16> to vector<512x128xbf16>
    %194 = arith.truncf %191 : vector<16x512xf32> to vector<16x512xbf16>
    %cst_65 = arith.constant dense<0.000000e+00> : vector<16x128xf32>
    %195 = tpu.matmul %194, %193, %cst_65 {dimension_numbers = #tpu.dot_dimension_numbers<[1], [0], [0], [1], [0, 0, 1, 1], [], []>} : vector<16x512xbf16>, vector<512x128xbf16>, vector<16x128xf32> -> vector<16x128xf32>
    %c0_66 = arith.constant 0 : index
    %c0_67 = arith.constant 0 : index
    %c1536 = arith.constant 1536 : index
    %196 = vector.load %arg8[%c0_66, %c0_67, %c1536] : memref<1x1x1664xf32, #tpu.memory_space<vmem>>, vector<1x1x128xf32>
    %197 = vector.shape_cast %196 : vector<1x1x128xf32> to vector<1x128xf32>
    %198 = vector.broadcast %197 : vector<1x128xf32> to vector<16x128xf32>
    %199 = arith.addf %195, %198 : vector<16x128xf32>
    %200 = arith.addf %144, %199 : vector<16x128xf32>
    %c1_i32 = arith.constant 1 : i32
    %201 = arith.cmpi eq, %arg0, %c1_i32 : i32
    %202 = arith.extui %201 : i1 to i32
    %c0_i32_68 = arith.constant 0 : i32
    %203 = arith.cmpi ne, %202, %c0_i32_68 : i32
    scf.if %203 {
      %c0_71 = arith.constant 0 : index
      %c0_72 = arith.constant 0 : index
      %207 = vector.load %arg9[%c0_71, %c0_72] : memref<1x128xf32, #tpu.memory_space<vmem>>, vector<1x128xf32>
      %c0_73 = arith.constant 0 : index
      %c0_74 = arith.constant 0 : index
      %208 = vector.load %arg10[%c0_73, %c0_74] : memref<1x128xf32, #tpu.memory_space<vmem>>, vector<1x128xf32>
      %cst_75 = arith.constant dense<0.000000e+00> : vector<16xf32>
      %209 = vector.multi_reduction <add>, %200, %cst_75 [1] : vector<16x128xf32> to vector<16xf32>
      %210 = vector.shape_cast %209 : vector<16xf32> to vector<16x1xf32>
      %cst_76 = arith.constant 1.280000e+02 : f32
      %211 = vector.broadcast %cst_76 : f32 to vector<16x1xf32>
      %212 = arith.divf %210, %211 : vector<16x1xf32>
      %213 = vector.broadcast %212 : vector<16x1xf32> to vector<16x128xf32>
      %214 = arith.subf %200, %213 : vector<16x128xf32>
      %215 = arith.mulf %214, %214 : vector<16x128xf32>
      %cst_77 = arith.constant dense<0.000000e+00> : vector<16xf32>
      %216 = vector.multi_reduction <add>, %215, %cst_77 [1] : vector<16x128xf32> to vector<16xf32>
      %217 = vector.shape_cast %216 : vector<16xf32> to vector<16x1xf32>
      %cst_78 = arith.constant 1.280000e+02 : f32
      %218 = vector.broadcast %cst_78 : f32 to vector<16x1xf32>
      %219 = arith.divf %217, %218 : vector<16x1xf32>
      %220 = vector.broadcast %212 : vector<16x1xf32> to vector<16x128xf32>
      %221 = arith.subf %200, %220 : vector<16x128xf32>
      %cst_79 = arith.constant 9.99999997E-7 : f32
      %222 = vector.broadcast %cst_79 : f32 to vector<16x1xf32>
      %223 = arith.addf %219, %222 : vector<16x1xf32>
      %224 = math.rsqrt %223 : vector<16x1xf32>
      %225 = vector.broadcast %224 : vector<16x1xf32> to vector<16x128xf32>
      %226 = arith.mulf %221, %225 : vector<16x128xf32>
      %227 = vector.broadcast %207 : vector<1x128xf32> to vector<16x128xf32>
      %228 = arith.mulf %226, %227 : vector<16x128xf32>
      %229 = vector.broadcast %208 : vector<1x128xf32> to vector<16x128xf32>
      %230 = arith.addf %228, %229 : vector<16x128xf32>
      %c0_80 = arith.constant 0 : index
      %c0_81 = arith.constant 0 : index
      %231 = vector.load %arg11[%c0_80, %c0_81] : memref<16x128xf32, #tpu.memory_space<vmem>>, vector<16x128xf32>
      tpu.vector_store %arg11[%c0_80, %c0_81], %230 {strides = array<i32>} : memref<16x128xf32, #tpu.memory_space<vmem>>, vector<16x128xf32>,
    } else {
    }
    %c1_i32_69 = arith.constant 1 : i32
    %204 = arith.cmpi ne, %arg0, %c1_i32_69 : i32
    %205 = arith.extui %204 : i1 to i32
    %c0_i32_70 = arith.constant 0 : i32
    %206 = arith.cmpi ne, %205, %c0_i32_70 : i32
    scf.if %206 {
      %c0_71 = arith.constant 0 : index
      %c0_72 = arith.constant 0 : index
      %207 = vector.load %arg11[%c0_71, %c0_72] : memref<16x128xf32, #tpu.memory_space<vmem>>, vector<16x128xf32>
      tpu.vector_store %arg11[%c0_71, %c0_72], %200 {strides = array<i32>} : memref<16x128xf32, #tpu.memory_space<vmem>>, vector<16x128xf32>,
    } else {
    }
    return
  }
  func.func @transform_0(%arg0: i32) -> (i32, i32) {
    %c0_i32 = arith.constant 0 : i32
    %c0_i32_0 = arith.constant 0 : i32
    %c0_i32_1 = arith.constant 0 : i32
    return %c0_i32, %c0_i32_0 : i32, i32
  }
  func.func @transform_1(%arg0: i32) -> (i32, i32) {
    %c0_i32 = arith.constant 0 : i32
    %c0_i32_0 = arith.constant 0 : i32
    %c0_i32_1 = arith.constant 0 : i32
    return %c0_i32, %c0_i32_0 : i32, i32
  }
  func.func @transform_2(%arg0: i32) -> (i32, i32) {
    %c0_i32 = arith.constant 0 : i32
    %c0_i32_0 = arith.constant 0 : i32
    %c0_i32_1 = arith.constant 0 : i32
    return %c0_i32, %c0_i32_0 : i32, i32
  }
  func.func @transform_3(%arg0: i32) -> (i32, i32) {
    %c0_i32 = arith.constant 0 : i32
    %c0_i32_0 = arith.constant 0 : i32
    %c0_i32_1 = arith.constant 0 : i32
    return %c0_i32, %c0_i32_0 : i32, i32
  }
  func.func @transform_4(%arg0: i32) -> (i32, i32) {
    %c0_i32 = arith.constant 0 : i32
    %c0_i32_0 = arith.constant 0 : i32
    %c0_i32_1 = arith.constant 0 : i32
    return %c0_i32, %c0_i32_0 : i32, i32
  }
  func.func @transform_5(%arg0: i32) -> (i32, i32, i32) {
    %c0_i32 = arith.constant 0 : i32
    %c0_i32_0 = arith.constant 0 : i32
    %c0_i32_1 = arith.constant 0 : i32
    return %arg0, %c0_i32, %c0_i32_0 : i32, i32, i32
  }
  func.func @transform_6(%arg0: i32) -> (i32, i32, i32) {
    %c0_i32 = arith.constant 0 : i32
    %c0_i32_0 = arith.constant 0 : i32
    %c0_i32_1 = arith.constant 0 : i32
    return %arg0, %c0_i32, %c0_i32_0 : i32, i32, i32
  }
  func.func @transform_7(%arg0: i32) -> (i32, i32, i32) {
    %c0_i32 = arith.constant 0 : i32
    %c0_i32_0 = arith.constant 0 : i32
    %c0_i32_1 = arith.constant 0 : i32
    return %arg0, %c0_i32, %c0_i32_0 : i32, i32, i32
  }
  func.func @transform_8(%arg0: i32) -> (i32, i32) {
    %c0_i32 = arith.constant 0 : i32
    %c0_i32_0 = arith.constant 0 : i32
    %c0_i32_1 = arith.constant 0 : i32
    return %c0_i32, %c0_i32_0 : i32, i32
  }
  func.func @transform_9(%arg0: i32) -> (i32, i32) {
    %c0_i32 = arith.constant 0 : i32
    %c0_i32_0 = arith.constant 0 : i32
    %c0_i32_1 = arith.constant 0 : i32
    return %c0_i32, %c0_i32_0 : i32, i32
  }
  func.func @transform_10(%arg0: i32) -> (i32, i32) {
    %c0_i32 = arith.constant 0 : i32
    %c0_i32_0 = arith.constant 0 : i32
    %c0_i32_1 = arith.constant 0 : i32
    return %c0_i32, %c0_i32_0 : i32, i32
  }
}

module attributes {stable_mosaic.version = 11 : i64} {
  func.func @_bert_stack_kernel(%arg0: i32, %arg1: memref<16x128xf32, #tpu.memory_space<vmem>>, %arg2: memref<16x128xf32, #tpu.memory_space<vmem>>, %arg3: memref<2x8xf32, #tpu.memory_space<vmem>>, %arg4: memref<1x128xf32, #tpu.memory_space<vmem>>, %arg5: memref<1x128xf32, #tpu.memory_space<vmem>>, %arg6: memref<1x128x1536xbf16, #tpu.memory_space<vmem>>, %arg7: memref<1x512x128xbf16, #tpu.memory_space<vmem>>, %arg8: memref<1x1x2432xf32, #tpu.memory_space<vmem>>, %arg9: memref<1x16x128xf32, #tpu.memory_space<vmem>>, %arg10: memref<16x128xf32, #tpu.memory_space<vmem>>) attributes {dimension_semantics = [#tpu.dimension_semantics<arbitrary>], iteration_bounds = array<i64: 8>, scalar_prefetch = 0 : i64, scratch_operands = 1 : i64, tpu.core_type = #tpu.core_type<tc>, window_params = [{pipeline_mode = #tpu.pipeline_mode<synchronous>, transform_indices = @transform_0, window_bounds = array<i64: 16, 128>}, {pipeline_mode = #tpu.pipeline_mode<synchronous>, transform_indices = @transform_1, window_bounds = array<i64: 16, 128>}, {pipeline_mode = #tpu.pipeline_mode<synchronous>, transform_indices = @transform_2, window_bounds = array<i64: 2, 8>}, {pipeline_mode = #tpu.pipeline_mode<synchronous>, transform_indices = @transform_3, window_bounds = array<i64: 1, 128>}, {pipeline_mode = #tpu.pipeline_mode<synchronous>, transform_indices = @transform_4, window_bounds = array<i64: 1, 128>}, {transform_indices = @transform_5, window_bounds = array<i64: 1, 128, 1536>}, {transform_indices = @transform_6, window_bounds = array<i64: 1, 512, 128>}, {transform_indices = @transform_7, window_bounds = array<i64: 1, 1, 2432>}, {transform_indices = @transform_8, window_bounds = array<i64: 1, 16, 128>}]} {
    %c0_i32 = arith.constant 0 : i32
    %0 = arith.cmpi eq, %arg0, %c0_i32 : i32
    %1 = arith.extui %0 : i1 to i32
    %c0_i32_0 = arith.constant 0 : i32
    %2 = arith.cmpi ne, %1, %c0_i32_0 : i32
    scf.if %2 {
      %c0_125 = arith.constant 0 : index
      %c0_126 = arith.constant 0 : index
      %348 = vector.load %arg1[%c0_125, %c0_126] : memref<16x128xf32, #tpu.memory_space<vmem>>, vector<16x128xf32>
      %c0_127 = arith.constant 0 : index
      %c0_128 = arith.constant 0 : index
      %349 = vector.load %arg4[%c0_127, %c0_128] : memref<1x128xf32, #tpu.memory_space<vmem>>, vector<1x128xf32>
      %c0_129 = arith.constant 0 : index
      %c0_130 = arith.constant 0 : index
      %350 = vector.load %arg5[%c0_129, %c0_130] : memref<1x128xf32, #tpu.memory_space<vmem>>, vector<1x128xf32>
      %cst_131 = arith.constant dense<0.000000e+00> : vector<16xf32>
      %351 = vector.multi_reduction <add>, %348, %cst_131 [1] : vector<16x128xf32> to vector<16xf32>
      %352 = vector.shape_cast %351 : vector<16xf32> to vector<16x1xf32>
      %cst_132 = arith.constant 1.280000e+02 : f32
      %353 = vector.broadcast %cst_132 : f32 to vector<16x1xf32>
      %354 = arith.divf %352, %353 : vector<16x1xf32>
      %355 = vector.broadcast %354 : vector<16x1xf32> to vector<16x128xf32>
      %356 = arith.subf %348, %355 : vector<16x128xf32>
      %357 = arith.mulf %356, %356 : vector<16x128xf32>
      %cst_133 = arith.constant dense<0.000000e+00> : vector<16xf32>
      %358 = vector.multi_reduction <add>, %357, %cst_133 [1] : vector<16x128xf32> to vector<16xf32>
      %359 = vector.shape_cast %358 : vector<16xf32> to vector<16x1xf32>
      %cst_134 = arith.constant 1.280000e+02 : f32
      %360 = vector.broadcast %cst_134 : f32 to vector<16x1xf32>
      %361 = arith.divf %359, %360 : vector<16x1xf32>
      %362 = vector.broadcast %354 : vector<16x1xf32> to vector<16x128xf32>
      %363 = arith.subf %348, %362 : vector<16x128xf32>
      %cst_135 = arith.constant 9.99999996E-13 : f32
      %364 = vector.broadcast %cst_135 : f32 to vector<16x1xf32>
      %365 = arith.addf %361, %364 : vector<16x1xf32>
      %366 = math.rsqrt %365 : vector<16x1xf32>
      %367 = vector.broadcast %366 : vector<16x1xf32> to vector<16x128xf32>
      %368 = arith.mulf %363, %367 : vector<16x128xf32>
      %369 = vector.broadcast %349 : vector<1x128xf32> to vector<16x128xf32>
      %370 = arith.mulf %368, %369 : vector<16x128xf32>
      %371 = vector.broadcast %350 : vector<1x128xf32> to vector<16x128xf32>
      %372 = arith.addf %370, %371 : vector<16x128xf32>
      %c0_136 = arith.constant 0 : index
      %c0_137 = arith.constant 0 : index
      %373 = vector.load %arg10[%c0_136, %c0_137] : memref<16x128xf32, #tpu.memory_space<vmem>>, vector<16x128xf32>
      tpu.vector_store %arg10[%c0_136, %c0_137], %372 {strides = array<i32>} : memref<16x128xf32, #tpu.memory_space<vmem>>, vector<16x128xf32>,
    } else {
    }
    %c0 = arith.constant 0 : index
    %c0_1 = arith.constant 0 : index
    %3 = vector.load %arg10[%c0, %c0_1] : memref<16x128xf32, #tpu.memory_space<vmem>>, vector<16x128xf32>
    %c0_2 = arith.constant 0 : index
    %c0_3 = arith.constant 0 : index
    %4 = vector.load %arg2[%c0_2, %c0_3] : memref<16x128xf32, #tpu.memory_space<vmem>>, vector<16x128xf32>
    %c0_4 = arith.constant 0 : index
    %c0_5 = arith.constant 0 : index
    %c0_6 = arith.constant 0 : index
    %5 = vector.load %arg6[%c0_4, %c0_5, %c0_6] : memref<1x128x1536xbf16, #tpu.memory_space<vmem>>, vector<1x128x384xbf16>
    %6 = vector.shape_cast %5 : vector<1x128x384xbf16> to vector<128x384xbf16>
    %7 = arith.truncf %3 : vector<16x128xf32> to vector<16x128xbf16>
    %cst = arith.constant dense<0.000000e+00> : vector<16x384xf32>
    %8 = tpu.matmul %7, %6, %cst {dimension_numbers = #tpu.dot_dimension_numbers<[1], [0], [0], [1], [0, 0, 1, 1], [], []>} : vector<16x128xbf16>, vector<128x384xbf16>, vector<16x384xf32> -> vector<16x384xf32>
    %c0_7 = arith.constant 0 : index
    %c0_8 = arith.constant 0 : index
    %c0_9 = arith.constant 0 : index
    %9 = vector.load %arg8[%c0_7, %c0_8, %c0_9] : memref<1x1x2432xf32, #tpu.memory_space<vmem>>, vector<1x1x384xf32>
    %10 = vector.shape_cast %9 : vector<1x1x384xf32> to vector<1x384xf32>
    %11 = vector.broadcast %10 : vector<1x384xf32> to vector<16x384xf32>
    %12 = arith.addf %8, %11 : vector<16x384xf32>
    %13 = vector.extract_strided_slice %12 {offsets = [0, 0], sizes = [16, 128], strides = [1, 1]} : vector<16x384xf32> to vector<16x128xf32>
    %14 = vector.extract_strided_slice %12 {offsets = [0, 128], sizes = [16, 128], strides = [1, 1]} : vector<16x384xf32> to vector<16x128xf32>
    %15 = vector.extract_strided_slice %12 {offsets = [0, 256], sizes = [16, 128], strides = [1, 1]} : vector<16x384xf32> to vector<16x128xf32>
    %c0_10 = arith.constant 0 : index
    %c0_11 = arith.constant 0 : index
    %16 = vector.load %arg3[%c0_10, %c0_11] : memref<2x8xf32, #tpu.memory_space<vmem>>, vector<2x8xf32>
    %17 = vector.shape_cast %16 : vector<2x8xf32> to vector<2x1x8xf32>
    %18 = vector.shape_cast %13 : vector<16x128xf32> to vector<2x8x128xf32>
    %19 = arith.truncf %18 : vector<2x8x128xf32> to vector<2x8x128xbf16>
    %20 = vector.shape_cast %14 : vector<16x128xf32> to vector<2x8x128xf32>
    %21 = arith.truncf %20 : vector<2x8x128xf32> to vector<2x8x128xbf16>
    %22 = vector.shape_cast %15 : vector<16x128xf32> to vector<2x8x128xf32>
    %23 = arith.truncf %22 : vector<2x8x128xf32> to vector<2x8x128xbf16>
    %24 = vector.extract_strided_slice %19 {offsets = [0, 0, 0], sizes = [2, 8, 32], strides = [1, 1, 1]} : vector<2x8x128xbf16> to vector<2x8x32xbf16>
    %25 = vector.extract_strided_slice %21 {offsets = [0, 0, 0], sizes = [2, 8, 32], strides = [1, 1, 1]} : vector<2x8x128xbf16> to vector<2x8x32xbf16>
    "tpu.trace_start"() <{level = 10 : i32, message = "bqd,bkd->bqk"}> : () -> ()
    %cst_12 = arith.constant dense<0.000000e+00> : vector<2x8x8xf32>
    %26 = tpu.matmul %24, %25, %cst_12 {dimension_numbers = #tpu.dot_dimension_numbers<[2], [2], [1], [1], [0, 0, 0, 1, 1, 1], [0], [0]>} : vector<2x8x32xbf16>, vector<2x8x32xbf16>, vector<2x8x8xf32> -> vector<2x8x8xf32>
    "tpu.trace_stop"() : () -> ()
    %cst_13 = arith.constant 0.176776692 : f32
    %27 = vector.broadcast %cst_13 : f32 to vector<2x8x8xf32>
    %28 = arith.mulf %26, %27 : vector<2x8x8xf32>
    %29 = vector.broadcast %17 : vector<2x1x8xf32> to vector<2x8x8xf32>
    %30 = arith.addf %28, %29 : vector<2x8x8xf32>
    %cst_14 = arith.constant dense<0xFF800000> : vector<2x8xf32>
    %31 = vector.multi_reduction <maximumf>, %30, %cst_14 [2] : vector<2x8x8xf32> to vector<2x8xf32>
    %32 = vector.shape_cast %31 : vector<2x8xf32> to vector<2x8x1xf32>
    %33 = vector.broadcast %32 : vector<2x8x1xf32> to vector<2x8x8xf32>
    %34 = arith.subf %30, %33 : vector<2x8x8xf32>
    %35 = math.exp %34 : vector<2x8x8xf32>
    %cst_15 = arith.constant dense<0.000000e+00> : vector<2x8xf32>
    %36 = vector.multi_reduction <add>, %35, %cst_15 [2] : vector<2x8x8xf32> to vector<2x8xf32>
    %37 = vector.shape_cast %36 : vector<2x8xf32> to vector<2x8x1xf32>
    %38 = tpu.reciprocal %37 {approx = true} : vector<2x8x1xf32> -> vector<2x8x1xf32>
    %39 = vector.broadcast %38 : vector<2x8x1xf32> to vector<2x8x8xf32>
    %40 = arith.mulf %35, %39 : vector<2x8x8xf32>
    %41 = arith.truncf %40 : vector<2x8x8xf32> to vector<2x8x8xbf16>
    %42 = vector.extract_strided_slice %23 {offsets = [0, 0, 0], sizes = [2, 8, 32], strides = [1, 1, 1]} : vector<2x8x128xbf16> to vector<2x8x32xbf16>
    "tpu.trace_start"() <{level = 10 : i32, message = "bqk,bkd->bqd"}> : () -> ()
    %cst_16 = arith.constant dense<0.000000e+00> : vector<2x8x32xf32>
    %43 = tpu.matmul %41, %42, %cst_16 {dimension_numbers = #tpu.dot_dimension_numbers<[2], [1], [1], [2], [0, 0, 0, 1, 1, 2], [0], [0]>} : vector<2x8x8xbf16>, vector<2x8x32xbf16>, vector<2x8x32xf32> -> vector<2x8x32xf32>
    "tpu.trace_stop"() : () -> ()
    %44 = vector.extract_strided_slice %19 {offsets = [0, 0, 32], sizes = [2, 8, 32], strides = [1, 1, 1]} : vector<2x8x128xbf16> to vector<2x8x32xbf16>
    %45 = vector.extract_strided_slice %21 {offsets = [0, 0, 32], sizes = [2, 8, 32], strides = [1, 1, 1]} : vector<2x8x128xbf16> to vector<2x8x32xbf16>
    "tpu.trace_start"() <{level = 10 : i32, message = "bqd,bkd->bqk"}> : () -> ()
    %cst_17 = arith.constant dense<0.000000e+00> : vector<2x8x8xf32>
    %46 = tpu.matmul %44, %45, %cst_17 {dimension_numbers = #tpu.dot_dimension_numbers<[2], [2], [1], [1], [0, 0, 0, 1, 1, 1], [0], [0]>} : vector<2x8x32xbf16>, vector<2x8x32xbf16>, vector<2x8x8xf32> -> vector<2x8x8xf32>
    "tpu.trace_stop"() : () -> ()
    %cst_18 = arith.constant 0.176776692 : f32
    %47 = vector.broadcast %cst_18 : f32 to vector<2x8x8xf32>
    %48 = arith.mulf %46, %47 : vector<2x8x8xf32>
    %49 = vector.broadcast %17 : vector<2x1x8xf32> to vector<2x8x8xf32>
    %50 = arith.addf %48, %49 : vector<2x8x8xf32>
    %cst_19 = arith.constant dense<0xFF800000> : vector<2x8xf32>
    %51 = vector.multi_reduction <maximumf>, %50, %cst_19 [2] : vector<2x8x8xf32> to vector<2x8xf32>
    %52 = vector.shape_cast %51 : vector<2x8xf32> to vector<2x8x1xf32>
    %53 = vector.broadcast %52 : vector<2x8x1xf32> to vector<2x8x8xf32>
    %54 = arith.subf %50, %53 : vector<2x8x8xf32>
    %55 = math.exp %54 : vector<2x8x8xf32>
    %cst_20 = arith.constant dense<0.000000e+00> : vector<2x8xf32>
    %56 = vector.multi_reduction <add>, %55, %cst_20 [2] : vector<2x8x8xf32> to vector<2x8xf32>
    %57 = vector.shape_cast %56 : vector<2x8xf32> to vector<2x8x1xf32>
    %58 = tpu.reciprocal %57 {approx = true} : vector<2x8x1xf32> -> vector<2x8x1xf32>
    %59 = vector.broadcast %58 : vector<2x8x1xf32> to vector<2x8x8xf32>
    %60 = arith.mulf %55, %59 : vector<2x8x8xf32>
    %61 = arith.truncf %60 : vector<2x8x8xf32> to vector<2x8x8xbf16>
    %62 = vector.extract_strided_slice %23 {offsets = [0, 0, 32], sizes = [2, 8, 32], strides = [1, 1, 1]} : vector<2x8x128xbf16> to vector<2x8x32xbf16>
    "tpu.trace_start"() <{level = 10 : i32, message = "bqk,bkd->bqd"}> : () -> ()
    %cst_21 = arith.constant dense<0.000000e+00> : vector<2x8x32xf32>
    %63 = tpu.matmul %61, %62, %cst_21 {dimension_numbers = #tpu.dot_dimension_numbers<[2], [1], [1], [2], [0, 0, 0, 1, 1, 2], [0], [0]>} : vector<2x8x8xbf16>, vector<2x8x32xbf16>, vector<2x8x32xf32> -> vector<2x8x32xf32>
    "tpu.trace_stop"() : () -> ()
    %64 = vector.extract_strided_slice %19 {offsets = [0, 0, 64], sizes = [2, 8, 32], strides = [1, 1, 1]} : vector<2x8x128xbf16> to vector<2x8x32xbf16>
    %65 = vector.extract_strided_slice %21 {offsets = [0, 0, 64], sizes = [2, 8, 32], strides = [1, 1, 1]} : vector<2x8x128xbf16> to vector<2x8x32xbf16>
    "tpu.trace_start"() <{level = 10 : i32, message = "bqd,bkd->bqk"}> : () -> ()
    %cst_22 = arith.constant dense<0.000000e+00> : vector<2x8x8xf32>
    %66 = tpu.matmul %64, %65, %cst_22 {dimension_numbers = #tpu.dot_dimension_numbers<[2], [2], [1], [1], [0, 0, 0, 1, 1, 1], [0], [0]>} : vector<2x8x32xbf16>, vector<2x8x32xbf16>, vector<2x8x8xf32> -> vector<2x8x8xf32>
    "tpu.trace_stop"() : () -> ()
    %cst_23 = arith.constant 0.176776692 : f32
    %67 = vector.broadcast %cst_23 : f32 to vector<2x8x8xf32>
    %68 = arith.mulf %66, %67 : vector<2x8x8xf32>
    %69 = vector.broadcast %17 : vector<2x1x8xf32> to vector<2x8x8xf32>
    %70 = arith.addf %68, %69 : vector<2x8x8xf32>
    %cst_24 = arith.constant dense<0xFF800000> : vector<2x8xf32>
    %71 = vector.multi_reduction <maximumf>, %70, %cst_24 [2] : vector<2x8x8xf32> to vector<2x8xf32>
    %72 = vector.shape_cast %71 : vector<2x8xf32> to vector<2x8x1xf32>
    %73 = vector.broadcast %72 : vector<2x8x1xf32> to vector<2x8x8xf32>
    %74 = arith.subf %70, %73 : vector<2x8x8xf32>
    %75 = math.exp %74 : vector<2x8x8xf32>
    %cst_25 = arith.constant dense<0.000000e+00> : vector<2x8xf32>
    %76 = vector.multi_reduction <add>, %75, %cst_25 [2] : vector<2x8x8xf32> to vector<2x8xf32>
    %77 = vector.shape_cast %76 : vector<2x8xf32> to vector<2x8x1xf32>
    %78 = tpu.reciprocal %77 {approx = true} : vector<2x8x1xf32> -> vector<2x8x1xf32>
    %79 = vector.broadcast %78 : vector<2x8x1xf32> to vector<2x8x8xf32>
    %80 = arith.mulf %75, %79 : vector<2x8x8xf32>
    %81 = arith.truncf %80 : vector<2x8x8xf32> to vector<2x8x8xbf16>
    %82 = vector.extract_strided_slice %23 {offsets = [0, 0, 64], sizes = [2, 8, 32], strides = [1, 1, 1]} : vector<2x8x128xbf16> to vector<2x8x32xbf16>
    "tpu.trace_start"() <{level = 10 : i32, message = "bqk,bkd->bqd"}> : () -> ()
    %cst_26 = arith.constant dense<0.000000e+00> : vector<2x8x32xf32>
    %83 = tpu.matmul %81, %82, %cst_26 {dimension_numbers = #tpu.dot_dimension_numbers<[2], [1], [1], [2], [0, 0, 0, 1, 1, 2], [0], [0]>} : vector<2x8x8xbf16>, vector<2x8x32xbf16>, vector<2x8x32xf32> -> vector<2x8x32xf32>
    "tpu.trace_stop"() : () -> ()
    %84 = vector.extract_strided_slice %19 {offsets = [0, 0, 96], sizes = [2, 8, 32], strides = [1, 1, 1]} : vector<2x8x128xbf16> to vector<2x8x32xbf16>
    %85 = vector.extract_strided_slice %21 {offsets = [0, 0, 96], sizes = [2, 8, 32], strides = [1, 1, 1]} : vector<2x8x128xbf16> to vector<2x8x32xbf16>
    "tpu.trace_start"() <{level = 10 : i32, message = "bqd,bkd->bqk"}> : () -> ()
    %cst_27 = arith.constant dense<0.000000e+00> : vector<2x8x8xf32>
    %86 = tpu.matmul %84, %85, %cst_27 {dimension_numbers = #tpu.dot_dimension_numbers<[2], [2], [1], [1], [0, 0, 0, 1, 1, 1], [0], [0]>} : vector<2x8x32xbf16>, vector<2x8x32xbf16>, vector<2x8x8xf32> -> vector<2x8x8xf32>
    "tpu.trace_stop"() : () -> ()
    %cst_28 = arith.constant 0.176776692 : f32
    %87 = vector.broadcast %cst_28 : f32 to vector<2x8x8xf32>
    %88 = arith.mulf %86, %87 : vector<2x8x8xf32>
    %89 = vector.broadcast %17 : vector<2x1x8xf32> to vector<2x8x8xf32>
    %90 = arith.addf %88, %89 : vector<2x8x8xf32>
    %cst_29 = arith.constant dense<0xFF800000> : vector<2x8xf32>
    %91 = vector.multi_reduction <maximumf>, %90, %cst_29 [2] : vector<2x8x8xf32> to vector<2x8xf32>
    %92 = vector.shape_cast %91 : vector<2x8xf32> to vector<2x8x1xf32>
    %93 = vector.broadcast %92 : vector<2x8x1xf32> to vector<2x8x8xf32>
    %94 = arith.subf %90, %93 : vector<2x8x8xf32>
    %95 = math.exp %94 : vector<2x8x8xf32>
    %cst_30 = arith.constant dense<0.000000e+00> : vector<2x8xf32>
    %96 = vector.multi_reduction <add>, %95, %cst_30 [2] : vector<2x8x8xf32> to vector<2x8xf32>
    %97 = vector.shape_cast %96 : vector<2x8xf32> to vector<2x8x1xf32>
    %98 = tpu.reciprocal %97 {approx = true} : vector<2x8x1xf32> -> vector<2x8x1xf32>
    %99 = vector.broadcast %98 : vector<2x8x1xf32> to vector<2x8x8xf32>
    %100 = arith.mulf %95, %99 : vector<2x8x8xf32>
    %101 = arith.truncf %100 : vector<2x8x8xf32> to vector<2x8x8xbf16>
    %102 = vector.extract_strided_slice %23 {offsets = [0, 0, 96], sizes = [2, 8, 32], strides = [1, 1, 1]} : vector<2x8x128xbf16> to vector<2x8x32xbf16>
    "tpu.trace_start"() <{level = 10 : i32, message = "bqk,bkd->bqd"}> : () -> ()
    %cst_31 = arith.constant dense<0.000000e+00> : vector<2x8x32xf32>
    %103 = tpu.matmul %101, %102, %cst_31 {dimension_numbers = #tpu.dot_dimension_numbers<[2], [1], [1], [2], [0, 0, 0, 1, 1, 2], [0], [0]>} : vector<2x8x8xbf16>, vector<2x8x32xbf16>, vector<2x8x32xf32> -> vector<2x8x32xf32>
    "tpu.trace_stop"() : () -> ()
    %104 = tpu.concatenate %43, %63, %83, %103 in 2 : vector<2x8x32xf32>, vector<2x8x32xf32>, vector<2x8x32xf32>, vector<2x8x32xf32> -> vector<2x8x128xf32>
    %105 = vector.shape_cast %104 : vector<2x8x128xf32> to vector<16x128xf32>
    %c0_32 = arith.constant 0 : index
    %c0_33 = arith.constant 0 : index
    %c384 = arith.constant 384 : index
    %106 = vector.load %arg6[%c0_32, %c0_33, %c384] : memref<1x128x1536xbf16, #tpu.memory_space<vmem>>, vector<1x128x128xbf16>
    %107 = vector.shape_cast %106 : vector<1x128x128xbf16> to vector<128x128xbf16>
    %108 = arith.truncf %105 : vector<16x128xf32> to vector<16x128xbf16>
    %cst_34 = arith.constant dense<0.000000e+00> : vector<16x128xf32>
    %109 = tpu.matmul %108, %107, %cst_34 {dimension_numbers = #tpu.dot_dimension_numbers<[1], [0], [0], [1], [0, 0, 1, 1], [], []>} : vector<16x128xbf16>, vector<128x128xbf16>, vector<16x128xf32> -> vector<16x128xf32>
    %c0_35 = arith.constant 0 : index
    %c0_36 = arith.constant 0 : index
    %c384_37 = arith.constant 384 : index
    %110 = vector.load %arg8[%c0_35, %c0_36, %c384_37] : memref<1x1x2432xf32, #tpu.memory_space<vmem>>, vector<1x1x128xf32>
    %111 = vector.shape_cast %110 : vector<1x1x128xf32> to vector<1x128xf32>
    %112 = vector.broadcast %111 : vector<1x128xf32> to vector<16x128xf32>
    %113 = arith.addf %109, %112 : vector<16x128xf32>
    %114 = arith.addf %3, %113 : vector<16x128xf32>
    %c0_38 = arith.constant 0 : index
    %c0_39 = arith.constant 0 : index
    %c512 = arith.constant 512 : index
    %115 = vector.load %arg8[%c0_38, %c0_39, %c512] : memref<1x1x2432xf32, #tpu.memory_space<vmem>>, vector<1x1x128xf32>
    %116 = vector.shape_cast %115 : vector<1x1x128xf32> to vector<1x128xf32>
    %c0_40 = arith.constant 0 : index
    %c0_41 = arith.constant 0 : index
    %c640 = arith.constant 640 : index
    %117 = vector.load %arg8[%c0_40, %c0_41, %c640] : memref<1x1x2432xf32, #tpu.memory_space<vmem>>, vector<1x1x128xf32>
    %118 = vector.shape_cast %117 : vector<1x1x128xf32> to vector<1x128xf32>
    %cst_42 = arith.constant dense<0.000000e+00> : vector<16xf32>
    %119 = vector.multi_reduction <add>, %114, %cst_42 [1] : vector<16x128xf32> to vector<16xf32>
    %120 = vector.shape_cast %119 : vector<16xf32> to vector<16x1xf32>
    %cst_43 = arith.constant 1.280000e+02 : f32
    %121 = vector.broadcast %cst_43 : f32 to vector<16x1xf32>
    %122 = arith.divf %120, %121 : vector<16x1xf32>
    %123 = vector.broadcast %122 : vector<16x1xf32> to vector<16x128xf32>
    %124 = arith.subf %114, %123 : vector<16x128xf32>
    %125 = arith.mulf %124, %124 : vector<16x128xf32>
    %cst_44 = arith.constant dense<0.000000e+00> : vector<16xf32>
    %126 = vector.multi_reduction <add>, %125, %cst_44 [1] : vector<16x128xf32> to vector<16xf32>
    %127 = vector.shape_cast %126 : vector<16xf32> to vector<16x1xf32>
    %cst_45 = arith.constant 1.280000e+02 : f32
    %128 = vector.broadcast %cst_45 : f32 to vector<16x1xf32>
    %129 = arith.divf %127, %128 : vector<16x1xf32>
    %130 = vector.broadcast %122 : vector<16x1xf32> to vector<16x128xf32>
    %131 = arith.subf %114, %130 : vector<16x128xf32>
    %cst_46 = arith.constant 9.99999996E-13 : f32
    %132 = vector.broadcast %cst_46 : f32 to vector<16x1xf32>
    %133 = arith.addf %129, %132 : vector<16x1xf32>
    %134 = math.rsqrt %133 : vector<16x1xf32>
    %135 = vector.broadcast %134 : vector<16x1xf32> to vector<16x128xf32>
    %136 = arith.mulf %131, %135 : vector<16x128xf32>
    %137 = vector.broadcast %116 : vector<1x128xf32> to vector<16x128xf32>
    %138 = arith.mulf %136, %137 : vector<16x128xf32>
    %139 = vector.broadcast %118 : vector<1x128xf32> to vector<16x128xf32>
    %140 = arith.addf %138, %139 : vector<16x128xf32>
    %c0_47 = arith.constant 0 : index
    %c0_48 = arith.constant 0 : index
    %c512_49 = arith.constant 512 : index
    %141 = vector.load %arg6[%c0_47, %c0_48, %c512_49] : memref<1x128x1536xbf16, #tpu.memory_space<vmem>>, vector<1x128x128xbf16>
    %142 = vector.shape_cast %141 : vector<1x128x128xbf16> to vector<128x128xbf16>
    %143 = arith.truncf %140 : vector<16x128xf32> to vector<16x128xbf16>
    %cst_50 = arith.constant dense<0.000000e+00> : vector<16x128xf32>
    %144 = tpu.matmul %143, %142, %cst_50 {dimension_numbers = #tpu.dot_dimension_numbers<[1], [0], [0], [1], [0, 0, 1, 1], [], []>} : vector<16x128xbf16>, vector<128x128xbf16>, vector<16x128xf32> -> vector<16x128xf32>
    %c0_51 = arith.constant 0 : index
    %c0_52 = arith.constant 0 : index
    %c768 = arith.constant 768 : index
    %145 = vector.load %arg8[%c0_51, %c0_52, %c768] : memref<1x1x2432xf32, #tpu.memory_space<vmem>>, vector<1x1x128xf32>
    %146 = vector.shape_cast %145 : vector<1x1x128xf32> to vector<1x128xf32>
    %147 = vector.broadcast %146 : vector<1x128xf32> to vector<16x128xf32>
    %148 = arith.addf %144, %147 : vector<16x128xf32>
    %c0_53 = arith.constant 0 : index
    %c0_54 = arith.constant 0 : index
    %c640_55 = arith.constant 640 : index
    %149 = vector.load %arg6[%c0_53, %c0_54, %c640_55] : memref<1x128x1536xbf16, #tpu.memory_space<vmem>>, vector<1x128x256xbf16>
    %150 = vector.shape_cast %149 : vector<1x128x256xbf16> to vector<128x256xbf16>
    %151 = arith.truncf %4 : vector<16x128xf32> to vector<16x128xbf16>
    %cst_56 = arith.constant dense<0.000000e+00> : vector<16x256xf32>
    %152 = tpu.matmul %151, %150, %cst_56 {dimension_numbers = #tpu.dot_dimension_numbers<[1], [0], [0], [1], [0, 0, 1, 1], [], []>} : vector<16x128xbf16>, vector<128x256xbf16>, vector<16x256xf32> -> vector<16x256xf32>
    %c0_57 = arith.constant 0 : index
    %c0_58 = arith.constant 0 : index
    %c896 = arith.constant 896 : index
    %153 = vector.load %arg8[%c0_57, %c0_58, %c896] : memref<1x1x2432xf32, #tpu.memory_space<vmem>>, vector<1x1x256xf32>
    %154 = vector.shape_cast %153 : vector<1x1x256xf32> to vector<1x256xf32>
    %155 = vector.broadcast %154 : vector<1x256xf32> to vector<16x256xf32>
    %156 = arith.addf %152, %155 : vector<16x256xf32>
    %157 = vector.extract_strided_slice %156 {offsets = [0, 0], sizes = [16, 128], strides = [1, 1]} : vector<16x256xf32> to vector<16x128xf32>
    %158 = vector.extract_strided_slice %156 {offsets = [0, 128], sizes = [16, 128], strides = [1, 1]} : vector<16x256xf32> to vector<16x128xf32>
    %159 = tpu.iota {dimensions = array<i32: 1>} : vector<8x8xi32>
    %c5_i32 = arith.constant 5 : i32
    %160 = vector.broadcast %c5_i32 : i32 to vector<8x8xi32>
    %161 = arith.cmpi slt, %159, %160 : vector<8x8xi32>
    %cst_59 = arith.constant 0.000000e+00 : f32
    %cst_60 = arith.constant -1.000000e+09 : f32
    %162 = vector.broadcast %cst_59 : f32 to vector<8x8xf32>
    %163 = vector.broadcast %cst_60 : f32 to vector<8x8xf32>
    %164 = arith.select %161, %162, %163 : vector<8x8xi1>, vector<8x8xf32>
    %165 = vector.shape_cast %164 : vector<8x8xf32> to vector<1x8x8xf32>
    %166 = vector.shape_cast %148 : vector<16x128xf32> to vector<2x8x128xf32>
    %167 = arith.truncf %166 : vector<2x8x128xf32> to vector<2x8x128xbf16>
    %168 = vector.shape_cast %157 : vector<16x128xf32> to vector<2x8x128xf32>
    %169 = arith.truncf %168 : vector<2x8x128xf32> to vector<2x8x128xbf16>
    %170 = vector.shape_cast %158 : vector<16x128xf32> to vector<2x8x128xf32>
    %171 = arith.truncf %170 : vector<2x8x128xf32> to vector<2x8x128xbf16>
    %172 = vector.extract_strided_slice %167 {offsets = [0, 0, 0], sizes = [2, 8, 32], strides = [1, 1, 1]} : vector<2x8x128xbf16> to vector<2x8x32xbf16>
    %173 = vector.extract_strided_slice %169 {offsets = [0, 0, 0], sizes = [2, 8, 32], strides = [1, 1, 1]} : vector<2x8x128xbf16> to vector<2x8x32xbf16>
    "tpu.trace_start"() <{level = 10 : i32, message = "bqd,bkd->bqk"}> : () -> ()
    %cst_61 = arith.constant dense<0.000000e+00> : vector<2x8x8xf32>
    %174 = tpu.matmul %172, %173, %cst_61 {dimension_numbers = #tpu.dot_dimension_numbers<[2], [2], [1], [1], [0, 0, 0, 1, 1, 1], [0], [0]>} : vector<2x8x32xbf16>, vector<2x8x32xbf16>, vector<2x8x8xf32> -> vector<2x8x8xf32>
    "tpu.trace_stop"() : () -> ()
    %cst_62 = arith.constant 0.176776692 : f32
    %175 = vector.broadcast %cst_62 : f32 to vector<2x8x8xf32>
    %176 = arith.mulf %174, %175 : vector<2x8x8xf32>
    %177 = vector.broadcast %165 : vector<1x8x8xf32> to vector<2x8x8xf32>
    %178 = arith.addf %176, %177 : vector<2x8x8xf32>
    %cst_63 = arith.constant dense<0xFF800000> : vector<2x8xf32>
    %179 = vector.multi_reduction <maximumf>, %178, %cst_63 [2] : vector<2x8x8xf32> to vector<2x8xf32>
    %180 = vector.shape_cast %179 : vector<2x8xf32> to vector<2x8x1xf32>
    %181 = vector.broadcast %180 : vector<2x8x1xf32> to vector<2x8x8xf32>
    %182 = arith.subf %178, %181 : vector<2x8x8xf32>
    %183 = math.exp %182 : vector<2x8x8xf32>
    %cst_64 = arith.constant dense<0.000000e+00> : vector<2x8xf32>
    %184 = vector.multi_reduction <add>, %183, %cst_64 [2] : vector<2x8x8xf32> to vector<2x8xf32>
    %185 = vector.shape_cast %184 : vector<2x8xf32> to vector<2x8x1xf32>
    %186 = tpu.reciprocal %185 {approx = true} : vector<2x8x1xf32> -> vector<2x8x1xf32>
    %187 = vector.broadcast %186 : vector<2x8x1xf32> to vector<2x8x8xf32>
    %188 = arith.mulf %183, %187 : vector<2x8x8xf32>
    %189 = arith.truncf %188 : vector<2x8x8xf32> to vector<2x8x8xbf16>
    %190 = vector.extract_strided_slice %171 {offsets = [0, 0, 0], sizes = [2, 8, 32], strides = [1, 1, 1]} : vector<2x8x128xbf16> to vector<2x8x32xbf16>
    "tpu.trace_start"() <{level = 10 : i32, message = "bqk,bkd->bqd"}> : () -> ()
    %cst_65 = arith.constant dense<0.000000e+00> : vector<2x8x32xf32>
    %191 = tpu.matmul %189, %190, %cst_65 {dimension_numbers = #tpu.dot_dimension_numbers<[2], [1], [1], [2], [0, 0, 0, 1, 1, 2], [0], [0]>} : vector<2x8x8xbf16>, vector<2x8x32xbf16>, vector<2x8x32xf32> -> vector<2x8x32xf32>
    "tpu.trace_stop"() : () -> ()
    %192 = vector.extract_strided_slice %167 {offsets = [0, 0, 32], sizes = [2, 8, 32], strides = [1, 1, 1]} : vector<2x8x128xbf16> to vector<2x8x32xbf16>
    %193 = vector.extract_strided_slice %169 {offsets = [0, 0, 32], sizes = [2, 8, 32], strides = [1, 1, 1]} : vector<2x8x128xbf16> to vector<2x8x32xbf16>
    "tpu.trace_start"() <{level = 10 : i32, message = "bqd,bkd->bqk"}> : () -> ()
    %cst_66 = arith.constant dense<0.000000e+00> : vector<2x8x8xf32>
    %194 = tpu.matmul %192, %193, %cst_66 {dimension_numbers = #tpu.dot_dimension_numbers<[2], [2], [1], [1], [0, 0, 0, 1, 1, 1], [0], [0]>} : vector<2x8x32xbf16>, vector<2x8x32xbf16>, vector<2x8x8xf32> -> vector<2x8x8xf32>
    "tpu.trace_stop"() : () -> ()
    %cst_67 = arith.constant 0.176776692 : f32
    %195 = vector.broadcast %cst_67 : f32 to vector<2x8x8xf32>
    %196 = arith.mulf %194, %195 : vector<2x8x8xf32>
    %197 = vector.broadcast %165 : vector<1x8x8xf32> to vector<2x8x8xf32>
    %198 = arith.addf %196, %197 : vector<2x8x8xf32>
    %cst_68 = arith.constant dense<0xFF800000> : vector<2x8xf32>
    %199 = vector.multi_reduction <maximumf>, %198, %cst_68 [2] : vector<2x8x8xf32> to vector<2x8xf32>
    %200 = vector.shape_cast %199 : vector<2x8xf32> to vector<2x8x1xf32>
    %201 = vector.broadcast %200 : vector<2x8x1xf32> to vector<2x8x8xf32>
    %202 = arith.subf %198, %201 : vector<2x8x8xf32>
    %203 = math.exp %202 : vector<2x8x8xf32>
    %cst_69 = arith.constant dense<0.000000e+00> : vector<2x8xf32>
    %204 = vector.multi_reduction <add>, %203, %cst_69 [2] : vector<2x8x8xf32> to vector<2x8xf32>
    %205 = vector.shape_cast %204 : vector<2x8xf32> to vector<2x8x1xf32>
    %206 = tpu.reciprocal %205 {approx = true} : vector<2x8x1xf32> -> vector<2x8x1xf32>
    %207 = vector.broadcast %206 : vector<2x8x1xf32> to vector<2x8x8xf32>
    %208 = arith.mulf %203, %207 : vector<2x8x8xf32>
    %209 = arith.truncf %208 : vector<2x8x8xf32> to vector<2x8x8xbf16>
    %210 = vector.extract_strided_slice %171 {offsets = [0, 0, 32], sizes = [2, 8, 32], strides = [1, 1, 1]} : vector<2x8x128xbf16> to vector<2x8x32xbf16>
    "tpu.trace_start"() <{level = 10 : i32, message = "bqk,bkd->bqd"}> : () -> ()
    %cst_70 = arith.constant dense<0.000000e+00> : vector<2x8x32xf32>
    %211 = tpu.matmul %209, %210, %cst_70 {dimension_numbers = #tpu.dot_dimension_numbers<[2], [1], [1], [2], [0, 0, 0, 1, 1, 2], [0], [0]>} : vector<2x8x8xbf16>, vector<2x8x32xbf16>, vector<2x8x32xf32> -> vector<2x8x32xf32>
    "tpu.trace_stop"() : () -> ()
    %212 = vector.extract_strided_slice %167 {offsets = [0, 0, 64], sizes = [2, 8, 32], strides = [1, 1, 1]} : vector<2x8x128xbf16> to vector<2x8x32xbf16>
    %213 = vector.extract_strided_slice %169 {offsets = [0, 0, 64], sizes = [2, 8, 32], strides = [1, 1, 1]} : vector<2x8x128xbf16> to vector<2x8x32xbf16>
    "tpu.trace_start"() <{level = 10 : i32, message = "bqd,bkd->bqk"}> : () -> ()
    %cst_71 = arith.constant dense<0.000000e+00> : vector<2x8x8xf32>
    %214 = tpu.matmul %212, %213, %cst_71 {dimension_numbers = #tpu.dot_dimension_numbers<[2], [2], [1], [1], [0, 0, 0, 1, 1, 1], [0], [0]>} : vector<2x8x32xbf16>, vector<2x8x32xbf16>, vector<2x8x8xf32> -> vector<2x8x8xf32>
    "tpu.trace_stop"() : () -> ()
    %cst_72 = arith.constant 0.176776692 : f32
    %215 = vector.broadcast %cst_72 : f32 to vector<2x8x8xf32>
    %216 = arith.mulf %214, %215 : vector<2x8x8xf32>
    %217 = vector.broadcast %165 : vector<1x8x8xf32> to vector<2x8x8xf32>
    %218 = arith.addf %216, %217 : vector<2x8x8xf32>
    %cst_73 = arith.constant dense<0xFF800000> : vector<2x8xf32>
    %219 = vector.multi_reduction <maximumf>, %218, %cst_73 [2] : vector<2x8x8xf32> to vector<2x8xf32>
    %220 = vector.shape_cast %219 : vector<2x8xf32> to vector<2x8x1xf32>
    %221 = vector.broadcast %220 : vector<2x8x1xf32> to vector<2x8x8xf32>
    %222 = arith.subf %218, %221 : vector<2x8x8xf32>
    %223 = math.exp %222 : vector<2x8x8xf32>
    %cst_74 = arith.constant dense<0.000000e+00> : vector<2x8xf32>
    %224 = vector.multi_reduction <add>, %223, %cst_74 [2] : vector<2x8x8xf32> to vector<2x8xf32>
    %225 = vector.shape_cast %224 : vector<2x8xf32> to vector<2x8x1xf32>
    %226 = tpu.reciprocal %225 {approx = true} : vector<2x8x1xf32> -> vector<2x8x1xf32>
    %227 = vector.broadcast %226 : vector<2x8x1xf32> to vector<2x8x8xf32>
    %228 = arith.mulf %223, %227 : vector<2x8x8xf32>
    %229 = arith.truncf %228 : vector<2x8x8xf32> to vector<2x8x8xbf16>
    %230 = vector.extract_strided_slice %171 {offsets = [0, 0, 64], sizes = [2, 8, 32], strides = [1, 1, 1]} : vector<2x8x128xbf16> to vector<2x8x32xbf16>
    "tpu.trace_start"() <{level = 10 : i32, message = "bqk,bkd->bqd"}> : () -> ()
    %cst_75 = arith.constant dense<0.000000e+00> : vector<2x8x32xf32>
    %231 = tpu.matmul %229, %230, %cst_75 {dimension_numbers = #tpu.dot_dimension_numbers<[2], [1], [1], [2], [0, 0, 0, 1, 1, 2], [0], [0]>} : vector<2x8x8xbf16>, vector<2x8x32xbf16>, vector<2x8x32xf32> -> vector<2x8x32xf32>
    "tpu.trace_stop"() : () -> ()
    %232 = vector.extract_strided_slice %167 {offsets = [0, 0, 96], sizes = [2, 8, 32], strides = [1, 1, 1]} : vector<2x8x128xbf16> to vector<2x8x32xbf16>
    %233 = vector.extract_strided_slice %169 {offsets = [0, 0, 96], sizes = [2, 8, 32], strides = [1, 1, 1]} : vector<2x8x128xbf16> to vector<2x8x32xbf16>
    "tpu.trace_start"() <{level = 10 : i32, message = "bqd,bkd->bqk"}> : () -> ()
    %cst_76 = arith.constant dense<0.000000e+00> : vector<2x8x8xf32>
    %234 = tpu.matmul %232, %233, %cst_76 {dimension_numbers = #tpu.dot_dimension_numbers<[2], [2], [1], [1], [0, 0, 0, 1, 1, 1], [0], [0]>} : vector<2x8x32xbf16>, vector<2x8x32xbf16>, vector<2x8x8xf32> -> vector<2x8x8xf32>
    "tpu.trace_stop"() : () -> ()
    %cst_77 = arith.constant 0.176776692 : f32
    %235 = vector.broadcast %cst_77 : f32 to vector<2x8x8xf32>
    %236 = arith.mulf %234, %235 : vector<2x8x8xf32>
    %237 = vector.broadcast %165 : vector<1x8x8xf32> to vector<2x8x8xf32>
    %238 = arith.addf %236, %237 : vector<2x8x8xf32>
    %cst_78 = arith.constant dense<0xFF800000> : vector<2x8xf32>
    %239 = vector.multi_reduction <maximumf>, %238, %cst_78 [2] : vector<2x8x8xf32> to vector<2x8xf32>
    %240 = vector.shape_cast %239 : vector<2x8xf32> to vector<2x8x1xf32>
    %241 = vector.broadcast %240 : vector<2x8x1xf32> to vector<2x8x8xf32>
    %242 = arith.subf %238, %241 : vector<2x8x8xf32>
    %243 = math.exp %242 : vector<2x8x8xf32>
    %cst_79 = arith.constant dense<0.000000e+00> : vector<2x8xf32>
    %244 = vector.multi_reduction <add>, %243, %cst_79 [2] : vector<2x8x8xf32> to vector<2x8xf32>
    %245 = vector.shape_cast %244 : vector<2x8xf32> to vector<2x8x1xf32>
    %246 = tpu.reciprocal %245 {approx = true} : vector<2x8x1xf32> -> vector<2x8x1xf32>
    %247 = vector.broadcast %246 : vector<2x8x1xf32> to vector<2x8x8xf32>
    %248 = arith.mulf %243, %247 : vector<2x8x8xf32>
    %249 = arith.truncf %248 : vector<2x8x8xf32> to vector<2x8x8xbf16>
    %250 = vector.extract_strided_slice %171 {offsets = [0, 0, 96], sizes = [2, 8, 32], strides = [1, 1, 1]} : vector<2x8x128xbf16> to vector<2x8x32xbf16>
    "tpu.trace_start"() <{level = 10 : i32, message = "bqk,bkd->bqd"}> : () -> ()
    %cst_80 = arith.constant dense<0.000000e+00> : vector<2x8x32xf32>
    %251 = tpu.matmul %249, %250, %cst_80 {dimension_numbers = #tpu.dot_dimension_numbers<[2], [1], [1], [2], [0, 0, 0, 1, 1, 2], [0], [0]>} : vector<2x8x8xbf16>, vector<2x8x32xbf16>, vector<2x8x32xf32> -> vector<2x8x32xf32>
    "tpu.trace_stop"() : () -> ()
    %252 = tpu.concatenate %191, %211, %231, %251 in 2 : vector<2x8x32xf32>, vector<2x8x32xf32>, vector<2x8x32xf32>, vector<2x8x32xf32> -> vector<2x8x128xf32>
    %253 = vector.shape_cast %252 : vector<2x8x128xf32> to vector<16x128xf32>
    %c0_81 = arith.constant 0 : index
    %c0_82 = arith.constant 0 : index
    %c896_83 = arith.constant 896 : index
    %254 = vector.load %arg6[%c0_81, %c0_82, %c896_83] : memref<1x128x1536xbf16, #tpu.memory_space<vmem>>, vector<1x128x128xbf16>
    %255 = vector.shape_cast %254 : vector<1x128x128xbf16> to vector<128x128xbf16>
    %256 = arith.truncf %253 : vector<16x128xf32> to vector<16x128xbf16>
    %cst_84 = arith.constant dense<0.000000e+00> : vector<16x128xf32>
    %257 = tpu.matmul %256, %255, %cst_84 {dimension_numbers = #tpu.dot_dimension_numbers<[1], [0], [0], [1], [0, 0, 1, 1], [], []>} : vector<16x128xbf16>, vector<128x128xbf16>, vector<16x128xf32> -> vector<16x128xf32>
    %c0_85 = arith.constant 0 : index
    %c0_86 = arith.constant 0 : index
    %c1152 = arith.constant 1152 : index
    %258 = vector.load %arg8[%c0_85, %c0_86, %c1152] : memref<1x1x2432xf32, #tpu.memory_space<vmem>>, vector<1x1x128xf32>
    %259 = vector.shape_cast %258 : vector<1x1x128xf32> to vector<1x128xf32>
    %260 = vector.broadcast %259 : vector<1x128xf32> to vector<16x128xf32>
    %261 = arith.addf %257, %260 : vector<16x128xf32>
    %262 = arith.addf %140, %261 : vector<16x128xf32>
    %c0_87 = arith.constant 0 : index
    %c0_88 = arith.constant 0 : index
    %c1280 = arith.constant 1280 : index
    %263 = vector.load %arg8[%c0_87, %c0_88, %c1280] : memref<1x1x2432xf32, #tpu.memory_space<vmem>>, vector<1x1x128xf32>
    %264 = vector.shape_cast %263 : vector<1x1x128xf32> to vector<1x128xf32>
    %c0_89 = arith.constant 0 : index
    %c0_90 = arith.constant 0 : index
    %c1408 = arith.constant 1408 : index
    %265 = vector.load %arg8[%c0_89, %c0_90, %c1408] : memref<1x1x2432xf32, #tpu.memory_space<vmem>>, vector<1x1x128xf32>
    %266 = vector.shape_cast %265 : vector<1x1x128xf32> to vector<1x128xf32>
    %cst_91 = arith.constant dense<0.000000e+00> : vector<16xf32>
    %267 = vector.multi_reduction <add>, %262, %cst_91 [1] : vector<16x128xf32> to vector<16xf32>
    %268 = vector.shape_cast %267 : vector<16xf32> to vector<16x1xf32>
    %cst_92 = arith.constant 1.280000e+02 : f32
    %269 = vector.broadcast %cst_92 : f32 to vector<16x1xf32>
    %270 = arith.divf %268, %269 : vector<16x1xf32>
    %271 = vector.broadcast %270 : vector<16x1xf32> to vector<16x128xf32>
    %272 = arith.subf %262, %271 : vector<16x128xf32>
    %273 = arith.mulf %272, %272 : vector<16x128xf32>
    %cst_93 = arith.constant dense<0.000000e+00> : vector<16xf32>
    %274 = vector.multi_reduction <add>, %273, %cst_93 [1] : vector<16x128xf32> to vector<16xf32>
    %275 = vector.shape_cast %274 : vector<16xf32> to vector<16x1xf32>
    %cst_94 = arith.constant 1.280000e+02 : f32
    %276 = vector.broadcast %cst_94 : f32 to vector<16x1xf32>
    %277 = arith.divf %275, %276 : vector<16x1xf32>
    %278 = vector.broadcast %270 : vector<16x1xf32> to vector<16x128xf32>
    %279 = arith.subf %262, %278 : vector<16x128xf32>
    %cst_95 = arith.constant 9.99999996E-13 : f32
    %280 = vector.broadcast %cst_95 : f32 to vector<16x1xf32>
    %281 = arith.addf %277, %280 : vector<16x1xf32>
    %282 = math.rsqrt %281 : vector<16x1xf32>
    %283 = vector.broadcast %282 : vector<16x1xf32> to vector<16x128xf32>
    %284 = arith.mulf %279, %283 : vector<16x128xf32>
    %285 = vector.broadcast %264 : vector<1x128xf32> to vector<16x128xf32>
    %286 = arith.mulf %284, %285 : vector<16x128xf32>
    %287 = vector.broadcast %266 : vector<1x128xf32> to vector<16x128xf32>
    %288 = arith.addf %286, %287 : vector<16x128xf32>
    %c0_96 = arith.constant 0 : index
    %c0_97 = arith.constant 0 : index
    %c1024 = arith.constant 1024 : index
    %289 = vector.load %arg6[%c0_96, %c0_97, %c1024] : memref<1x128x1536xbf16, #tpu.memory_space<vmem>>, vector<1x128x512xbf16>
    %290 = vector.shape_cast %289 : vector<1x128x512xbf16> to vector<128x512xbf16>
    %291 = arith.truncf %288 : vector<16x128xf32> to vector<16x128xbf16>
    %cst_98 = arith.constant dense<0.000000e+00> : vector<16x512xf32>
    %292 = tpu.matmul %291, %290, %cst_98 {dimension_numbers = #tpu.dot_dimension_numbers<[1], [0], [0], [1], [0, 0, 1, 1], [], []>} : vector<16x128xbf16>, vector<128x512xbf16>, vector<16x512xf32> -> vector<16x512xf32>
    %c0_99 = arith.constant 0 : index
    %c0_100 = arith.constant 0 : index
    %c1536 = arith.constant 1536 : index
    %293 = vector.load %arg8[%c0_99, %c0_100, %c1536] : memref<1x1x2432xf32, #tpu.memory_space<vmem>>, vector<1x1x512xf32>
    %294 = vector.shape_cast %293 : vector<1x1x512xf32> to vector<1x512xf32>
    %295 = vector.broadcast %294 : vector<1x512xf32> to vector<16x512xf32>
    %296 = arith.addf %292, %295 : vector<16x512xf32>
    %297 = arith.mulf %296, %296 : vector<16x512xf32>
    %298 = arith.mulf %296, %297 : vector<16x512xf32>
    %cst_101 = arith.constant 4.471500e-02 : f32
    %299 = vector.broadcast %cst_101 : f32 to vector<16x512xf32>
    %300 = arith.mulf %299, %298 : vector<16x512xf32>
    %301 = arith.addf %296, %300 : vector<16x512xf32>
    %cst_102 = arith.constant 0.797884583 : f32
    %302 = vector.broadcast %cst_102 : f32 to vector<16x512xf32>
    %303 = arith.mulf %302, %301 : vector<16x512xf32>
    %304 = math.tanh %303 : vector<16x512xf32>
    %cst_103 = arith.constant 1.000000e+00 : f32
    %305 = vector.broadcast %cst_103 : f32 to vector<16x512xf32>
    %306 = arith.addf %305, %304 : vector<16x512xf32>
    %cst_104 = arith.constant 5.000000e-01 : f32
    %307 = vector.broadcast %cst_104 : f32 to vector<16x512xf32>
    %308 = arith.mulf %307, %306 : vector<16x512xf32>
    %309 = arith.mulf %296, %308 : vector<16x512xf32>
    %c0_105 = arith.constant 0 : index
    %c0_106 = arith.constant 0 : index
    %c0_107 = arith.constant 0 : index
    %310 = vector.load %arg7[%c0_105, %c0_106, %c0_107] : memref<1x512x128xbf16, #tpu.memory_space<vmem>>, vector<1x512x128xbf16>
    %311 = vector.shape_cast %310 : vector<1x512x128xbf16> to vector<512x128xbf16>
    %312 = arith.truncf %309 : vector<16x512xf32> to vector<16x512xbf16>
    %cst_108 = arith.constant dense<0.000000e+00> : vector<16x128xf32>
    %313 = tpu.matmul %312, %311, %cst_108 {dimension_numbers = #tpu.dot_dimension_numbers<[1], [0], [0], [1], [0, 0, 1, 1], [], []>} : vector<16x512xbf16>, vector<512x128xbf16>, vector<16x128xf32> -> vector<16x128xf32>
    %c0_109 = arith.constant 0 : index
    %c0_110 = arith.constant 0 : index
    %c2048 = arith.constant 2048 : index
    %314 = vector.load %arg8[%c0_109, %c0_110, %c2048] : memref<1x1x2432xf32, #tpu.memory_space<vmem>>, vector<1x1x128xf32>
    %315 = vector.shape_cast %314 : vector<1x1x128xf32> to vector<1x128xf32>
    %316 = vector.broadcast %315 : vector<1x128xf32> to vector<16x128xf32>
    %317 = arith.addf %313, %316 : vector<16x128xf32>
    %318 = arith.addf %288, %317 : vector<16x128xf32>
    %c0_111 = arith.constant 0 : index
    %c0_112 = arith.constant 0 : index
    %c2176 = arith.constant 2176 : index
    %319 = vector.load %arg8[%c0_111, %c0_112, %c2176] : memref<1x1x2432xf32, #tpu.memory_space<vmem>>, vector<1x1x128xf32>
    %320 = vector.shape_cast %319 : vector<1x1x128xf32> to vector<1x128xf32>
    %c0_113 = arith.constant 0 : index
    %c0_114 = arith.constant 0 : index
    %c2304 = arith.constant 2304 : index
    %321 = vector.load %arg8[%c0_113, %c0_114, %c2304] : memref<1x1x2432xf32, #tpu.memory_space<vmem>>, vector<1x1x128xf32>
    %322 = vector.shape_cast %321 : vector<1x1x128xf32> to vector<1x128xf32>
    %cst_115 = arith.constant dense<0.000000e+00> : vector<16xf32>
    %323 = vector.multi_reduction <add>, %318, %cst_115 [1] : vector<16x128xf32> to vector<16xf32>
    %324 = vector.shape_cast %323 : vector<16xf32> to vector<16x1xf32>
    %cst_116 = arith.constant 1.280000e+02 : f32
    %325 = vector.broadcast %cst_116 : f32 to vector<16x1xf32>
    %326 = arith.divf %324, %325 : vector<16x1xf32>
    %327 = vector.broadcast %326 : vector<16x1xf32> to vector<16x128xf32>
    %328 = arith.subf %318, %327 : vector<16x128xf32>
    %329 = arith.mulf %328, %328 : vector<16x128xf32>
    %cst_117 = arith.constant dense<0.000000e+00> : vector<16xf32>
    %330 = vector.multi_reduction <add>, %329, %cst_117 [1] : vector<16x128xf32> to vector<16xf32>
    %331 = vector.shape_cast %330 : vector<16xf32> to vector<16x1xf32>
    %cst_118 = arith.constant 1.280000e+02 : f32
    %332 = vector.broadcast %cst_118 : f32 to vector<16x1xf32>
    %333 = arith.divf %331, %332 : vector<16x1xf32>
    %334 = vector.broadcast %326 : vector<16x1xf32> to vector<16x128xf32>
    %335 = arith.subf %318, %334 : vector<16x128xf32>
    %cst_119 = arith.constant 9.99999996E-13 : f32
    %336 = vector.broadcast %cst_119 : f32 to vector<16x1xf32>
    %337 = arith.addf %333, %336 : vector<16x1xf32>
    %338 = math.rsqrt %337 : vector<16x1xf32>
    %339 = vector.broadcast %338 : vector<16x1xf32> to vector<16x128xf32>
    %340 = arith.mulf %335, %339 : vector<16x128xf32>
    %341 = vector.broadcast %320 : vector<1x128xf32> to vector<16x128xf32>
    %342 = arith.mulf %340, %341 : vector<16x128xf32>
    %343 = vector.broadcast %322 : vector<1x128xf32> to vector<16x128xf32>
    %344 = arith.addf %342, %343 : vector<16x128xf32>
    %c0_120 = arith.constant 0 : index
    %c0_121 = arith.constant 0 : index
    %345 = vector.load %arg10[%c0_120, %c0_121] : memref<16x128xf32, #tpu.memory_space<vmem>>, vector<16x128xf32>
    tpu.vector_store %arg10[%c0_120, %c0_121], %344 {strides = array<i32>} : memref<16x128xf32, #tpu.memory_space<vmem>>, vector<16x128xf32>,
    %346 = vector.shape_cast %344 : vector<16x128xf32> to vector<1x16x128xf32>
    %c0_122 = arith.constant 0 : index
    %c0_123 = arith.constant 0 : index
    %c0_124 = arith.constant 0 : index
    %347 = vector.load %arg9[%c0_122, %c0_123, %c0_124] : memref<1x16x128xf32, #tpu.memory_space<vmem>>, vector<1x16x128xf32>
    tpu.vector_store %arg9[%c0_122, %c0_123, %c0_124], %346 {strides = array<i32>} : memref<1x16x128xf32, #tpu.memory_space<vmem>>, vector<1x16x128xf32>,
    return
  }
  func.func @transform_0(%arg0: i32) -> (i32, i32) {
    %c0_i32 = arith.constant 0 : i32
    %c0_i32_0 = arith.constant 0 : i32
    %c0_i32_1 = arith.constant 0 : i32
    return %c0_i32, %c0_i32_0 : i32, i32
  }
  func.func @transform_1(%arg0: i32) -> (i32, i32) {
    %c0_i32 = arith.constant 0 : i32
    %c0_i32_0 = arith.constant 0 : i32
    %c0_i32_1 = arith.constant 0 : i32
    return %c0_i32, %c0_i32_0 : i32, i32
  }
  func.func @transform_2(%arg0: i32) -> (i32, i32) {
    %c0_i32 = arith.constant 0 : i32
    %c0_i32_0 = arith.constant 0 : i32
    %c0_i32_1 = arith.constant 0 : i32
    return %c0_i32, %c0_i32_0 : i32, i32
  }
  func.func @transform_3(%arg0: i32) -> (i32, i32) {
    %c0_i32 = arith.constant 0 : i32
    %c0_i32_0 = arith.constant 0 : i32
    %c0_i32_1 = arith.constant 0 : i32
    return %c0_i32, %c0_i32_0 : i32, i32
  }
  func.func @transform_4(%arg0: i32) -> (i32, i32) {
    %c0_i32 = arith.constant 0 : i32
    %c0_i32_0 = arith.constant 0 : i32
    %c0_i32_1 = arith.constant 0 : i32
    return %c0_i32, %c0_i32_0 : i32, i32
  }
  func.func @transform_5(%arg0: i32) -> (i32, i32, i32) {
    %c0_i32 = arith.constant 0 : i32
    %c0_i32_0 = arith.constant 0 : i32
    %c0_i32_1 = arith.constant 0 : i32
    return %arg0, %c0_i32, %c0_i32_0 : i32, i32, i32
  }
  func.func @transform_6(%arg0: i32) -> (i32, i32, i32) {
    %c0_i32 = arith.constant 0 : i32
    %c0_i32_0 = arith.constant 0 : i32
    %c0_i32_1 = arith.constant 0 : i32
    return %arg0, %c0_i32, %c0_i32_0 : i32, i32, i32
  }
  func.func @transform_7(%arg0: i32) -> (i32, i32, i32) {
    %c0_i32 = arith.constant 0 : i32
    %c0_i32_0 = arith.constant 0 : i32
    %c0_i32_1 = arith.constant 0 : i32
    return %arg0, %c0_i32, %c0_i32_0 : i32, i32, i32
  }
  func.func @transform_8(%arg0: i32) -> (i32, i32, i32) {
    %c0_i32 = arith.constant 0 : i32
    %c0_i32_0 = arith.constant 0 : i32
    %c0_i32_1 = arith.constant 0 : i32
    return %arg0, %c0_i32, %c0_i32_0 : i32, i32, i32
  }
}

module attributes {stable_mosaic.version = 11 : i64} {
  func.func @_tail_kernel(%arg0: memref<2x128xf32, #tpu.memory_space<vmem>>, %arg1: memref<2x128xf32, #tpu.memory_space<vmem>>, %arg2: memref<2x128xf32, #tpu.memory_space<vmem>>, %arg3: memref<128x32xf32, #tpu.memory_space<vmem>>, %arg4: memref<1x32xf32, #tpu.memory_space<vmem>>, %arg5: memref<128x32xf32, #tpu.memory_space<vmem>>, %arg6: memref<1x32xf32, #tpu.memory_space<vmem>>, %arg7: memref<128x32xf32, #tpu.memory_space<vmem>>, %arg8: memref<1x32xf32, #tpu.memory_space<vmem>>, %arg9: memref<128x32xf32, #tpu.memory_space<vmem>>, %arg10: memref<1x32xf32, #tpu.memory_space<vmem>>, %arg11: memref<128x128xf32, #tpu.memory_space<vmem>>, %arg12: memref<1x128xf32, #tpu.memory_space<vmem>>, %arg13: memref<128x2xf32, #tpu.memory_space<vmem>>, %arg14: memref<1x2xf32, #tpu.memory_space<vmem>>, %arg15: memref<128x128xf32, #tpu.memory_space<vmem>>, %arg16: memref<1x128xf32, #tpu.memory_space<vmem>>, %arg17: memref<128x2xf32, #tpu.memory_space<vmem>>, %arg18: memref<1x2xf32, #tpu.memory_space<vmem>>, %arg19: memref<2x2xf32, #tpu.memory_space<vmem>>, %arg20: memref<2x2xf32, #tpu.memory_space<vmem>>, %arg21: memref<2x2xf32, #tpu.memory_space<vmem>>, %arg22: memref<2x2xf32, #tpu.memory_space<vmem>>, %arg23: memref<1x1xf32, #tpu.memory_space<vmem>>, %arg24: memref<1x1xf32, #tpu.memory_space<vmem>>) attributes {dimension_semantics = [], scalar_prefetch = 0 : i64, scratch_operands = 0 : i64, tpu.core_type = #tpu.core_type<tc>} {
    %c0 = arith.constant 0 : index
    %c0_0 = arith.constant 0 : index
    %0 = vector.load %arg0[%c0, %c0_0] : memref<2x128xf32, #tpu.memory_space<vmem>>, vector<2x128xf32>
    %c0_1 = arith.constant 0 : index
    %c0_2 = arith.constant 0 : index
    %1 = vector.load %arg1[%c0_1, %c0_2] : memref<2x128xf32, #tpu.memory_space<vmem>>, vector<2x128xf32>
    %c0_3 = arith.constant 0 : index
    %c0_4 = arith.constant 0 : index
    %2 = vector.load %arg2[%c0_3, %c0_4] : memref<2x128xf32, #tpu.memory_space<vmem>>, vector<2x128xf32>
    %3 = vector.extract_strided_slice %0 {offsets = [0, 0], sizes = [1, 128], strides = [1, 1]} : vector<2x128xf32> to vector<1x128xf32>
    %c0_5 = arith.constant 0 : index
    %c0_6 = arith.constant 0 : index
    %4 = vector.load %arg3[%c0_5, %c0_6] : memref<128x32xf32, #tpu.memory_space<vmem>>, vector<128x32xf32>
    %cst = arith.constant dense<0.000000e+00> : vector<1x32xf32>
    %5 = tpu.matmul %3, %4, %cst {dimension_numbers = #tpu.dot_dimension_numbers<[1], [0], [0], [1], [0, 0, 1, 1], [], []>} : vector<1x128xf32>, vector<128x32xf32>, vector<1x32xf32> -> vector<1x32xf32>
    %c0_7 = arith.constant 0 : index
    %c0_8 = arith.constant 0 : index
    %6 = vector.load %arg4[%c0_7, %c0_8] : memref<1x32xf32, #tpu.memory_space<vmem>>, vector<1x32xf32>
    %7 = arith.addf %5, %6 : vector<1x32xf32>
    %8 = vector.extract_strided_slice %1 {offsets = [0, 0], sizes = [1, 128], strides = [1, 1]} : vector<2x128xf32> to vector<1x128xf32>
    %c0_9 = arith.constant 0 : index
    %c0_10 = arith.constant 0 : index
    %9 = vector.load %arg5[%c0_9, %c0_10] : memref<128x32xf32, #tpu.memory_space<vmem>>, vector<128x32xf32>
    %cst_11 = arith.constant dense<0.000000e+00> : vector<1x32xf32>
    %10 = tpu.matmul %8, %9, %cst_11 {dimension_numbers = #tpu.dot_dimension_numbers<[1], [0], [0], [1], [0, 0, 1, 1], [], []>} : vector<1x128xf32>, vector<128x32xf32>, vector<1x32xf32> -> vector<1x32xf32>
    %c0_12 = arith.constant 0 : index
    %c0_13 = arith.constant 0 : index
    %11 = vector.load %arg6[%c0_12, %c0_13] : memref<1x32xf32, #tpu.memory_space<vmem>>, vector<1x32xf32>
    %12 = arith.addf %10, %11 : vector<1x32xf32>
    %13 = arith.negf %12 : vector<1x32xf32>
    %14 = math.exp %13 : vector<1x32xf32>
    %cst_14 = arith.constant 1.000000e+00 : f32
    %15 = vector.broadcast %cst_14 : f32 to vector<1x32xf32>
    %16 = arith.addf %15, %14 : vector<1x32xf32>
    %17 = arith.divf %15, %16 : vector<1x32xf32>
    %cst_15 = arith.constant 0.000000e+00 : f32
    %18 = vector.broadcast %cst_15 : f32 to vector<1x32xf32>
    %19 = arith.maximumf %7, %18 : vector<1x32xf32>
    %20 = arith.mulf %7, %17 : vector<1x32xf32>
    %21 = arith.subf %19, %20 : vector<1x32xf32>
    %22 = math.absf %7 : vector<1x32xf32>
    %cst_16 = arith.constant 0.000000e+00 : f32
    %23 = vector.broadcast %cst_16 : f32 to vector<1x32xf32>
    %24 = arith.subf %23, %22 : vector<1x32xf32>
    %25 = math.exp %24 : vector<1x32xf32>
    %26 = math.log1p %25 : vector<1x32xf32>
    %27 = arith.addf %21, %26 : vector<1x32xf32>
    %cst_17 = arith.constant dense<0.000000e+00> : vector<1xf32>
    %28 = vector.multi_reduction <add>, %27, %cst_17 [1] : vector<1x32xf32> to vector<1xf32>
    %29 = vector.shape_cast %28 : vector<1xf32> to vector<1x1xf32>
    %cst_18 = arith.constant dense<0.000000e+00> : vector<1xf32>
    %30 = vector.multi_reduction <add>, %29, %cst_18 [0] : vector<1x1xf32> to vector<1xf32>
    %31 = vector.shape_cast %30 : vector<1xf32> to vector<1x1xf32>
    %cst_19 = arith.constant 3.200000e+01 : f32
    %32 = vector.broadcast %cst_19 : f32 to vector<1x1xf32>
    %33 = arith.divf %31, %32 : vector<1x1xf32>
    %cst_20 = arith.constant 3.200000e+01 : f32
    %34 = vector.broadcast %cst_20 : f32 to vector<1x1xf32>
    %35 = arith.mulf %33, %34 : vector<1x1xf32>
    %c0_21 = arith.constant 0 : index
    %c0_22 = arith.constant 0 : index
    %36 = vector.load %arg23[%c0_21, %c0_22] : memref<1x1xf32, #tpu.memory_space<vmem>>, vector<1x1xf32>
    tpu.vector_store %arg23[%c0_21, %c0_22], %35 {strides = array<i32>} : memref<1x1xf32, #tpu.memory_space<vmem>>, vector<1x1xf32>,
    %37 = vector.extract_strided_slice %0 {offsets = [1, 0], sizes = [1, 128], strides = [1, 1]} : vector<2x128xf32> to vector<1x128xf32>
    %c0_23 = arith.constant 0 : index
    %c0_24 = arith.constant 0 : index
    %38 = vector.load %arg7[%c0_23, %c0_24] : memref<128x32xf32, #tpu.memory_space<vmem>>, vector<128x32xf32>
    %cst_25 = arith.constant dense<0.000000e+00> : vector<1x32xf32>
    %39 = tpu.matmul %37, %38, %cst_25 {dimension_numbers = #tpu.dot_dimension_numbers<[1], [0], [0], [1], [0, 0, 1, 1], [], []>} : vector<1x128xf32>, vector<128x32xf32>, vector<1x32xf32> -> vector<1x32xf32>
    %c0_26 = arith.constant 0 : index
    %c0_27 = arith.constant 0 : index
    %40 = vector.load %arg8[%c0_26, %c0_27] : memref<1x32xf32, #tpu.memory_space<vmem>>, vector<1x32xf32>
    %41 = arith.addf %39, %40 : vector<1x32xf32>
    %42 = vector.extract_strided_slice %1 {offsets = [1, 0], sizes = [1, 128], strides = [1, 1]} : vector<2x128xf32> to vector<1x128xf32>
    %c0_28 = arith.constant 0 : index
    %c0_29 = arith.constant 0 : index
    %43 = vector.load %arg9[%c0_28, %c0_29] : memref<128x32xf32, #tpu.memory_space<vmem>>, vector<128x32xf32>
    %cst_30 = arith.constant dense<0.000000e+00> : vector<1x32xf32>
    %44 = tpu.matmul %42, %43, %cst_30 {dimension_numbers = #tpu.dot_dimension_numbers<[1], [0], [0], [1], [0, 0, 1, 1], [], []>} : vector<1x128xf32>, vector<128x32xf32>, vector<1x32xf32> -> vector<1x32xf32>
    %c0_31 = arith.constant 0 : index
    %c0_32 = arith.constant 0 : index
    %45 = vector.load %arg10[%c0_31, %c0_32] : memref<1x32xf32, #tpu.memory_space<vmem>>, vector<1x32xf32>
    %46 = arith.addf %44, %45 : vector<1x32xf32>
    %47 = arith.negf %46 : vector<1x32xf32>
    %48 = math.exp %47 : vector<1x32xf32>
    %cst_33 = arith.constant 1.000000e+00 : f32
    %49 = vector.broadcast %cst_33 : f32 to vector<1x32xf32>
    %50 = arith.addf %49, %48 : vector<1x32xf32>
    %51 = arith.divf %49, %50 : vector<1x32xf32>
    %cst_34 = arith.constant 0.000000e+00 : f32
    %52 = vector.broadcast %cst_34 : f32 to vector<1x32xf32>
    %53 = arith.maximumf %41, %52 : vector<1x32xf32>
    %54 = arith.mulf %41, %51 : vector<1x32xf32>
    %55 = arith.subf %53, %54 : vector<1x32xf32>
    %56 = math.absf %41 : vector<1x32xf32>
    %cst_35 = arith.constant 0.000000e+00 : f32
    %57 = vector.broadcast %cst_35 : f32 to vector<1x32xf32>
    %58 = arith.subf %57, %56 : vector<1x32xf32>
    %59 = math.exp %58 : vector<1x32xf32>
    %60 = math.log1p %59 : vector<1x32xf32>
    %61 = arith.addf %55, %60 : vector<1x32xf32>
    %cst_36 = arith.constant dense<0.000000e+00> : vector<1xf32>
    %62 = vector.multi_reduction <add>, %61, %cst_36 [1] : vector<1x32xf32> to vector<1xf32>
    %63 = vector.shape_cast %62 : vector<1xf32> to vector<1x1xf32>
    %cst_37 = arith.constant dense<0.000000e+00> : vector<1xf32>
    %64 = vector.multi_reduction <add>, %63, %cst_37 [0] : vector<1x1xf32> to vector<1xf32>
    %65 = vector.shape_cast %64 : vector<1xf32> to vector<1x1xf32>
    %cst_38 = arith.constant 3.200000e+01 : f32
    %66 = vector.broadcast %cst_38 : f32 to vector<1x1xf32>
    %67 = arith.divf %65, %66 : vector<1x1xf32>
    %cst_39 = arith.constant 3.200000e+01 : f32
    %68 = vector.broadcast %cst_39 : f32 to vector<1x1xf32>
    %69 = arith.mulf %67, %68 : vector<1x1xf32>
    %c0_40 = arith.constant 0 : index
    %c0_41 = arith.constant 0 : index
    %70 = vector.load %arg24[%c0_40, %c0_41] : memref<1x1xf32, #tpu.memory_space<vmem>>, vector<1x1xf32>
    tpu.vector_store %arg24[%c0_40, %c0_41], %69 {strides = array<i32>} : memref<1x1xf32, #tpu.memory_space<vmem>>, vector<1x1xf32>,
    %c0_42 = arith.constant 0 : index
    %c0_43 = arith.constant 0 : index
    %71 = vector.load %arg11[%c0_42, %c0_43] : memref<128x128xf32, #tpu.memory_space<vmem>>, vector<128x128xf32>
    %cst_44 = arith.constant dense<0.000000e+00> : vector<2x128xf32>
    %72 = tpu.matmul %2, %71, %cst_44 {dimension_numbers = #tpu.dot_dimension_numbers<[1], [0], [0], [1], [0, 0, 1, 1], [], []>} : vector<2x128xf32>, vector<128x128xf32>, vector<2x128xf32> -> vector<2x128xf32>
    %c0_45 = arith.constant 0 : index
    %c0_46 = arith.constant 0 : index
    %73 = vector.load %arg12[%c0_45, %c0_46] : memref<1x128xf32, #tpu.memory_space<vmem>>, vector<1x128xf32>
    %74 = vector.broadcast %73 : vector<1x128xf32> to vector<2x128xf32>
    %75 = arith.addf %72, %74 : vector<2x128xf32>
    %cst_47 = arith.constant 0.000000e+00 : f32
    %76 = vector.broadcast %cst_47 : f32 to vector<2x128xf32>
    %77 = arith.maximumf %75, %76 : vector<2x128xf32>
    %c0_48 = arith.constant 0 : index
    %c0_49 = arith.constant 0 : index
    %78 = vector.load %arg13[%c0_48, %c0_49] : memref<128x2xf32, #tpu.memory_space<vmem>>, vector<128x2xf32>
    %cst_50 = arith.constant dense<0.000000e+00> : vector<2x2xf32>
    %79 = tpu.matmul %77, %78, %cst_50 {dimension_numbers = #tpu.dot_dimension_numbers<[1], [0], [0], [1], [0, 0, 1, 1], [], []>} : vector<2x128xf32>, vector<128x2xf32>, vector<2x2xf32> -> vector<2x2xf32>
    %c0_51 = arith.constant 0 : index
    %c0_52 = arith.constant 0 : index
    %80 = vector.load %arg14[%c0_51, %c0_52] : memref<1x2xf32, #tpu.memory_space<vmem>>, vector<1x2xf32>
    %81 = vector.broadcast %80 : vector<1x2xf32> to vector<2x2xf32>
    %82 = arith.addf %79, %81 : vector<2x2xf32>
    %c0_53 = arith.constant 0 : index
    %c0_54 = arith.constant 0 : index
    %83 = vector.load %arg15[%c0_53, %c0_54] : memref<128x128xf32, #tpu.memory_space<vmem>>, vector<128x128xf32>
    %cst_55 = arith.constant dense<0.000000e+00> : vector<2x128xf32>
    %84 = tpu.matmul %2, %83, %cst_55 {dimension_numbers = #tpu.dot_dimension_numbers<[1], [0], [0], [1], [0, 0, 1, 1], [], []>} : vector<2x128xf32>, vector<128x128xf32>, vector<2x128xf32> -> vector<2x128xf32>
    %c0_56 = arith.constant 0 : index
    %c0_57 = arith.constant 0 : index
    %85 = vector.load %arg16[%c0_56, %c0_57] : memref<1x128xf32, #tpu.memory_space<vmem>>, vector<1x128xf32>
    %86 = vector.broadcast %85 : vector<1x128xf32> to vector<2x128xf32>
    %87 = arith.addf %84, %86 : vector<2x128xf32>
    %cst_58 = arith.constant 0.000000e+00 : f32
    %88 = vector.broadcast %cst_58 : f32 to vector<2x128xf32>
    %89 = arith.maximumf %87, %88 : vector<2x128xf32>
    %c0_59 = arith.constant 0 : index
    %c0_60 = arith.constant 0 : index
    %90 = vector.load %arg17[%c0_59, %c0_60] : memref<128x2xf32, #tpu.memory_space<vmem>>, vector<128x2xf32>
    %cst_61 = arith.constant dense<0.000000e+00> : vector<2x2xf32>
    %91 = tpu.matmul %89, %90, %cst_61 {dimension_numbers = #tpu.dot_dimension_numbers<[1], [0], [0], [1], [0, 0, 1, 1], [], []>} : vector<2x128xf32>, vector<128x2xf32>, vector<2x2xf32> -> vector<2x2xf32>
    %c0_62 = arith.constant 0 : index
    %c0_63 = arith.constant 0 : index
    %92 = vector.load %arg18[%c0_62, %c0_63] : memref<1x2xf32, #tpu.memory_space<vmem>>, vector<1x2xf32>
    %93 = vector.broadcast %92 : vector<1x2xf32> to vector<2x2xf32>
    %94 = arith.addf %91, %93 : vector<2x2xf32>
    %c0_64 = arith.constant 0 : index
    %c0_65 = arith.constant 0 : index
    %95 = vector.load %arg19[%c0_64, %c0_65] : memref<2x2xf32, #tpu.memory_space<vmem>>, vector<2x2xf32>
    tpu.vector_store %arg19[%c0_64, %c0_65], %82 {strides = array<i32>} : memref<2x2xf32, #tpu.memory_space<vmem>>, vector<2x2xf32>,
    %cst_66 = arith.constant dense<0xFF800000> : vector<2xf32>
    %96 = vector.multi_reduction <maximumf>, %82, %cst_66 [1] : vector<2x2xf32> to vector<2xf32>
    %97 = vector.shape_cast %96 : vector<2xf32> to vector<2x1xf32>
    %98 = vector.broadcast %97 : vector<2x1xf32> to vector<2x2xf32>
    %99 = arith.subf %82, %98 : vector<2x2xf32>
    %100 = math.exp %99 : vector<2x2xf32>
    %cst_67 = arith.constant dense<0.000000e+00> : vector<2xf32>
    %101 = vector.multi_reduction <add>, %100, %cst_67 [1] : vector<2x2xf32> to vector<2xf32>
    %102 = vector.shape_cast %101 : vector<2xf32> to vector<2x1xf32>
    %103 = vector.broadcast %102 : vector<2x1xf32> to vector<2x2xf32>
    %104 = arith.divf %100, %103 : vector<2x2xf32>
    %c0_68 = arith.constant 0 : index
    %c0_69 = arith.constant 0 : index
    %105 = vector.load %arg20[%c0_68, %c0_69] : memref<2x2xf32, #tpu.memory_space<vmem>>, vector<2x2xf32>
    tpu.vector_store %arg20[%c0_68, %c0_69], %104 {strides = array<i32>} : memref<2x2xf32, #tpu.memory_space<vmem>>, vector<2x2xf32>,
    %c0_70 = arith.constant 0 : index
    %c0_71 = arith.constant 0 : index
    %106 = vector.load %arg21[%c0_70, %c0_71] : memref<2x2xf32, #tpu.memory_space<vmem>>, vector<2x2xf32>
    tpu.vector_store %arg21[%c0_70, %c0_71], %94 {strides = array<i32>} : memref<2x2xf32, #tpu.memory_space<vmem>>, vector<2x2xf32>,
    %cst_72 = arith.constant dense<0xFF800000> : vector<2xf32>
    %107 = vector.multi_reduction <maximumf>, %94, %cst_72 [1] : vector<2x2xf32> to vector<2xf32>
    %108 = vector.shape_cast %107 : vector<2xf32> to vector<2x1xf32>
    %109 = vector.broadcast %108 : vector<2x1xf32> to vector<2x2xf32>
    %110 = arith.subf %94, %109 : vector<2x2xf32>
    %111 = math.exp %110 : vector<2x2xf32>
    %cst_73 = arith.constant dense<0.000000e+00> : vector<2xf32>
    %112 = vector.multi_reduction <add>, %111, %cst_73 [1] : vector<2x2xf32> to vector<2xf32>
    %113 = vector.shape_cast %112 : vector<2xf32> to vector<2x1xf32>
    %114 = vector.broadcast %113 : vector<2x1xf32> to vector<2x2xf32>
    %115 = arith.divf %111, %114 : vector<2x2xf32>
    %c0_74 = arith.constant 0 : index
    %c0_75 = arith.constant 0 : index
    %116 = vector.load %arg22[%c0_74, %c0_75] : memref<2x2xf32, #tpu.memory_space<vmem>>, vector<2x2xf32>
    tpu.vector_store %arg22[%c0_74, %c0_75], %115 {strides = array<i32>} : memref<2x2xf32, #tpu.memory_space<vmem>>, vector<2x2xf32>,
    return
  }
}

</mosaic_0001>

<bundles_post_ra>
// kernel: albef_forward.5
= control target key start
LH: loop header
LB: loop body
LE: loop exit
PB: predicated region body
PF: predicated region fallthrough
CT: control target
= control target key end

     0   :  { %s2495_s0 = inlined_call_operand.vmem [shape: f32[2,128], index: 0, kind: input, shape index: {}]   ;;  %s2496_s1 = inlined_call_operand.vmem [shape: f32[2,128], index: 1, kind: input, shape index: {}]   ;;  %s2497_s2 = inlined_call_operand.vmem [shape: f32[2,128], index: 2, kind: input, shape index: {}]   ;;  %s2498_s3 = inlined_call_operand.vmem [shape: f32[128,32], index: 3, kind: input, shape index: {}]   ;;  %s2499_s4 = inlined_call_operand.vmem [shape: f32[1,32], index: 4, kind: input, shape index: {}]   ;;  %s2500_s5 = inlined_call_operand.vmem [shape: f32[128,32], index: 5, kind: input, shape index: {}]   ;;  %s2501_s6 = inlined_call_operand.vmem [shape: f32[1,32], index: 6, kind: input, shape index: {}]   ;;  %s2502_s7 = inlined_call_operand.vmem [shape: f32[128,32], index: 7, kind: input, shape index: {}]   ;;  %s2503_s8 = inlined_call_operand.vmem [shape: f32[1,32], index: 8, kind: input, shape index: {}]   ;;  %s2504_s9 = inlined_call_operand.vmem [shape: f32[128,32], index: 9, kind: input, shape index: {}]   ;;  %s2505_s10 = inlined_call_operand.vmem [shape: f32[1,32], index: 10, kind: input, shape index: {}]   ;;  %s2506_s11 = inlined_call_operand.vmem [shape: f32[128,128], index: 11, kind: input, shape index: {}]   ;;  %s2507_s12 = inlined_call_operand.vmem [shape: f32[1,128], index: 12, kind: input, shape index: {}]   ;;  %s2508_s13 = inlined_call_operand.vmem [shape: f32[128,2], index: 13, kind: input, shape index: {}]   ;;  %s2509_s14 = inlined_call_operand.vmem [shape: f32[1,2], index: 14, kind: input, shape index: {}]   ;;  %s2510_s15 = inlined_call_operand.vmem [shape: f32[128,128], index: 15, kind: input, shape index: {}]   ;;  %s2511_s16 = inlined_call_operand.vmem [shape: f32[1,128], index: 16, kind: input, shape index: {}]   ;;  %s2512_s17 = inlined_call_operand.vmem [shape: f32[128,2], index: 17, kind: input, shape index: {}]   ;;  %s2513_s18 = inlined_call_operand.vmem [shape: f32[1,2], index: 18, kind: input, shape index: {}]   ;;  %s2514_s19 = inlined_call_operand.hbm [shape: f32[2,2], index: 19, kind: output, shape index: {0}]   ;;  %s2515_s20 = inlined_call_operand.hbm [shape: f32[2,2], index: 20, kind: output, shape index: {1}]   ;;  %s2516_s21 = inlined_call_operand.hbm [shape: f32[2,2], index: 21, kind: output, shape index: {2}]   ;;  %s2517_s22 = inlined_call_operand.hbm [shape: f32[2,2], index: 22, kind: output, shape index: {3}]   ;;  %s2518_s23 = inlined_call_operand.hbm [shape: f32[1,1], index: 23, kind: output, shape index: {4}]   ;;  %s2519_s24 = inlined_call_operand.hbm [shape: f32[1,1], index: 24, kind: output, shape index: {5}]  }
   0x1   :  { %2523 = sst [smem:[#allocation16_spill]] %s2495_s0 }
   0x2   :  { %2524 = sst [smem:[#allocation17_spill]] %s2496_s1 }
   0x3   :  { %2525 = sst [smem:[#allocation18_spill]] %s2497_s2 }
   0x4   :  { %2526 = sst [smem:[#allocation19_spill]] %s2498_s3 }
   0x5   :  { %2527 = sst [smem:[#allocation20_spill]] %s2499_s4 }
   0x6   :  { %2528 = sst [smem:[#allocation21_spill]] %s2500_s5 }
   0x7   :  { %2529 = sst [smem:[#allocation22_spill]] %s2501_s6 }
   0x8   :  { %2530 = sst [smem:[#allocation23_spill]] %s2502_s7 }
   0x9   :  { %2531 = sst [smem:[#allocation24_spill]] %s2503_s8 }
   0xa   :  { %30 = vsyncpa [#allocation3], 0 }
   0xb   :  { %31 = vsyncpa [#allocation5], 0 }
   0xc   :  { %32 = vsyncpa [#allocation8], 0  ;;  %s2532_s27 = sld [smem:[#allocation19_spill]]  ;;  %s2533_s0 = sld [smem:[#allocation21_spill]]  ;;  %v1762_v3 = vmov 0.0|0.0   ;;  %vm1763_vm0 = vmmov 0  }
   0xd   :  { %1397 = vmatprep.subr.bf16.mxu0 %v1762_v3  ;;  %1421 = vmatprep.subr.bf16.mxu1 %v1762_v3  ;;  %v1764_v11 = vmov 0.0   ;;  %s2534_s26 = sld [smem:[#allocation23_spill]]  ;;  %v372_v52 = vld [vmem:[%s2504_s9] sm:$0xff]  ;;  %v373_v53 = vld [vmem:[%s2504_s9 + $0x8] sm:$0xff]  ;;  %s2535_s3 = sld [smem:[#allocation16_spill]]  ;;  %v374_v60 = vld [vmem:[%s2504_s9 + $0x10] sm:$0xff] }
   0xe   :  { %1149 = vmatprep.mubr.msk.f32.mxu0 %vm1763_vm0, %v1764_v11  ;;  %1184 = vmatprep.mubr.msk.f32.mxu1 %vm1763_vm0, %v1764_v11  ;;  %s2536_s4 = sld [smem:[#allocation17_spill]]  ;;  %v1470_v57 = vpack.c.bf16 %v373_v53, %v372_v52  ;;  %v375_v61 = vld [vmem:[%s2504_s9 + $0x18] sm:$0xff] }
  0x12   :  { %v75_v0 = vld [vmem:[%s2532_s27] sm:$0xff]  ;;  %v76_v1 = vld [vmem:[%s2532_s27 + $0x8] sm:$0xff]  ;;  %v77_v6 = vld [vmem:[%s2532_s27 + $0x10] sm:$0xff] }
  0x13   :  { %v162_v2 = vld [vmem:[%s2533_s0] sm:$0xff]  ;;  %v1398_v4 = vpack.c.bf16 %v76_v1, %v75_v0  ;;  %v163_v5 = vld [vmem:[%s2533_s0 + $0x8] sm:$0xff]  ;;  %v78_v7 = vld [vmem:[%s2532_s27 + $0x18] sm:$0xff] }
  0x14   :  { %v1422_v8 = vpack.c.bf16 %v163_v5, %v162_v2  ;;  %v164_v9 = vld [vmem:[%s2533_s0 + $0x10] sm:$0xff]  ;;  %v165_v10 = vld [vmem:[%s2533_s0 + $0x18] sm:$0xff]  ;;  %v1401_v12 = vpack.c.bf16 %v78_v7, %v77_v6  ;;  %v79_v14 = vld [vmem:[%s2532_s27 + $0x20] sm:$0xff] }
  0x15   :  { %1399 = vmatpush3.bf16.msra.mxu0 %v1398_v4  ;;  %v1425_v13 = vpack.c.bf16 %v165_v10, %v164_v9  ;;  %v80_v15 = vld [vmem:[%s2532_s27 + $0x28] sm:$0xff]  ;;  %v166_v16 = vld [vmem:[%s2533_s0 + $0x20] sm:$0xff]  ;;  %v81_v20 = vld [vmem:[%s2532_s27 + $0x30] sm:$0xff] }
  0x16   :  { %1423 = vmatpush3.bf16.msra.mxu1 %v1422_v8  ;;  %1400 = vmatprep.subr.bf16.mxu0 %v1762_v3  ;;  %v167_v17 = vld [vmem:[%s2533_s0 + $0x28] sm:$0xff]  ;;  %v1404_v18 = vpack.c.bf16 %v80_v15, %v79_v14  ;;  %v82_v21 = vld [vmem:[%s2532_s27 + $0x38] sm:$0xff]  ;;  %v168_v22 = vld [vmem:[%s2533_s0 + $0x30] sm:$0xff] }
  0x17   :  { %1424 = vmatprep.subr.bf16.mxu1 %v1762_v3  ;;  %v1428_v19 = vpack.c.bf16 %v167_v17, %v166_v16  ;;  %v169_v23 = vld [vmem:[%s2533_s0 + $0x38] sm:$0xff]  ;;  %v1407_v24 = vpack.c.bf16 %v82_v21, %v81_v20  ;;  %v83_v26 = vld [vmem:[%s2532_s27 + $0x40] sm:$0xff]  ;;  %v84_v27 = vld [vmem:[%s2532_s27 + $0x48] sm:$0xff] }
  0x18   :  { %v1431_v25 = vpack.c.bf16 %v169_v23, %v168_v22  ;;  %v170_v28 = vld [vmem:[%s2533_s0 + $0x40] sm:$0xff]  ;;  %v171_v29 = vld [vmem:[%s2533_s0 + $0x48] sm:$0xff]  ;;  %v1410_v30 = vpack.c.bf16 %v84_v27, %v83_v26  ;;  %v85_v32 = vld [vmem:[%s2532_s27 + $0x50] sm:$0xff] }
  0x19   :  { %1402 = vmatpush3.bf16.msra.mxu0 %v1401_v12  ;;  %v1434_v31 = vpack.c.bf16 %v171_v29, %v170_v28  ;;  %v86_v33 = vld [vmem:[%s2532_s27 + $0x58] sm:$0xff]  ;;  %v172_v34 = vld [vmem:[%s2533_s0 + $0x50] sm:$0xff]  ;;  %v87_v38 = vld [vmem:[%s2532_s27 + $0x60] sm:$0xff] }
  0x1a   :  { %1426 = vmatpush3.bf16.msra.mxu1 %v1425_v13  ;;  %1403 = vmatprep.subr.bf16.mxu0 %v1762_v3  ;;  %v173_v35 = vld [vmem:[%s2533_s0 + $0x58] sm:$0xff]  ;;  %v1413_v36 = vpack.c.bf16 %v86_v33, %v85_v32  ;;  %v88_v39 = vld [vmem:[%s2532_s27 + $0x68] sm:$0xff]  ;;  %v174_v40 = vld [vmem:[%s2533_s0 + $0x60] sm:$0xff] }
  0x1b   :  { %1427 = vmatprep.subr.bf16.mxu1 %v1762_v3  ;;  %v1437_v37 = vpack.c.bf16 %v173_v35, %v172_v34  ;;  %v175_v41 = vld [vmem:[%s2533_s0 + $0x68] sm:$0xff]  ;;  %v1416_v42 = vpack.c.bf16 %v88_v39, %v87_v38  ;;  %v89_v44 = vld [vmem:[%s2532_s27 + $0x70] sm:$0xff]  ;;  %v90_v45 = vld [vmem:[%s2532_s27 + $0x78] sm:$0xff] }
  0x1c   :  { %v1440_v43 = vpack.c.bf16 %v175_v41, %v174_v40  ;;  %v176_v46 = vld [vmem:[%s2533_s0 + $0x70] sm:$0xff]  ;;  %v177_v47 = vld [vmem:[%s2533_s0 + $0x78] sm:$0xff]  ;;  %v1419_v48 = vpack.c.bf16 %v90_v45, %v89_v44  ;;  %v282_v50 = vld [vmem:[%s2534_s26] sm:$0xff] }
  0x1d   :  { %1405 = vmatpush3.bf16.msra.mxu0 %v1404_v18  ;;  %v1443_v49 = vpack.c.bf16 %v177_v47, %v176_v46  ;;  %v283_v51 = vld [vmem:[%s2534_s26 + $0x8] sm:$0xff]  ;;  %v2027_v54 = vld [vmem:[%s2535_s3] sm:$0x3]  ;;  %v284_v58 = vld [vmem:[%s2534_s26 + $0x10] sm:$0xff] }
  0x1e   :  { %1429 = vmatpush3.bf16.msra.mxu1 %v1428_v19  ;;  %1406 = vmatprep.subr.bf16.mxu0 %v1762_v3  ;;  %v1446_v55 = vpack.c.bf16 %v283_v51, %v282_v50  ;;  %v2032_v56 = vld [vmem:[%s2536_s4] sm:$0x3]  ;;  %v285_v59 = vld [vmem:[%s2534_s26 + $0x18] sm:$0xff] }
  0x1f   :  { %1430 = vmatprep.subr.bf16.mxu1 %v1762_v3 }
  0x21   :  { %1408 = vmatpush3.bf16.msra.mxu0 %v1407_v24 }
  0x22   :  { %1432 = vmatpush3.bf16.msra.mxu1 %v1431_v25  ;;  %1409 = vmatprep.subr.bf16.mxu0 %v1762_v3 }
  0x23   :  { %1433 = vmatprep.subr.bf16.mxu1 %v1762_v3 }
  0x25   :  { %1411 = vmatpush3.bf16.msra.mxu0 %v1410_v30 }
  0x26   :  { %1435 = vmatpush3.bf16.msra.mxu1 %v1434_v31  ;;  %1412 = vmatprep.subr.bf16.mxu0 %v1762_v3 }
  0x27   :  { %1436 = vmatprep.subr.bf16.mxu1 %v1762_v3 }
  0x29   :  { %1414 = vmatpush3.bf16.msra.mxu0 %v1413_v36 }
  0x2a   :  { %1438 = vmatpush3.bf16.msra.mxu1 %v1437_v37  ;;  %1415 = vmatprep.subr.bf16.mxu0 %v1762_v3 }
  0x2b   :  { %1439 = vmatprep.subr.bf16.mxu1 %v1762_v3 }
  0x2d   :  { %1417 = vmatpush3.bf16.msra.mxu0 %v1416_v42 }
  0x2e   :  { %1441 = vmatpush3.bf16.msra.mxu1 %v1440_v43  ;;  %1418 = vmatprep.subr.bf16.mxu0 %v1762_v3 }
  0x2f   :  { %1442 = vmatprep.subr.bf16.mxu1 %v1762_v3 }
  0x31   :  { %1420 = vmatpush3.bf16.msra.mxu0 %v1419_v48 }
  0x32   :  { %1444 = vmatpush3.bf16.msra.mxu1 %v1443_v49  ;;  %1445 = vmatprep.subr.bf16.mxu0 %v1762_v3 }
  0x33   :  { %1469 = vmatprep.subr.bf16.mxu1 %v1762_v3 }
  0x34   :  { %33 = vsyncpa [#allocation11], 0  ;;  %1150 = vmatmul.mubr.f32.vlgmr.msra.gmra.mrb[0].mxu0 %v2027_v54  ;;  %v1449_v62 = vpack.c.bf16 %v285_v59, %v284_v58  ;;  %v1473_v63 = vpack.c.bf16 %v375_v61, %v374_v60  ;;  %v286_v0 = vld [vmem:[%s2534_s26 + $0x20] sm:$0xff]  ;;  %v287_v1 = vld [vmem:[%s2534_s26 + $0x28] sm:$0xff]  ;;  %v300_v40 = vrot.slane %v2027_v54, 1  ;;  %v390_v41 = vrot.slane %v2032_v56, 1 }
  0x35   :  { %1185 = vmatmul.mubr.f32.vlgmr.msra.gmra.mrb[0].mxu1 %v2032_v56  ;;  %1447 = vmatpush3.bf16.msra.mxu0 %v1446_v55  ;;  %v376_v2 = vld [vmem:[%s2504_s9 + $0x20] sm:$0xff]  ;;  %v377_v4 = vld [vmem:[%s2504_s9 + $0x28] sm:$0xff]  ;;  %v1452_v5 = vpack.c.bf16 %v287_v1, %v286_v0  ;;  %v288_v7 = vld [vmem:[%s2534_s26 + $0x30] sm:$0xff]  ;;  %s2537_s6 = sld [smem:[#allocation18_spill]]  ;;  %s2538_s4 = sld [smem:[#allocation20_spill]]  ;;  %vm272_vm3 = vcmask 253952  }
  0x36   :  { %1471 = vmatpush3.bf16.msra.mxu1 %v1470_v57  ;;  %1448 = vmatprep.subr.bf16.mxu0 %v1762_v3  ;;  %v1476_v6 = vpack.c.bf16 %v377_v4, %v376_v2  ;;  %v289_v8 = vld [vmem:[%s2534_s26 + $0x38] sm:$0xff]  ;;  %v378_v9 = vld [vmem:[%s2504_s9 + $0x30] sm:$0xff]  ;;  %v290_v14 = vld [vmem:[%s2534_s26 + $0x40] sm:$0xff]  ;;  %vm866_vm4 = vcmask 9216   ;;  %vm280_vm5 = vcmask 0  }
  0x37   :  { %1472 = vmatprep.subr.bf16.mxu1 %v1762_v3  ;;  %1219 = vmatprep.mubr.msk.f32.mxu0 %vm1763_vm0, %v1764_v11  ;;  %v379_v10 = vld [vmem:[%s2504_s9 + $0x38] sm:$0xff]  ;;  %v1455_v12 = vpack.c.bf16 %v289_v8, %v288_v7  ;;  %v291_v15 = vld [vmem:[%s2534_s26 + $0x48] sm:$0xff]  ;;  %v380_v16 = vld [vmem:[%s2504_s9 + $0x40] sm:$0xff] }
  0x38   :  { %1254 = vmatprep.mubr.msk.f32.mxu1 %vm1763_vm0, %v1764_v11  ;;  %v1479_v13 = vpack.c.bf16 %v379_v10, %v378_v9  ;;  %v381_v17 = vld [vmem:[%s2504_s9 + $0x48] sm:$0xff]  ;;  %v1458_v18 = vpack.c.bf16 %v291_v15, %v290_v14  ;;  %v292_v20 = vld [vmem:[%s2534_s26 + $0x50] sm:$0xff]  ;;  %v293_v21 = vld [vmem:[%s2534_s26 + $0x58] sm:$0xff] }
  0x39   :  { %1450 = vmatpush3.bf16.msra.mxu0 %v1449_v62  ;;  %v1482_v19 = vpack.c.bf16 %v381_v17, %v380_v16  ;;  %v382_v22 = vld [vmem:[%s2504_s9 + $0x50] sm:$0xff]  ;;  %v383_v23 = vld [vmem:[%s2504_s9 + $0x58] sm:$0xff]  ;;  %v1461_v24 = vpack.c.bf16 %v293_v21, %v292_v20  ;;  %v294_v26 = vld [vmem:[%s2534_s26 + $0x60] sm:$0xff] }
  0x3a   :  { %1474 = vmatpush3.bf16.msra.mxu1 %v1473_v63  ;;  %1451 = vmatprep.subr.bf16.mxu0 %v1762_v3  ;;  %v1485_v25 = vpack.c.bf16 %v383_v23, %v382_v22  ;;  %v295_v27 = vld [vmem:[%s2534_s26 + $0x68] sm:$0xff]  ;;  %v384_v28 = vld [vmem:[%s2504_s9 + $0x60] sm:$0xff]  ;;  %v296_v32 = vld [vmem:[%s2534_s26 + $0x70] sm:$0xff] }
  0x3b   :  { %1475 = vmatprep.subr.bf16.mxu1 %v1762_v3  ;;  %v385_v29 = vld [vmem:[%s2504_s9 + $0x68] sm:$0xff]  ;;  %v1464_v30 = vpack.c.bf16 %v295_v27, %v294_v26  ;;  %v297_v33 = vld [vmem:[%s2534_s26 + $0x78] sm:$0xff]  ;;  %v386_v34 = vld [vmem:[%s2504_s9 + $0x70] sm:$0xff]  ;;  %s2539_s26 = sld [smem:[#allocation22_spill]] }
  0x3c   :  { %v1488_v31 = vpack.c.bf16 %v385_v29, %v384_v28  ;;  %v387_v35 = vld [vmem:[%s2504_s9 + $0x78] sm:$0xff]  ;;  %v1467_v36 = vpack.c.bf16 %v297_v33, %v296_v32  ;;  %v492_v38 = vld [vmem:[%s2506_s11] sm:$0xff]  ;;  %v493_v39 = vld [vmem:[%s2506_s11 + $0x8] sm:$0xff]  ;;  %s2540_s9 = sld [smem:[#allocation24_spill]] }
  0x3d   :  { %1453 = vmatpush3.bf16.msra.mxu0 %v1452_v5  ;;  %v1491_v37 = vpack.c.bf16 %v387_v35, %v386_v34  ;;  %v1494_v42 = vpack.c.bf16 %v493_v39, %v492_v38  ;;  %v494_v43 = vld [vmem:[%s2506_s11 + $0x10] sm:$0xff]  ;;  %v495_v44 = vld [vmem:[%s2506_s11 + $0x18] sm:$0xff]  ;;  %v496_v46 = vld [vmem:[%s2506_s11 + $0x20] sm:$0xff] }
  0x3e   :  { %1477 = vmatpush3.bf16.msra.mxu1 %v1476_v6  ;;  %1454 = vmatprep.subr.bf16.mxu0 %v1762_v3  ;;  %v1497_v45 = vpack.c.bf16 %v495_v44, %v494_v43  ;;  %v497_v47 = vld [vmem:[%s2506_s11 + $0x28] sm:$0xff]  ;;  %v498_v49 = vld [vmem:[%s2506_s11 + $0x30] sm:$0xff]  ;;  %v499_v50 = vld [vmem:[%s2506_s11 + $0x38] sm:$0xff] }
  0x3f   :  { %1478 = vmatprep.subr.bf16.mxu1 %v1762_v3  ;;  %v1500_v48 = vpack.c.bf16 %v497_v47, %v496_v46  ;;  %v1503_v51 = vpack.c.bf16 %v499_v50, %v498_v49  ;;  %v500_v52 = vld [vmem:[%s2506_s11 + $0x40] sm:$0xff]  ;;  %v501_v53 = vld [vmem:[%s2506_s11 + $0x48] sm:$0xff]  ;;  %v502_v55 = vld [vmem:[%s2506_s11 + $0x50] sm:$0xff] }
  0x40   :  { %v1506_v54 = vpack.c.bf16 %v501_v53, %v500_v52  ;;  %v503_v56 = vld [vmem:[%s2506_s11 + $0x58] sm:$0xff]  ;;  %v504_v58 = vld [vmem:[%s2506_s11 + $0x60] sm:$0xff]  ;;  %v505_v59 = vld [vmem:[%s2506_s11 + $0x68] sm:$0xff] }
  0x41   :  { %1456 = vmatpush3.bf16.msra.mxu0 %v1455_v12  ;;  %v1509_v57 = vpack.c.bf16 %v503_v56, %v502_v55  ;;  %v1512_v60 = vpack.c.bf16 %v505_v59, %v504_v58  ;;  %v506_v61 = vld [vmem:[%s2506_s11 + $0x70] sm:$0xff]  ;;  %v507_v62 = vld [vmem:[%s2506_s11 + $0x78] sm:$0xff]  ;;  %v679_v0 = vld [vmem:[%s2510_s15] sm:$0xff] }
  0x42   :  { %1480 = vmatpush3.bf16.msra.mxu1 %v1479_v13  ;;  %1457 = vmatprep.subr.bf16.mxu0 %v1762_v3  ;;  %v1515_v63 = vpack.c.bf16 %v507_v62, %v506_v61  ;;  %v680_v1 = vld [vmem:[%s2510_s15 + $0x8] sm:$0xff]  ;;  %v74_v2 = vld [vmem:[%s2537_s6] sm:$0x3]  ;;  %v681_v5 = vld [vmem:[%s2510_s15 + $0x10] sm:$0xff] }
  0x43   :  { %1481 = vmatprep.subr.bf16.mxu1 %v1762_v3  ;;  %v1542_v4 = vpack.c.bf16 %v680_v1, %v679_v0  ;;  %v682_v6 = vld [vmem:[%s2510_s15 + $0x18] sm:$0xff]  ;;  %v683_v8 = vld [vmem:[%s2510_s15 + $0x20] sm:$0xff]  ;;  %v684_v9 = vld [vmem:[%s2510_s15 + $0x28] sm:$0xff] }
  0x44   :  { %v1545_v7 = vpack.c.bf16 %v682_v6, %v681_v5  ;;  %v1548_v10 = vpack.c.bf16 %v684_v9, %v683_v8  ;;  %v685_v12 = vld [vmem:[%s2510_s15 + $0x30] sm:$0xff]  ;;  %v686_v13 = vld [vmem:[%s2510_s15 + $0x38] sm:$0xff]  ;;  %v687_v15 = vld [vmem:[%s2510_s15 + $0x40] sm:$0xff] }
  0x45   :  { %1459 = vmatpush3.bf16.msra.mxu0 %v1458_v18  ;;  %v1551_v14 = vpack.c.bf16 %v686_v13, %v685_v12  ;;  %v688_v16 = vld [vmem:[%s2510_s15 + $0x48] sm:$0xff]  ;;  %v689_v18 = vld [vmem:[%s2510_s15 + $0x50] sm:$0xff]  ;;  %v691_v21 = vld [vmem:[%s2510_s15 + $0x60] sm:$0xff] }
  0x46   :  { %1483 = vmatpush3.bf16.msra.mxu1 %v1482_v19  ;;  %1460 = vmatprep.subr.bf16.mxu0 %v1762_v3  ;;  %v1554_v17 = vpack.c.bf16 %v688_v16, %v687_v15  ;;  %v690_v19 = vld [vmem:[%s2510_s15 + $0x58] sm:$0xff]  ;;  %v692_v22 = vld [vmem:[%s2510_s15 + $0x68] sm:$0xff]  ;;  %v586_v27 = vld [vmem:[%s2508_s13] sm:$0xff] }
  0x47   :  { %1484 = vmatprep.subr.bf16.mxu1 %v1762_v3  ;;  %v1557_v20 = vpack.c.bf16 %v690_v19, %v689_v18  ;;  %v1560_v23 = vpack.c.bf16 %v692_v22, %v691_v21  ;;  %v587_v28 = vld [vmem:[%s2508_s13 + $0x8] sm:$0xff]  ;;  %v590_v33 = vld [vmem:[%s2508_s13 + $0x20] sm:$0xff]  ;;  %v597_v43 = vld [vmem:[%s2508_s13 + $0x58] sm:$0xff] }
  0x48   :  { %v1518_v29 = vpack.c.bf16 %v587_v28, %v586_v27  ;;  %v591_v34 = vld [vmem:[%s2508_s13 + $0x28] sm:$0xff]  ;;  %v594_v39 = vld [vmem:[%s2508_s13 + $0x40] sm:$0xff]  ;;  %v601_v49 = vld [vmem:[%s2508_s13 + $0x78] sm:$0xff] }
  0x49   :  { %1462 = vmatpush3.bf16.msra.mxu0 %v1461_v24  ;;  %v693_v24 = vld [vmem:[%s2510_s15 + $0x70] sm:$0xff]  ;;  %v1524_v35 = vpack.c.bf16 %v591_v34, %v590_v33  ;;  %v599_v46 = vld [vmem:[%s2508_s13 + $0x68] sm:$0xff]  ;;  %v178_v52 = vld [vmem:[%s2539_s26] sm:$0x1] }
  0x4a   :  { %1486 = vmatpush3.bf16.msra.mxu1 %v1485_v25  ;;  %1463 = vmatprep.subr.bf16.mxu0 %v1762_v3  ;;  %v694_v25 = vld [vmem:[%s2510_s15 + $0x78] sm:$0xff]  ;;  %v298_v8 = vld [vmem:[%s2540_s9] sm:$0x1] }
  0x4b   :  { %1487 = vmatprep.subr.bf16.mxu1 %v1762_v3  ;;  %v1563_v26 = vpack.c.bf16 %v694_v25, %v693_v24  ;;  %v388_v12 = vld [vmem:[%s2505_s10] sm:$0x1] }
  0x4d   :  { %1465 = vmatpush3.bf16.msra.mxu0 %v1464_v30  ;;  %v588_v30 = vld [vmem:[%s2508_s13 + $0x10] sm:$0xff] }
  0x4e   :  { %1489 = vmatpush3.bf16.msra.mxu1 %v1488_v31  ;;  %1466 = vmatprep.subr.bf16.mxu0 %v1762_v3  ;;  %v589_v31 = vld [vmem:[%s2508_s13 + $0x18] sm:$0xff] }
  0x4f   :  { %1490 = vmatprep.subr.bf16.mxu1 %v1762_v3  ;;  %v1521_v32 = vpack.c.bf16 %v589_v31, %v588_v30 }
  0x51   :  { %1468 = vmatpush3.bf16.msra.mxu0 %v1467_v36  ;;  %v592_v36 = vld [vmem:[%s2508_s13 + $0x30] sm:$0xff] }
  0x52   :  { %1492 = vmatpush3.bf16.msra.mxu1 %v1491_v37  ;;  %1493 = vmatprep.subr.bf16.mxu0 %v1762_v3  ;;  %v593_v37 = vld [vmem:[%s2508_s13 + $0x38] sm:$0xff] }
  0x53   :  { %1517 = vmatprep.subr.bf16.mxu1 %v1762_v3  ;;  %v1527_v38 = vpack.c.bf16 %v593_v37, %v592_v36  ;;  %v977_v37 = vld [vmem:[%s2507_s12] ss:$0 sm:$0xff] }
  0x54   :  { %1220 = vmatmul.mubr.f32.vlgmr.msra.gmra.mrb[2].mxu0 %v300_v40  ;;  %v595_v40 = vld [vmem:[%s2508_s13 + $0x48] sm:$0xff] }
  0x55   :  { %1255 = vmatmul.mubr.f32.vlgmr.msra.gmra.mrb[2].mxu1 %v390_v41  ;;  %1495 = vmatpush3.bf16.msra.mxu0 %v1494_v42  ;;  %v1530_v41 = vpack.c.bf16 %v595_v40, %v594_v39  ;;  %v596_v42 = vld [vmem:[%s2508_s13 + $0x50] sm:$0xff]  ;;  %v773_v40 = vld [vmem:[%s2512_s17] sm:$0xff] }
  0x56   :  { %1496 = vmatprep.subr.bf16.mxu0 %v1762_v3  ;;  %1289 = vmatprep.mubr.msk.f32.mxu0 %vm1763_vm0, %v1764_v11  ;;  %v1533_v44 = vpack.c.bf16 %v597_v43, %v596_v42 }
  0x57   :  { %1324 = vmatprep.mubr.msk.f32.mxu1 %vm1763_vm0, %v1764_v11  ;;  %1519 = vmatpush3.bf16.msra.mxu1 %v1518_v29 }
  0x58   :  { %1520 = vmatprep.subr.bf16.mxu1 %v1762_v3 }
  0x59   :  { %1498 = vmatpush3.bf16.msra.mxu0 %v1497_v45  ;;  %v598_v45 = vld [vmem:[%s2508_s13 + $0x60] sm:$0xff] }
  0x5a   :  { %1499 = vmatprep.subr.bf16.mxu0 %v1762_v3  ;;  %v1536_v47 = vpack.c.bf16 %v599_v46, %v598_v45 }
  0x5b   :  { %1522 = vmatpush3.bf16.msra.mxu1 %v1521_v32 }
  0x5c   :  { %1523 = vmatprep.subr.bf16.mxu1 %v1762_v3 }
  0x5d   :  { %1501 = vmatpush3.bf16.msra.mxu0 %v1500_v48  ;;  %v600_v48 = vld [vmem:[%s2508_s13 + $0x70] sm:$0xff] }
  0x5e   :  { %1502 = vmatprep.subr.bf16.mxu0 %v1762_v3  ;;  %v1539_v50 = vpack.c.bf16 %v601_v49, %v600_v48 }
  0x5f   :  { %1525 = vmatpush3.bf16.msra.mxu1 %v1524_v35 }
  0x60   :  { %1526 = vmatprep.subr.bf16.mxu1 %v1762_v3 }
  0x61   :  { %1504 = vmatpush3.bf16.msra.mxu0 %v1503_v51  ;;  %v91_v51 = vld [vmem:[%s2538_s4] sm:$0x1] }
  0x62   :  { %1505 = vmatprep.subr.bf16.mxu0 %v1762_v3 }
  0x63   :  { %1528 = vmatpush3.bf16.msra.mxu1 %v1527_v38 }
  0x64   :  { %1529 = vmatprep.subr.bf16.mxu1 %v1762_v3 }
  0x65   :  { %1507 = vmatpush3.bf16.msra.mxu0 %v1506_v54 }
  0x66   :  { %1508 = vmatprep.subr.bf16.mxu0 %v1762_v3 }
  0x67   :  { %1531 = vmatpush3.bf16.msra.mxu1 %v1530_v41  ;;  %v774_v41 = vld [vmem:[%s2512_s17 + $0x8] sm:$0xff] }
  0x68   :  { %1532 = vmatprep.subr.bf16.mxu1 %v1762_v3  ;;  %v1566_v49 = vpack.c.bf16 %v774_v41, %v773_v40 }
  0x69   :  { %1510 = vmatpush3.bf16.msra.mxu0 %v1509_v57 }
  0x6a   :  { %1511 = vmatprep.subr.bf16.mxu0 %v1762_v3 }
  0x6b   :  { %1534 = vmatpush3.bf16.msra.mxu1 %v1533_v44 }
  0x6c   :  { %1535 = vmatprep.subr.bf16.mxu1 %v1762_v3 }
  0x6d   :  { %1513 = vmatpush3.bf16.msra.mxu0 %v1512_v60 }
  0x6e   :  { %1514 = vmatprep.subr.bf16.mxu0 %v1762_v3 }
  0x6f   :  { %1537 = vmatpush3.bf16.msra.mxu1 %v1536_v47 }
  0x70   :  { %1538 = vmatprep.subr.bf16.mxu1 %v1762_v3 }
  0x71   :  { %1516 = vmatpush3.bf16.msra.mxu0 %v1515_v63 }
  0x72   :  { %1541 = vmatprep.subr.bf16.mxu0 %v1762_v3 }
  0x73   :  { %1540 = vmatpush3.bf16.msra.mxu1 %v1539_v50 }
  0x74   :  { %1290 = vmatmul.mubr.f32.vlgmr.msra.gmra.mrb[4].mxu0 %v74_v2  ;;  %1565 = vmatprep.subr.bf16.mxu1 %v1762_v3 }
  0x75   :  { %1543 = vmatpush3.bf16.msra.mxu0 %v1542_v4  ;;  %1359 = vmatprep.mubr.msk.f32.mxu0 %vm1763_vm0, %v1764_v11 }
  0x76   :  { %1544 = vmatprep.subr.bf16.mxu0 %v1762_v3 }
  0x79   :  { %1546 = vmatpush3.bf16.msra.mxu0 %v1545_v7 }
  0x7a   :  { %1547 = vmatprep.subr.bf16.mxu0 %v1762_v3 }
  0x7d   :  { %1549 = vmatpush3.bf16.msra.mxu0 %v1548_v10 }
  0x7e   :  { %1550 = vmatprep.subr.bf16.mxu0 %v1762_v3 }
  0x81   :  { %1552 = vmatpush3.bf16.msra.mxu0 %v1551_v14 }
  0x82   :  { %1553 = vmatprep.subr.bf16.mxu0 %v1762_v3 }
  0x85   :  { %1555 = vmatpush3.bf16.msra.mxu0 %v1554_v17 }
  0x86   :  { %1556 = vmatprep.subr.bf16.mxu0 %v1762_v3 }
  0x89   :  { %1558 = vmatpush3.bf16.msra.mxu0 %v1557_v20 }
  0x8a   :  { %1559 = vmatprep.subr.bf16.mxu0 %v1762_v3 }
  0x8d   :  { %1561 = vmatpush3.bf16.msra.mxu0 %v1560_v23 }
  0x8e   :  { %1562 = vmatprep.subr.bf16.mxu0 %v1762_v3 }
  0x91   :  { %1564 = vmatpush3.bf16.msra.mxu0 %v1563_v26 }
  0x94   :  { %1360 = vmatmul.mubr.f32.vlgmr.msra.gmra.mrb[6].mxu0 %v74_v2 }
 0x107   :  { %v158_v53 = vpop.f32.mrb[0].mxu0 }
 0x108   :  { %v159_v54 = vadd.f32 %v158_v53, %v91_v51  ;;  %v245_v55 = vpop.f32.mrb[0].mxu1  ;;  %v1151_v56 = vpop.f32.mrb[1].mxu0  ;;  %v775_v51 = vld [vmem:[%s2512_s17 + $0x10] sm:$0xff] }
 0x109   :  { %v246_v57 = vadd.f32 %v245_v55, %v178_v52  ;;  %v1186_v58 = vpop.f32.mrb[1].mxu1  ;;  %v776_v52 = vld [vmem:[%s2512_s17 + $0x18] sm:$0xff] }
 0x10a   :  { %v258_v59 = vand.u32 2147483647, %v159_v54  ;;  %v255_v7 = vmax.f32 %v159_v54, 0.0  ;;  %v1569_v55 = vpack.c.bf16 %v776_v52, %v775_v51  ;;  %v778_v58 = vld [vmem:[%s2512_s17 + $0x28] sm:$0xff] }
 0x10b   :  { %v975_v60 = vmul.f32 -1.442695, %v246_v57  ;;  %v777_v57 = vld [vmem:[%s2512_s17 + $0x20] sm:$0xff] }
 0x10c   :  { %v259_v61 = vsub.f32 0.0, %v258_v59  ;;  %v1572_v59 = vpack.c.bf16 %v778_v58, %v777_v57 }
 0x10d   :  { %1598 = vpow2.f32 %v975_v60  ;;  %v780_v60 = vld [vmem:[%s2512_s17 + $0x38] sm:$0xff] }
 0x10e   :  { %v260_v62 = vmul.f32 1.442695, %v259_v61 }
 0x110   :  { %1600 = vpow2.f32 %v260_v62  ;;  %v781_v62 = vld [vmem:[%s2512_s17 + $0x40] sm:$0xff] }
 0x117   :  { %v1599_v63 = vpop.eup %1598 }
 0x118   :  { %v252_v0 = vadd.f32 1.0, %v1599_v63  ;;  %v782_v63 = vld [vmem:[%s2512_s17 + $0x48] sm:$0xff] }
 0x11a   :  { %v1601_v1 = vpop.eup %1600  ;;  %1602 = vrcp.f32 %v252_v0  ;;  %v1578_v0 = vpack.c.bf16 %v782_v63, %v781_v62 }
 0x11b   :  { %v262_v2 = vadd.f32 1.0, %v1601_v1  ;;  %v265_v4 = vmul.f32 -0.5, %v1601_v1  ;;  %v268_v10 = vand.u32 2147483647, %v1601_v1 }
 0x11d   :  { %1604 = vlog2.f32 %v262_v2  ;;  %v266_v6 = vadd.f32 1.0, %v265_v4  ;;  %vm269_vm1 = vcmp.lt.f32.partialorder %v268_v10, 0.0004427343  ;;  %v784_v2 = vld [vmem:[%s2512_s17 + $0x58] sm:$0xff]  ;;  %v979_v10 = vld [vmem:[%s2511_s16] ss:$0 sm:$0xff] }
 0x11f   :  { %v267_v20 = vmul.f32 %v1601_v1, %v266_v6  ;;  %v783_v1 = vld [vmem:[%s2512_s17 + $0x50] sm:$0xff]  ;;  %v786_v6 = vld [vmem:[%s2512_s17 + $0x68] sm:$0xff] }
 0x120   :  { %v1581_v4 = vpack.c.bf16 %v784_v2, %v783_v1 }
 0x124   :  { %v1603_v5 = vpop.eup %1602 }
 0x125   :  { %v256_v9 = vmul.f32 %v1603_v5, %v159_v54  ;;  %v785_v5 = vld [vmem:[%s2512_s17 + $0x60] sm:$0xff] }
 0x127   :  { %v1605_v13 = vpop.eup %1604  ;;  %v368_v14 = vpop.f32.mrb[2].mxu0  ;;  %v257_v15 = vsub.f32 %v255_v7, %v256_v9  ;;  %v1584_v7 = vpack.c.bf16 %v786_v6, %v785_v5  ;;  %v788_v9 = vld [vmem:[%s2512_s17 + $0x78] sm:$0xff] }
 0x128   :  { %v369_v16 = vadd.f32 %v368_v14, %v298_v8  ;;  %v458_v17 = vpop.f32.mrb[2].mxu1  ;;  %v1221_v18 = vpop.f32.mrb[3].mxu0  ;;  %v264_v19 = vmul.f32 0.6931472, %v1605_v13  ;;  %v787_v8 = vld [vmem:[%s2512_s17 + $0x70] sm:$0xff] }
 0x129   :  { %v459_v21 = vadd.f32 %v458_v17, %v388_v12  ;;  %v1256_v22 = vpop.f32.mrb[3].mxu1  ;;  %v1587_v12 = vpack.c.bf16 %v788_v9, %v787_v8  ;;  %v978_v17 = vld [vmem:[%s2509_s14] ss:$0 sm:$0xff]  ;;  %s1765_s14 = smov [#allocation2]  }
 0x12a   :  { %v471_v23 = vand.u32 2147483647, %v369_v16  ;;  %v270_v24 = vsel %vm269_vm1, %v267_v20, %v264_v19  ;;  %v468_v36 = vmax.f32 %v369_v16, 0.0 }
 0x12b   :  { %v976_v25 = vmul.f32 -1.442695, %v459_v21  ;;  %v2332_v26 = vadd.f32 %v270_v24, %v257_v15 }
 0x12c   :  { %v472_v27 = vsub.f32 0.0, %v471_v23 }
 0x12d   :  { %1606 = vpow2.f32 %v976_v25 }
 0x12e   :  { %v473_v28 = vmul.f32 1.442695, %v472_v27  ;;  %v273_v27 = vsel %vm272_vm3, %v2332_v26, 0.0 }
 0x130   :  { %1608 = vpow2.f32 %v473_v28 }
 0x137   :  { %v1607_v29 = vpop.eup %1606 }
 0x138   :  { %v465_v30 = vadd.f32 1.0, %v1607_v29 }
 0x13a   :  { %v1609_v31 = vpop.eup %1608  ;;  %1610 = vrcp.f32 %v465_v30 }
 0x13b   :  { %v475_v32 = vadd.f32 1.0, %v1609_v31  ;;  %v478_v33 = vmul.f32 -0.5, %v1609_v31  ;;  %v481_v39 = vand.u32 2147483647, %v1609_v31 }
 0x13d   :  { %1612 = vlog2.f32 %v475_v32  ;;  %v479_v35 = vadd.f32 1.0, %v478_v33  ;;  %vm482_vm2 = vcmp.lt.f32.partialorder %v481_v39, 0.0004427343 }
 0x13f   :  { %v480_v48 = vmul.f32 %v1609_v31, %v479_v35 }
 0x144   :  { %v1611_v34 = vpop.eup %1610 }
 0x145   :  { %v469_v38 = vmul.f32 %v1611_v34, %v369_v16 }
 0x147   :  { %v1613_v42 = vpop.eup %1612  ;;  %v581_v43 = vpop.f32.mrb[4].mxu0  ;;  %v470_v44 = vsub.f32 %v468_v36, %v469_v38 }
 0x148   :  { %v582_v45 = vadd.f32 %v977_v37, %v581_v43  ;;  %v1291_v46 = vpop.f32.mrb[5].mxu0  ;;  %v477_v47 = vmul.f32 0.6931472, %v1613_v42 }
 0x14a   :  { %v585_v50 = vmax.f32 %v582_v45, 0.0  ;;  %v483_v53 = vsel %vm482_vm2, %v480_v48, %v477_v47 }
 0x14b   :  { %v484_v54 = vadd.f32 %v483_v53, %v470_v44 }
 0x14c   :  { %1325 = vmatmul.mubr.f32.vlgmr.msra.gmra.mrb[4].mxu1 %v585_v50 }
 0x14d   :  { %1567 = vmatpush3.bf16.msra.mxu1 %v1566_v49  ;;  %1394 = vmatprep.mubr.msk.f32.mxu1 %vm1763_vm0, %v1764_v11  ;;  %v2352_v56 = vsel %vm272_vm3, %v484_v54, 0.0  ;;  %v779_v11 = vld [vmem:[%s2512_s17 + $0x30] sm:$0xff] }
 0x14e   :  { %1568 = vmatprep.subr.bf16.mxu1 %v1762_v3  ;;  %v1575_v61 = vpack.c.bf16 %v780_v60, %v779_v11 }
 0x151   :  { %1570 = vmatpush3.bf16.msra.mxu1 %v1569_v55 }
 0x152   :  { %1571 = vmatprep.subr.bf16.mxu1 %v1762_v3 }
 0x155   :  { %1573 = vmatpush3.bf16.msra.mxu1 %v1572_v59 }
 0x156   :  { %1574 = vmatprep.subr.bf16.mxu1 %v1762_v3 }
 0x159   :  { %1576 = vmatpush3.bf16.msra.mxu1 %v1575_v61 }
 0x15a   :  { %1577 = vmatprep.subr.bf16.mxu1 %v1762_v3 }
 0x15d   :  { %1579 = vmatpush3.bf16.msra.mxu1 %v1578_v0 }
 0x15e   :  { %1580 = vmatprep.subr.bf16.mxu1 %v1762_v3 }
 0x161   :  { %1582 = vmatpush3.bf16.msra.mxu1 %v1581_v4 }
 0x162   :  { %1583 = vmatprep.subr.bf16.mxu1 %v1762_v3 }
 0x165   :  { %1585 = vmatpush3.bf16.msra.mxu1 %v1584_v7 }
 0x166   :  { %1586 = vmatprep.subr.bf16.mxu1 %v1762_v3  ;;  %v980_v3 = vld [vmem:[%s2513_s18] ss:$0 sm:$0xff]  ;;  %s899_s18 = sshll.u32 %s1765_s14, 4  ;;  %s900_s18 = int_to_ptr.vmem [resolvable:$true] %s899_s18 }
 0x167   :  { %v768_v13 = vpop.f32.mrb[6].mxu0  ;;  %s1622_s27 = scalar_lea.vmem %s900_s18, 32  ;;  %p1627_p1 = scmp.lt.s32.totalorder %s900_s18, %s900_s18 }
 0x168   :  { %v769_v14 = vadd.f32 %v979_v10, %v768_v13  ;;  %v1361_v15 = vpop.f32.mrb[7].mxu0  ;;  %p1623_p0 = scmp.ne.s32.totalorder %s900_s18, %s1622_s27  ;;  %p1628_p2 = scmp.lt.s32.totalorder %s1622_s27, %s1622_s27 }
 0x169   :  { %1588 = vmatpush3.bf16.msra.mxu1 %v1587_v12 }
 0x16a   :  { %v772_v16 = vmax.f32 %v769_v14, 0.0  ;;  %p1629_p3 = por %p1628_p2, %p1627_p1 }
 0x16c   :  { %1395 = vmatmul.mubr.f32.vlgmr.msra.gmra.mrb[6].mxu1 %v772_v16  ;;  %p1630_p4 = pnand %p1629_p3, %p1623_p0 }
 0x21f   :  { %v675_v18 = vpop.f32.mrb[4].mxu1 }
 0x220   :  { %v676_v19 = vadd.f32 %v978_v17, %v675_v18  ;;  %v1326_v20 = vpop.f32.mrb[5].mxu1 }
 0x222   :  { %v868_v21 = vsel %vm866_vm4, %v676_v19, -inf  ;;  %867 = vst.msk [vmem:[#allocation2] sm:$0x3] %vm866_vm4, %v676_v19 }
 0x223   :  { %869 = vmax.xlane.f32.xlu0 %v868_v21 }
 0x23f   :  { %v862_v22 = vpop.f32.mrb[6].mxu1 }
 0x240   :  { %v863_v23 = vadd.f32 %v980_v3, %v862_v22  ;;  %v1396_v24 = vpop.f32.mrb[7].mxu1 }
 0x242   :  { %880 = vst.msk [vmem:[#allocation6] sm:$0x3] %vm866_vm4, %v863_v23  ;;  %v881_v25 = vsel %vm866_vm4, %v863_v23, -inf }
 0x243   :  { %882 = vmax.xlane.f32.xlu0 %v881_v25 }
 0x247   :  { %274 = vadd.xlane.f32.xlu0 %v273_v27 }
 0x2b0   :  { %v870_v28 = vpop.xlane.xlu0 %869 }
 0x2b1   :  { %v871_v29 = vsub.f32 %v676_v19, %v870_v28 }
 0x2b3   :  { %v872_v30 = vmul.f32 1.442695, %v871_v29 }
 0x2b5   :  { %1614 = vpow2.f32 %v872_v30 }
 0x2bf   :  { %v1615_v31 = vpop.eup %1614 }
 0x2c0   :  { %v874_v32 = vsel %vm866_vm4, %v1615_v31, 0.0 }
 0x2c1   :  { %875 = vadd.xlane.f32.xlu1 %v874_v32 }
 0x2d0   :  { %v883_v33 = vpop.xlane.xlu0 %882 }
 0x2d1   :  { %v884_v34 = vsub.f32 %v863_v23, %v883_v33 }
 0x2d3   :  { %v885_v35 = vmul.f32 1.442695, %v884_v34 }
 0x2d4   :  { %v275_v36 = vpop.xlane.xlu0 %274 }
 0x2d5   :  { %1616 = vpow2.f32 %v885_v35  ;;  %v278_v37 = vmul.f32 0.03125, %v275_v36 }
 0x2d7   :  { %v279_v38 = vmul.f32 32.0, %v278_v37 }
 0x2d9   :  { %281 = vst.msk [vmem:[#allocation9] sm:$0x1] %vm280_vm5, %v279_v38 }
 0x2df   :  { %v2414_v26 = vpop.eup %1616 }
 0x2e0   :  { %v887_v39 = vsel %vm866_vm4, %v2414_v26, 0.0 }
 0x2e1   :  { %888 = vadd.xlane.f32.xlu1 %v887_v39 }
 0x2e5   :  { %486 = vadd.xlane.f32.xlu1 %v2352_v56 }
 0x2e6   :  { %1633 = shalt.err (!%p1630_p4)
}
 0x2e7   :  { %s1634_s15 = scalar_lea.hbm %s2514_s19, 32 }
 0x2e8   :  { %p1635_p5 = scmp.ne.s32.totalorder %s2514_s19, %s1634_s15  ;;  %p1638_p6 = scmp.lt.u32.totalorder %s1634_s15, %s2514_s19 }
 0x2ea   :  { %p1640_p7 = pnand %p1638_p6, %p1635_p5 }
 0x2ec   :  { %1643 = shalt.err (!%p1640_p7)
}
 0x2ed   :  { %902 = dma.vmem_to_hbm [thread:$0]  %s900_s18, 32, %s2514_s19, [#allocation3]  }
 0x2ee   :  { %s1766_s12 = smov [#allocation4]   ;;  %s1767_s30 = smov [#allocation6]  }
 0x2ef   :  { %s909_s7 = sshll.u32 %s1766_s12, 4  ;;  %s919_s3 = sshll.u32 %s1767_s30, 4  ;;  %s910_s7 = int_to_ptr.vmem [resolvable:$true] %s909_s7  ;;  %s920_s3 = int_to_ptr.vmem [resolvable:$true] %s919_s3 }
 0x2f0   :  { %s1644_s25 = scalar_lea.vmem %s910_s7, 32  ;;  %p1649_p9 = scmp.lt.s32.totalorder %s910_s7, %s910_s7 }
 0x2f1   :  { %p1645_p8 = scmp.ne.s32.totalorder %s910_s7, %s1644_s25  ;;  %p1650_p10 = scmp.lt.s32.totalorder %s1644_s25, %s1644_s25 }
 0x2f3   :  { %p1651_p11 = por %p1650_p10, %p1649_p9 }
 0x2f5   :  { %p1652_p12 = pnand %p1651_p11, %p1645_p8 }
 0x34e   :  { %v876_v40 = vpop.xlane.xlu1 %875 }
 0x34f   :  { %1618 = vrcp.f32 %v876_v40 }
 0x359   :  { %v1619_v41 = vpop.eup %1618 }
 0x35a   :  { %v878_v42 = vmul.f32 %v1619_v41, %v1615_v31 }
 0x35c   :  { %879 = vst.msk [vmem:[#allocation4] sm:$0x3] %vm866_vm4, %v878_v42 }
 0x35d   :  { %1655 = shalt.err (!%p1652_p12)
}
 0x35e   :  { %s1656_s4 = scalar_lea.hbm %s2515_s20, 32 }
 0x35f   :  { %p1657_p13 = scmp.ne.s32.totalorder %s2515_s20, %s1656_s4  ;;  %p1660_p0 = scmp.lt.u32.totalorder %s1656_s4, %s2515_s20 }
 0x361   :  { %p1662_p1 = pnand %p1660_p0, %p1657_p13 }
 0x363   :  { %1665 = shalt.err (!%p1662_p1)
}
 0x364   :  { %912 = dma.vmem_to_hbm [thread:$0]  %s910_s7, 32, %s2515_s20, [#allocation5]  }
 0x365   :  { %s1666_s14 = scalar_lea.vmem %s920_s3, 32  ;;  %p1671_p3 = scmp.lt.s32.totalorder %s920_s3, %s920_s3 }
 0x366   :  { %p1667_p2 = scmp.ne.s32.totalorder %s920_s3, %s1666_s14  ;;  %p1672_p4 = scmp.lt.s32.totalorder %s1666_s14, %s1666_s14 }
 0x368   :  { %p1673_p5 = por %p1672_p4, %p1671_p3 }
 0x36a   :  { %p1674_p6 = pnand %p1673_p5, %p1667_p2 }
 0x36c   :  { %1677 = shalt.err (!%p1674_p6)
}
 0x36d   :  { %s1678_s9 = scalar_lea.hbm %s2516_s21, 32 }
 0x36e   :  { %p1679_p7 = scmp.ne.s32.totalorder %s2516_s21, %s1678_s9  ;;  %p1682_p8 = scmp.lt.u32.totalorder %s1678_s9, %s2516_s21 }
 0x370   :  { %p1684_p9 = pnand %p1682_p8, %p1679_p7 }
 0x372   :  { %1687 = shalt.err (!%p1684_p9)
}
 0x373   :  { %922 = dma.vmem_to_hbm [thread:$0]  %s920_s3, 32, %s2516_s21, [#allocation5]   ;;  %v889_v43 = vpop.xlane.xlu1 %888 }
 0x374   :  { %1620 = vrcp.f32 %v889_v43  ;;  %s1768_s2 = smov [#allocation10]   ;;  %s1769_s29 = smov [#allocation7]  }
 0x375   :  { %s949_s0 = sshll.u32 %s1768_s2, 4  ;;  %s929_s12 = sshll.u32 %s1769_s29, 4  ;;  %s950_s0 = int_to_ptr.vmem [resolvable:$true] %s949_s0  ;;  %s930_s12 = int_to_ptr.vmem [resolvable:$true] %s929_s12 }
 0x376   :  { %s1770_s7 = smov [#allocation9]   ;;  %s1688_s25 = scalar_lea.vmem %s950_s0, 16 }
 0x377   :  { %v487_v44 = vpop.xlane.xlu1 %486  ;;  %s939_s30 = sshll.u32 %s1770_s7, 4  ;;  %p1689_p10 = scmp.ne.s32.totalorder %s950_s0, %s1688_s25  ;;  %s940_s30 = int_to_ptr.vmem [resolvable:$true] %s939_s30 }
 0x378   :  { %v489_v45 = vmul.f32 0.03125, %v487_v44  ;;  %s1692_s19 = scalar_lea.vmem %s950_s0, 32  ;;  %p1693_p11 = scmp.lt.s32.totalorder %s950_s0, %s950_s0 }
 0x379   :  { %p1694_p12 = scmp.lt.s32.totalorder %s1692_s19, %s1688_s25 }
 0x37a   :  { %v490_v46 = vmul.f32 32.0, %v489_v45 }
 0x37b   :  { %p1695_p13 = por %p1694_p12, %p1693_p11 }
 0x37c   :  { %491 = vst.msk [vmem:[#allocation10] sm:$0x1] %vm280_vm5, %v490_v46 }
 0x37d   :  { %p1696_p0 = pnand %p1695_p13, %p1689_p10 }
 0x37f   :  { %1699 = shalt.err (!%p1696_p0)
}
 0x380   :  { %s1700_s8 = scalar_lea.hbm %s2519_s24, 16 }
 0x381   :  { %p1701_p1 = scmp.ne.s32.totalorder %s2519_s24, %s1700_s8  ;;  %p1704_p2 = scmp.lt.u32.totalorder %s1700_s8, %s2519_s24 }
 0x383   :  { %p1706_p3 = pnand %p1704_p2, %p1701_p1 }
 0x385   :  { %1709 = shalt.err (!%p1706_p3)
}
 0x386   :  { %952 = dma.vmem_to_hbm [thread:$0]  %s950_s0, 16, %s2519_s24, [#allocation11]   ;;  %v1621_v47 = vpop.eup %1620 }
 0x387   :  { %v891_v48 = vmul.f32 %v1621_v47, %v2414_v26  ;;  %s1710_s17 = scalar_lea.vmem %s930_s12, 32  ;;  %p1715_p5 = scmp.lt.s32.totalorder %s930_s12, %s930_s12 }
 0x388   :  { %p1711_p4 = scmp.ne.s32.totalorder %s930_s12, %s1710_s17  ;;  %p1716_p6 = scmp.lt.s32.totalorder %s1710_s17, %s1710_s17 }
 0x389   :  { %892 = vst.msk [vmem:[#allocation7] sm:$0x3] %vm866_vm4, %v891_v48 }
 0x38a   :  { %p1717_p7 = por %p1716_p6, %p1715_p5 }
 0x38c   :  { %p1718_p8 = pnand %p1717_p7, %p1711_p4 }
 0x38e   :  { %1721 = shalt.err (!%p1718_p8)
}
 0x38f   :  { %s1722_s27 = scalar_lea.hbm %s2517_s22, 32 }
 0x390   :  { %p1723_p9 = scmp.ne.s32.totalorder %s2517_s22, %s1722_s27  ;;  %p1726_p10 = scmp.lt.u32.totalorder %s1722_s27, %s2517_s22 }
 0x392   :  { %p1728_p11 = pnand %p1726_p10, %p1723_p9 }
 0x394   :  { %1731 = shalt.err (!%p1728_p11)
}
 0x395   :  { %932 = dma.vmem_to_hbm [thread:$0]  %s930_s12, 32, %s2517_s22, [#allocation8]  }
 0x396   :  { %s1732_s20 = scalar_lea.vmem %s940_s30, 16  ;;  %s1736_s11 = scalar_lea.vmem %s940_s30, 32 }
 0x397   :  { %p1733_p12 = scmp.ne.s32.totalorder %s940_s30, %s1732_s20  ;;  %p1737_p13 = scmp.lt.s32.totalorder %s940_s30, %s940_s30 }
 0x398   :  { %p1738_p0 = scmp.lt.s32.totalorder %s1736_s11, %s1732_s20 }
 0x39a   :  { %p1739_p1 = por %p1738_p0, %p1737_p13 }
 0x39c   :  { %p1740_p2 = pnand %p1739_p1, %p1733_p12 }
 0x39e   :  { %1743 = shalt.err (!%p1740_p2)
}
 0x39f   :  { %s1744_s29 = scalar_lea.hbm %s2518_s23, 16 }
 0x3a0   :  { %p1745_p3 = scmp.ne.s32.totalorder %s2518_s23, %s1744_s29  ;;  %p1748_p4 = scmp.lt.u32.totalorder %s1744_s29, %s2518_s23 }
 0x3a2   :  { %p1750_p5 = pnand %p1748_p4, %p1745_p3 }
 0x3a4   :  { %1753 = shalt.err (!%p1750_p5)
}
 0x3a5   :  { %942 = dma.vmem_to_hbm [thread:$0]  %s940_s30, 16, %s2518_s23, [#allocation8]  }
 0x3a6   :  { %1754 = dma.done.wait [#allocation3], 32  }
 0x3a7   :  { %1755 = vsyncadd [#allocation3], 4294967264 }
 0x3a8   :  { %1756 = dma.done.wait [#allocation5], 64  }
 0x3a9   :  { %1757 = vsyncadd [#allocation5], 4294967232 }
 0x3aa   :  { %1758 = dma.done.wait [#allocation8], 48  }
 0x3ab   :  { %1759 = vsyncadd [#allocation8], 4294967248 }
 0x3ac   :  { %1760 = dma.done.wait [#allocation11], 16  }
 0x3ad   :  { %1761 = vsyncadd [#allocation11], 4294967280 }
 0x3ae   :  { %971 = vsyncpa [#allocation3], 1 }
 0x3af   :  { %972 = vsyncpa [#allocation5], 1 }
 0x3b0   :  { %973 = vsyncpa [#allocation8], 1 }
 0x3b1   :  { %974 = vsyncpa [#allocation11], 1 }

// kernel: albef_forward.3
= control target key start
LH: loop header
LB: loop body
LE: loop exit
PB: predicated region body
PF: predicated region fallthrough
CT: control target
= control target key end

     0   :  { %s5351_s0 = inlined_call_operand.vmem [shape: f32[8,768], index: 0, kind: input, shape index: {}]   ;;  %s5352_s1 = inlined_call_operand.hbm [shape: bf16[768,128], index: 1, kind: input, shape index: {}]   ;;  %s5353_s2 = inlined_call_operand.hbm [shape: f32[1,128], index: 2, kind: input, shape index: {}]   ;;  %s5354_s3 = inlined_call_operand.hbm [shape: f32[1,128], index: 3, kind: input, shape index: {}]   ;;  %s5355_s4 = inlined_call_operand.hbm [shape: f32[5,128], index: 4, kind: input, shape index: {}]   ;;  %s5356_s5 = inlined_call_operand.hbm [shape: bf16[2,128,1024], index: 5, kind: input, shape index: {}]   ;;  %s5357_s6 = inlined_call_operand.hbm [shape: bf16[2,512,128], index: 6, kind: input, shape index: {}]   ;;  %s5358_s7 = inlined_call_operand.hbm [shape: f32[2,1,1664], index: 7, kind: input, shape index: {}]   ;;  %s5359_s8 = inlined_call_operand.hbm [shape: f32[1,128], index: 8, kind: input, shape index: {}]   ;;  %s5360_s9 = inlined_call_operand.hbm [shape: f32[1,128], index: 9, kind: input, shape index: {}]   ;;  %s5361_s10 = inlined_call_operand.vmem [shape: f32[16,128], index: 10, kind: output, shape index: {}]  }
   0x1   :  { %5387 = sst [smem:[#allocation24_spill]] %s5351_s0 }
   0x2   :  { %5388 = sst [smem:[#allocation25_spill]] %s5352_s1 }
   0x3   :  { %5389 = sst [smem:[#allocation26_spill]] %s5353_s2 }
   0x4   :  { %5390 = sst [smem:[#allocation27_spill]] %s5356_s5 }
   0x5   :  { %5391 = sst [smem:[#allocation28_spill]] %s5361_s10 }
   0x6   :  { %15 = vsyncpa [#allocation3], 0 }
   0x7   :  { %16 = vsyncpa [#allocation5], 0 }
   0x8   :  { %17 = vsyncpa [#allocation8], 0  ;;  %s4530_s13 = smov 0   ;;  %s4532_s14 = smov 0  }
   0x9   :  { %s4534_s15 = smov 0   ;;  %s4536_s16 = smov 0  }
   0xa LB: > { %5392 = sst [smem:[#allocation20_spill]] %s4449_s15  ;;  %s4455_s17 = smov [#allocation2]   ;;  %s4453_s16 = sphi %s4536_s16, %s5433_s16   ;;  %s4449_s15 = sphi %s4534_s15, %s5435_s15   ;;  %s4445_s14 = sphi %s4532_s14, %s5437_s14   ;;  %s4441_s13 = sphi %s4530_s13, %s5436_s13  }
   0xb   : > { %s289_s18 = sshll.u32 %s4455_s17, 4  ;;  %s4551_s19 = sadd.s32 4294967295, %s4453_s16   ;;  %s4557_s18 = int_to_ptr.vmem [resolvable:$true] %s289_s18 }
   0xc   : > { %p3364_p0 = scmp.ge.s32.totalorder %s4453_s16, 1  ;;  %p5368_p1 = scmp.eq.s32.totalorder %s4551_s19, 0 }
   0xd   : > { %p274_p2 = scmp.lt.s32.totalorder %s4453_s16, 3  ;;  %s4456_s21 = smov [#allocation4]  }
   0xe   : > { %s303_s22 = sshll.u32 %s4456_s21, 4  ;;  %s5395_s1 = sld [smem:[#allocation25_spill]]  ;;  %s4571_s22 = int_to_ptr.vmem [resolvable:$true] %s303_s22 }
   0xf   : > { %p4559_p4 = pnand %p3364_p0, %p274_p2 }
  0x11   : > { %s5393_s20 = scalar_select %p4559_p4, 1, 0 }
  0x12   : > { %p3893_p5 = pneg %p4559_p4 }
  0x14   : > { %p4567_p6 = pnand %p3893_p5, %p5368_p1  ;;  %s4141_s26 = scalar_lea.hbm %s5395_s1, 6144 }
  0x15   : > { %p4142_p7 = scmp.ne.s32.totalorder %s5395_s1, %s4141_s26  ;;  %p4148_p11 = scmp.lt.u32.totalorder %s4141_s26, %s5395_s1 }
  0x16   : > { %s5394_s23 = scalar_select %p4567_p6, 1, 0 }
  0x17   : > { %p4581_p8 = pneg %p4567_p6 }
  0x19   : > { %s5396_s29 = scalar_select %p4581_p8, 1, 0 }
  0x1a   : > { %p4144_p9 = pnand %p4581_p8, %p4142_p7 }
  0x1c   : > { %p4145_p10 = pneg %p4144_p9 }
  0x1e   : > { %p4150_p12 = pnand %p4148_p11, %p4145_p10 }
  0x20   : > { %4153 = shalt.err (!%p4150_p12)
}
  0x21   : > { %s4154_s12 = scalar_lea.vmem %s4557_s18, 6144  ;;  %p4162_p5 = scmp.lt.s32.totalorder %s4557_s18, %s4557_s18 }
  0x22   : > { %p4155_p13 = scmp.ne.s32.totalorder %s4557_s18, %s4154_s12  ;;  %p4163_p3 = scmp.lt.s32.totalorder %s4154_s12, %s4154_s12 }
  0x24   : > { %p4157_p0 = pnand %p4155_p13, %p4581_p8  ;;  %p4164_p7 = por %p4163_p3, %p4162_p5 }
  0x26   : > { %p4158_p2 = pneg %p4157_p0 }
  0x28   : > { %p4165_p9 = pnand %p4164_p7, %p4158_p2 }
  0x2a   : > { %4168 = shalt.err (!%p4165_p9)
}
  0x2b   : > { %s5366_s17 = smov 64   ;;  %s5367_s21 = smov 4  }
  0x2c   : > { %3896 = dma.hbm_to_vmem [thread:$0]  (!%p4567_p6), %s5395_s1, 6144, %s4557_s18, [#allocation3], %s5366_s17, %s5366_s17, %s5367_s21  }
  0x2d   : > { %s5397_s2 = sld [smem:[#allocation26_spill]] }
  0x33   : > { %s4169_s28 = scalar_lea.hbm %s5397_s2, 16 }
  0x34   : > { %p4170_p3 = scmp.ne.s32.totalorder %s5397_s2, %s4169_s28  ;;  %p4176_p12 = scmp.lt.u32.totalorder %s4169_s28, %s5397_s2 }
  0x36   : > { %p4172_p10 = pnand %p4170_p3, %p4581_p8 }
  0x38   : > { %p4173_p11 = pneg %p4172_p10 }
  0x3a   : > { %p4178_p13 = pnand %p4176_p12, %p4173_p11 }
  0x3c   : > { %4181 = shalt.err (!%p4178_p13)
}
  0x3d   : > { %s4182_s18 = scalar_lea.vmem %s4571_s22, 16  ;;  %s4189_s24 = scalar_lea.vmem %s4571_s22, 32 }
  0x3e   : > { %p4183_p0 = scmp.ne.s32.totalorder %s4571_s22, %s4182_s18  ;;  %p4190_p7 = scmp.lt.s32.totalorder %s4571_s22, %s4571_s22 }
  0x3f   : > { %p4191_p9 = scmp.lt.s32.totalorder %s4189_s24, %s4182_s18 }
  0x40   : > { %p4185_p2 = pnand %p4183_p0, %p4581_p8 }
  0x41   : > { %p4192_p3 = por %p4191_p9, %p4190_p7 }
  0x42   : > { %p4186_p5 = pneg %p4185_p2 }
  0x44   : > { %p4193_p10 = pnand %p4192_p3, %p4186_p5 }
  0x46   : > { %4196 = shalt.err (!%p4193_p10)
}
  0x47   : > { %3899 = dma.hbm_to_vmem [thread:$0]  (!%p4567_p6), %s5397_s2, 16, %s4571_s22, [#allocation5]  }
  0x48   : > { %s4630_s26 = sadd.s32 1, %s4453_s16   ;;  %s135_s27 = sadd.s32 1, %s4449_s15 }
  0x49   : > { %5398 = sst [smem:[#allocation21_spill]] %s4630_s26  ;;  %s132_s28 = ssub.s32 %s4453_s16, %s4630_s26 }
  0x4a   : > { %p142_p11 = scmp.ne.s32.totalorder %s4449_s15, %s4445_s14  ;;  %p133_p12 = scmp.eq.s32.totalorder %s132_s28, 0 }
  0x4b   : > { %p143_p13 = scmp.eq.s32.totalorder %s4453_s16, 0  ;;  %p148_p0 = scmp.ne.s32.totalorder %s4445_s14, %s4441_s13 }
  0x4c   : > { %p3928_p2 = scmp.lt.s32.totalorder %s4453_s16, 2  ;;  %s358_s12 = sand.u32 1, %s4453_s16  }
  0x4d   : > { %s4642_s30 = scalar_select %p133_p12, %s4449_s15, %s135_s27  }
  0x4e   : > { %p144_p5 = por %p143_p13, %p142_p11  ;;  %p4646_p7 = por %p5368_p1, %p148_p0 }
  0x4f   : > { %5399 = sst [smem:[#allocation22_spill]] %s4642_s30  ;;  %s4652_s22 = sand.u32 1, %s4449_s15  }
  0x50   : > { %s5400_s11 = scalar_select %p4646_p7, 1, 0 }
  0x51   : > { %s3372_s18 = sshll.u32 %s4652_s22, 9  ;;  %s3562_s24 = sshll.u32 %s4453_s16, 13 }
  0x52   : > { %5401 = sst [smem:[#allocation23_spill]] %s5400_s11  ;;  %s5402_s5 = sld [smem:[#allocation27_spill]] }
  0x53   : > { %s362_s13 = scalar_lea.vmem [#allocation9], %s3372_s18  ;;  %p4663_p9 = pnand %p3928_p2, %p144_p5 }
  0x54   : > { %s369_s27 = sshll.u32 %s362_s13, 4  ;;  %s4667_s21 = scalar_lea.sflag [#allocation3], %s358_s12  ;;  %s4661_s27 = int_to_ptr.vmem [resolvable:$true] %s369_s27 }
  0x55   : > { %s5403_s17 = scalar_select %p4663_p9, 1, 0 }
  0x56   : > { %p4673_p10 = pneg %p4663_p9 }
  0x58   : > { %s4659_s28 = scalar_lea.hbm %s5402_s5, %s3562_s24  ;;  %s4202_s25 = scalar_lea.hbm %s5402_s5, 16384 }
  0x59   : > { %s4197_s1 = scalar_lea.hbm %s4659_s28, 8192  ;;  %p4203_p13 = scmp.lt.u32.totalorder %s4659_s28, %s5402_s5 }
  0x5a   : > { %p4198_p3 = scmp.ne.s32.totalorder %s4659_s28, %s4197_s1  ;;  %p4204_p0 = scmp.lt.u32.totalorder %s4202_s25, %s4197_s1 }
  0x5b   : > { %s5404_s24 = scalar_select %p4673_p10, 1, 0 }
  0x5c   : > { %p4200_p11 = pnand %p4673_p10, %p4198_p3  ;;  %p4205_p2 = por %p4204_p0, %p4203_p13 }
  0x5d   : > { %p4206_p5 = scmp.lt.u32.totalorder %s4197_s1, %s4659_s28 }
  0x5e   : > { %p4201_p12 = pneg %p4200_p11 }
  0x5f   : > { %p4207_p1 = por %p4206_p5, %p4205_p2 }
  0x61   : > { %p4208_p7 = pnand %p4207_p1, %p4201_p12 }
  0x63   : > { %4211 = shalt.err (!%p4208_p7)
}
  0x64   : > { %s4212_s12 = scalar_lea.vmem %s4661_s27, 8192  ;;  %s4459_s18 = smov [#allocation9]  }
  0x65   : > { %p4213_p3 = scmp.ne.s32.totalorder %s4661_s27, %s4212_s12  ;;  %s4217_s10 = sshll.u32 %s4459_s18, 4  ;;  %s4218_s10 = int_to_ptr.vmem [resolvable:$false] %s4217_s10 }
  0x66   : > { %s4219_s2 = scalar_lea.vmem %s4218_s10, 16384  ;;  %p4220_p6 = scmp.lt.s32.totalorder %s4661_s27, %s4218_s10 }
  0x67   : > { %p4215_p11 = pnand %p4213_p3, %p4673_p10  ;;  %p4221_p8 = scmp.lt.s32.totalorder %s4219_s2, %s4212_s12 }
  0x69   : > { %p4216_p4 = pneg %p4215_p11  ;;  %p4222_p13 = por %p4221_p8, %p4220_p6 }
  0x6b   : > { %p4223_p0 = pnand %p4222_p13, %p4216_p4 }
  0x6d   : > { %4226 = shalt.err (!%p4223_p0)
}
  0x6e   : > { %s4460_s1 = smov 512   ;;  %s4461_s25 = smov 32  }
  0x6f   : > { %3915 = dma.hbm_to_vmem [thread:$0]  (!%p4663_p9), %s4659_s28, 8192, %s4661_s27, %s4667_s21, %s4460_s1, %s4460_s1, %s4461_s25  }
  0x70   : > { %s4462_s13 = smov [#allocation6]   ;;  %s4463_s18 = smov [#allocation7]  }
  0x71   : > { %s314_s5 = sshll.u32 %s4462_s13, 4  ;;  %s325_s30 = sshll.u32 %s4463_s18, 4  ;;  %s315_s5 = int_to_ptr.vmem [resolvable:$true] %s314_s5  ;;  %s326_s30 = int_to_ptr.vmem [resolvable:$true] %s325_s30 }
  0x72   : > { %s4227_s12 = scalar_lea.hbm %s5354_s3, 16  ;;  %p5405_p4 = scmp.ne.s32.totalorder %s5396_s29, 0 }
  0x73   : > { %p4228_p1 = scmp.ne.s32.totalorder %s5354_s3, %s4227_s12  ;;  %p4234_p7 = scmp.lt.u32.totalorder %s4227_s12, %s5354_s3 }
  0x75   : > { %p4230_p6 = pnand %p4228_p1, %p5405_p4 }
  0x77   : > { %p4231_p8 = pneg %p4230_p6 }
  0x79   : > { %p4236_p12 = pnand %p4234_p7, %p4231_p8 }
  0x7b   : > { %4239 = shalt.err (!%p4236_p12)
}
  0x7c   : > { %s4240_s28 = scalar_lea.vmem %s315_s5, 16  ;;  %s4247_s15 = scalar_lea.vmem %s315_s5, 32 }
  0x7d   : > { %p4241_p2 = scmp.ne.s32.totalorder %s315_s5, %s4240_s28  ;;  %p4248_p11 = scmp.lt.s32.totalorder %s315_s5, %s315_s5 }
  0x7e   : > { %p4249_p13 = scmp.lt.s32.totalorder %s4247_s15, %s4240_s28 }
  0x7f   : > { %p4243_p5 = pnand %p4241_p2, %p5405_p4 }
  0x80   : > { %p4250_p0 = por %p4249_p13, %p4248_p11 }
  0x81   : > { %p4244_p3 = pneg %p4243_p5 }
  0x83   : > { %p4251_p9 = pnand %p4250_p0, %p4244_p3 }
  0x85   : > { %4254 = shalt.err (!%p4251_p9)
}
  0x86   : > { %p5406_p1 = scmp.ne.s32.totalorder %s5394_s23, 0  ;;  %s3375_s0 = sshll.u32 %s4652_s22, 8 }
  0x87   : > { %s4255_s25 = scalar_lea.hbm %s5355_s4, 128 }
  0x88   : > { %3902 = dma.hbm_to_vmem [thread:$0]  (!%p5406_p1), %s5354_s3, 16, %s315_s5, [#allocation5]  }
  0x89   : > { %p4256_p6 = scmp.ne.s32.totalorder %s5355_s4, %s4255_s25  ;;  %p4262_p7 = scmp.lt.u32.totalorder %s4255_s25, %s5355_s4 }
  0x8b   : > { %p4258_p9 = pnand %p4256_p6, %p5405_p4 }
  0x8d   : > { %p4259_p8 = pneg %p4258_p9 }
  0x8f   : > { %p4264_p12 = pnand %p4262_p7, %p4259_p8 }
  0x91   : > { %4267 = shalt.err (!%p4264_p12)
}
  0x92   : > { %s4268_s5 = scalar_lea.vmem %s326_s30, 128  ;;  %p4276_p11 = scmp.lt.s32.totalorder %s326_s30, %s326_s30 }
  0x93   : > { %p4269_p2 = scmp.ne.s32.totalorder %s326_s30, %s4268_s5  ;;  %p4277_p13 = scmp.lt.s32.totalorder %s4268_s5, %s4268_s5 }
  0x95   : > { %p4271_p5 = pnand %p4269_p2, %p5405_p4  ;;  %p4278_p0 = por %p4277_p13, %p4276_p11 }
  0x97   : > { %p4272_p3 = pneg %p4271_p5 }
  0x99   : > { %p4279_p10 = pnand %p4278_p0, %p4272_p3 }
  0x9b   : > { %4282 = shalt.err (!%p4279_p10)
}
  0x9c   : > { %3905 = dma.hbm_to_vmem [thread:$0]  (!%p5406_p1), %s5355_s4, 128, %s326_s30, [#allocation8]  }
  0x9d   : > { %s3563_s15 = sshll.u32 %s4453_s16, 12  ;;  %s383_s1 = scalar_lea.vmem [#allocation10], %s3375_s0 }
  0x9e   : > { %s4738_s11 = scalar_lea.hbm %s5357_s6, %s3563_s15  ;;  %s390_s25 = sshll.u32 %s383_s1, 4  ;;  %s4740_s25 = int_to_ptr.vmem [resolvable:$true] %s390_s25 }
  0x9f   : > { %s4283_s13 = scalar_lea.hbm %s4738_s11, 4096  ;;  %p5407_p6 = scmp.ne.s32.totalorder %s5404_s24, 0 }
  0xa0   : > { %p4284_p10 = scmp.ne.s32.totalorder %s4738_s11, %s4283_s13  ;;  %s4288_s10 = scalar_lea.hbm %s5357_s6, 8192 }
  0xa1   : > { %p4289_p7 = scmp.lt.u32.totalorder %s4738_s11, %s5357_s6  ;;  %p4290_p12 = scmp.lt.u32.totalorder %s4288_s10, %s4283_s13 }
  0xa2   : > { %p4286_p9 = pnand %p4284_p10, %p5407_p6  ;;  %p4292_p5 = scmp.lt.u32.totalorder %s4283_s13, %s4738_s11 }
  0xa3   : > { %p4291_p2 = por %p4290_p12, %p4289_p7 }
  0xa4   : > { %p4287_p8 = pneg %p4286_p9 }
  0xa5   : > { %p4293_p3 = por %p4292_p5, %p4291_p2 }
  0xa7   : > { %p4294_p11 = pnand %p4293_p3, %p4287_p8 }
  0xa9   : > { %4297 = shalt.err (!%p4294_p11)
}
  0xaa   : > { %s4298_s0 = scalar_lea.vmem %s4740_s25, 4096  ;;  %s4464_s2 = smov [#allocation10]  }
  0xab   : > { %p4299_p13 = scmp.ne.s32.totalorder %s4740_s25, %s4298_s0  ;;  %s4303_s28 = sshll.u32 %s4464_s2, 4  ;;  %s4304_s28 = int_to_ptr.vmem [resolvable:$false] %s4303_s28 }
  0xac   : > { %s4305_s15 = scalar_lea.vmem %s4304_s28, 8192  ;;  %p4306_p9 = scmp.lt.s32.totalorder %s4740_s25, %s4304_s28 }
  0xad   : > { %p4301_p0 = pnand %p4299_p13, %p5407_p6  ;;  %p4307_p1 = scmp.lt.s32.totalorder %s4305_s15, %s4298_s0 }
  0xaf   : > { %p4302_p10 = pneg %p4301_p0  ;;  %p4308_p7 = por %p4307_p1, %p4306_p9 }
  0xb1   : > { %p4309_p12 = pnand %p4308_p7, %p4302_p10 }
  0xb3   : > { %4312 = shalt.err (!%p4309_p12)
}
  0xb4   : > { %p5408_p8 = scmp.ne.s32.totalorder %s5403_s17, 0  ;;  %s5409_s26 = smov 4  }
  0xb5   : > { %s5410_s27 = smov 64   ;;  %s4465_s1 = smov [#allocation12]  }
  0xb6   : > { %3918 = dma.hbm_to_vmem [thread:$0]  (!%p5408_p8), %s4738_s11, 4096, %s4740_s25, %s4667_s21, %s5410_s27, %s5410_s27, %s5409_s26  }
  0xb7   : > { %s336_s13 = sshll.u32 %s4465_s1, 4  ;;  %s4466_s30 = smov [#allocation13]   ;;  %s337_s13 = int_to_ptr.vmem [resolvable:$true] %s336_s13 }
  0xb8   : > { %s347_s18 = sshll.u32 %s4466_s30, 4  ;;  %s4313_s5 = scalar_lea.hbm %s5359_s8, 16  ;;  %s348_s18 = int_to_ptr.vmem [resolvable:$true] %s347_s18 }
  0xb9   : > { %p4314_p1 = scmp.ne.s32.totalorder %s5359_s8, %s4313_s5  ;;  %p4320_p3 = scmp.lt.u32.totalorder %s4313_s5, %s5359_s8 }
  0xbb   : > { %p4316_p2 = pnand %p4314_p1, %p5405_p4 }
  0xbd   : > { %p4317_p5 = pneg %p4316_p2 }
  0xbf   : > { %p4322_p11 = pnand %p4320_p3, %p4317_p5 }
  0xc1   : > { %4325 = shalt.err (!%p4322_p11)
}
  0xc2   : > { %s4326_s11 = scalar_lea.vmem %s337_s13, 16  ;;  %s4333_s25 = scalar_lea.vmem %s337_s13, 32 }
  0xc3   : > { %p4327_p13 = scmp.ne.s32.totalorder %s337_s13, %s4326_s11  ;;  %p4334_p9 = scmp.lt.s32.totalorder %s337_s13, %s337_s13 }
  0xc4   : > { %p4335_p7 = scmp.lt.s32.totalorder %s4333_s25, %s4326_s11 }
  0xc5   : > { %p4329_p0 = pnand %p4327_p13, %p5405_p4 }
  0xc6   : > { %p4336_p12 = por %p4335_p7, %p4334_p9 }
  0xc7   : > { %p4330_p10 = pneg %p4329_p0 }
  0xc9   : > { %p4337_p8 = pnand %p4336_p12, %p4330_p10 }
  0xcb   : > { %4340 = shalt.err (!%p4337_p8)
}
  0xcc   : > { %p5411_p1 = scmp.ne.s32.totalorder %s5394_s23, 0  ;;  %s3860_s1 = smul.u32 13, %s4652_s22 }
  0xcd   : > { %s4341_s12 = scalar_lea.hbm %s5360_s9, 16 }
  0xce   : > { %3908 = dma.hbm_to_vmem [thread:$0]  (!%p5411_p1), %s5359_s8, 16, %s337_s13, [#allocation5]  }
  0xcf   : > { %p4342_p2 = scmp.ne.s32.totalorder %s5360_s9, %s4341_s12  ;;  %p4348_p3 = scmp.lt.u32.totalorder %s4341_s12, %s5360_s9 }
  0xd1   : > { %p4344_p8 = pnand %p4342_p2, %p5405_p4 }
  0xd3   : > { %p4345_p5 = pneg %p4344_p8 }
  0xd5   : > { %p4350_p11 = pnand %p4348_p3, %p4345_p5 }
  0xd7   : > { %4353 = shalt.err (!%p4350_p11)
}
  0xd8   : > { %s4354_s13 = scalar_lea.vmem %s348_s18, 16  ;;  %s4361_s22 = scalar_lea.vmem %s348_s18, 32 }
  0xd9   : > { %p4355_p13 = scmp.ne.s32.totalorder %s348_s18, %s4354_s13  ;;  %p4362_p9 = scmp.lt.s32.totalorder %s348_s18, %s348_s18 }
  0xda   : > { %p4363_p7 = scmp.lt.s32.totalorder %s4361_s22, %s4354_s13 }
  0xdb   : > { %p4357_p0 = pnand %p4355_p13, %p5405_p4 }
  0xdc   : > { %p4364_p12 = por %p4363_p7, %p4362_p9 }
  0xdd   : > { %p4358_p10 = pneg %p4357_p0 }
  0xdf   : > { %p4365_p6 = pnand %p4364_p12, %p4358_p10 }
  0xe1   : > { %4368 = shalt.err (!%p4365_p6)
}
  0xe2   : > { %3911 = dma.hbm_to_vmem [thread:$0]  (!%p5411_p1), %s5360_s9, 16, %s348_s18, [#allocation8]  }
  0xe3   : > { %s3861_s25 = smul.u32 208, %s4453_s16  ;;  %s404_s26 = scalar_lea.vmem [#allocation11], %s3860_s1 }
  0xe4   : > { %s412_s27 = sshll.u32 %s404_s26, 4  ;;  %p5412_p2 = scmp.ne.s32.totalorder %s5404_s24, 0  ;;  %s413_s27 = int_to_ptr.vmem [resolvable:$true] %s412_s27 }
  0xe5   : > { %s410_s10 = scalar_lea.hbm %s5358_s7, %s3861_s25  ;;  %s4374_s0 = scalar_lea.hbm %s5358_s7, 416 }
  0xe6   : > { %s4369_s12 = scalar_lea.hbm %s410_s10, 208  ;;  %p4375_p1 = scmp.lt.u32.totalorder %s410_s10, %s5358_s7 }
  0xe7   : > { %p4370_p4 = scmp.ne.s32.totalorder %s410_s10, %s4369_s12  ;;  %p4376_p5 = scmp.lt.u32.totalorder %s4374_s0, %s4369_s12 }
  0xe8   : > { %p4378_p11 = scmp.lt.u32.totalorder %s4369_s12, %s410_s10 }
  0xe9   : > { %p4372_p6 = pnand %p4370_p4, %p5412_p2  ;;  %p4377_p3 = por %p4376_p5, %p4375_p1 }
  0xeb   : > { %p4373_p8 = pneg %p4372_p6  ;;  %p4379_p13 = por %p4378_p11, %p4377_p3 }
  0xed   : > { %p4380_p0 = pnand %p4379_p13, %p4373_p8 }
  0xef   : > { %4383 = shalt.err (!%p4380_p0)
}
  0xf0   : > { %s4384_s16 = scalar_lea.vmem %s413_s27, 208  ;;  %s4467_s18 = smov [#allocation11]  }
  0xf1   : > { %p4385_p10 = scmp.ne.s32.totalorder %s413_s27, %s4384_s16  ;;  %s4389_s1 = sshll.u32 %s4467_s18, 4  ;;  %s4390_s1 = int_to_ptr.vmem [resolvable:$false] %s4389_s1 }
  0xf2   : > { %s4391_s13 = scalar_lea.vmem %s4390_s1, 416  ;;  %p4392_p12 = scmp.lt.s32.totalorder %s413_s27, %s4390_s1 }
  0xf3   : > { %p4387_p9 = pnand %p4385_p10, %p5412_p2  ;;  %p4393_p4 = scmp.lt.s32.totalorder %s4391_s13, %s4384_s16 }
  0xf5   : > { %p4388_p7 = pneg %p4387_p9  ;;  %p4394_p6 = por %p4393_p4, %p4392_p12 }
  0xf7   : > { %p4395_p1 = pnand %p4394_p6, %p4388_p7 }
  0xf9   : > { %4398 = shalt.err (!%p4395_p1)
}
  0xfa   : > { %p5413_p5 = scmp.ne.s32.totalorder %s5403_s17, 0  ;;  %p5414_p8 = scmp.ne.s32.totalorder %s5393_s20, 0 }
  0xfb   : > { %p5415_p3 = scmp.eq.s32.totalorder (!%p5414_p8), %s4551_s19, 0 }
  0xfc   : > { %3921 = dma.hbm_to_vmem [thread:$0]  (!%p5413_p5), %s410_s10, 208, %s413_s27, %s4667_s21  }
  0xfd   : > { %421 = sbr.rel (%p5414_p8) target bundleno = 4953 (0x1359), region = 60 }
 0x104   : > { %4416 = dma.done.wait (%p5415_p3), [#allocation3], 6144   ;;  %p5416_p2 = pmov %p5415_p3 }
 0x106   : > { %4418 = vsyncadd (%p5416_p2), [#allocation3], 4294961152  ;;  %p5417_p11 = pmov %p5416_p2 }
 0x107   : > { %p5418_p13 = pmov %p5416_p2 }
 0x108   : > { %4420 = dma.done.wait (%p5417_p11), [#allocation5], 32  }
 0x109   : > { %4422 = vsyncadd (%p5418_p13), [#allocation5], 4294967264  ;;  %p5419_p0 = pmov %p5416_p2 }
 0x10b   : > { %4424 = dma.done.wait (%p5419_p0), [#allocation8], 128   ;;  %p5420_p10 = pmov %p5419_p0 }
 0x10c   : > { %s5421_s20 = sld [smem:[#allocation23_spill]]  ;;  %s439_s17 = sand.u32 1, %s4551_s19  }
 0x10d   : > { %4426 = vsyncadd (%p5420_p10), [#allocation8], 4294967168  ;;  %s441_s21 = sand.u32 1, %s4445_s14   ;;  %s440_s22 = scalar_lea.sflag [#allocation3], %s439_s17 }
 0x10e   : > { %s3384_s24 = sshll.u32 %s441_s21, 9 }
 0x10f   : > { %s4837_s15 = scalar_lea.vmem [#allocation9], %s3384_s24 }
 0x112   : > { %p5422_p9 = scmp.ne.s32.totalorder %s5421_s20, 0 }
 0x114   : > { %4428 = dma.done.wait (%p5422_p9), %s440_s22, 12496  }
 0x115   : > { %4430 = vsyncadd (%p5422_p9), %s440_s22, 4294954800  ;;  %s3385_s11 = sshll.u32 %s441_s21, 8  ;;  %s3862_s25 = smul.u32 13, %s441_s21 }
 0x116   : > { %s4843_s26 = scalar_lea.vmem [#allocation10], %s3385_s11  ;;  %p5423_p7 = pmov %p5419_p0 }
 0x117   : > { %s4845_s27 = scalar_lea.vmem [#allocation11], %s3862_s25 }
 0x118   : > { %4432 = dma.done.wait (%p5423_p7), [#allocation5], 16   ;;  %p5424_p12 = pmov %p5419_p0 }
 0x119   : > { %p5425_p4 = pmov %p5419_p0 }
 0x11a   : > { %4434 = vsyncadd (%p5424_p12), [#allocation5], 4294967280 }
 0x11b   : > { %4436 = dma.done.wait (%p5425_p4), [#allocation8], 16   ;;  %p5426_p6 = pmov %p5419_p0 }
 0x11c   : > { %p5427_p1 = scmp.ne.s32.totalorder %s4551_s19, 0 }
 0x11d   : > { %4438 = vsyncadd (%p5426_p6), [#allocation8], 4294967280  ;;  %v3984_v0 = vld [vmem:[#allocation2 + $0x40] sm:$0xff] (!%p5427_p1)   ;;  %v3988_v4 = vld [vmem:[#allocation2 + $0x48] sm:$0xff] (!%p5427_p1)   ;;  %s5428_s10 = sld [smem:[#allocation24_spill]] (!%p5427_p1)  ;;  %vm1045_vm0 = vcmask (!%p5427_p1), 1040384  }
 0x11e   : > { %515 = sbr.rel (%p5427_p1) target bundleno = 576 (0x240), region = 100  ;;  %v3985_v1 = vld [vmem:[#allocation2] sm:$0xff] (!%p5427_p1)   ;;  %3564 = vmatprep.subr.bf16.mxu0 (!%p5427_p1), %v3984_v0  ;;  %v3989_v5 = vld [vmem:[#allocation2 + $0x8] sm:$0xff] (!%p5427_p1)   ;;  %v3992_v8 = vld [vmem:[#allocation2 + $0x50] sm:$0xff] (!%p5427_p1)   ;;  %vm1048_vm1 = vcmask (!%p5427_p1), 1044480   ;;  %s5429_s21 = sld [smem:[#allocation28_spill]] (!%p5427_p1) }
 0x11f   : > { %v3986_v2 = vld [vmem:[#allocation2 + $0xc0] sm:$0xff] (!%p5427_p1)   ;;  %3565 = vmatpush3.bf16.msra.mxu0 (!%p5427_p1), %v3985_v1  ;;  %v3990_v6 = vld [vmem:[#allocation2 + $0xc8] sm:$0xff] (!%p5427_p1)   ;;  %v3993_v9 = vld [vmem:[#allocation2 + $0x10] sm:$0xff] (!%p5427_p1)  }
 0x120   : > { %v3987_v3 = vld [vmem:[#allocation2 + $0x80] sm:$0xff] (!%p5427_p1)   ;;  %3586 = vmatprep.subr.bf16.mxu1 (!%p5427_p1), %v3986_v2  ;;  %3566 = vmatprep.subr.bf16.mxu0 (!%p5427_p1), %v3988_v4  ;;  %v3991_v7 = vld [vmem:[#allocation2 + $0x88] sm:$0xff] (!%p5427_p1)   ;;  %v3994_v10 = vld [vmem:[#allocation2 + $0xd0] sm:$0xff] (!%p5427_p1)  }
 0x121   : > { %3587 = vmatpush3.bf16.msra.mxu1 (!%p5427_p1), %v3987_v3  ;;  %v3995_v11 = vld [vmem:[#allocation2 + $0x90] sm:$0xff] (!%p5427_p1)   ;;  %v3996_v12 = vld [vmem:[#allocation2 + $0x58] sm:$0xff] (!%p5427_p1)   ;;  %v4000_v16 = vld [vmem:[#allocation2 + $0x60] sm:$0xff] (!%p5427_p1)  }
 0x122   : > { %3588 = vmatprep.subr.bf16.mxu1 (!%p5427_p1), %v3990_v6  ;;  %v3997_v13 = vld [vmem:[#allocation2 + $0x18] sm:$0xff] (!%p5427_p1)   ;;  %v4001_v17 = vld [vmem:[#allocation2 + $0x20] sm:$0xff] (!%p5427_p1)   ;;  %v4004_v20 = vld [vmem:[#allocation2 + $0x68] sm:$0xff] (!%p5427_p1)  }
 0x123   : > { %3567 = vmatpush3.bf16.msra.mxu0 (!%p5427_p1), %v3989_v5  ;;  %v3998_v14 = vld [vmem:[#allocation2 + $0xd8] sm:$0xff] (!%p5427_p1)   ;;  %v4002_v18 = vld [vmem:[#allocation2 + $0xe0] sm:$0xff] (!%p5427_p1)   ;;  %v4005_v21 = vld [vmem:[#allocation2 + $0x28] sm:$0xff] (!%p5427_p1)  }
 0x124   : > { %3568 = vmatprep.subr.bf16.mxu0 (!%p5427_p1), %v3992_v8  ;;  %v3999_v15 = vld [vmem:[#allocation2 + $0x98] sm:$0xff] (!%p5427_p1)   ;;  %v4003_v19 = vld [vmem:[#allocation2 + $0xa0] sm:$0xff] (!%p5427_p1)   ;;  %v4006_v22 = vld [vmem:[#allocation2 + $0xe8] sm:$0xff] (!%p5427_p1)  }
 0x125   : > { %3589 = vmatpush3.bf16.msra.mxu1 %v3991_v7  ;;  %v4007_v23 = vld [vmem:[#allocation2 + $0xa8] sm:$0xff]   ;;  %v4008_v24 = vld [vmem:[#allocation2 + $0x70] sm:$0xff]   ;;  %v4012_v28 = vld [vmem:[#allocation2 + $0x78] sm:$0xff]  }
 0x126   : > { %3590 = vmatprep.subr.bf16.mxu1 %v3994_v10  ;;  %v4009_v25 = vld [vmem:[#allocation2 + $0x30] sm:$0xff]   ;;  %v4013_v29 = vld [vmem:[#allocation2 + $0x38] sm:$0xff]   ;;  %v517_v31 = vld [vmem:[%s5428_s10 + $0x8] sm:$0xff] }
 0x127   : > { %3569 = vmatpush3.bf16.msra.mxu0 %v3993_v9  ;;  %v4010_v26 = vld [vmem:[#allocation2 + $0xf0] sm:$0xff]   ;;  %v4014_v30 = vld [vmem:[#allocation2 + $0xf8] sm:$0xff]   ;;  %v523_v32 = vpack.c.bf16 %v517_v31, %v517_v31  ;;  %v516_v34 = vld [vmem:[%s5428_s10] sm:$0xff] }
 0x128   : > { %3570 = vmatprep.subr.bf16.mxu0 %v3996_v12  ;;  %v4011_v27 = vld [vmem:[#allocation2 + $0xb0] sm:$0xff]   ;;  %v4015_v33 = vld [vmem:[#allocation2 + $0xb8] sm:$0xff]   ;;  %v522_v35 = vpack.c.bf16 %v516_v34, %v516_v34  ;;  %v4016_v36 = vld [vmem:[#allocation2 + $0x140] sm:$0xff]  }
 0x129   : > { %3591 = vmatpush3.bf16.msra.mxu1 %v3995_v11  ;;  %v519_v37 = vld [vmem:[%s5428_s10 + $0x18] sm:$0xff]  ;;  %951 = vmatprep.mubr.bf16.mxu0 %v523_v32  ;;  %v4017_v39 = vld [vmem:[#allocation2 + $0x100] sm:$0xff]   ;;  %v518_v40 = vld [vmem:[%s5428_s10 + $0x10] sm:$0xff] }
 0x12a   : > { %3592 = vmatprep.subr.bf16.mxu1 %v3998_v14  ;;  %v525_v38 = vpack.c.bf16 %v519_v37, %v519_v37  ;;  %v524_v41 = vpack.c.bf16 %v518_v40, %v518_v40  ;;  %v4018_v42 = vld [vmem:[#allocation2 + $0x148] sm:$0xff]   ;;  %v4020_v44 = vld [vmem:[#allocation2 + $0x150] sm:$0xff]   ;;  %v4022_v46 = vld [vmem:[#allocation2 + $0x158] sm:$0xff]  }
 0x12b   : > { %3571 = vmatpush3.bf16.msra.mxu0 %v3997_v13  ;;  %v4019_v43 = vld [vmem:[#allocation2 + $0x108] sm:$0xff]   ;;  %v4021_v45 = vld [vmem:[#allocation2 + $0x110] sm:$0xff]   ;;  %v4023_v47 = vld [vmem:[#allocation2 + $0x118] sm:$0xff]  }
 0x12c   : > { %3572 = vmatprep.subr.bf16.mxu0 %v4000_v16  ;;  %991 = vmatprep.mubr.bf16.mxu1 %v525_v38  ;;  %v4024_v48 = vld [vmem:[#allocation2 + $0x160] sm:$0xff]   ;;  %v4026_v50 = vld [vmem:[#allocation2 + $0x168] sm:$0xff]   ;;  %v4028_v54 = vld [vmem:[#allocation2 + $0x170] sm:$0xff]  }
 0x12d   : > { %3593 = vmatpush3.bf16.msra.mxu1 %v3999_v15  ;;  %v4025_v49 = vld [vmem:[#allocation2 + $0x120] sm:$0xff]   ;;  %v521_v51 = vld [vmem:[%s5428_s10 + $0x28] sm:$0xff]  ;;  %v4029_v55 = vld [vmem:[#allocation2 + $0x130] sm:$0xff]  }
 0x12e   : > { %3594 = vmatprep.subr.bf16.mxu1 %v4002_v18  ;;  %v527_v52 = vpack.c.bf16 %v521_v51, %v521_v51  ;;  %v4027_v53 = vld [vmem:[#allocation2 + $0x128] sm:$0xff]   ;;  %v4030_v56 = vld [vmem:[#allocation2 + $0x178] sm:$0xff]   ;;  %v520_v58 = vld [vmem:[%s5428_s10 + $0x20] sm:$0xff] }
 0x12f   : > { %3573 = vmatpush3.bf16.msra.mxu0 %v4001_v17  ;;  %v4031_v57 = vld [vmem:[#allocation2 + $0x138] sm:$0xff]   ;;  %v526_v59 = vpack.c.bf16 %v520_v58, %v520_v58  ;;  %v3389_v61 = vld [vmem:[#allocation4] ss:$0 sm:$0xff]  ;;  %v1041_v15 = vld [vmem:[#allocation6] sm:$0x1] }
 0x130   : > { %3574 = vmatprep.subr.bf16.mxu0 %v4004_v20  ;;  %v1042_v17 = vld [vmem:[#allocation7] sm:$0x1f] }
 0x131   : > { %3595 = vmatpush3.bf16.msra.mxu1 %v4003_v19 }
 0x132   : > { %3596 = vmatprep.subr.bf16.mxu1 %v4006_v22 }
 0x133   : > { %3575 = vmatpush3.bf16.msra.mxu0 %v4005_v21 }
 0x134   : > { %3576 = vmatprep.subr.bf16.mxu0 %v4008_v24 }
 0x135   : > { %3597 = vmatpush3.bf16.msra.mxu1 %v4007_v23 }
 0x136   : > { %3598 = vmatprep.subr.bf16.mxu1 %v4010_v26 }
 0x137   : > { %3577 = vmatpush3.bf16.msra.mxu0 %v4009_v25 }
 0x138   : > { %3578 = vmatprep.subr.bf16.mxu0 %v4012_v28 }
 0x139   : > { %3599 = vmatpush3.bf16.msra.mxu1 %v4011_v27 }
 0x13a   : > { %3600 = vmatprep.subr.bf16.mxu1 %v4014_v30 }
 0x13b   : > { %3579 = vmatpush3.bf16.msra.mxu0 %v4013_v29 }
 0x13c   : > { %3608 = vmatprep.subr.bf16.mxu0 %v4016_v36 }
 0x13d   : > { %3601 = vmatpush3.bf16.msra.mxu1 %v4015_v33 }
 0x13e   : > { %952 = vmatmul.mubr.bf16.vlgmr.msra.gmra.mrb[0].mxu0 %v522_v35 }
 0x13f   : > { %3609 = vmatpush3.bf16.msra.mxu0 %v4017_v39  ;;  %1031 = vmatprep.mubr.bf16.mxu0 %v527_v52 }
 0x140   : > { %992 = vmatmul.mubr.bf16.vlgmr.msra.gmra.mrb[0].mxu1 %v524_v41  ;;  %3610 = vmatprep.subr.bf16.mxu0 %v4018_v42 }
 0x143   : > { %3611 = vmatpush3.bf16.msra.mxu0 %v4019_v43 }
 0x144   : > { %3612 = vmatprep.subr.bf16.mxu0 %v4020_v44 }
 0x147   : > { %3613 = vmatpush3.bf16.msra.mxu0 %v4021_v45 }
 0x148   : > { %3614 = vmatprep.subr.bf16.mxu0 %v4022_v46 }
 0x14b   : > { %3615 = vmatpush3.bf16.msra.mxu0 %v4023_v47 }
 0x14c   : > { %3616 = vmatprep.subr.bf16.mxu0 %v4024_v48 }
 0x14f   : > { %3617 = vmatpush3.bf16.msra.mxu0 %v4025_v49 }
 0x150   : > { %3618 = vmatprep.subr.bf16.mxu0 %v4026_v50 }
 0x153   : > { %3619 = vmatpush3.bf16.msra.mxu0 %v4027_v53 }
 0x154   : > { %3620 = vmatprep.subr.bf16.mxu0 %v4028_v54 }
 0x157   : > { %3621 = vmatpush3.bf16.msra.mxu0 %v4029_v55 }
 0x158   : > { %3622 = vmatprep.subr.bf16.mxu0 %v4030_v56 }
 0x15b   : > { %3623 = vmatpush3.bf16.msra.mxu0 %v4031_v57 }
 0x15e   : > { %1032 = vmatmul.mubr.bf16.vlgmr.msra.gmra.mrb[4].mxu0 %v526_v59 }
 0x211   : > { %v3580_v60 = vpop.f32.mrb[0].mxu0 }
 0x212   : > { %v3581_v62 = vpop.f32.mrb[1].mxu0 }
 0x213   : > { %v3582_v63 = vadd.f32 %v3581_v62, %v3580_v60  ;;  %v3583_v0 = vpop.f32.mrb[2].mxu0  ;;  %v3602_v1 = vpop.f32.mrb[0].mxu1 }
 0x214   : > { %v3584_v2 = vpop.f32.mrb[3].mxu0  ;;  %v3603_v4 = vpop.f32.mrb[1].mxu1 }
 0x215   : > { %v954_v3 = vadd.f32 %v3582_v63, %v3389_v61  ;;  %v3604_v5 = vadd.f32 %v3603_v4, %v3602_v1  ;;  %v3605_v6 = vpop.f32.mrb[2].mxu1 }
 0x216   : > { %v3606_v7 = vpop.f32.mrb[3].mxu1 }
 0x217   : > { %v994_v8 = vadd.f32 %v3604_v5, %v954_v3 }
 0x231   : > { %v3624_v9 = vpop.f32.mrb[4].mxu0 }
 0x232   : > { %v3625_v10 = vpop.f32.mrb[5].mxu0 }
 0x233   : > { %v3626_v11 = vadd.f32 %v3625_v10, %v3624_v9  ;;  %v3627_v12 = vpop.f32.mrb[6].mxu0 }
 0x234   : > { %v3628_v13 = vpop.f32.mrb[7].mxu0 }
 0x235   : > { %v1034_v14 = vadd.f32 %v3626_v11, %v994_v8 }
 0x237   : > { %v1040_v16 = vcombine.high %v1034_v14, %v1034_v14  ;;  %v1043_v18 = vrot.slane %v1034_v14, 7 }
 0x239   : > { %v1046_v19 = vsel %vm1045_vm0, %v1041_v15, %v1043_v18  ;;  %v1050_v20 = vrot.slane %v1040_v16, 7 }
 0x23a   : > { %v1047_v21 = vadd.f32 %v1046_v19, %v1042_v17 }
 0x23b   : > { %v1052_v22 = vsel %vm1045_vm0, %v1041_v15, %v1050_v20 }
 0x23c   : > { %v1049_v23 = vsel %vm1048_vm1, %v1047_v21, 0.0  ;;  %v1053_v24 = vadd.f32 %v1052_v22, %v1042_v17 }
 0x23d   : > { %1055 = vst [vmem:[%s5429_s21] sm:$0xff] %v1049_v23 }
 0x23e   : > { %v1054_v25 = vsel %vm1048_vm1, %v1053_v24, 0.0 }
 0x23f   : > { %1056 = vst [vmem:[%s5429_s21 + $0x8] sm:$0xff] %v1054_v25 }
 0x240 PF: > { %s5430_s29 = sld [smem:[#allocation28_spill]]  ;;  %v1100_v28 = vld [vmem:[%s4837_s15] sm:$0xff]  ;;  %v1101_v30 = vld [vmem:[%s4837_s15 + $0x8] sm:$0xf]  ;;  %v4468_v32 = vmov 0.0   ;;  %v4469_v9 = vmov 0  }
 0x241   : > { %v1102_v29 = vld [vmem:[%s4837_s15 + $0x20] sm:$0xff]  ;;  %3724 = vmatprep.subr.bf16.mxu1 %v4468_v32  ;;  %v1103_v34 = vld [vmem:[%s4837_s15 + $0x28] sm:$0xf]  ;;  %1310 = vmatprep.mubr.bf16.mxu0 %v4469_v9  ;;  %vm4470_vm2 = vmmov 0   ;;  %vm1372_vm3 = vcmask 261120   ;;  %vm1497_vm4 = vcmask 1043456  }
 0x242   : > { %v3441_v31 = vcombine.high %v1100_v28, %v1102_v29  ;;  %v3440_v33 = vcombine.low %v1100_v28, %v1102_v29  ;;  %v1104_v35 = vld [vmem:[%s4837_s15 + $0x40] sm:$0xff]  ;;  %v3442_v37 = vcombine.low %v1101_v30, %v1103_v34  ;;  %v1105_v47 = vld [vmem:[%s4837_s15 + $0x48] sm:$0xf]  ;;  %3740 = vmatprep.mubr.msk.bf16.mxu1 %vm4470_vm2, %v4468_v32  ;;  %vm1469_vm6 = vcmask 64512   ;;  %s4472_s23 = smov 96   ;;  %s4473_s5 = smov 64  }
 0x243   : > { %v1106_v36 = vld [vmem:[%s4837_s15 + $0x60] sm:$0xff]  ;;  %v1107_v48 = vld [vmem:[%s4837_s15 + $0x68] sm:$0xf]  ;;  %s4474_s0 = smov 32   ;;  %vm2291_vm7 = vcmask 523264   ;;  %vm2294_vm8 = vcmask 785408  }
 0x244   : > { %v3444_v38 = vcombine.high %v1104_v35, %v1106_v36  ;;  %1278 = vmatprep.subr.bf16.mxu0 %v3441_v31  ;;  %3725 = vmatpush3.bf16.msra.mxu1 %v3442_v37  ;;  %v3443_v49 = vcombine.low %v1104_v35, %v1106_v36  ;;  %v3445_v50 = vcombine.low %v1105_v47, %v1107_v48  ;;  %v1108_v51 = vld [vmem:[%s4837_s15 + $0x80] sm:$0xff]  ;;  %v1109_v54 = vld [vmem:[%s4837_s15 + $0x88] sm:$0xf]  ;;  %p3556_p5 = scmp.ne.s32.totalorder %s4551_s19, 1 }
 0x245   : > { %1279 = vmatpush1.bf16.msra.mxu0 %v3440_v33  ;;  %3726 = vmatprep.subr.bf16.mxu1 %v4468_v32  ;;  %v1110_v52 = vld [vmem:[%s4837_s15 + $0xa0] sm:$0xff]  ;;  %v1111_v55 = vld [vmem:[%s4837_s15 + $0xa8] sm:$0xf] }
 0x246   : > { %v1057_v26 = vld [vmem:[%s5430_s29] sm:$0xff]  ;;  %v1058_v27 = vld [vmem:[%s5430_s29 + $0x8] sm:$0xff]  ;;  %1280 = vmatprep.subr.bf16.mxu0 %v3444_v38  ;;  %v3447_v53 = vcombine.high %v1108_v51, %v1110_v52  ;;  %v3446_v56 = vcombine.low %v1108_v51, %v1110_v52  ;;  %v3448_v57 = vcombine.low %v1109_v54, %v1111_v55  ;;  %v1113_v61 = vld [vmem:[%s4837_s15 + $0xc8] sm:$0xf] }
 0x247   : > { %1061 = vadd.xlane.f32.xlu0 %v1057_v26  ;;  %v1112_v58 = vld [vmem:[%s4837_s15 + $0xc0] sm:$0xff]  ;;  %v1115_v62 = vld [vmem:[%s4837_s15 + $0xe8] sm:$0xf] }
 0x248   : > { %3727 = vmatpush3.bf16.msra.mxu1 %v3445_v50  ;;  %v1114_v59 = vld [vmem:[%s4837_s15 + $0xe0] sm:$0xff]  ;;  %v3451_v0 = vcombine.low %v1113_v61, %v1115_v62  ;;  %v1117_v3 = vld [vmem:[%s4837_s15 + $0x108] sm:$0xf] }
 0x249   : > { %1281 = vmatpush1.bf16.msra.mxu0 %v3443_v49  ;;  %3728 = vmatprep.subr.bf16.mxu1 %v4468_v32  ;;  %v3450_v60 = vcombine.high %v1112_v58, %v1114_v59  ;;  %v3449_v63 = vcombine.low %v1112_v58, %v1114_v59  ;;  %v1116_v1 = vld [vmem:[%s4837_s15 + $0x100] sm:$0xff]  ;;  %v1119_v6 = vld [vmem:[%s4837_s15 + $0x128] sm:$0xf] }
 0x24a   : > { %1282 = vmatprep.subr.bf16.mxu0 %v3447_v53  ;;  %v1118_v2 = vld [vmem:[%s4837_s15 + $0x120] sm:$0xff]  ;;  %v3454_v10 = vcombine.low %v1117_v3, %v1119_v6  ;;  %v1121_v12 = vld [vmem:[%s4837_s15 + $0x148] sm:$0xf] }
 0x24b   : > { %1063 = vadd.xlane.f32.xlu0 %v1058_v27  ;;  %v3453_v4 = vcombine.high %v1116_v1, %v1118_v2  ;;  %v3452_v5 = vcombine.low %v1116_v1, %v1118_v2  ;;  %v1120_v7 = vld [vmem:[%s4837_s15 + $0x140] sm:$0xff]  ;;  %v1123_v13 = vld [vmem:[%s4837_s15 + $0x168] sm:$0xf] }
 0x24c   : > { %3729 = vmatpush3.bf16.msra.mxu1 %v3448_v57  ;;  %v1122_v8 = vld [vmem:[%s4837_s15 + $0x160] sm:$0xff]  ;;  %v3457_v17 = vcombine.low %v1121_v12, %v1123_v13  ;;  %v1125_v19 = vld [vmem:[%s4837_s15 + $0x188] sm:$0xf] }
 0x24d   : > { %1283 = vmatpush1.bf16.msra.mxu0 %v3446_v56  ;;  %3730 = vmatprep.subr.bf16.mxu1 %v4468_v32  ;;  %v3456_v11 = vcombine.high %v1120_v7, %v1122_v8  ;;  %v1124_v14 = vld [vmem:[%s4837_s15 + $0x180] sm:$0xff]  ;;  %v3455_v16 = vcombine.low %v1120_v7, %v1122_v8  ;;  %v1127_v20 = vld [vmem:[%s4837_s15 + $0x1a8] sm:$0xf] }
 0x24e   : > { %1284 = vmatprep.subr.bf16.mxu0 %v3450_v60  ;;  %v1126_v15 = vld [vmem:[%s4837_s15 + $0x1a0] sm:$0xff]  ;;  %v3460_v24 = vcombine.low %v1125_v19, %v1127_v20 }
 0x24f   : > { %v3459_v18 = vcombine.high %v1124_v14, %v1126_v15  ;;  %v1128_v21 = vld [vmem:[%s4837_s15 + $0x1c0] sm:$0xff]  ;;  %v3458_v23 = vcombine.low %v1124_v14, %v1126_v15 }
 0x250   : > { %3731 = vmatpush3.bf16.msra.mxu1 %v3451_v0  ;;  %v1130_v22 = vld [vmem:[%s4837_s15 + $0x1e0] sm:$0xff] }
 0x251   : > { %1285 = vmatpush1.bf16.msra.mxu0 %v3449_v63  ;;  %3732 = vmatprep.subr.bf16.mxu1 %v4468_v32  ;;  %v3462_v25 = vcombine.high %v1128_v21, %v1130_v22  ;;  %v3461_v28 = vcombine.low %v1128_v21, %v1130_v22 }
 0x252   : > { %1286 = vmatprep.subr.bf16.mxu0 %v3453_v4 }
 0x254   : > { %3733 = vmatpush3.bf16.msra.mxu1 %v3454_v10 }
 0x255   : > { %1287 = vmatpush1.bf16.msra.mxu0 %v3452_v5  ;;  %3734 = vmatprep.subr.bf16.mxu1 %v4468_v32 }
 0x256   : > { %1288 = vmatprep.subr.bf16.mxu0 %v3456_v11 }
 0x258   : > { %3735 = vmatpush3.bf16.msra.mxu1 %v3457_v17  ;;  %v4471_v17 = vmov -1e+09  }
 0x259   : > { %1289 = vmatpush1.bf16.msra.mxu0 %v3455_v16  ;;  %3736 = vmatprep.subr.bf16.mxu1 %v4468_v32 }
 0x25a   : > { %1290 = vmatprep.subr.bf16.mxu0 %v3459_v18 }
 0x25c   : > { %3737 = vmatpush3.bf16.msra.mxu1 %v3460_v24 }
 0x25d   : > { %1291 = vmatpush1.bf16.msra.mxu0 %v3458_v23  ;;  %3738 = vmatprep.subr.bf16.mxu1 %v4468_v32 }
 0x25e   : > { %1292 = vmatprep.subr.bf16.mxu0 %v3462_v25 }
 0x261   : > { %1293 = vmatpush1.bf16.msra.mxu0 %v3461_v28 }
 0x262   : > { %3768 = vmatprep.subr.bf16.mxu0 %v4468_v32 }
 0x2d4   : > { %v1062_v39 = vpop.xlane.xlu0 %1061 }
 0x2d5   : > { %v1066_v40 = vmul.f32 0.0078125, %v1062_v39  ;;  %v3438_v39 = vld [vmem:[%s4845_s27] ss:$0 sm:$0xff] }
 0x2d7   : > { %v4895_v41 = vsub.f32 %v1057_v26, %v1066_v40  ;;  %v1129_v26 = vld [vmem:[%s4837_s15 + $0x1c8] sm:$0xf] }
 0x2d8   : > { %v1064_v42 = vpop.xlane.xlu0 %1063 }
 0x2d9   : > { %v1067_v43 = vmul.f32 0.0078125, %v1064_v42  ;;  %v1070_v44 = vmul.f32 %v4895_v41, %v4895_v41 }
 0x2db   : > { %v4899_v45 = vsub.f32 %v1058_v27, %v1067_v43  ;;  %1072 = vadd.xlane.f32.xlu1 %v1070_v44  ;;  %v1131_v27 = vld [vmem:[%s4837_s15 + $0x1e8] sm:$0xf]  ;;  %v3439_v44 = vld [vmem:[%s4845_s27 + $0x1] ss:$0 sm:$0xff] }
 0x2dc   : > { %v3463_v29 = vcombine.low %v1129_v26, %v1131_v27 }
 0x2dd   : > { %v1071_v46 = vmul.f32 %v4899_v45, %v4899_v45 }
 0x2de   : > { %3739 = vmatpush3.bf16.msra.mxu1 %v3463_v29 }
 0x2df   : > { %1074 = vadd.xlane.f32.xlu1 %v1071_v46  ;;  %3744 = vmatprep.subr.bf16.mxu1 %v4468_v32 }
 0x368   : > { %v1073_v30 = vpop.xlane.xlu1 %1072 }
 0x369   : > { %v1076_v31 = vmul.f32 0.0078125, %v1073_v30 }
 0x36b   : > { %v1078_v33 = vadd.f32 1e-06, %v1076_v31 }
 0x36c   : > { %v1075_v34 = vpop.xlane.xlu1 %1074 }
 0x36d   : > { %4079 = vrsqrt.f32 %v1078_v33  ;;  %v1077_v35 = vmul.f32 0.0078125, %v1075_v34 }
 0x36f   : > { %v1079_v36 = vadd.f32 1e-06, %v1077_v35 }
 0x371   : > { %4081 = vrsqrt.f32 %v1079_v36 }
 0x377   : > { %v4080_v37 = vpop.eup %4079 }
 0x378   : > { %v1082_v38 = vmul.f32 %v4080_v37, %v4895_v41  ;;  %v1135_v41 = vlaneseq }
 0x37a   : > { %v1090_v43 = vmul.f32 %v3438_v39, %v1082_v38  ;;  %v4948_v50 = vshrl.u32 %v1135_v41, 7  ;;  %v1363_v16 = vand.u32 127, %v1135_v41 }
 0x37b   : > { %v4082_v40 = vpop.eup %4081 }
 0x37c   : > { %v1083_v42 = vmul.f32 %v4082_v40, %v4899_v45  ;;  %v1098_v47 = vadd.f32 %v3439_v44, %v1090_v43  ;;  %v1141_v51 = vsub.s32 1, %v4948_v50  ;;  %v1133_v45 = vld [vmem:[%s4845_s27 + $0x2] sm:$0x7]  ;;  %v1145_v52 = vsub.s32 2, %v4948_v50 }
 0x37d   : > { %v1137_v54 = vsub.s32 0, %v4948_v50  ;;  %vm1364_vm5 = vcmp.lt.s32.totalorder %v1363_v16, 5 }
 0x37e   : > { %v1091_v46 = vmul.f32 %v3438_v39, %v1083_v42  ;;  %v1142_v53 = vrot.slane %v1133_v45, %v1141_v51  ;;  %v1146_v57 = vrot.slane %v1133_v45, %v1145_v52  ;;  %v4989_v18 = vsel %vm1364_vm5, 0.0, %v4471_v17 }
 0x37f   : > { %v1138_v2 = vrot.slane %v1133_v45, %v1137_v54 }
 0x380   : > { %v1099_v48 = vadd.f32 %v3439_v44, %v1091_v46 }
 0x382   : > { %v1132_v49 = vpack.c.bf16 %v1099_v48, %v1098_v47 }
 0x384   : > { %1311 = vmatmul.mubr.bf16.vlgmr.msra.gmra.mrb[0].mxu0 %v1132_v49  ;;  %3741 = vmatmul.mubr.bf16.vlgmr.msra.gmra.mrb[0].mxu1 %v1132_v49 }
 0x385   : > { %3746 = vmatprep.mubr.msk.bf16.mxu1 %vm4470_vm2, %v4468_v32  ;;  %3770 = vmatprep.mubr.msk.bf16.mxu0 %vm4470_vm2, %v4468_v32 }
 0x457   : > { %v1312_v55 = vpop.f32.mrb[0].mxu0  ;;  %v1355_v56 = vpop.f32.mrb[0].mxu1 }
 0x458   : > { %v1314_v58 = vpop.f32.mrb[1].mxu0  ;;  %v3742_v59 = vpop.f32.mrb[1].mxu1  ;;  %v1313_v6 = vadd.f32 %v1312_v55, %v1138_v2  ;;  %v1356_v10 = vadd.f32 %v1355_v56, %v1146_v57 }
 0x459   : > { %v1315_v60 = vadd.f32 %v1314_v58, %v1142_v53  ;;  %v1316_v61 = vpop.f32.mrb[2].mxu0  ;;  %v1358_v62 = vpop.f32.mrb[2].mxu1 }
 0x45a   : > { %v4958_v63 = vadd.f32 %v1358_v62, %v1146_v57  ;;  %v1318_v0 = vpop.f32.mrb[3].mxu0  ;;  %v3743_v1 = vpop.f32.mrb[3].mxu1  ;;  %v4969_v8 = vpack.c.bf16 %v1313_v6, %v1313_v6  ;;  %v1317_v12 = vadd.f32 %v1316_v61, %v1138_v2  ;;  %v4978_v13 = vpack.c.bf16 %v1356_v10, %v1356_v10 }
 0x45b   : > { %v4962_v3 = vpack.c.bf16 %v1315_v60, %v1315_v60  ;;  %v1319_v4 = vadd.f32 %v1318_v0, %v1142_v53 }
 0x45c   : > { %v4980_v14 = vpack.c.bf16 %v1317_v12, %v1317_v12  ;;  %v1499_v15 = vsel %vm1497_vm4, %v4978_v13, 0  ;;  %v5009_v53 = vpack.c.bf16 %v4958_v63, %v4958_v63 }
 0x45d   : > { %v1377_v5 = vsel %vm1372_vm3, %v4962_v3, 0  ;;  %v4967_v7 = vpack.c.bf16 %v1319_v4, %v1319_v4 }
 0x45e   : > { %3745 = vmatpush3.bf16.xpose.msra.mxu1 %v1377_v5  ;;  %v1545_v58 = vsel %vm1497_vm4, %v5009_v53, 0 }
 0x45f   : > { %3750 = vmatprep.subr.bf16.mxu1 %v4468_v32  ;;  %v1423_v11 = vsel %vm1372_vm3, %v4967_v7, 0 }
 0x465   : > { %3747 = vmatmul.mubr.msk.bf16.vlgmr.msra.gmra.mrb[4].mxu1 %vm1372_vm3, %v4969_v8 }
 0x466   : > { %3751 = vmatpush3.bf16.xpose.msra.mxu1 %v1423_v11  ;;  %3752 = vmatprep.mubr.msk.bf16.mxu1 %vm4470_vm2, %v4468_v32 }
 0x467   : > { %3756 = vmatprep.subr.bf16.mxu1 %v4468_v32 }
 0x46d   : > { %3753 = vmatmul.mubr.msk.bf16.vlgmr.msra.gmra.mrb[8].mxu1 %vm1372_vm3, %v4980_v14 }
 0x46e   : > { %3757 = vmatpush3.bf16.msra.mxu1 %v1499_v15  ;;  %3758 = vmatprep.mubr.msk.bf16.mxu1 %vm4470_vm2, %v4468_v32 }
 0x46f   : > { %3762 = vmatprep.subr.bf16.mxu1 %v4468_v32 }
 0x538   : > { %v1413_v19 = vpop.f32.mrb[4].mxu1 }
 0x539   : > { %v1465_v20 = vmul.f32 0.17677669, %v1413_v19  ;;  %v3748_v21 = vpop.f32.mrb[5].mxu1 }
 0x53a   : > { %v1416_v22 = vpop.f32.mrb[6].mxu1 }
 0x53b   : > { %v3749_v23 = vpop.f32.mrb[7].mxu1  ;;  %v1467_v24 = vadd.f32 %v1465_v20, %v4989_v18 }
 0x53d   : > { %v1470_v25 = vsel %vm1469_vm6, %v1467_v24, -inf }
 0x53e   : > { %1471 = vmax.xlane.f32.xlu0 %v1470_v25 }
 0x540   : > { %v1459_v26 = vpop.f32.mrb[8].mxu1 }
 0x541   : > { %v1466_v27 = vmul.f32 0.17677669, %v1459_v26  ;;  %v3754_v28 = vpop.f32.mrb[9].mxu1 }
 0x542   : > { %v1462_v29 = vpop.f32.mrb[10].mxu1 }
 0x543   : > { %v3755_v30 = vpop.f32.mrb[11].mxu1  ;;  %v1468_v31 = vadd.f32 %v1466_v27, %v4989_v18 }
 0x545   : > { %v1473_v33 = vsel %vm1469_vm6, %v1468_v31, -inf }
 0x546   : > { %1474 = vmax.xlane.f32.xlu1 %v1473_v33 }
 0x557   : > { %1643 = vrot.lane.b32.xlu1 %v4967_v7, %s4472_s23 }
 0x5cb   : > { %v1472_v34 = vpop.xlane.xlu0 %1471 }
 0x5cc   : > { %v1476_v35 = vsub.f32 %v1467_v24, %v1472_v34 }
 0x5ce   : > { %v1478_v36 = vmul.f32 1.442695, %v1476_v35 }
 0x5d0   : > { %4083 = vpow2.f32 %v1478_v36 }
 0x5d3   : > { %v1475_v37 = vpop.xlane.xlu1 %1474 }
 0x5d4   : > { %v1477_v38 = vsub.f32 %v1468_v31, %v1475_v37 }
 0x5d6   : > { %v1480_v39 = vmul.f32 1.442695, %v1477_v38 }
 0x5d7   : > { %v1644_v47 = vpop.permute.xlu1 %1643 }
 0x5d8   : > { %4085 = vpow2.f32 %v1480_v39  ;;  %v1649_v62 = vsel %vm1372_vm3, %v1644_v47, 0 }
 0x5da   : > { %v4084_v40 = vpop.eup %4083 }
 0x5db   : > { %v1482_v42 = vsel %vm1469_vm6, %v4084_v40, 0.0 }
 0x5dc   : > { %1483 = vadd.xlane.f32.xlu0 %v1482_v42 }
 0x5e2   : > { %v4086_v43 = vpop.eup %4085 }
 0x5e3   : > { %v1485_v44 = vsel %vm1469_vm6, %v4086_v43, 0.0 }
 0x5e4   : > { %1486 = vadd.xlane.f32.xlu1 %v1485_v44 }
 0x5f2   : > { %1591 = vrot.lane.b32.xlu0 %v4962_v3, %s4472_s23 }
 0x5f5   : > { %1588 = vrot.lane.b32.xlu1 %v4969_v8, %s4472_s23 }
 0x5f9   : > { %1640 = vrot.lane.b32.xlu1 %v4980_v14, %s4472_s23 }
 0x669   : > { %v1484_v46 = vpop.xlane.xlu0 %1483 }
 0x66a   : > { %4087 = vrcp.f32 %v1484_v46 }
 0x66d   : > { %v1592_v48 = vpop.permute.xlu0 %1591 }
 0x66e   : > { %v1597_v49 = vsel %vm1372_vm3, %v1592_v48, 0 }
 0x66f   : > { %3769 = vmatpush3.bf16.xpose.msra.mxu0 %v1597_v49 }
 0x670   : > { %3780 = vmatprep.subr.bf16.mxu0 %v4468_v32 }
 0x671   : > { %v1487_v41 = vpop.xlane.xlu1 %1486 }
 0x672   : > { %4089 = vrcp.f32 %v1487_v41 }
 0x674   : > { %v4088_v45 = vpop.eup %4087 }
 0x675   : > { %v1490_v55 = vmul.f32 %v4088_v45, %v4084_v40  ;;  %v1589_v56 = vpop.permute.xlu1 %1588 }
 0x676   : > { %3771 = vmatmul.mubr.msk.bf16.vlgmr.msra.gmra.mrb[4].mxu0 %vm1372_vm3, %v1589_v56 }
 0x677   : > { %v1492_v57 = vpack.c.bf16 %v1490_v55, %v1490_v55  ;;  %3782 = vmatprep.mubr.msk.bf16.mxu0 %vm4470_vm2, %v4468_v32 }
 0x679   : > { %3759 = vmatmul.mubr.msk.bf16.vlgmr.msra.gmra.mrb[12].mxu1 %vm1469_vm6, %v1492_v57  ;;  %v1641_v63 = vpop.permute.xlu1 %1640 }
 0x67a   : > { %3763 = vmatpush3.bf16.msra.mxu1 %v1545_v58  ;;  %3764 = vmatprep.mubr.msk.bf16.mxu1 %vm4470_vm2, %v4468_v32 }
 0x67b   : > { %3774 = vmatprep.subr.bf16.mxu1 %v4468_v32 }
 0x67c   : > { %v4090_v59 = vpop.eup %4089 }
 0x67d   : > { %v1491_v60 = vmul.f32 %v4090_v59, %v4086_v43 }
 0x67f   : > { %v1493_v61 = vpack.c.bf16 %v1491_v60, %v1491_v60 }
 0x681   : > { %3765 = vmatmul.mubr.msk.bf16.vlgmr.msra.gmra.mrb[16].mxu1 %vm1469_vm6, %v1493_v61 }
 0x682   : > { %3776 = vmatprep.mubr.msk.bf16.mxu1 %vm4470_vm2, %v4468_v32 }
 0x683   : > { %3775 = vmatpush3.bf16.xpose.msra.mxu1 %v1649_v62 }
 0x684   : > { %3786 = vmatprep.subr.bf16.mxu1 %v4468_v32 }
 0x68a   : > { %3777 = vmatmul.mubr.msk.bf16.vlgmr.msra.gmra.mrb[20].mxu1 %vm1372_vm3, %v1641_v63 }
 0x68b   : > { %3788 = vmatprep.mubr.msk.bf16.mxu1 %vm4470_vm2, %v4468_v32 }
 0x749   : > { %v1633_v0 = vpop.f32.mrb[4].mxu0 }
 0x74a   : > { %v1691_v1 = vmul.f32 0.17677669, %v1633_v0  ;;  %v3772_v2 = vpop.f32.mrb[5].mxu0 }
 0x74b   : > { %v1636_v4 = vpop.f32.mrb[6].mxu0 }
 0x74c   : > { %v5028_v5 = vpop.f32.mrb[12].mxu1  ;;  %v3773_v6 = vpop.f32.mrb[7].mxu0  ;;  %v1693_v10 = vadd.f32 %v1691_v1, %v4989_v18 }
 0x74d   : > { %v3760_v11 = vpop.f32.mrb[13].mxu1 }
 0x74e   : > { %v1538_v12 = vpop.f32.mrb[14].mxu1  ;;  %v1695_v15 = vsel %vm1469_vm6, %v1693_v10, -inf }
 0x74f   : > { %1696 = vmax.xlane.f32.xlu0 %v1695_v15  ;;  %v3761_v16 = vpop.f32.mrb[15].mxu1 }
 0x754   : > { %v5032_v17 = vpop.f32.mrb[16].mxu1 }
 0x755   : > { %v3766_v19 = vpop.f32.mrb[17].mxu1 }
 0x756   : > { %v1584_v20 = vpop.f32.mrb[18].mxu1 }
 0x757   : > { %v3767_v21 = vpop.f32.mrb[19].mxu1 }
 0x75d   : > { %v1685_v22 = vpop.f32.mrb[20].mxu1 }
 0x75e   : > { %v1692_v23 = vmul.f32 0.17677669, %v1685_v22  ;;  %v3778_v24 = vpop.f32.mrb[21].mxu1 }
 0x75f   : > { %v1688_v25 = vpop.f32.mrb[22].mxu1 }
 0x760   : > { %v3779_v26 = vpop.f32.mrb[23].mxu1  ;;  %v1694_v27 = vadd.f32 %v1692_v23, %v4989_v18 }
 0x762   : > { %v1698_v28 = vsel %vm1469_vm6, %v1694_v27, -inf }
 0x763   : > { %1699 = vmax.xlane.f32.xlu1 %v1698_v28 }
 0x774   : > { %1769 = vrot.lane.b32.xlu1 %v5009_v53, %s4472_s23 }
 0x778   : > { %1819 = vrot.lane.b32.xlu1 %v4962_v3, %s4473_s5 }
 0x77c   : > { %1869 = vrot.lane.b32.xlu1 %v4967_v7, %s4473_s5 }
 0x780   : > { %1867 = vrot.lane.b32.xlu1 %v4980_v14, %s4473_s5 }
 0x7dc   : > { %v1697_v29 = vpop.xlane.xlu0 %1696 }
 0x7dd   : > { %v1701_v30 = vsub.f32 %v1693_v10, %v1697_v29 }
 0x7df   : > { %v1703_v31 = vmul.f32 1.442695, %v1701_v30 }
 0x7e1   : > { %4091 = vpow2.f32 %v1703_v31 }
 0x7eb   : > { %v4092_v33 = vpop.eup %4091 }
 0x7ec   : > { %v1707_v34 = vsel %vm1469_vm6, %v4092_v33, 0.0 }
 0x7ed   : > { %1708 = vadd.xlane.f32.xlu0 %v1707_v34 }
 0x7f0   : > { %v1700_v35 = vpop.xlane.xlu1 %1699 }
 0x7f1   : > { %v1702_v36 = vsub.f32 %v1694_v27, %v1700_v35 }
 0x7f3   : > { %v1705_v37 = vmul.f32 1.442695, %v1702_v36 }
 0x7f4   : > { %v1770_v38 = vpop.permute.xlu1 %1769 }
 0x7f5   : > { %4093 = vpow2.f32 %v1705_v37  ;;  %v1775_v39 = vsel %vm1497_vm4, %v1770_v38, 0 }
 0x7f6   : > { %3787 = vmatpush3.bf16.msra.mxu1 %v1775_v39 }
 0x7f7   : > { %3798 = vmatprep.subr.bf16.mxu1 %v4468_v32 }
 0x7f8   : > { %v1820_v41 = vpop.permute.xlu1 %1819 }
 0x7f9   : > { %v1825_v58 = vsel %vm1372_vm3, %v1820_v41, 0 }
 0x7fc   : > { %v1870_v57 = vpop.permute.xlu1 %1869 }
 0x7fd   : > { %v1875_v60 = vsel %vm1372_vm3, %v1870_v57, 0 }
 0x7ff   : > { %v4094_v40 = vpop.eup %4093 }
 0x800   : > { %v1710_v42 = vsel %vm1469_vm6, %v4094_v40, 0.0  ;;  %v1868_v62 = vpop.permute.xlu1 %1867 }
 0x801   : > { %1711 = vadd.xlane.f32.xlu0 %v1710_v42 }
 0x817   : > { %1720 = vrot.lane.b32.xlu0 %v4978_v13, %s4472_s23 }
 0x81b   : > { %1817 = vrot.lane.b32.xlu0 %v4969_v8, %s4473_s5 }
 0x87a   : > { %v1709_v43 = vpop.xlane.xlu0 %1708 }
 0x87b   : > { %4095 = vrcp.f32 %v1709_v43 }
 0x885   : > { %v4096_v44 = vpop.eup %4095 }
 0x886   : > { %v1715_v47 = vmul.f32 %v4096_v44, %v4092_v33 }
 0x888   : > { %v1717_v45 = vpack.c.bf16 %v1715_v47, %v1715_v47 }
 0x88e   : > { %v1712_v46 = vpop.xlane.xlu0 %1711 }
 0x88f   : > { %4097 = vrcp.f32 %v1712_v46 }
 0x892   : > { %v1721_v48 = vpop.permute.xlu0 %1720 }
 0x893   : > { %v1726_v49 = vsel %vm1497_vm4, %v1721_v48, 0 }
 0x894   : > { %3781 = vmatpush3.bf16.msra.mxu0 %v1726_v49 }
 0x895   : > { %3792 = vmatprep.subr.bf16.mxu0 %v4468_v32 }
 0x896   : > { %v1818_v61 = vpop.permute.xlu0 %1817 }
 0x897   : > { %3783 = vmatmul.mubr.msk.bf16.vlgmr.msra.gmra.mrb[8].mxu0 %vm1469_vm6, %v1717_v45 }
 0x898   : > { %3794 = vmatprep.mubr.msk.bf16.mxu0 %vm4470_vm2, %v4468_v32 }
 0x899   : > { %v4098_v55 = vpop.eup %4097 }
 0x89a   : > { %v1716_v56 = vmul.f32 %v4098_v55, %v4094_v40 }
 0x89c   : > { %v1718_v59 = vpack.c.bf16 %v1716_v56, %v1716_v56 }
 0x89d   : > { %3793 = vmatpush3.bf16.xpose.msra.mxu0 %v1825_v58 }
 0x89e   : > { %3789 = vmatmul.mubr.msk.bf16.vlgmr.msra.gmra.mrb[24].mxu1 %vm1469_vm6, %v1718_v59  ;;  %3804 = vmatprep.subr.bf16.mxu0 %v4468_v32 }
 0x89f   : > { %3799 = vmatpush3.bf16.xpose.msra.mxu1 %v1875_v60  ;;  %3800 = vmatprep.mubr.msk.bf16.mxu1 %vm4470_vm2, %v4468_v32 }
 0x8a0   : > { %3810 = vmatprep.subr.bf16.mxu1 %v4468_v32 }
 0x8a4   : > { %3795 = vmatmul.mubr.msk.bf16.vlgmr.msra.gmra.mrb[12].mxu0 %vm1372_vm3, %v1818_v61 }
 0x8a5   : > { %3806 = vmatprep.mubr.msk.bf16.mxu0 %vm4470_vm2, %v4468_v32 }
 0x8a6   : > { %3801 = vmatmul.mubr.msk.bf16.vlgmr.msra.gmra.mrb[28].mxu1 %vm1372_vm3, %v1868_v62 }
 0x8a7   : > { %3812 = vmatprep.mubr.msk.bf16.mxu1 %vm4470_vm2, %v4468_v32 }
 0x96a   : > { %v5070_v63 = vpop.f32.mrb[8].mxu0 }
 0x96b   : > { %v3784_v0 = vpop.f32.mrb[9].mxu0 }
 0x96c   : > { %v1765_v1 = vpop.f32.mrb[10].mxu0 }
 0x96d   : > { %v3785_v2 = vpop.f32.mrb[11].mxu0 }
 0x971   : > { %v5072_v4 = vpop.f32.mrb[24].mxu1 }
 0x972   : > { %v4032_v6 = vpack.i.bf16 %v5072_v4, %v5070_v63  ;;  %v3790_v10 = vpop.f32.mrb[25].mxu1 }
 0x973   : > { %v1814_v11 = vpop.f32.mrb[26].mxu1 }
 0x974   : > { %v3791_v12 = vpop.f32.mrb[27].mxu1 }
 0x977   : > { %v1861_v15 = vpop.f32.mrb[12].mxu0 }
 0x978   : > { %v1917_v16 = vmul.f32 0.17677669, %v1861_v15  ;;  %v3796_v19 = vpop.f32.mrb[13].mxu0 }
 0x979   : > { %v1864_v20 = vpop.f32.mrb[14].mxu0  ;;  %v1911_v21 = vpop.f32.mrb[28].mxu1 }
 0x97a   : > { %v1918_v22 = vmul.f32 0.17677669, %v1911_v21  ;;  %v3797_v23 = vpop.f32.mrb[15].mxu0  ;;  %v3802_v24 = vpop.f32.mrb[29].mxu1  ;;  %v1919_v25 = vadd.f32 %v1917_v16, %v4989_v18 }
 0x97b   : > { %v1914_v26 = vpop.f32.mrb[30].mxu1 }
 0x97c   : > { %v3803_v27 = vpop.f32.mrb[31].mxu1  ;;  %v1921_v28 = vsel %vm1469_vm6, %v1919_v25, -inf  ;;  %v1920_v29 = vadd.f32 %v1918_v22, %v4989_v18 }
 0x97d   : > { %1922 = vmax.xlane.f32.xlu0 %v1921_v28 }
 0x97e   : > { %v1924_v30 = vsel %vm1469_vm6, %v1920_v29, -inf }
 0x97f   : > { %1925 = vmax.xlane.f32.xlu1 %v1924_v30 }
 0x990   : > { %1993 = vrot.lane.b32.xlu1 %v5009_v53, %s4473_s5 }
 0x994   : > { %2043 = vrot.lane.b32.xlu1 %v4962_v3, %s4474_s0 }
 0x998   : > { %2093 = vrot.lane.b32.xlu1 %v4967_v7, %s4474_s0 }
 0x99c   : > { %2091 = vrot.lane.b32.xlu1 %v4980_v14, %s4474_s0 }
 0xa0a   : > { %v1923_v31 = vpop.xlane.xlu0 %1922 }
 0xa0b   : > { %v1927_v33 = vsub.f32 %v1919_v25, %v1923_v31 }
 0xa0c   : > { %v1926_v34 = vpop.xlane.xlu1 %1925 }
 0xa0d   : > { %v1929_v35 = vmul.f32 1.442695, %v1927_v33  ;;  %v1928_v36 = vsub.f32 %v1920_v29, %v1926_v34 }
 0xa0f   : > { %4099 = vpow2.f32 %v1929_v35  ;;  %v1931_v37 = vmul.f32 1.442695, %v1928_v36 }
 0xa10   : > { %v1994_v38 = vpop.permute.xlu1 %1993 }
 0xa11   : > { %4101 = vpow2.f32 %v1931_v37  ;;  %v1999_v39 = vsel %vm1497_vm4, %v1994_v38, 0 }
 0xa12   : > { %3811 = vmatpush3.bf16.msra.mxu1 %v1999_v39 }
 0xa13   : > { %3822 = vmatprep.subr.bf16.mxu1 %v4468_v32 }
 0xa14   : > { %v2044_v48 = vpop.permute.xlu1 %2043 }
 0xa18   : > { %v2094_v56 = vpop.permute.xlu1 %2093 }
 0xa19   : > { %v4100_v3 = vpop.eup %4099  ;;  %v2099_v58 = vsel %vm1372_vm3, %v2094_v56, 0 }
 0xa1a   : > { %v1933_v7 = vsel %vm1469_vm6, %v4100_v3, 0.0 }
 0xa1b   : > { %v4102_v40 = vpop.eup %4101  ;;  %1934 = vadd.xlane.f32.xlu0 %v1933_v7 }
 0xa1c   : > { %v1936_v14 = vsel %vm1469_vm6, %v4102_v40, 0.0  ;;  %v2092_v60 = vpop.permute.xlu1 %2091 }
 0xa1f   : > { %1937 = vadd.xlane.f32.xlu0 %v1936_v14 }
 0xa35   : > { %1945 = vrot.lane.b32.xlu0 %v4978_v13, %s4473_s5 }
 0xa39   : > { %2041 = vrot.lane.b32.xlu0 %v4969_v8, %s4474_s0  ;;  %v2049_v8 = vsel %vm1372_vm3, %v2044_v48, 0  ;;  %v2297_v48 = vld [vmem:[%s4837_s15 + $0xc] sm:$0xf] }
 0xaa8   : > { %v1935_v42 = vpop.xlane.xlu0 %1934 }
 0xaa9   : > { %4103 = vrcp.f32 %v1935_v42 }
 0xaac   : > { %v1938_v43 = vpop.xlane.xlu0 %1937 }
 0xaad   : > { %4105 = vrcp.f32 %v1938_v43 }
 0xab0   : > { %v1946_v44 = vpop.permute.xlu0 %1945 }
 0xab1   : > { %v1951_v46 = vsel %vm1497_vm4, %v1946_v44, 0 }
 0xab2   : > { %3805 = vmatpush3.bf16.msra.mxu0 %v1951_v46 }
 0xab3   : > { %v4104_v47 = vpop.eup %4103  ;;  %3816 = vmatprep.subr.bf16.mxu0 %v4468_v32 }
 0xab4   : > { %v1941_v49 = vmul.f32 %v4104_v47, %v4100_v3  ;;  %v2042_v59 = vpop.permute.xlu0 %2041 }
 0xab6   : > { %v1943_v41 = vpack.c.bf16 %v1941_v49, %v1941_v49  ;;  %v2298_v49 = vld [vmem:[%s4837_s15 + $0x2c] sm:$0xf] }
 0xab7   : > { %v4106_v45 = vpop.eup %4105 }
 0xab8   : > { %v1942_v55 = vmul.f32 %v4106_v45, %v4102_v40  ;;  %3807 = vmatmul.mubr.msk.bf16.vlgmr.msra.gmra.mrb[16].mxu0 %vm1469_vm6, %v1943_v41  ;;  %v2299_v41 = vld [vmem:[%s4837_s15 + $0x4c] sm:$0xf]  ;;  %v3481_v45 = vcombine.low %v2297_v48, %v2298_v49  ;;  %v2452_v48 = vld [vmem:[%s4837_s15 + $0x10] sm:$0xff] }
 0xab9   : > { %3818 = vmatprep.mubr.msk.bf16.mxu0 %vm4470_vm2, %v4468_v32  ;;  %v2454_v49 = vld [vmem:[%s4837_s15 + $0x30] sm:$0xff] }
 0xaba   : > { %v1944_v57 = vpack.c.bf16 %v1942_v55, %v1942_v55  ;;  %v2300_v55 = vld [vmem:[%s4837_s15 + $0x6c] sm:$0xf] }
 0xabb   : > { %3817 = vmatpush3.bf16.xpose.msra.mxu0 %v2049_v8  ;;  %v3482_v56 = vcombine.low %v2299_v41, %v2300_v55  ;;  %v2301_v8 = vld [vmem:[%s4837_s15 + $0x8c] sm:$0xf]  ;;  %v2453_v41 = vld [vmem:[%s4837_s15 + $0x18] sm:$0xff]  ;;  %v3492_v55 = vcombine.high %v2452_v48, %v2454_v49 }
 0xabc   : > { %3813 = vmatmul.mubr.msk.bf16.vlgmr.msra.gmra.mrb[32].mxu1 %vm1469_vm6, %v1944_v57  ;;  %3828 = vmatprep.subr.bf16.mxu0 %v4468_v32  ;;  %v2302_v57 = vld [vmem:[%s4837_s15 + $0xac] sm:$0xf] }
 0xabd   : > { %3823 = vmatpush3.bf16.xpose.msra.mxu1 %v2099_v58  ;;  %3824 = vmatprep.mubr.msk.bf16.mxu1 %vm4470_vm2, %v4468_v32  ;;  %v3483_v58 = vcombine.low %v2301_v8, %v2302_v57  ;;  %v2456_v8 = vld [vmem:[%s4837_s15 + $0x50] sm:$0xff] }
 0xabe   : > { %3834 = vmatprep.subr.bf16.mxu1 %v4468_v32  ;;  %v2458_v57 = vld [vmem:[%s4837_s15 + $0x70] sm:$0xff] }
 0xac2   : > { %3819 = vmatmul.mubr.msk.bf16.vlgmr.msra.gmra.mrb[20].mxu0 %vm1372_vm3, %v2042_v59  ;;  %v2303_v59 = vld [vmem:[%s4837_s15 + $0xcc] sm:$0xf] }
 0xac3   : > { %3830 = vmatprep.mubr.msk.bf16.mxu0 %vm4470_vm2, %v4468_v32 }
 0xac4   : > { %3825 = vmatmul.mubr.msk.bf16.vlgmr.msra.gmra.mrb[36].mxu1 %vm1372_vm3, %v2092_v60  ;;  %v2304_v60 = vld [vmem:[%s4837_s15 + $0xec] sm:$0xf] }
 0xac5   : > { %3836 = vmatprep.mubr.msk.bf16.mxu1 %vm4470_vm2, %v4468_v32 }
 0xb8b   : > { %v1987_v61 = vpop.f32.mrb[16].mxu0 }
 0xb8c   : > { %v3808_v62 = vpop.f32.mrb[17].mxu0 }
 0xb8d   : > { %v1990_v0 = vpop.f32.mrb[18].mxu0  ;;  %v2305_v62 = vld [vmem:[%s4837_s15 + $0x10c] sm:$0xf] }
 0xb8e   : > { %v3809_v1 = vpop.f32.mrb[19].mxu0  ;;  %v2306_v0 = vld [vmem:[%s4837_s15 + $0x12c] sm:$0xf] }
 0xb8f   : > { %v2035_v2 = vpop.f32.mrb[32].mxu1  ;;  %v3485_v1 = vcombine.low %v2305_v62, %v2306_v0  ;;  %v2459_v62 = vld [vmem:[%s4837_s15 + $0x78] sm:$0xff] }
 0xb90   : > { %v4037_v10 = vpack.i.bf16 %v2035_v2, %v1987_v61  ;;  %v3814_v11 = vpop.f32.mrb[33].mxu1  ;;  %v3484_v61 = vcombine.low %v2303_v59, %v2304_v60  ;;  %v2307_v2 = vld [vmem:[%s4837_s15 + $0x14c] sm:$0xf]  ;;  %v3496_v60 = vcombine.high %v2456_v8, %v2458_v57 }
 0xb91   : > { %v2038_v12 = vpop.f32.mrb[34].mxu1 }
 0xb92   : > { %v3815_v15 = vpop.f32.mrb[35].mxu1  ;;  %v2309_v12 = vld [vmem:[%s4837_s15 + $0x18c] sm:$0xf] }
 0xb93   : > { %v2310_v15 = vld [vmem:[%s4837_s15 + $0x1ac] sm:$0xf] }
 0xb95   : > { %v2085_v16 = vpop.f32.mrb[20].mxu0 }
 0xb96   : > { %v2141_v19 = vmul.f32 0.17677669, %v2085_v16  ;;  %v3820_v20 = vpop.f32.mrb[21].mxu0  ;;  %v3487_v16 = vcombine.low %v2309_v12, %v2310_v15 }
 0xb97   : > { %v2088_v21 = vpop.f32.mrb[22].mxu0  ;;  %v2135_v22 = vpop.f32.mrb[36].mxu1  ;;  %v2312_v20 = vld [vmem:[%s4837_s15 + $0x1ec] sm:$0xf] }
 0xb98   : > { %v2142_v23 = vmul.f32 0.17677669, %v2135_v22  ;;  %v3821_v24 = vpop.f32.mrb[23].mxu0  ;;  %v3826_v25 = vpop.f32.mrb[37].mxu1  ;;  %v2143_v26 = vadd.f32 %v2141_v19, %v4989_v18  ;;  %v2311_v19 = vld [vmem:[%s4837_s15 + $0x1cc] sm:$0xf] }
 0xb99   : > { %v2138_v27 = vpop.f32.mrb[38].mxu1  ;;  %v3488_v21 = vcombine.low %v2311_v19, %v2312_v20 }
 0xb9a   : > { %v3827_v28 = vpop.f32.mrb[39].mxu1  ;;  %v2145_v29 = vsel %vm1469_vm6, %v2143_v26, -inf  ;;  %v2144_v30 = vadd.f32 %v2142_v23, %v4989_v18 }
 0xb9b   : > { %2146 = vmax.xlane.f32.xlu0 %v2145_v29 }
 0xb9c   : > { %v2148_v31 = vsel %vm1469_vm6, %v2144_v30, -inf }
 0xb9d   : > { %2149 = vmax.xlane.f32.xlu1 %v2148_v31 }
 0xbae   : > { %2217 = vrot.lane.b32.xlu1 %v5009_v53, %s4474_s0 }
 0xbb2   : > { %4033 = vrot.lane.b32.xlu1 %v4032_v6, %s4474_s0 }
 0xbb6   : > { %4038 = vrot.lane.b32.xlu1 %v4037_v10, %s4473_s5  ;;  %v2308_v10 = vld [vmem:[%s4837_s15 + $0x16c] sm:$0xf] }
 0xbb7   : > { %v3486_v11 = vcombine.low %v2307_v2, %v2308_v10 }
 0xc28   : > { %v2147_v33 = vpop.xlane.xlu0 %2146 }
 0xc29   : > { %v2151_v34 = vsub.f32 %v2143_v26, %v2147_v33 }
 0xc2a   : > { %v2150_v35 = vpop.xlane.xlu1 %2149 }
 0xc2b   : > { %v2153_v36 = vmul.f32 1.442695, %v2151_v34  ;;  %v2152_v37 = vsub.f32 %v2144_v30, %v2150_v35 }
 0xc2d   : > { %4107 = vpow2.f32 %v2153_v36  ;;  %v2155_v18 = vmul.f32 1.442695, %v2152_v37 }
 0xc2e   : > { %v2218_v38 = vpop.permute.xlu1 %2217 }
 0xc2f   : > { %4109 = vpow2.f32 %v2155_v18  ;;  %v2223_v39 = vsel %vm1497_vm4, %v2218_v38, 0 }
 0xc30   : > { %3835 = vmatpush3.bf16.msra.mxu1 %v2223_v39 }
 0xc31   : > { %2667 = vmatprep.subr.bf16.mxu1 %v3492_v55 }
 0xc32   : > { %v4034_v31 = vpop.permute.xlu1 %4033 }
 0xc33   : > { %v4036_v34 = vunpack.i.h.bf16 %v4034_v31  ;;  %v4035_v35 = vunpack.i.l.bf16 %v4034_v31  ;;  %v2466_v31 = vld [vmem:[%s4837_s15 + $0xf0] sm:$0xff] }
 0xc35   : > { %v2290_v18 = vsel %vm1372_vm3, %v5032_v17, %v4036_v34  ;;  %v2289_v38 = vsel %vm1372_vm3, %v5028_v5, %v4035_v35  ;;  %v2467_v35 = vld [vmem:[%s4837_s15 + $0xf8] sm:$0xff] }
 0xc36   : > { %v4039_v33 = vpop.permute.xlu1 %4038 }
 0xc37   : > { %v4108_v53 = vpop.eup %4107  ;;  %v4040_v36 = vunpack.i.l.bf16 %v4039_v33 }
 0xc38   : > { %v2157_v3 = vsel %vm1469_vm6, %v4108_v53, 0.0 }
 0xc39   : > { %v4110_v7 = vpop.eup %4109  ;;  %2158 = vadd.xlane.f32.xlu0 %v2157_v3  ;;  %v2292_v3 = vsel %vm2291_vm7, %v2289_v38, %v4040_v36  ;;  %v2470_v38 = vld [vmem:[%s4837_s15 + $0x130] sm:$0xff] }
 0xc3a   : > { %v2160_v63 = vsel %vm1469_vm6, %v4110_v7, 0.0 }
 0xc3d   : > { %2161 = vadd.xlane.f32.xlu0 %v2160_v63 }
 0xc53   : > { %2169 = vrot.lane.b32.xlu0 %v4978_v13, %s4474_s0 }
 0xcc6   : > { %v2159_v4 = vpop.xlane.xlu0 %2158 }
 0xcc7   : > { %4111 = vrcp.f32 %v2159_v4 }
 0xcca   : > { %v2162_v6 = vpop.xlane.xlu0 %2161 }
 0xccb   : > { %4113 = vrcp.f32 %v2162_v6 }
 0xcce   : > { %v2170_v40 = vpop.permute.xlu0 %2169 }
 0xccf   : > { %v2175_v14 = vsel %vm1497_vm4, %v2170_v40, 0  ;;  %v3480_v40 = vld [vmem:[%s4845_s27 + $0x5] ss:$0 sm:$0xff] }
 0xcd0   : > { %3829 = vmatpush3.bf16.msra.mxu0 %v2175_v14 }
 0xcd1   : > { %v4112_v42 = vpop.eup %4111  ;;  %3840 = vmatprep.subr.bf16.mxu0 %v4468_v32 }
 0xcd2   : > { %v2165_v43 = vmul.f32 %v4112_v42, %v4108_v53 }
 0xcd4   : > { %v2167_v44 = vpack.c.bf16 %v2165_v43, %v2165_v43  ;;  %v4135_v43 = vld [vmem:[%s5430_s29] sm:$0xff] }
 0xcd5   : > { %v4114_v46 = vpop.eup %4113 }
 0xcd6   : > { %v2166_v13 = vmul.f32 %v4114_v46, %v4110_v7  ;;  %3831 = vmatmul.mubr.msk.bf16.vlgmr.msra.gmra.mrb[24].mxu0 %vm1469_vm6, %v2167_v44 }
 0xcd7   : > { %3856 = vmatprep.mubr.msk.bf16.mxu0 %vm4470_vm2, %v4468_v32  ;;  %3841 = vmatpush3.bf16.msra.mxu0 %v3481_v45  ;;  %v3491_v45 = vcombine.low %v2452_v48, %v2454_v49  ;;  %v2477_v48 = vld [vmem:[%s4837_s15 + $0x198] sm:$0xff] }
 0xcd8   : > { %v2168_v47 = vpack.c.bf16 %v2166_v13, %v2166_v13  ;;  %3842 = vmatprep.subr.bf16.mxu0 %v4468_v32 }
 0xcda   : > { %3837 = vmatmul.mubr.msk.bf16.vlgmr.msra.gmra.mrb[40].mxu1 %vm1469_vm6, %v2168_v47 }
 0xcdb   : > { %2699 = vmatprep.mubr.bf16.mxu1 %v4469_v9  ;;  %3843 = vmatpush3.bf16.msra.mxu0 %v3482_v56  ;;  %v2455_v56 = vld [vmem:[%s4837_s15 + $0x38] sm:$0xff] }
 0xcdc   : > { %3844 = vmatprep.subr.bf16.mxu0 %v4468_v32  ;;  %v3494_v59 = vcombine.high %v2453_v41, %v2455_v56  ;;  %2668 = vmatpush1.bf16.msra.mxu1 %v3491_v45 }
 0xcdd   : > { %2669 = vmatprep.subr.bf16.mxu1 %v3496_v60  ;;  %v2483_v60 = vld [vmem:[%s4837_s15 + $0x1f8] sm:$0xff] }
 0xcdf   : > { %3845 = vmatpush3.bf16.msra.mxu0 %v3483_v58  ;;  %v3493_v58 = vcombine.low %v2453_v41, %v2455_v56  ;;  %v2479_v41 = vld [vmem:[%s4837_s15 + $0x1b8] sm:$0xff] }
 0xce0   : > { %3846 = vmatprep.subr.bf16.mxu0 %v4468_v32  ;;  %v3517_v55 = vcombine.low %v2477_v48, %v2479_v41  ;;  %v3518_v56 = vcombine.high %v2477_v48, %v2479_v41  ;;  %v4074_v48 = vld [vmem:[%s4843_s26 + $0xb0] sm:$0xff]   ;;  %v4076_v41 = vld [vmem:[%s4843_s26 + $0xf8] sm:$0xff]  }
 0xce3   : > { %3847 = vmatpush3.bf16.msra.mxu0 %v3484_v61  ;;  %v2457_v61 = vld [vmem:[%s4837_s15 + $0x58] sm:$0xff] }
 0xce4   : > { %3848 = vmatprep.subr.bf16.mxu0 %v4468_v32  ;;  %v3498_v0 = vcombine.high %v2457_v61, %v2459_v62  ;;  %v3497_v2 = vcombine.low %v2457_v61, %v2459_v62 }
 0xce7   : > { %3849 = vmatpush3.bf16.msra.mxu0 %v3485_v1  ;;  %v3495_v1 = vcombine.low %v2456_v8, %v2458_v57  ;;  %v2480_v8 = vld [vmem:[%s4837_s15 + $0x1d0] sm:$0xff] }
 0xce8   : > { %3850 = vmatprep.subr.bf16.mxu0 %v4468_v32  ;;  %v2482_v57 = vld [vmem:[%s4837_s15 + $0x1f0] sm:$0xff] }
 0xce9   : > { %2670 = vmatpush1.bf16.msra.mxu1 %v3495_v1  ;;  %v3519_v61 = vcombine.low %v2480_v8, %v2482_v57 }
 0xceb   : > { %3851 = vmatpush3.bf16.msra.mxu0 %v3486_v11 }
 0xcec   : > { %3852 = vmatprep.subr.bf16.mxu0 %v4468_v32 }
 0xcef   : > { %3853 = vmatpush3.bf16.msra.mxu0 %v3487_v16 }
 0xcf0   : > { %3854 = vmatprep.subr.bf16.mxu0 %v4468_v32  ;;  %v4041_v32 = vunpack.i.h.bf16 %v4039_v33  ;;  %v2465_v33 = vld [vmem:[%s4837_s15 + $0xd8] sm:$0xff] }
 0xcf1   : > { %v3505_v36 = vcombine.low %v2465_v33, %v2467_v35 }
 0xcf2   : > { %v2293_v7 = vsel %vm2291_vm7, %v2290_v18, %v4041_v32  ;;  %v2468_v18 = vld [vmem:[%s4837_s15 + $0x110] sm:$0xff] }
 0xcf3   : > { %3855 = vmatpush3.bf16.msra.mxu0 %v3488_v21 }
 0xcf4   : > { %2710 = vmatprep.subr.bf16.mxu0 %v3494_v59  ;;  %v3520_v59 = vcombine.high %v2480_v8, %v2482_v57  ;;  %v2501_v8 = vsub.s32 3, %v4948_v50 }
 0xda9   : > { %v2211_v22 = vpop.f32.mrb[24].mxu0 }
 0xdaa   : > { %v3832_v23 = vpop.f32.mrb[25].mxu0 }
 0xdab   : > { %v2214_v24 = vpop.f32.mrb[26].mxu0  ;;  %v2462_v23 = vld [vmem:[%s4837_s15 + $0xb0] sm:$0xff] }
 0xdac   : > { %v3833_v25 = vpop.f32.mrb[27].mxu0  ;;  %v2461_v24 = vld [vmem:[%s4837_s15 + $0x98] sm:$0xff] }
 0xdad   : > { %v2259_v26 = vpop.f32.mrb[40].mxu1 }
 0xdae   : > { %v4042_v27 = vpack.i.bf16 %v2259_v26, %v2211_v22  ;;  %v3838_v28 = vpop.f32.mrb[41].mxu1  ;;  %v2460_v22 = vld [vmem:[%s4837_s15 + $0x90] sm:$0xff]  ;;  %v2463_v26 = vld [vmem:[%s4837_s15 + $0xb8] sm:$0xff] }
 0xdaf   : > { %v2262_v29 = vpop.f32.mrb[42].mxu1  ;;  %v3500_v25 = vcombine.high %v2460_v22, %v2462_v23  ;;  %v3501_v28 = vcombine.low %v2461_v24, %v2463_v26 }
 0xdb0   : > { %4043 = vrot.lane.b32.xlu0 %v4042_v27, %s4472_s23  ;;  %v3839_v30 = vpop.f32.mrb[43].mxu1  ;;  %v3499_v27 = vcombine.low %v2460_v22, %v2462_v23  ;;  %v3502_v29 = vcombine.high %v2461_v24, %v2463_v26  ;;  %v3489_v22 = vld [vmem:[%s4845_s27 + $0x6] ss:$0 sm:$0xff]  ;;  %v3490_v26 = vld [vmem:[%s4845_s27 + $0x7] ss:$0 sm:$0xff] }
 0xdb1   : > { %2671 = vmatprep.subr.bf16.mxu1 %v3500_v25  ;;  %v2464_v30 = vld [vmem:[%s4837_s15 + $0xd0] sm:$0xff] }
 0xdb2   : > { %2672 = vmatpush1.bf16.msra.mxu1 %v3499_v27  ;;  %v3504_v34 = vcombine.high %v2464_v30, %v2466_v31  ;;  %v3503_v32 = vcombine.low %v2464_v30, %v2466_v31  ;;  %v4047_v31 = vld [vmem:[%s4843_s26 + $0x40] sm:$0xff]  }
 0xdb4   : > { %2673 = vmatprep.subr.bf16.mxu1 %v3504_v34  ;;  %v4050_v34 = vld [vmem:[%s4843_s26 + $0x80] sm:$0xff]  }
 0xdb6   : > { %2674 = vmatpush1.bf16.msra.mxu1 %v3503_v32  ;;  %v4053_v32 = vld [vmem:[%s4843_s26 + $0x8] sm:$0xff]  }
 0xe22   : > { %v4044_v37 = vpop.permute.xlu0 %4043 }
 0xe23   : > { %v4046_v39 = vunpack.i.h.bf16 %v4044_v37  ;;  %v4045_v53 = vunpack.i.l.bf16 %v4044_v37  ;;  %v3506_v37 = vcombine.high %v2465_v33, %v2467_v35  ;;  %v4048_v33 = vld [vmem:[%s4843_s26 + $0xc0] sm:$0xff]   ;;  %v4052_v35 = vld [vmem:[%s4843_s26 + $0xc8] sm:$0xff]  }
 0xe25   : > { %v2296_v63 = vsel %vm2294_vm8, %v2293_v7, %v4046_v39  ;;  %v2295_v4 = vsel %vm2294_vm8, %v2292_v3, %v4045_v53  ;;  %v2469_v39 = vld [vmem:[%s4837_s15 + $0x118] sm:$0xff]  ;;  %v3508_v53 = vcombine.high %v2468_v18, %v2470_v38  ;;  %v3507_v7 = vcombine.low %v2468_v18, %v2470_v38  ;;  %v4056_v18 = vld [vmem:[%s4843_s26 + $0xd0] sm:$0xff]  }
 0xe26   : > { %v2313_v6 = vpack.c.bf16 %v2296_v63, %v2295_v4  ;;  %v2471_v3 = vld [vmem:[%s4837_s15 + $0x138] sm:$0xff]  ;;  %v4057_v38 = vld [vmem:[%s4843_s26 + $0x10] sm:$0xff]  }
 0xe27   : > { %v3509_v63 = vcombine.low %v2469_v39, %v2471_v3  ;;  %v3510_v4 = vcombine.high %v2469_v39, %v2471_v3  ;;  %2675 = vmatprep.subr.bf16.mxu1 %v3508_v53  ;;  %v4058_v39 = vld [vmem:[%s4843_s26 + $0x90] sm:$0xff]   ;;  %v4059_v53 = vld [vmem:[%s4843_s26 + $0x58] sm:$0xff]  }
 0xe28   : > { %3857 = vmatmul.mubr.bf16.vlgmr.msra.gmra.mrb[28].mxu0 %v2313_v6  ;;  %2676 = vmatpush1.bf16.msra.mxu1 %v3507_v7  ;;  %v2472_v6 = vld [vmem:[%s4837_s15 + $0x150] sm:$0xff]  ;;  %v4060_v3 = vld [vmem:[%s4843_s26 + $0xd8] sm:$0xff]  }
 0xe29   : > { %2742 = vmatprep.mubr.bf16.mxu0 %v4469_v9  ;;  %v4136_v9 = vld [vmem:[%s5430_s29 + $0x8] sm:$0xff]  ;;  %2711 = vmatpush1.bf16.msra.mxu0 %v3493_v58 }
 0xe2a   : > { %2712 = vmatprep.subr.bf16.mxu0 %v3498_v0  ;;  %v2481_v58 = vld [vmem:[%s4837_s15 + $0x1d8] sm:$0xff] }
 0xe2b   : > { %v3522_v62 = vcombine.high %v2481_v58, %v2483_v60  ;;  %v3521_v0 = vcombine.low %v2481_v58, %v2483_v60  ;;  %v4061_v7 = vld [vmem:[%s4843_s26 + $0x18] sm:$0xff]  }
 0xe2d   : > { %2713 = vmatpush1.bf16.msra.mxu0 %v3497_v2 }
 0xe2e   : > { %2714 = vmatprep.subr.bf16.mxu0 %v3502_v29 }
 0xe31   : > { %2715 = vmatpush1.bf16.msra.mxu0 %v3501_v28 }
 0xe32   : > { %2716 = vmatprep.subr.bf16.mxu0 %v3506_v37  ;;  %v4055_v37 = vld [vmem:[%s4843_s26 + $0x50] sm:$0xff]  }
 0xe35   : > { %2717 = vmatpush1.bf16.msra.mxu0 %v3505_v36  ;;  %v4054_v36 = vld [vmem:[%s4843_s26 + $0x88] sm:$0xff]  }
 0xe36   : > { %2718 = vmatprep.subr.bf16.mxu0 %v3510_v4  ;;  %v4063_v4 = vld [vmem:[%s4843_s26 + $0x60] sm:$0xff]  }
 0xe39   : > { %2719 = vmatpush1.bf16.msra.mxu0 %v3509_v63  ;;  %v4062_v63 = vld [vmem:[%s4843_s26 + $0x98] sm:$0xff]  }
 0xefb   : > { %v2403_v14 = vpop.f32.mrb[28].mxu0 }
 0xefc   : > { %v2404_v42 = vadd.f32 %v3480_v40, %v2403_v14  ;;  %v3858_v17 = vpop.f32.mrb[29].mxu0  ;;  %v2473_v14 = vld [vmem:[%s4837_s15 + $0x158] sm:$0xff] }
 0xefd   : > { %v2406_v5 = vpop.f32.mrb[30].mxu0  ;;  %v2475_v17 = vld [vmem:[%s4837_s15 + $0x178] sm:$0xff] }
 0xefe   : > { %v5170_v44 = vadd.f32 %v4135_v43, %v2404_v42  ;;  %v2407_v46 = vadd.f32 %v3480_v40, %v2406_v5  ;;  %v3859_v13 = vpop.f32.mrb[31].mxu0  ;;  %v2474_v40 = vld [vmem:[%s4837_s15 + $0x170] sm:$0xff]  ;;  %v3513_v43 = vcombine.low %v2473_v14, %v2475_v17 }
 0xeff   : > { %v3512_v42 = vcombine.high %v2472_v6, %v2474_v40  ;;  %v3511_v5 = vcombine.low %v2472_v6, %v2474_v40  ;;  %v2476_v13 = vld [vmem:[%s4837_s15 + $0x190] sm:$0xff]  ;;  %v4064_v6 = vld [vmem:[%s4843_s26 + $0xe0] sm:$0xff]  }
 0xf00   : > { %v5175_v47 = vadd.f32 %v4136_v9, %v2407_v46  ;;  %2414 = vadd.xlane.f32.xlu1 %v5170_v44  ;;  %v3514_v46 = vcombine.high %v2473_v14, %v2475_v17  ;;  %v2478_v9 = vld [vmem:[%s4837_s15 + $0x1b0] sm:$0xff]  ;;  %v4065_v40 = vld [vmem:[%s4843_s26 + $0x20] sm:$0xff]   ;;  %v4068_v17 = vld [vmem:[%s4843_s26 + $0xe8] sm:$0xff]  }
 0xf01   : > { %2677 = vmatprep.subr.bf16.mxu1 %v3512_v42  ;;  %v3516_v49 = vcombine.high %v2476_v13, %v2478_v9  ;;  %v3515_v45 = vcombine.low %v2476_v13, %v2478_v9  ;;  %v4066_v14 = vld [vmem:[%s4843_s26 + $0xa0] sm:$0xff]   ;;  %v4067_v42 = vld [vmem:[%s4843_s26 + $0x68] sm:$0xff]   ;;  %v4072_v13 = vld [vmem:[%s4843_s26 + $0xf0] sm:$0xff]  }
 0xf02   : > { %2416 = vadd.xlane.f32.xlu0 %v5175_v47  ;;  %2720 = vmatprep.subr.bf16.mxu0 %v3514_v46  ;;  %v4071_v46 = vld [vmem:[%s4843_s26 + $0x70] sm:$0xff]  }
 0xf03   : > { %2678 = vmatpush1.bf16.msra.mxu1 %v3511_v5  ;;  %2721 = vmatpush1.bf16.msra.mxu0 %v3513_v43  ;;  %v4069_v5 = vld [vmem:[%s4843_s26 + $0x28] sm:$0xff]   ;;  %v4073_v9 = vld [vmem:[%s4843_s26 + $0x30] sm:$0xff]  }
 0xf04   : > { %2679 = vmatprep.subr.bf16.mxu1 %v3516_v49  ;;  %2722 = vmatprep.subr.bf16.mxu0 %v3518_v56  ;;  %v4070_v43 = vld [vmem:[%s4843_s26 + $0xa8] sm:$0xff]   ;;  %v4075_v49 = vld [vmem:[%s4843_s26 + $0x78] sm:$0xff]  }
 0xf05   : > { %v2485_v56 = vld [vmem:[%s4845_s27 + $0x8] sm:$0xf] }
 0xf06   : > { %v2490_v57 = vrot.slane %v2485_v56, %v1137_v54  ;;  %v2498_v58 = vrot.slane %v2485_v56, %v1145_v52  ;;  %v2502_v60 = vrot.slane %v2485_v56, %v2501_v8 }
 0xf07   : > { %2680 = vmatpush1.bf16.msra.mxu1 %v3515_v45  ;;  %2723 = vmatpush1.bf16.msra.mxu0 %v3517_v55  ;;  %v4077_v45 = vld [vmem:[%s4843_s26 + $0x38] sm:$0xff]  }
 0xf08   : > { %2681 = vmatprep.subr.bf16.mxu1 %v3520_v59  ;;  %2724 = vmatprep.subr.bf16.mxu0 %v3522_v62  ;;  %v4078_v55 = vld [vmem:[%s4843_s26 + $0xb8] sm:$0xff]   ;;  %v2494_v59 = vrot.slane %v2485_v56, %v1141_v51 }
 0xf0b   : > { %2682 = vmatpush1.bf16.msra.mxu1 %v3519_v61  ;;  %2725 = vmatpush1.bf16.msra.mxu0 %v3521_v0 }
 0xf0c   : > { %3680 = vmatprep.subr.bf16.mxu1 %v4047_v31  ;;  %3702 = vmatprep.subr.bf16.mxu0 %v4048_v33 }
 0xf8d   : > { %v2415_v10 = vpop.xlane.xlu1 %2414 }
 0xf8e   : > { %v2418_v11 = vmul.f32 0.0078125, %v2415_v10 }
 0xf8f   : > { %v2417_v12 = vpop.xlane.xlu0 %2416 }
 0xf90   : > { %v5188_v15 = vsub.f32 %v5170_v44, %v2418_v11  ;;  %v2419_v16 = vmul.f32 0.0078125, %v2417_v12 }
 0xf92   : > { %v5191_v19 = vsub.f32 %v5175_v47, %v2419_v16  ;;  %v2422_v20 = vmul.f32 %v5188_v15, %v5188_v15 }
 0xf94   : > { %2424 = vadd.xlane.f32.xlu0 %v2422_v20  ;;  %v2423_v21 = vmul.f32 %v5191_v19, %v5191_v19 }
 0xf98   : > { %2426 = vadd.xlane.f32.xlu0 %v2423_v21 }
0x1021   : > { %v2425_v1 = vpop.xlane.xlu0 %2424 }
0x1022   : > { %v2428_v2 = vmul.f32 0.0078125, %v2425_v1 }
0x1024   : > { %v2430_v10 = vadd.f32 1e-06, %v2428_v2 }
0x1025   : > { %v2427_v11 = vpop.xlane.xlu0 %2426 }
0x1026   : > { %4115 = vrsqrt.f32 %v2430_v10  ;;  %v2429_v12 = vmul.f32 0.0078125, %v2427_v11 }
0x1028   : > { %v2431_v16 = vadd.f32 1e-06, %v2429_v12 }
0x102a   : > { %4117 = vrsqrt.f32 %v2431_v16 }
0x1030   : > { %v4116_v20 = vpop.eup %4115 }
0x1031   : > { %v2434_v21 = vmul.f32 %v4116_v20, %v5188_v15  ;;  %v4049_v15 = vld [vmem:[%s4843_s26] sm:$0xff]  }
0x1033   : > { %v2442_v25 = vmul.f32 %v3489_v22, %v2434_v21 }
0x1034   : > { %v4118_v23 = vpop.eup %4117 }
0x1035   : > { %v2435_v24 = vmul.f32 %v4118_v23, %v5191_v19  ;;  %v2450_v28 = vadd.f32 %v3490_v26, %v2442_v25  ;;  %v4051_v19 = vld [vmem:[%s4843_s26 + $0x48] sm:$0xff]  }
0x1037   : > { %v2443_v27 = vmul.f32 %v3489_v22, %v2435_v24 }
0x1039   : > { %v2451_v29 = vadd.f32 %v3490_v26, %v2443_v27 }
0x103b   : > { %v2484_v30 = vpack.c.bf16 %v2451_v29, %v2450_v28 }
0x103d   : > { %2700 = vmatmul.mubr.bf16.vlgmr.msra.gmra.mrb[44].mxu1 %v2484_v30  ;;  %2743 = vmatmul.mubr.bf16.vlgmr.msra.gmra.mrb[32].mxu0 %v2484_v30 }
0x103e   : > { %3681 = vmatpush3.bf16.msra.mxu1 %v4049_v15  ;;  %3703 = vmatpush3.bf16.msra.mxu0 %v4050_v34 }
0x103f   : > { %3682 = vmatprep.subr.bf16.mxu1 %v4051_v19  ;;  %3704 = vmatprep.subr.bf16.mxu0 %v4052_v35 }
0x1042   : > { %3683 = vmatpush3.bf16.msra.mxu1 %v4053_v32  ;;  %3705 = vmatpush3.bf16.msra.mxu0 %v4054_v36 }
0x1043   : > { %3684 = vmatprep.subr.bf16.mxu1 %v4055_v37  ;;  %3706 = vmatprep.subr.bf16.mxu0 %v4056_v18 }
0x1046   : > { %3685 = vmatpush3.bf16.msra.mxu1 %v4057_v38  ;;  %3707 = vmatpush3.bf16.msra.mxu0 %v4058_v39 }
0x1047   : > { %3686 = vmatprep.subr.bf16.mxu1 %v4059_v53  ;;  %3708 = vmatprep.subr.bf16.mxu0 %v4060_v3 }
0x104a   : > { %3687 = vmatpush3.bf16.msra.mxu1 %v4061_v7  ;;  %3709 = vmatpush3.bf16.msra.mxu0 %v4062_v63 }
0x104b   : > { %3688 = vmatprep.subr.bf16.mxu1 %v4063_v4  ;;  %3710 = vmatprep.subr.bf16.mxu0 %v4064_v6 }
0x104e   : > { %3689 = vmatpush3.bf16.msra.mxu1 %v4065_v40  ;;  %3711 = vmatpush3.bf16.msra.mxu0 %v4066_v14 }
0x104f   : > { %3690 = vmatprep.subr.bf16.mxu1 %v4067_v42  ;;  %3712 = vmatprep.subr.bf16.mxu0 %v4068_v17 }
0x1052   : > { %3691 = vmatpush3.bf16.msra.mxu1 %v4069_v5  ;;  %3713 = vmatpush3.bf16.msra.mxu0 %v4070_v43 }
0x1053   : > { %3692 = vmatprep.subr.bf16.mxu1 %v4071_v46  ;;  %3714 = vmatprep.subr.bf16.mxu0 %v4072_v13 }
0x1056   : > { %3693 = vmatpush3.bf16.msra.mxu1 %v4073_v9  ;;  %3715 = vmatpush3.bf16.msra.mxu0 %v4074_v48 }
0x1057   : > { %3694 = vmatprep.subr.bf16.mxu1 %v4075_v49  ;;  %3716 = vmatprep.subr.bf16.mxu0 %v4076_v41 }
0x105a   : > { %3695 = vmatpush3.bf16.msra.mxu1 %v4077_v45  ;;  %3717 = vmatpush3.bf16.msra.mxu0 %v4078_v55 }
0x1110   : > { %v2701_v61 = vpop.f32.mrb[44].mxu1  ;;  %v2744_v62 = vpop.f32.mrb[32].mxu0 }
0x1111   : > { %v5265_v0 = vadd.f32 %v2701_v61, %v2490_v57  ;;  %v5267_v1 = vadd.f32 %v2744_v62, %v2498_v58  ;;  %v2703_v2 = vpop.f32.mrb[45].mxu1  ;;  %v2746_v10 = vpop.f32.mrb[33].mxu0 }
0x1112   : > { %v5269_v11 = vadd.f32 %v2703_v2, %v2494_v59  ;;  %v5271_v12 = vadd.f32 %v2746_v10, %v2502_v60  ;;  %v2705_v54 = vpop.f32.mrb[46].mxu1  ;;  %v2748_v16 = vpop.f32.mrb[34].mxu0 }
0x1113   : > { %v2753_v52 = vmul.f32 %v5265_v0, %v5265_v0  ;;  %v2755_v50 = vmul.f32 %v5267_v1, %v5267_v1  ;;  %v5277_v51 = vadd.f32 %v2705_v54, %v2490_v57  ;;  %v5279_v20 = vadd.f32 %v2748_v16, %v2498_v58  ;;  %v2707_v21 = vpop.f32.mrb[47].mxu1  ;;  %v2750_v22 = vpop.f32.mrb[35].mxu0 }
0x1114   : > { %v2754_v23 = vmul.f32 %v5269_v11, %v5269_v11  ;;  %v2756_v24 = vmul.f32 %v5271_v12, %v5271_v12  ;;  %v5285_v25 = vadd.f32 %v2707_v21, %v2494_v59  ;;  %v5287_v26 = vadd.f32 %v2750_v22, %v2502_v60 }
0x1115   : > { %v2761_v27 = vmul.f32 %v2753_v52, %v5265_v0  ;;  %v2763_v28 = vmul.f32 %v2755_v50, %v5267_v1  ;;  %v2757_v29 = vmul.f32 %v5277_v51, %v5277_v51  ;;  %v2759_v30 = vmul.f32 %v5279_v20, %v5279_v20 }
0x1116   : > { %v2762_v31 = vmul.f32 %v2754_v23, %v5269_v11  ;;  %v2764_v33 = vmul.f32 %v2756_v24, %v5271_v12  ;;  %v2758_v15 = vmul.f32 %v5285_v25, %v5285_v25  ;;  %v2760_v34 = vmul.f32 %v5287_v26, %v5287_v26 }
0x1117   : > { %v2769_v19 = vmul.f32 0.044715, %v2761_v27  ;;  %v2771_v35 = vmul.f32 0.044715, %v2763_v28  ;;  %v2765_v32 = vmul.f32 %v2757_v29, %v5277_v51  ;;  %v2767_v36 = vmul.f32 %v2759_v30, %v5279_v20 }
0x1118   : > { %v2770_v37 = vmul.f32 0.044715, %v2762_v31  ;;  %v2772_v18 = vmul.f32 0.044715, %v2764_v33  ;;  %v2766_v38 = vmul.f32 %v2758_v15, %v5285_v25  ;;  %v2768_v39 = vmul.f32 %v2760_v34, %v5287_v26 }
0x1119   : > { %v2777_v53 = vadd.f32 %v2769_v19, %v5265_v0  ;;  %v2779_v3 = vadd.f32 %v2771_v35, %v5267_v1  ;;  %v2773_v7 = vmul.f32 0.044715, %v2765_v32  ;;  %v2775_v63 = vmul.f32 0.044715, %v2767_v36 }
0x111a   : > { %v2778_v4 = vadd.f32 %v2770_v37, %v5269_v11  ;;  %v2780_v6 = vadd.f32 %v2772_v18, %v5271_v12  ;;  %v2774_v40 = vmul.f32 0.044715, %v2766_v38  ;;  %v2776_v14 = vmul.f32 0.044715, %v2768_v39 }
0x111b   : > { %v2785_v42 = vmul.f32 0.7978846, %v2777_v53  ;;  %v2787_v17 = vmul.f32 0.7978846, %v2779_v3  ;;  %v2781_v5 = vadd.f32 %v2773_v7, %v5277_v51  ;;  %v2783_v43 = vadd.f32 %v2775_v63, %v5279_v20 }
0x111c   : > { %v2786_v46 = vmul.f32 0.7978846, %v2778_v4  ;;  %v2788_v13 = vmul.f32 0.7978846, %v2780_v6  ;;  %v2782_v9 = vadd.f32 %v2774_v40, %v5285_v25  ;;  %v2784_v48 = vadd.f32 %v2776_v14, %v5287_v26 }
0x111d   : > { %4119 = vtanh.f32 %v2785_v42  ;;  %v2789_v49 = vmul.f32 0.7978846, %v2781_v5  ;;  %v2791_v41 = vmul.f32 0.7978846, %v2783_v43 }
0x111e   : > { %4121 = vtanh.f32 %v2787_v17  ;;  %v2790_v45 = vmul.f32 0.7978846, %v2782_v9  ;;  %v2792_v55 = vmul.f32 0.7978846, %v2784_v48 }
0x111f   : > { %4123 = vtanh.f32 %v2786_v46 }
0x1120   : > { %4125 = vtanh.f32 %v2788_v13 }
0x1121   : > { %4127 = vtanh.f32 %v2789_v49 }
0x1122   : > { %4129 = vtanh.f32 %v2791_v41 }
0x1123   : > { %4131 = vtanh.f32 %v2790_v45 }
0x1124   : > { %4133 = vtanh.f32 %v2792_v55 }
0x1127   : > { %v4120_v56 = vpop.eup %4119 }
0x1128   : > { %v4122_v8 = vpop.eup %4121  ;;  %v2801_v57 = vadd.f32 1.0, %v4120_v56 }
0x1129   : > { %v4124_v58 = vpop.eup %4123  ;;  %v2803_v59 = vadd.f32 1.0, %v4122_v8 }
0x112a   : > { %v4126_v60 = vpop.eup %4125  ;;  %v2802_v61 = vadd.f32 1.0, %v4124_v58  ;;  %v2809_v54 = vmul.f32 0.5, %v2801_v57 }
0x112b   : > { %v4128_v62 = vpop.eup %4127  ;;  %v2804_v2 = vadd.f32 1.0, %v4126_v60  ;;  %v2811_v50 = vmul.f32 0.5, %v2803_v59 }
0x112c   : > { %v4130_v10 = vpop.eup %4129  ;;  %v2805_v16 = vadd.f32 1.0, %v4128_v62  ;;  %v2810_v27 = vmul.f32 0.5, %v2802_v61  ;;  %v2817_v31 = vmul.f32 %v2809_v54, %v5265_v0  ;;  %v3557_v61 = vld [vmem:[#allocation12] ss:$0 sm:$0xff] (!%p3556_p5) }
0x112d   : > { %v4132_v52 = vpop.eup %4131  ;;  %v2807_v21 = vadd.f32 1.0, %v4130_v10  ;;  %v2812_v30 = vmul.f32 0.5, %v2804_v2  ;;  %v2819_v34 = vmul.f32 %v2811_v50, %v5267_v1  ;;  %v3558_v2 = vld [vmem:[#allocation13] ss:$0 sm:$0xff] (!%p3556_p5) }
0x112e   : > { %v4134_v22 = vpop.eup %4133  ;;  %v2813_v23 = vmul.f32 0.5, %v2805_v16  ;;  %v2806_v24 = vadd.f32 1.0, %v4132_v52  ;;  %v2818_v32 = vmul.f32 %v2810_v27, %v5269_v11 }
0x112f   : > { %v2815_v28 = vmul.f32 0.5, %v2807_v21  ;;  %v2808_v29 = vadd.f32 1.0, %v4134_v22  ;;  %v2820_v18 = vmul.f32 %v2812_v30, %v5271_v12 }
0x1130   : > { %v2821_v33 = vmul.f32 %v2813_v23, %v5277_v51  ;;  %v2814_v15 = vmul.f32 0.5, %v2806_v24 }
0x1131   : > { %v2823_v19 = vmul.f32 %v2815_v28, %v5279_v20  ;;  %v2816_v35 = vmul.f32 0.5, %v2808_v29  ;;  %v3523_v20 = vld [vmem:[%s4845_s27 + $0xc] ss:$0 sm:$0xff]  ;;  %s5431_s27 = sld [smem:[#allocation28_spill]] (!%p3556_p5) }
0x1132   : > { %v2822_v36 = vmul.f32 %v2814_v15, %v5285_v25  ;;  %v2889_v37 = vpack.c.bf16 %v2821_v33, %v2817_v31 }
0x1133   : > { %v2824_v38 = vmul.f32 %v2816_v35, %v5287_v26  ;;  %v2891_v39 = vpack.c.bf16 %v2823_v19, %v2819_v34 }
0x1134   : > { %v2890_v0 = vpack.c.bf16 %v2822_v36, %v2818_v32 }
0x1135   : > { %v2892_v53 = vpack.c.bf16 %v2824_v38, %v2820_v18 }
0x1136   : > { %3124 = vmatprep.mubr.bf16.mxu1 %v2890_v0 }
0x1137   : > { %3165 = vmatprep.mubr.bf16.mxu0 %v2892_v53  ;;  %3125 = vmatmul.mubr.bf16.vlgmr.msra.gmra.mrb[48].mxu1 %v2889_v37 }
0x1138   : > { %3166 = vmatmul.mubr.bf16.vlgmr.msra.gmra.mrb[36].mxu0 %v2891_v39 }
0x120a   : > { %v3696_v1 = vpop.f32.mrb[48].mxu1 }
0x120b   : > { %v3718_v51 = vpop.f32.mrb[36].mxu0  ;;  %v3697_v3 = vpop.f32.mrb[49].mxu1 }
0x120c   : > { %v3698_v7 = vadd.f32 %v3697_v3, %v3696_v1  ;;  %v3719_v11 = vpop.f32.mrb[37].mxu0  ;;  %v3699_v63 = vpop.f32.mrb[50].mxu1 }
0x120d   : > { %v3720_v25 = vadd.f32 %v3719_v11, %v3718_v51  ;;  %v3721_v4 = vpop.f32.mrb[38].mxu0  ;;  %v3700_v6 = vpop.f32.mrb[51].mxu1 }
0x120e   : > { %v3127_v12 = vadd.f32 %v3698_v7, %v3523_v20  ;;  %v3701_v40 = vadd.f32 %v3700_v6, %v3699_v63  ;;  %v3722_v26 = vpop.f32.mrb[39].mxu0  ;;  %3179 = sbr.rel (%p3556_p5) target bundleno = 4944 (0x1350), region = 104 }
0x120f   : > { %v3723_v14 = vadd.f32 %v3722_v26, %v3721_v4 }
0x1210   : > { %v3168_v42 = vadd.f32 %v3720_v25, %v3127_v12  ;;  %v3130_v17 = vadd.f32 %v3701_v40, %v3523_v20 }
0x1212   : > { %v3174_v5 = vadd.f32 %v3168_v42, %v5170_v44  ;;  %v3171_v43 = vadd.f32 %v3723_v14, %v3130_v17 }
0x1214   : > { %v3175_v46 = vadd.f32 %v3171_v43, %v5175_v47  ;;  %3182 = vadd.xlane.f32.xlu0 (!%p3556_p5), %v3174_v5 }
0x1218   : > { %3184 = vadd.xlane.f32.xlu0 %v3175_v46 }
0x12a1   : > { %v3183_v13 = vpop.xlane.xlu0 %3182 }
0x12a2   : > { %v3186_v9 = vmul.f32 0.0078125, %v3183_v13 }
0x12a4   : > { %v3188_v48 = vsub.f32 %v3174_v5, %v3186_v9 }
0x12a5   : > { %v3185_v49 = vpop.xlane.xlu0 %3184 }
0x12a6   : > { %v3187_v41 = vmul.f32 0.0078125, %v3185_v49  ;;  %v3190_v45 = vmul.f32 %v3188_v48, %v3188_v48 }
0x12a8   : > { %v3189_v55 = vsub.f32 %v3175_v46, %v3187_v41  ;;  %3192 = vadd.xlane.f32.xlu1 %v3190_v45 }
0x12aa   : > { %v3191_v56 = vmul.f32 %v3189_v55, %v3189_v55 }
0x12ac   : > { %3194 = vadd.xlane.f32.xlu1 %v3191_v56 }
0x1335   : > { %v3193_v8 = vpop.xlane.xlu1 %3192 }
0x1336   : > { %v3196_v44 = vmul.f32 0.0078125, %v3193_v8 }
0x1338   : > { %v3198_v57 = vadd.f32 1e-06, %v3196_v44 }
0x1339   : > { %v3195_v58 = vpop.xlane.xlu1 %3194 }
0x133a   : > { %4137 = vrsqrt.f32 %v3198_v57  ;;  %v3197_v47 = vmul.f32 0.0078125, %v3195_v58 }
0x133c   : > { %v3199_v59 = vadd.f32 1e-06, %v3197_v47 }
0x133e   : > { %4139 = vrsqrt.f32 %v3199_v59 }
0x1344   : > { %v4138_v60 = vpop.eup %4137 }
0x1345   : > { %v3202_v62 = vmul.f32 %v4138_v60, %v3188_v48 }
0x1347   : > { %v3210_v10 = vmul.f32 %v3557_v61, %v3202_v62 }
0x1348   : > { %v4140_v54 = vpop.eup %4139 }
0x1349   : > { %v3218_v16 = vadd.f32 %v3558_v2, %v3210_v10  ;;  %v3203_v52 = vmul.f32 %v4140_v54, %v3189_v55 }
0x134b   : > { %3220 = vst [vmem:[%s5431_s27] sm:$0xff] %v3218_v16  ;;  %v3211_v50 = vmul.f32 %v3557_v61, %v3203_v52 }
0x134d   : > { %v3219_v21 = vadd.f32 %v3558_v2, %v3211_v50 }
0x134f   : > { %3221 = vst [vmem:[%s5431_s27 + $0x8] sm:$0xff] %v3219_v21 }
0x1350 PF: > { %p3559_p8 = scmp.eq.s32.totalorder %s4551_s19, 1 }
0x1351   : > { %s5432_s21 = sld [smem:[#allocation28_spill]] (!%p3559_p8) }
0x1352   : > { %3225 = sbr.rel (%p3559_p8) target bundleno = 4953 (0x1359), region = 108 }
0x1357   : > { %3226 = vst [vmem:[%s5432_s21] sm:$0xff] (!%p3559_p8), %v3174_v5  ;;  %3227 = vst [vmem:[%s5432_s21 + $0x8] sm:$0xff] (!%p3559_p8), %v3175_v46 }
0x1359 PF: > { %s5433_s16 = sld [smem:[#allocation21_spill]]  ;;  %s5434_s11 = sld [smem:[#allocation20_spill]] }
0x135a   : > { %s5435_s15 = sld [smem:[#allocation22_spill]]  ;;  %s5436_s13 = smov %s4445_s14 }
0x135f   : > { %p20_p3 = scmp.ge.s32.totalorder %s5433_s16, 4   ;;  %s5437_s14 = smov %s5434_s11 }
0x1361   :  { %22 = sbr.rel (!%p20_p3) target bundleno = 10 (0xa), region = 153 }
0x1368   :  { %3239 = vsyncpa [#allocation3], 1 }
0x1369   :  { %3241 = vsyncpa [#allocation3 + $0x1], 1 }
0x136a   :  { %3242 = vsyncpa [#allocation5], 1 }
0x136b   :  { %3243 = vsyncpa [#allocation8], 1 }

// kernel: albef_forward.4
= control target key start
LH: loop header
LB: loop body
LE: loop exit
PB: predicated region body
PF: predicated region fallthrough
CT: control target
= control target key end

     0   :  { %s6277_s0 = inlined_call_operand.vmem [shape: f32[16,128], index: 0, kind: input, shape index: {}]   ;;  %s6278_s1 = inlined_call_operand.vmem [shape: f32[16,128], index: 1, kind: input, shape index: {}]   ;;  %s6279_s2 = inlined_call_operand.vmem [shape: f32[2,8], index: 2, kind: input, shape index: {}]   ;;  %s6280_s3 = inlined_call_operand.hbm [shape: f32[1,128], index: 3, kind: input, shape index: {}]   ;;  %s6281_s4 = inlined_call_operand.hbm [shape: f32[1,128], index: 4, kind: input, shape index: {}]   ;;  %s6282_s5 = inlined_call_operand.hbm [shape: bf16[8,128,1536], index: 5, kind: input, shape index: {}]   ;;  %s6283_s6 = inlined_call_operand.hbm [shape: bf16[8,512,128], index: 6, kind: input, shape index: {}]   ;;  %s6284_s7 = inlined_call_operand.hbm [shape: f32[8,1,2432], index: 7, kind: input, shape index: {}]   ;;  %s6285_s8 = inlined_call_operand.vmem [shape: f32[8,16,128], index: 8, kind: output, shape index: {}]  }
   0x1   :  { %6299 = sst [smem:[#allocation16_spill]] %s6280_s3 }
   0x2   :  { %6300 = sst [smem:[#allocation17_spill]] %s6282_s5 }
   0x3   :  { %6301 = sst [smem:[#allocation18_spill]] %s6283_s6 }
   0x4   :  { %13 = vsyncpa [#allocation4], 0 }
   0x5   :  { %14 = vsyncpa [#allocation6], 0  ;;  %s5340_s27 = smov 0   ;;  %s5342_s28 = smov 0  }
   0x6   :  { %s5344_s29 = smov 0   ;;  %s5346_s30 = smov 0  }
   0x7 LB: > { %6302 = sst [smem:[#allocation13_spill]] %s5272_s29  ;;  %s5359_s9 = sadd.s32 4294967295, %s5276_s30   ;;  %s5276_s30 = sphi %s5346_s30, %s6328_s30   ;;  %s5272_s29 = sphi %s5344_s29, %s6330_s29   ;;  %s5268_s28 = sphi %s5342_s28, %s6332_s28   ;;  %s5264_s27 = sphi %s5340_s27, %s6331_s27  }
   0x8   : > { %s5362_s10 = sadd.s32 1, %s5276_s30   ;;  %s132_s12 = sadd.s32 1, %s5272_s29 }
   0x9   : > { %6303 = sst [smem:[#allocation14_spill]] %s5362_s10  ;;  %s129_s11 = ssub.s32 %s5276_s30, %s5362_s10 }
   0xa   : > { %p130_p0 = scmp.eq.s32.totalorder %s129_s11, 0  ;;  %p139_p1 = scmp.ne.s32.totalorder %s5272_s29, %s5268_s28 }
   0xb   : > { %p140_p2 = scmp.eq.s32.totalorder %s5276_s30, 0  ;;  %p145_p3 = scmp.ne.s32.totalorder %s5268_s28, %s5264_s27 }
   0xc   : > { %s5372_s13 = scalar_select %p130_p0, %s5272_s29, %s132_s12  }
   0xd   : > { %p5374_p4 = por %p140_p2, %p139_p1  ;;  %p6286_p5 = scmp.eq.s32.totalorder %s5359_s9, 0 }
   0xe   : > { %6304 = sst [smem:[#allocation15_spill]] %s5372_s13  ;;  %p4103_p6 = scmp.ge.s32.totalorder %s5276_s30, 1 }
   0xf   : > { %p234_p7 = scmp.lt.s32.totalorder %s5276_s30, 9  ;;  %p5383_p8 = por %p6286_p5, %p145_p3 }
  0x10   : > { %s5278_s17 = smov [#allocation3]   ;;  %p4751_p12 = scmp.lt.s32.totalorder %s5276_s30, 8 }
  0x11   : > { %s6306_s15 = scalar_select %p5383_p8, 1, 0 }
  0x12   : > { %p5388_p10 = pnand %p4103_p6, %p234_p7  ;;  %s256_s18 = sshll.u32 %s5278_s17, 4  ;;  %s257_s18 = int_to_ptr.vmem [resolvable:$true] %s256_s18 }
  0x13   : > { %p5404_p0 = pnand %p4751_p12, %p5374_p4  ;;  %s5409_s22 = sand.u32 1, %s5272_s29  }
  0x14   : > { %s6307_s16 = scalar_select %p5388_p10, 1, 0 }
  0x15   : > { %p4732_p11 = pneg %p5388_p10  ;;  %s4712_s23 = smul.u32 768, %s5409_s22 }
  0x16   : > { %s6309_s21 = scalar_select %p5404_p0, 1, 0 }
  0x17   : > { %p5398_p13 = pnand %p4732_p11, %p6286_p5  ;;  %s6310_s3 = sld [smem:[#allocation16_spill]] }
  0x19   : > { %s6308_s20 = scalar_select %p5398_p13, 1, 0 }
  0x1a   : > { %p6290_p2 = pneg %p5398_p13 }
  0x1d   : > { %s5088_s26 = scalar_lea.hbm %s6310_s3, 16 }
  0x1e   : > { %p5089_p1 = scmp.ne.s32.totalorder %s6310_s3, %s5088_s26  ;;  %p5095_p6 = scmp.lt.u32.totalorder %s5088_s26, %s6310_s3 }
  0x20   : > { %p5091_p3 = pnand %p6290_p2, %p5089_p1 }
  0x22   : > { %p5092_p4 = pneg %p5091_p3 }
  0x24   : > { %p5097_p7 = pnand %p5095_p6, %p5092_p4 }
  0x26   : > { %5100 = shalt.err (!%p5097_p7)
}
  0x27   : > { %s5101_s17 = scalar_lea.vmem %s257_s18, 16  ;;  %s5108_s24 = scalar_lea.vmem %s257_s18, 32 }
  0x28   : > { %p5102_p11 = scmp.ne.s32.totalorder %s257_s18, %s5101_s17  ;;  %p5109_p5 = scmp.lt.s32.totalorder %s257_s18, %s257_s18 }
  0x29   : > { %p5110_p8 = scmp.lt.s32.totalorder %s5108_s24, %s5101_s17 }
  0x2a   : > { %p5104_p12 = pnand %p5102_p11, %p6290_p2 }
  0x2b   : > { %p5111_p10 = por %p5110_p8, %p5109_p5 }
  0x2c   : > { %p5105_p9 = pneg %p5104_p12 }
  0x2e   : > { %p5112_p0 = pnand %p5111_p10, %p5105_p9 }
  0x30   : > { %5115 = shalt.err (!%p5112_p0)
}
  0x31   : > { %4735 = dma.hbm_to_vmem [thread:$0]  (!%p5398_p13), %s6310_s3, 16, %s257_s18, [#allocation4]  }
  0x32   : > { %s4713_s26 = smul.u32 12288, %s5276_s30  ;;  %s282_s11 = scalar_lea.vmem [#allocation7], %s4712_s23 }
  0x33   : > { %s289_s12 = sshll.u32 %s282_s11, 4  ;;  %s6311_s5 = sld [smem:[#allocation17_spill]]  ;;  %s5435_s12 = int_to_ptr.vmem [resolvable:$true] %s289_s12 }
  0x34   : > { %s6312_s24 = sand.u32 1, %s5276_s30   ;;  %p6313_p8 = scmp.ne.s32.totalorder %s6309_s21, 0 }
  0x35   : > { %s5444_s25 = scalar_lea.sflag [#allocation4], %s6312_s24 }
  0x36   : > { %p5450_p9 = pneg %p6313_p8 }
  0x38   : > { %s6314_s18 = scalar_select %p5450_p9, 1, 0 }
  0x39   : > { %s5440_s17 = scalar_lea.hbm %s6311_s5, %s4713_s26  ;;  %s5121_s26 = scalar_lea.hbm %s6311_s5, 98304 }
  0x3a   : > { %s5116_s27 = scalar_lea.hbm %s5440_s17, 12288  ;;  %p5122_p1 = scmp.lt.u32.totalorder %s5440_s17, %s6311_s5 }
  0x3b   : > { %p5117_p5 = scmp.ne.s32.totalorder %s5440_s17, %s5116_s27  ;;  %p5123_p3 = scmp.lt.u32.totalorder %s5121_s26, %s5116_s27 }
  0x3c   : > { %p5125_p6 = scmp.lt.u32.totalorder %s5116_s27, %s5440_s17 }
  0x3d   : > { %p5119_p10 = pnand %p5450_p9, %p5117_p5  ;;  %p5124_p4 = por %p5123_p3, %p5122_p1 }
  0x3f   : > { %p5120_p0 = pneg %p5119_p10  ;;  %p5126_p7 = por %p5125_p6, %p5124_p4 }
  0x41   : > { %p5127_p11 = pnand %p5126_p7, %p5120_p0 }
  0x43   : > { %5130 = shalt.err (!%p5127_p11)
}
  0x44   : > { %s5131_s24 = scalar_lea.vmem %s5435_s12, 12288  ;;  %s5279_s19 = smov [#allocation7]  }
  0x45   : > { %p5132_p12 = scmp.ne.s32.totalorder %s5435_s12, %s5131_s24  ;;  %s5136_s23 = sshll.u32 %s5279_s19, 4  ;;  %s5137_s23 = int_to_ptr.vmem [resolvable:$false] %s5136_s23 }
  0x46   : > { %s5138_s11 = scalar_lea.vmem %s5137_s23, 24576  ;;  %p5139_p2 = scmp.lt.s32.totalorder %s5435_s12, %s5137_s23 }
  0x47   : > { %p5134_p5 = pnand %p5132_p12, %p5450_p9  ;;  %p5140_p13 = scmp.lt.s32.totalorder %s5138_s11, %s5131_s24 }
  0x49   : > { %p5135_p10 = pneg %p5134_p5  ;;  %p5141_p1 = por %p5140_p13, %p5139_p2 }
  0x4b   : > { %p5142_p3 = pnand %p5141_p1, %p5135_p10 }
  0x4d   : > { %5145 = shalt.err (!%p5142_p3)
}
  0x4e   : > { %s5280_s27 = smov 768   ;;  %s5281_s26 = smov 48  }
  0x4f   : > { %4742 = dma.hbm_to_vmem [thread:$0]  (!%p6313_p8), %s5440_s17, 12288, %s5435_s12, %s5444_s25, %s5280_s27, %s5280_s27, %s5281_s26  }
  0x50   : > { %s4108_s14 = sshll.u32 %s5409_s22, 8  ;;  %s4294_s19 = sshll.u32 %s5276_s30, 12 }
  0x51   : > { %s6315_s6 = sld [smem:[#allocation18_spill]]  ;;  %s303_s23 = scalar_lea.vmem [#allocation8], %s4108_s14 }
  0x52   : > { %s310_s11 = sshll.u32 %s303_s23, 4  ;;  %s5481_s11 = int_to_ptr.vmem [resolvable:$true] %s310_s11 }
  0x57   : > { %s5479_s24 = scalar_lea.hbm %s6315_s6, %s4294_s19  ;;  %s5151_s27 = scalar_lea.hbm %s6315_s6, 32768 }
  0x58   : > { %s5146_s13 = scalar_lea.hbm %s5479_s24, 4096  ;;  %p5152_p4 = scmp.lt.u32.totalorder %s5479_s24, %s6315_s6 }
  0x59   : > { %p5147_p13 = scmp.ne.s32.totalorder %s5479_s24, %s5146_s13  ;;  %p5153_p6 = scmp.lt.u32.totalorder %s5151_s27, %s5146_s13 }
  0x5a   : > { %p5155_p11 = scmp.lt.u32.totalorder %s5146_s13, %s5479_s24 }
  0x5b   : > { %p5149_p2 = pnand %p5147_p13, %p5450_p9  ;;  %p5154_p7 = por %p5153_p6, %p5152_p4 }
  0x5d   : > { %p5150_p0 = pneg %p5149_p2  ;;  %p5156_p12 = por %p5155_p11, %p5154_p7 }
  0x5f   : > { %p5157_p5 = pnand %p5156_p12, %p5150_p0 }
  0x61   : > { %5160 = shalt.err (!%p5157_p5)
}
  0x62   : > { %s5161_s26 = scalar_lea.vmem %s5481_s11, 4096  ;;  %s5282_s14 = smov [#allocation8]  }
  0x63   : > { %p5162_p10 = scmp.ne.s32.totalorder %s5481_s11, %s5161_s26  ;;  %s5166_s19 = sshll.u32 %s5282_s14, 4  ;;  %s5167_s19 = int_to_ptr.vmem [resolvable:$false] %s5166_s19 }
  0x64   : > { %s5168_s23 = scalar_lea.vmem %s5167_s19, 8192  ;;  %p5169_p13 = scmp.lt.s32.totalorder %s5481_s11, %s5167_s19 }
  0x65   : > { %p5164_p1 = pnand %p5162_p10, %p5450_p9  ;;  %p5170_p2 = scmp.lt.s32.totalorder %s5168_s23, %s5161_s26 }
  0x67   : > { %p5165_p3 = pneg %p5164_p1  ;;  %p5171_p4 = por %p5170_p2, %p5169_p13 }
  0x69   : > { %p5172_p6 = pnand %p5171_p4, %p5165_p3 }
  0x6b   : > { %5175 = shalt.err (!%p5172_p6)
}
  0x6c   : > { %s5283_s13 = smov 64   ;;  %s5284_s12 = smov 4  }
  0x6d   : > { %4745 = dma.hbm_to_vmem [thread:$0]  (!%p6313_p8), %s5479_s24, 4096, %s5481_s11, %s5444_s25, %s5283_s13, %s5283_s13, %s5284_s12  }
  0x6e   : > { %s4714_s17 = smul.u32 19, %s5409_s22  ;;  %s5285_s27 = smov [#allocation5]  }
  0x6f   : > { %s267_s3 = sshll.u32 %s5285_s27, 4  ;;  %s4715_s5 = smul.u32 304, %s5276_s30  ;;  %s268_s3 = int_to_ptr.vmem [resolvable:$true] %s267_s3 }
  0x70   : > { %s5176_s19 = scalar_lea.hbm %s6281_s4, 16  ;;  %p6316_p7 = scmp.ne.s32.totalorder %s6308_s20, 0 }
  0x71   : > { %p5177_p0 = scmp.ne.s32.totalorder %s6281_s4, %s5176_s19  ;;  %p5183_p10 = scmp.lt.u32.totalorder %s5176_s19, %s6281_s4 }
  0x72   : > { %p6317_p11 = pneg %p6316_p7 }
  0x74   : > { %p5179_p12 = pnand %p5177_p0, %p6317_p11 }
  0x76   : > { %p5180_p5 = pneg %p5179_p12 }
  0x78   : > { %p5185_p1 = pnand %p5183_p10, %p5180_p5 }
  0x7a   : > { %5188 = shalt.err (!%p5185_p1)
}
  0x7b   : > { %s5189_s30 = scalar_lea.vmem %s268_s3, 16  ;;  %p6318_p13 = pmov %p6317_p11 }
  0x7c   : > { %p5190_p3 = scmp.ne.s32.totalorder %s268_s3, %s5189_s30  ;;  %s5196_s22 = scalar_lea.vmem %s268_s3, 32 }
  0x7d   : > { %p5197_p6 = scmp.lt.s32.totalorder %s268_s3, %s268_s3  ;;  %p5198_p8 = scmp.lt.s32.totalorder %s5196_s22, %s5189_s30 }
  0x7e   : > { %p5192_p2 = pnand %p5190_p3, %p6318_p13 }
  0x7f   : > { %p5199_p9 = por %p5198_p8, %p5197_p6 }
  0x80   : > { %p5193_p4 = pneg %p5192_p2 }
  0x82   : > { %p5200_p0 = pnand %p5199_p9, %p5193_p4 }
  0x84   : > { %5203 = shalt.err (!%p5200_p0)
}
  0x85   : > { %4738 = dma.hbm_to_vmem [thread:$0]  (!%p6316_p7), %s6281_s4, 16, %s268_s3, [#allocation6]  }
  0x86   : > { %s5530_s11 = scalar_lea.hbm %s6284_s7, %s4715_s5  ;;  %s324_s13 = scalar_lea.vmem [#allocation9], %s4714_s17 }
  0x87   : > { %s332_s12 = sshll.u32 %s324_s13, 4  ;;  %s5204_s27 = scalar_lea.hbm %s5530_s11, 304  ;;  %s333_s12 = int_to_ptr.vmem [resolvable:$true] %s332_s12 }
  0x88   : > { %p5205_p8 = scmp.ne.s32.totalorder %s5530_s11, %s5204_s27  ;;  %p6319_p9 = scmp.ne.s32.totalorder %s6314_s18, 0 }
  0x89   : > { %s5209_s3 = scalar_lea.hbm %s6284_s7, 2432  ;;  %p5210_p7 = scmp.lt.u32.totalorder %s5530_s11, %s6284_s7 }
  0x8a   : > { %p5207_p11 = pnand %p5205_p8, %p6319_p9  ;;  %p5211_p5 = scmp.lt.u32.totalorder %s5209_s3, %s5204_s27 }
  0x8b   : > { %p5213_p1 = scmp.lt.u32.totalorder %s5204_s27, %s5530_s11 }
  0x8c   : > { %p5208_p12 = pneg %p5207_p11  ;;  %p5212_p10 = por %p5211_p5, %p5210_p7 }
  0x8e   : > { %p5214_p3 = por %p5213_p1, %p5212_p10 }
  0x90   : > { %p5215_p13 = pnand %p5214_p3, %p5208_p12 }
  0x92   : > { %5218 = shalt.err (!%p5215_p13)
}
  0x93   : > { %s5219_s17 = scalar_lea.vmem %s333_s12, 304  ;;  %s5286_s5 = smov [#allocation9]  }
  0x94   : > { %p5220_p2 = scmp.ne.s32.totalorder %s333_s12, %s5219_s17  ;;  %s5224_s23 = sshll.u32 %s5286_s5, 4  ;;  %s5225_s23 = int_to_ptr.vmem [resolvable:$false] %s5224_s23 }
  0x95   : > { %s5226_s30 = scalar_lea.vmem %s5225_s23, 608  ;;  %p5227_p0 = scmp.lt.s32.totalorder %s333_s12, %s5225_s23 }
  0x96   : > { %p5222_p4 = pnand %p5220_p2, %p6319_p9  ;;  %p5228_p8 = scmp.lt.s32.totalorder %s5226_s30, %s5219_s17 }
  0x98   : > { %p5223_p6 = pneg %p5222_p4  ;;  %p5229_p11 = por %p5228_p8, %p5227_p0 }
  0x9a   : > { %p5230_p5 = pnand %p5229_p11, %p5223_p6 }
  0x9c   : > { %5233 = shalt.err (!%p5230_p5)
}
  0x9d   : > { %p6320_p7 = scmp.ne.s32.totalorder %s6309_s21, 0  ;;  %p6321_p12 = scmp.ne.s32.totalorder %s6307_s16, 0 }
  0x9e   : > { %p6322_p9 = scmp.eq.s32.totalorder (!%p6321_p12), %s5359_s9, 0 }
  0x9f   : > { %4748 = dma.hbm_to_vmem [thread:$0]  (!%p6320_p7), %s5530_s11, 304, %s333_s12, %s5444_s25  }
  0xa0   : > { %341 = sbr.rel (%p6321_p12) target bundleno = 7861 (0x1eb5), region = 52 }
  0xa7   : > { %5251 = dma.done.wait (%p6322_p9), [#allocation4], 16   ;;  %p6323_p10 = pmov %p6322_p9 }
  0xa8   : > { %p6324_p1 = pmov %p6322_p9 }
  0xa9   : > { %5253 = vsyncadd (%p6323_p10), [#allocation4], 4294967280 }
  0xaa   : > { %5255 = dma.done.wait (%p6324_p1), [#allocation6], 16   ;;  %p6325_p3 = pmov %p6324_p1 }
  0xab   : > { %s351_s21 = sand.u32 1, %s5359_s9   ;;  %s353_s25 = sand.u32 1, %s5268_s28  }
  0xac   : > { %5257 = vsyncadd (%p6325_p3), [#allocation6], 4294967280  ;;  %s4716_s18 = smul.u32 768, %s353_s25  ;;  %s352_s16 = scalar_lea.sflag [#allocation4], %s351_s21 }
  0xad   : > { %p6326_p13 = scmp.ne.s32.totalorder %s6306_s15, 0 }
  0xae   : > { %s5562_s22 = scalar_lea.vmem [#allocation7], %s4716_s18 }
  0xaf   : > { %5259 = dma.done.wait (%p6326_p13), %s352_s16, 16688  }
  0xb0   : > { %5261 = vsyncadd (%p6326_p13), %s352_s16, 4294950608  ;;  %s4115_s6 = sshll.u32 %s353_s25, 8  ;;  %s4717_s29 = smul.u32 19, %s353_s25 }
  0xb1   : > { %p416_p2 = scmp.lt.s32.totalorder %s5359_s9, 7  ;;  %s5575_s27 = scalar_lea.vmem [#allocation8], %s4115_s6 }
  0xb2   : > { %s5577_s20 = scalar_lea.vmem [#allocation9], %s4717_s29  ;;  %p6327_p4 = scmp.ne.s32.totalorder %s5359_s9, 0 }
  0xb3   : > { %s417_s10 = scalar_select %p416_p2, %s5359_s9, 7 }
  0xb4   : > { %425 = sbr.rel (%p6327_p4) target bundleno = 497 (0x1f1), region = 76  ;;  %v426_v0 = vld [vmem:[%s6277_s0] sm:$0xff] (!%p6327_p4)  ;;  %v427_v1 = vld [vmem:[%s6277_s0 + $0x8] sm:$0xff] (!%p6327_p4)  ;;  %v4119_v17 = vld [vmem:[#allocation3] ss:$0 sm:$0xff] (!%p6327_p4) }
  0xb5   : > { %s4295_s24 = sshll.u32 %s417_s10, 4  ;;  %430 = vadd.xlane.f32.xlu0 (!%p6327_p4), %v426_v0  ;;  %v4120_v19 = vld [vmem:[#allocation5] ss:$0 sm:$0xff] (!%p6327_p4) }
  0xb6   : > { %s5573_s12 = scalar_lea.vmem %s6285_s8, %s4295_s24 }
  0xb9   : > { %432 = vadd.xlane.f32.xlu0 (!%p6327_p4), %v427_v1 }
 0x142   : > { %v431_v2 = vpop.xlane.xlu0 %430 }
 0x143   : > { %v435_v3 = vmul.f32 0.0078125, %v431_v2 }
 0x145   : > { %v437_v4 = vsub.f32 %v426_v0, %v435_v3 }
 0x146   : > { %v433_v5 = vpop.xlane.xlu0 %432 }
 0x147   : > { %v436_v6 = vmul.f32 0.0078125, %v433_v5  ;;  %v439_v7 = vmul.f32 %v437_v4, %v437_v4 }
 0x149   : > { %v438_v8 = vsub.f32 %v427_v1, %v436_v6  ;;  %441 = vadd.xlane.f32.xlu1 %v439_v7 }
 0x14b   : > { %v440_v9 = vmul.f32 %v438_v8, %v438_v8 }
 0x14d   : > { %443 = vadd.xlane.f32.xlu1 %v440_v9 }
 0x1d6   : > { %v442_v10 = vpop.xlane.xlu1 %441 }
 0x1d7   : > { %v445_v11 = vmul.f32 0.0078125, %v442_v10 }
 0x1d9   : > { %v447_v12 = vadd.f32 1e-12, %v445_v11 }
 0x1da   : > { %v444_v13 = vpop.xlane.xlu1 %443 }
 0x1db   : > { %4800 = vrsqrt.f32 %v447_v12  ;;  %v446_v14 = vmul.f32 0.0078125, %v444_v13 }
 0x1dd   : > { %v448_v15 = vadd.f32 1e-12, %v446_v14 }
 0x1df   : > { %4802 = vrsqrt.f32 %v448_v15 }
 0x1e5   : > { %v4801_v16 = vpop.eup %4800 }
 0x1e6   : > { %v451_v18 = vmul.f32 %v4801_v16, %v437_v4 }
 0x1e8   : > { %v459_v20 = vmul.f32 %v4119_v17, %v451_v18 }
 0x1e9   : > { %v4803_v21 = vpop.eup %4802 }
 0x1ea   : > { %v467_v22 = vadd.f32 %v4120_v19, %v459_v20  ;;  %v452_v23 = vmul.f32 %v4803_v21, %v438_v8 }
 0x1ec   : > { %469 = vst [vmem:[#allocation2] sm:$0xff] %v467_v22  ;;  %v460_v24 = vmul.f32 %v4119_v17, %v452_v23 }
 0x1ee   : > { %v468_v25 = vadd.f32 %v4120_v19, %v460_v24 }
 0x1f0   : > { %470 = vst [vmem:[#allocation2 + $0x8] sm:$0xff] %v468_v25 }
 0x1f1 PF: > { %v4834_v26 = vld [vmem:[%s5562_s22 + $0x4] ss:$48 sps:$4 sm:$0xff]   ;;  %v4836_v27 = vld [vmem:[%s5562_s22] ss:$48 sps:$4 sm:$0xff]   ;;  %v5287_v28 = vmov 0   ;;  %v5288_v29 = vmov 0.0   ;;  %v510_v55 = vlaneseq }
 0x1f2   : > { %685 = vmatprep.mubr.bf16.mxu0 %v5287_v28  ;;  %4440 = vmatprep.subr.bf16.mxu1 %v5288_v29  ;;  %v4837_v30 = vld [vmem:[%s5562_s22 + $0x64] ss:$48 sps:$4 sm:$0xff]   ;;  %v4839_v31 = vld [vmem:[%s5562_s22 + $0x60] ss:$48 sps:$4 sm:$0xff]   ;;  %v4858_v37 = vld [vmem:[%s5562_s22 + $0x8] ss:$48 sps:$4 sm:$0xff]  }
 0x1f3   : > { %653 = vmatprep.subr.bf16.mxu0 %v4834_v26  ;;  %v4840_v32 = vld [vmem:[%s5562_s22 + $0xc4] ss:$48 sps:$4 sm:$0xff]   ;;  %v4842_v33 = vld [vmem:[%s5562_s22 + $0xc0] ss:$48 sps:$4 sm:$0xff]   ;;  %4441 = vmatpush3.bf16.msra.mxu1 %v4858_v37  ;;  %v4859_v38 = vld [vmem:[%s5562_s22 + $0x68] ss:$48 sps:$4 sm:$0xff]  }
 0x1f4   : > { %654 = vmatpush1.bf16.msra.mxu0 %v4836_v27  ;;  %v4843_v34 = vld [vmem:[%s5562_s22 + $0x124] ss:$48 sps:$4 sm:$0xff]   ;;  %v4845_v35 = vld [vmem:[%s5562_s22 + $0x120] ss:$48 sps:$4 sm:$0xff]   ;;  %4442 = vmatprep.subr.bf16.mxu1 %v5288_v29  ;;  %v4860_v41 = vld [vmem:[%s5562_s22 + $0xc8] ss:$48 sps:$4 sm:$0xff]  }
 0x1f5   : > { %655 = vmatprep.subr.bf16.mxu0 %v4837_v30  ;;  %v4846_v36 = vld [vmem:[%s5562_s22 + $0x184] ss:$48 sps:$4 sm:$0xff]   ;;  %v4848_v39 = vld [vmem:[%s5562_s22 + $0x180] ss:$48 sps:$4 sm:$0xff]   ;;  %v4861_v44 = vld [vmem:[%s5562_s22 + $0x128] ss:$48 sps:$4 sm:$0xff]  }
 0x1f6   : > { %v4849_v40 = vld [vmem:[%s5562_s22 + $0x1e4] ss:$48 sps:$4 sm:$0xff]   ;;  %v4851_v42 = vld [vmem:[%s5562_s22 + $0x1e0] ss:$48 sps:$4 sm:$0xff]   ;;  %v4862_v47 = vld [vmem:[%s5562_s22 + $0x188] ss:$48 sps:$4 sm:$0xff]  }
 0x1f7   : > { %4443 = vmatpush3.bf16.msra.mxu1 %v4859_v38  ;;  %v4852_v43 = vld [vmem:[%s5562_s22 + $0x244] ss:$48 sps:$4 sm:$0xff]   ;;  %v4854_v45 = vld [vmem:[%s5562_s22 + $0x240] ss:$48 sps:$4 sm:$0xff]   ;;  %v4863_v51 = vld [vmem:[%s5562_s22 + $0x1e8] ss:$48 sps:$4 sm:$0xff]  }
 0x1f8   : > { %656 = vmatpush1.bf16.msra.mxu0 %v4839_v31  ;;  %4444 = vmatprep.subr.bf16.mxu1 %v5288_v29  ;;  %v4855_v46 = vld [vmem:[%s5562_s22 + $0x2a4] ss:$48 sps:$4 sm:$0xff]   ;;  %v4857_v48 = vld [vmem:[%s5562_s22 + $0x2a0] ss:$48 sps:$4 sm:$0xff]   ;;  %v4864_v53 = vld [vmem:[%s5562_s22 + $0x248] ss:$48 sps:$4 sm:$0xff]  }
 0x1f9   : > { %657 = vmatprep.subr.bf16.mxu0 %v4840_v32  ;;  %v471_v49 = vld [vmem:[#allocation2] sm:$0xff]  ;;  %v472_v50 = vld [vmem:[#allocation2 + $0x8] sm:$0xff]  ;;  %vm5289_vm0 = vmmov 0   ;;  %v5629_v56 = vshrl.u32 %v510_v55, 7  ;;  %vm767_vm1 = vcmask 261120   ;;  %vm902_vm2 = vcmask 1043456  }
 0x1fa   : > { %v507_v52 = vpack.c.bf16 %v472_v50, %v471_v49  ;;  %v4865_v54 = vld [vmem:[%s5562_s22 + $0x2a8] ss:$48 sps:$4 sm:$0xff]   ;;  %4456 = vmatprep.mubr.msk.bf16.mxu1 %vm5289_vm0, %v5288_v29  ;;  %v508_v58 = vld [vmem:[%s5577_s20] sm:$0x7]  ;;  %v5290_v22 = vmov 1966171168  }
 0x1fb   : > { %4445 = vmatpush3.bf16.msra.mxu1 %v4860_v41  ;;  %v5632_v57 = vsub.s32 1, %v5629_v56  ;;  %v5637_v60 = vsub.s32 0, %v5629_v56  ;;  %v520_v12 = vsub.s32 2, %v5629_v56  ;;  %v748_v23 = vunpack.c.l.s4 %v5290_v22  ;;  %s5291_s17 = smov 96   ;;  %s5292_s5 = smov 64  }
 0x1fc   : > { %658 = vmatpush1.bf16.msra.mxu0 %v4842_v33  ;;  %4446 = vmatprep.subr.bf16.mxu1 %v5288_v29  ;;  %v4145_v26 = vld.sshfl [vmem:[%s6279_s2] sm:$0x11 pattern:$0x75316420]  ;;  %vm874_vm3 = vcmask 64512   ;;  %s5293_s23 = smov 32  }
 0x1fd   : > { %659 = vmatprep.subr.bf16.mxu0 %v4843_v34  ;;  %v517_v59 = vrot.slane %v508_v58, %v5632_v57  ;;  %v513_v2 = vrot.slane %v508_v58, %v5637_v60  ;;  %v521_v13 = vrot.slane %v508_v58, %v520_v12  ;;  %v749_v24 = vunpack.c.0.s8 %v748_v23 }
 0x1fe   : > { %v746_v30 = vcombine.high %v4145_v26, %v4145_v26  ;;  %vm1696_vm4 = vcmask 523264   ;;  %vm1699_vm5 = vcmask 785408  }
 0x1ff   : > { %4447 = vmatpush3.bf16.msra.mxu1 %v4861_v44  ;;  %v752_v25 = vsub.s32 %v749_v24, %v5629_v56 }
 0x200   : > { %660 = vmatpush1.bf16.msra.mxu0 %v4845_v35  ;;  %4448 = vmatprep.subr.bf16.mxu1 %v5288_v29 }
 0x201   : > { %661 = vmatprep.subr.bf16.mxu0 %v4846_v36  ;;  %v753_v27 = vrot.slane %v4145_v26, %v752_v25  ;;  %v760_v38 = vrot.slane %v746_v30, %v752_v25 }
 0x203   : > { %4449 = vmatpush3.bf16.msra.mxu1 %v4862_v47  ;;  %v5675_v31 = vrot.slane %v753_v27, %v5637_v60 }
 0x204   : > { %662 = vmatpush1.bf16.msra.mxu0 %v4848_v39  ;;  %4450 = vmatprep.subr.bf16.mxu1 %v5288_v29 }
 0x205   : > { %663 = vmatprep.subr.bf16.mxu0 %v4849_v40  ;;  %v5680_v40 = vrot.slane %v760_v38, %v5637_v60 }
 0x207   : > { %4451 = vmatpush3.bf16.msra.mxu1 %v4863_v51 }
 0x208   : > { %664 = vmatpush1.bf16.msra.mxu0 %v4851_v42  ;;  %4452 = vmatprep.subr.bf16.mxu1 %v5288_v29 }
 0x209   : > { %665 = vmatprep.subr.bf16.mxu0 %v4852_v43 }
 0x20b   : > { %4453 = vmatpush3.bf16.msra.mxu1 %v4864_v53 }
 0x20c   : > { %666 = vmatpush1.bf16.msra.mxu0 %v4854_v45  ;;  %4454 = vmatprep.subr.bf16.mxu1 %v5288_v29 }
 0x20d   : > { %667 = vmatprep.subr.bf16.mxu0 %v4855_v46 }
 0x20f   : > { %4455 = vmatpush3.bf16.msra.mxu1 %v4865_v54 }
 0x210   : > { %668 = vmatpush1.bf16.msra.mxu0 %v4857_v48  ;;  %4460 = vmatprep.subr.bf16.mxu1 %v5288_v29 }
 0x211   : > { %4484 = vmatprep.subr.bf16.mxu0 %v5288_v29 }
 0x212   : > { %4457 = vmatmul.mubr.bf16.vlgmr.msra.gmra.mrb[0].mxu1 %v507_v52 }
 0x213   : > { %686 = vmatmul.mubr.bf16.vlgmr.msra.gmra.mrb[0].mxu0 %v507_v52  ;;  %4462 = vmatprep.mubr.msk.bf16.mxu1 %vm5289_vm0, %v5288_v29 }
 0x214   : > { %4486 = vmatprep.mubr.msk.bf16.mxu0 %vm5289_vm0, %v5288_v29 }
 0x2e5   : > { %v730_v14 = vpop.f32.mrb[0].mxu1 }
 0x2e6   : > { %v687_v61 = vpop.f32.mrb[0].mxu0  ;;  %v731_v15 = vadd.f32 %v730_v14, %v521_v13  ;;  %v4458_v16 = vpop.f32.mrb[1].mxu1 }
 0x2e7   : > { %v689_v62 = vpop.f32.mrb[1].mxu0  ;;  %v688_v6 = vadd.f32 %v687_v61, %v513_v2  ;;  %v733_v17 = vpop.f32.mrb[2].mxu1 }
 0x2e8   : > { %v690_v63 = vadd.f32 %v689_v62, %v517_v59  ;;  %v691_v0 = vpop.f32.mrb[2].mxu0  ;;  %v5665_v18 = vpack.c.bf16 %v731_v15, %v731_v15  ;;  %v734_v19 = vadd.f32 %v733_v17, %v521_v13  ;;  %v4459_v20 = vpop.f32.mrb[3].mxu1 }
 0x2e9   : > { %v693_v1 = vpop.f32.mrb[3].mxu0  ;;  %v5647_v8 = vpack.c.bf16 %v688_v6, %v688_v6  ;;  %v692_v10 = vadd.f32 %v691_v0, %v513_v2 }
 0x2ea   : > { %v5640_v3 = vpack.c.bf16 %v690_v63, %v690_v63  ;;  %v694_v4 = vadd.f32 %v693_v1, %v517_v59  ;;  %v904_v21 = vsel %vm902_vm2, %v5665_v18, 0  ;;  %v5696_v2 = vpack.c.bf16 %v734_v19, %v734_v19 }
 0x2eb   : > { %v5656_v11 = vpack.c.bf16 %v692_v10, %v692_v10 }
 0x2ec   : > { %v772_v5 = vsel %vm767_vm1, %v5640_v3, 0  ;;  %v5645_v7 = vpack.c.bf16 %v694_v4, %v694_v4  ;;  %v950_v6 = vsel %vm902_vm2, %v5696_v2, 0 }
 0x2ed   : > { %4461 = vmatpush3.bf16.xpose.msra.mxu1 %v772_v5 }
 0x2ee   : > { %4466 = vmatprep.subr.bf16.mxu1 %v5288_v29  ;;  %v818_v9 = vsel %vm767_vm1, %v5645_v7, 0 }
 0x2f4   : > { %4463 = vmatmul.mubr.msk.bf16.vlgmr.msra.gmra.mrb[4].mxu1 %vm767_vm1, %v5647_v8 }
 0x2f5   : > { %4467 = vmatpush3.bf16.xpose.msra.mxu1 %v818_v9  ;;  %4468 = vmatprep.mubr.msk.bf16.mxu1 %vm5289_vm0, %v5288_v29 }
 0x2f6   : > { %4472 = vmatprep.subr.bf16.mxu1 %v5288_v29 }
 0x2fc   : > { %4469 = vmatmul.mubr.msk.bf16.vlgmr.msra.gmra.mrb[8].mxu1 %vm767_vm1, %v5656_v11 }
 0x2fd   : > { %4474 = vmatprep.mubr.msk.bf16.mxu1 %vm5289_vm0, %v5288_v29  ;;  %4473 = vmatpush3.bf16.msra.mxu1 %v904_v21 }
 0x2fe   : > { %4478 = vmatprep.subr.bf16.mxu1 %v5288_v29 }
 0x3c7   : > { %v808_v32 = vpop.f32.mrb[4].mxu1 }
 0x3c8   : > { %v860_v33 = vmul.f32 0.17677669, %v808_v32  ;;  %v4464_v34 = vpop.f32.mrb[5].mxu1 }
 0x3c9   : > { %v811_v35 = vpop.f32.mrb[6].mxu1 }
 0x3ca   : > { %v4465_v36 = vpop.f32.mrb[7].mxu1  ;;  %v872_v37 = vadd.f32 %v5675_v31, %v860_v33 }
 0x3cc   : > { %v875_v39 = vsel %vm874_vm3, %v872_v37, -inf }
 0x3cd   : > { %876 = vmax.xlane.f32.xlu0 %v875_v39 }
 0x3cf   : > { %v854_v41 = vpop.f32.mrb[8].mxu1 }
 0x3d0   : > { %v861_v42 = vmul.f32 0.17677669, %v854_v41  ;;  %v4470_v43 = vpop.f32.mrb[9].mxu1 }
 0x3d1   : > { %v857_v44 = vpop.f32.mrb[10].mxu1 }
 0x3d2   : > { %v4471_v45 = vpop.f32.mrb[11].mxu1  ;;  %v873_v46 = vadd.f32 %v5680_v40, %v861_v42 }
 0x3d4   : > { %v878_v47 = vsel %vm874_vm3, %v873_v46, -inf }
 0x3d5   : > { %879 = vmax.xlane.f32.xlu0 %v878_v47 }
 0x3eb   : > { %996 = vrot.lane.b32.xlu0 %v5640_v3, %s5291_s17 }
 0x45a   : > { %v877_v48 = vpop.xlane.xlu0 %876 }
 0x45b   : > { %v881_v49 = vsub.f32 %v872_v37, %v877_v48 }
 0x45d   : > { %v883_v50 = vmul.f32 1.442695, %v881_v49 }
 0x45f   : > { %4994 = vpow2.f32 %v883_v50 }
 0x462   : > { %v880_v51 = vpop.xlane.xlu0 %879 }
 0x463   : > { %v882_v59 = vsub.f32 %v873_v46, %v880_v51 }
 0x465   : > { %v885_v61 = vmul.f32 1.442695, %v882_v59 }
 0x466   : > { %v997_v52 = vpop.permute.xlu0 %996 }
 0x467   : > { %v1002_v53 = vsel %vm767_vm1, %v997_v52, 0  ;;  %4996 = vpow2.f32 %v885_v61 }
 0x468   : > { %4485 = vmatpush3.bf16.xpose.msra.mxu0 %v1002_v53 }
 0x469   : > { %v4995_v54 = vpop.eup %4994  ;;  %4496 = vmatprep.subr.bf16.mxu0 %v5288_v29 }
 0x46a   : > { %v887_v58 = vsel %vm874_vm3, %v4995_v54, 0.0 }
 0x46b   : > { %888 = vadd.xlane.f32.xlu1 %v887_v58 }
 0x471   : > { %v4997_v62 = vpop.eup %4996 }
 0x472   : > { %v890_v63 = vsel %vm874_vm3, %v4997_v62, 0.0 }
 0x47c   : > { %1048 = vrot.lane.b32.xlu1 %v5645_v7, %s5291_s17 }
 0x4a0   : > { %891 = vadd.xlane.f32.xlu1 %v890_v63 }
 0x4b1   : > { %993 = vrot.lane.b32.xlu1 %v5647_v8, %s5291_s17 }
 0x4b5   : > { %1045 = vrot.lane.b32.xlu1 %v5656_v11, %s5291_s17 }
 0x4f8   : > { %v889_v0 = vpop.xlane.xlu1 %888 }
 0x4f9   : > { %4998 = vrcp.f32 %v889_v0 }
 0x4fc   : > { %v1049_v9 = vpop.permute.xlu1 %1048 }
 0x4fd   : > { %v1054_v17 = vsel %vm767_vm1, %v1049_v9, 0 }
 0x503   : > { %v4999_v1 = vpop.eup %4998 }
 0x504   : > { %v895_v4 = vmul.f32 %v4999_v1, %v4995_v54 }
 0x506   : > { %v897_v5 = vpack.c.bf16 %v895_v4, %v895_v4 }
 0x508   : > { %4475 = vmatmul.mubr.msk.bf16.vlgmr.msra.gmra.mrb[12].mxu1 %vm874_vm3, %v897_v5 }
 0x509   : > { %4479 = vmatpush3.bf16.msra.mxu1 %v950_v6  ;;  %4480 = vmatprep.mubr.msk.bf16.mxu1 %vm5289_vm0, %v5288_v29 }
 0x50a   : > { %4490 = vmatprep.subr.bf16.mxu1 %v5288_v29 }
 0x52d   : > { %v892_v10 = vpop.xlane.xlu1 %891 }
 0x52e   : > { %5000 = vrcp.f32 %v892_v10 }
 0x531   : > { %v994_v13 = vpop.permute.xlu1 %993 }
 0x532   : > { %4487 = vmatmul.mubr.msk.bf16.vlgmr.msra.gmra.mrb[4].mxu0 %vm767_vm1, %v994_v13 }
 0x533   : > { %4498 = vmatprep.mubr.msk.bf16.mxu0 %vm5289_vm0, %v5288_v29 }
 0x535   : > { %v1046_v19 = vpop.permute.xlu1 %1045 }
 0x538   : > { %v5001_v14 = vpop.eup %5000 }
 0x539   : > { %v896_v15 = vmul.f32 %v5001_v14, %v4997_v62 }
 0x53b   : > { %v898_v16 = vpack.c.bf16 %v896_v15, %v896_v15 }
 0x53d   : > { %4481 = vmatmul.mubr.msk.bf16.vlgmr.msra.gmra.mrb[16].mxu1 %vm874_vm3, %v898_v16 }
 0x53e   : > { %4491 = vmatpush3.bf16.xpose.msra.mxu1 %v1054_v17  ;;  %4492 = vmatprep.mubr.msk.bf16.mxu1 %vm5289_vm0, %v5288_v29 }
 0x53f   : > { %4502 = vmatprep.subr.bf16.mxu1 %v5288_v29 }
 0x545   : > { %4493 = vmatmul.mubr.msk.bf16.vlgmr.msra.gmra.mrb[20].mxu1 %vm767_vm1, %v1046_v19 }
 0x546   : > { %4504 = vmatprep.mubr.msk.bf16.mxu1 %vm5289_vm0, %v5288_v29 }
 0x5db   : > { %v5715_v20 = vpop.f32.mrb[12].mxu1 }
 0x5dc   : > { %v4476_v21 = vpop.f32.mrb[13].mxu1 }
 0x5dd   : > { %v943_v22 = vpop.f32.mrb[14].mxu1 }
 0x5de   : > { %v4477_v23 = vpop.f32.mrb[15].mxu1 }
 0x605   : > { %v1038_v24 = vpop.f32.mrb[4].mxu0 }
 0x606   : > { %v1096_v25 = vmul.f32 0.17677669, %v1038_v24  ;;  %v4488_v26 = vpop.f32.mrb[5].mxu0 }
 0x607   : > { %v1041_v27 = vpop.f32.mrb[6].mxu0 }
 0x608   : > { %v4489_v30 = vpop.f32.mrb[7].mxu0  ;;  %v1098_v32 = vadd.f32 %v1096_v25, %v5675_v31 }
 0x60a   : > { %v1100_v33 = vsel %vm874_vm3, %v1098_v32, -inf }
 0x60b   : > { %1101 = vmax.xlane.f32.xlu0 %v1100_v33 }
 0x610   : > { %v5719_v34 = vpop.f32.mrb[16].mxu1 }
 0x611   : > { %v4482_v35 = vpop.f32.mrb[17].mxu1 }
 0x612   : > { %v989_v36 = vpop.f32.mrb[18].mxu1 }
 0x613   : > { %v4483_v37 = vpop.f32.mrb[19].mxu1 }
 0x618   : > { %v1090_v38 = vpop.f32.mrb[20].mxu1 }
 0x619   : > { %v1097_v39 = vmul.f32 0.17677669, %v1090_v38  ;;  %v4494_v41 = vpop.f32.mrb[21].mxu1 }
 0x61a   : > { %v1093_v42 = vpop.f32.mrb[22].mxu1 }
 0x61b   : > { %v4495_v43 = vpop.f32.mrb[23].mxu1  ;;  %v1099_v44 = vadd.f32 %v1097_v39, %v5680_v40 }
 0x61d   : > { %v1103_v45 = vsel %vm874_vm3, %v1099_v44, -inf }
 0x61e   : > { %1104 = vmax.xlane.f32.xlu1 %v1103_v45 }
 0x62f   : > { %1174 = vrot.lane.b32.xlu1 %v5696_v2, %s5291_s17 }
 0x633   : > { %1224 = vrot.lane.b32.xlu1 %v5640_v3, %s5292_s5 }
 0x637   : > { %1274 = vrot.lane.b32.xlu1 %v5645_v7, %s5292_s5 }
 0x63b   : > { %1272 = vrot.lane.b32.xlu1 %v5656_v11, %s5292_s5 }
 0x698   : > { %v1102_v46 = vpop.xlane.xlu0 %1101 }
 0x699   : > { %v1106_v47 = vsub.f32 %v1098_v32, %v1102_v46 }
 0x69b   : > { %v1108_v48 = vmul.f32 1.442695, %v1106_v47 }
 0x69d   : > { %5002 = vpow2.f32 %v1108_v48 }
 0x6a7   : > { %v5003_v49 = vpop.eup %5002 }
 0x6a8   : > { %v1112_v50 = vsel %vm874_vm3, %v5003_v49, 0.0 }
 0x6a9   : > { %1113 = vadd.xlane.f32.xlu0 %v1112_v50 }
 0x6ab   : > { %v1105_v51 = vpop.xlane.xlu1 %1104 }
 0x6ac   : > { %v1107_v52 = vsub.f32 %v1099_v44, %v1105_v51 }
 0x6ae   : > { %v1110_v53 = vmul.f32 1.442695, %v1107_v52 }
 0x6af   : > { %v1175_v54 = vpop.permute.xlu1 %1174 }
 0x6b0   : > { %5004 = vpow2.f32 %v1110_v53  ;;  %v1180_v58 = vsel %vm902_vm2, %v1175_v54, 0 }
 0x6b1   : > { %4503 = vmatpush3.bf16.msra.mxu1 %v1180_v58 }
 0x6b2   : > { %4514 = vmatprep.subr.bf16.mxu1 %v5288_v29 }
 0x6b3   : > { %v1225_v6 = vpop.permute.xlu1 %1224 }
 0x6b4   : > { %v1230_v15 = vsel %vm767_vm1, %v1225_v6, 0 }
 0x6b7   : > { %v1275_v14 = vpop.permute.xlu1 %1274 }
 0x6b8   : > { %v1280_v17 = vsel %vm767_vm1, %v1275_v14, 0 }
 0x6ba   : > { %v5005_v59 = vpop.eup %5004 }
 0x6bb   : > { %v1115_v61 = vsel %vm874_vm3, %v5005_v59, 0.0  ;;  %v1273_v21 = vpop.permute.xlu1 %1272 }
 0x6bc   : > { %1116 = vadd.xlane.f32.xlu0 %v1115_v61 }
 0x6d2   : > { %1125 = vrot.lane.b32.xlu0 %v5665_v18, %s5291_s17 }
 0x6d6   : > { %1222 = vrot.lane.b32.xlu0 %v5647_v8, %s5292_s5 }
 0x736   : > { %v1114_v62 = vpop.xlane.xlu0 %1113 }
 0x737   : > { %5006 = vrcp.f32 %v1114_v62 }
 0x741   : > { %v5007_v63 = vpop.eup %5006 }
 0x742   : > { %v1120_v1 = vmul.f32 %v5007_v63, %v5003_v49 }
 0x744   : > { %v1122_v9 = vpack.c.bf16 %v1120_v1, %v1120_v1 }
 0x749   : > { %v1117_v0 = vpop.xlane.xlu0 %1116 }
 0x74a   : > { %5008 = vrcp.f32 %v1117_v0 }
 0x74d   : > { %v1126_v4 = vpop.permute.xlu0 %1125 }
 0x74e   : > { %v1131_v5 = vsel %vm902_vm2, %v1126_v4, 0 }
 0x74f   : > { %4497 = vmatpush3.bf16.msra.mxu0 %v1131_v5 }
 0x750   : > { %4508 = vmatprep.subr.bf16.mxu0 %v5288_v29 }
 0x751   : > { %v1223_v19 = vpop.permute.xlu0 %1222 }
 0x752   : > { %4499 = vmatmul.mubr.msk.bf16.vlgmr.msra.gmra.mrb[8].mxu0 %vm874_vm3, %v1122_v9 }
 0x753   : > { %4510 = vmatprep.mubr.msk.bf16.mxu0 %vm5289_vm0, %v5288_v29 }
 0x754   : > { %v5009_v10 = vpop.eup %5008 }
 0x755   : > { %v1121_v13 = vmul.f32 %v5009_v10, %v5005_v59 }
 0x757   : > { %v1123_v16 = vpack.c.bf16 %v1121_v13, %v1121_v13 }
 0x758   : > { %4509 = vmatpush3.bf16.xpose.msra.mxu0 %v1230_v15 }
 0x759   : > { %4505 = vmatmul.mubr.msk.bf16.vlgmr.msra.gmra.mrb[24].mxu1 %vm874_vm3, %v1123_v16  ;;  %4520 = vmatprep.subr.bf16.mxu0 %v5288_v29 }
 0x75a   : > { %4515 = vmatpush3.bf16.xpose.msra.mxu1 %v1280_v17  ;;  %4516 = vmatprep.mubr.msk.bf16.mxu1 %vm5289_vm0, %v5288_v29 }
 0x75b   : > { %4526 = vmatprep.subr.bf16.mxu1 %v5288_v29 }
 0x75f   : > { %4511 = vmatmul.mubr.msk.bf16.vlgmr.msra.gmra.mrb[12].mxu0 %vm767_vm1, %v1223_v19 }
 0x760   : > { %4522 = vmatprep.mubr.msk.bf16.mxu0 %vm5289_vm0, %v5288_v29 }
 0x761   : > { %4517 = vmatmul.mubr.msk.bf16.vlgmr.msra.gmra.mrb[28].mxu1 %vm767_vm1, %v1273_v21 }
 0x762   : > { %4528 = vmatprep.mubr.msk.bf16.mxu1 %vm5289_vm0, %v5288_v29 }
 0x825   : > { %v5757_v22 = vpop.f32.mrb[8].mxu0 }
 0x826   : > { %v4500_v23 = vpop.f32.mrb[9].mxu0 }
 0x827   : > { %v1170_v24 = vpop.f32.mrb[10].mxu0 }
 0x828   : > { %v4501_v25 = vpop.f32.mrb[11].mxu0 }
 0x82c   : > { %v5759_v26 = vpop.f32.mrb[24].mxu1 }
 0x82d   : > { %v4804_v27 = vpack.i.bf16 %v5759_v26, %v5757_v22  ;;  %v4506_v30 = vpop.f32.mrb[25].mxu1 }
 0x82e   : > { %v1219_v32 = vpop.f32.mrb[26].mxu1 }
 0x82f   : > { %v4507_v33 = vpop.f32.mrb[27].mxu1 }
 0x832   : > { %v1266_v35 = vpop.f32.mrb[12].mxu0 }
 0x833   : > { %v1322_v36 = vmul.f32 0.17677669, %v1266_v35  ;;  %v4512_v37 = vpop.f32.mrb[13].mxu0 }
 0x834   : > { %v1269_v38 = vpop.f32.mrb[14].mxu0  ;;  %v1316_v39 = vpop.f32.mrb[28].mxu1 }
 0x835   : > { %v1323_v41 = vmul.f32 0.17677669, %v1316_v39  ;;  %v4513_v42 = vpop.f32.mrb[15].mxu0  ;;  %v4518_v43 = vpop.f32.mrb[29].mxu1  ;;  %v1324_v44 = vadd.f32 %v1322_v36, %v5675_v31 }
 0x836   : > { %v1319_v45 = vpop.f32.mrb[30].mxu1 }
 0x837   : > { %v4519_v46 = vpop.f32.mrb[31].mxu1  ;;  %v1326_v47 = vsel %vm874_vm3, %v1324_v44, -inf  ;;  %v1325_v48 = vadd.f32 %v1323_v41, %v5680_v40 }
 0x838   : > { %1327 = vmax.xlane.f32.xlu0 %v1326_v47 }
 0x839   : > { %v1329_v49 = vsel %vm874_vm3, %v1325_v48, -inf }
 0x83a   : > { %1330 = vmax.xlane.f32.xlu1 %v1329_v49 }
 0x84b   : > { %1398 = vrot.lane.b32.xlu1 %v5696_v2, %s5292_s5 }
 0x84f   : > { %1448 = vrot.lane.b32.xlu1 %v5640_v3, %s5293_s23 }
 0x853   : > { %1498 = vrot.lane.b32.xlu1 %v5645_v7, %s5293_s23 }
 0x857   : > { %1496 = vrot.lane.b32.xlu1 %v5656_v11, %s5293_s23 }
 0x8c5   : > { %v1328_v50 = vpop.xlane.xlu0 %1327 }
 0x8c6   : > { %v1332_v51 = vsub.f32 %v1324_v44, %v1328_v50 }
 0x8c7   : > { %v1331_v52 = vpop.xlane.xlu1 %1330 }
 0x8c8   : > { %v1334_v53 = vmul.f32 1.442695, %v1332_v51  ;;  %v1333_v54 = vsub.f32 %v1325_v48, %v1331_v52 }
 0x8ca   : > { %5010 = vpow2.f32 %v1334_v53  ;;  %v1336_v58 = vmul.f32 1.442695, %v1333_v54 }
 0x8cb   : > { %v1399_v59 = vpop.permute.xlu1 %1398 }
 0x8cc   : > { %5012 = vpow2.f32 %v1336_v58  ;;  %v1404_v61 = vsel %vm902_vm2, %v1399_v59, 0 }
 0x8cd   : > { %4527 = vmatpush3.bf16.msra.mxu1 %v1404_v61 }
 0x8ce   : > { %4538 = vmatprep.subr.bf16.mxu1 %v5288_v29 }
 0x8cf   : > { %v1449_v6 = vpop.permute.xlu1 %1448 }
 0x8d3   : > { %v1499_v15 = vpop.permute.xlu1 %1498 }
 0x8d4   : > { %v5011_v3 = vpop.eup %5010  ;;  %v1504_v17 = vsel %vm767_vm1, %v1499_v15, 0  ;;  %v4870_v15 = vld [vmem:[%s5562_s22 + $0x18c] ss:$48 sps:$4 sm:$0xff]  }
 0x8d5   : > { %v1338_v7 = vsel %vm874_vm3, %v5011_v3, 0.0 }
 0x8d6   : > { %v5013_v62 = vpop.eup %5012  ;;  %1339 = vadd.xlane.f32.xlu0 %v1338_v7 }
 0x8d7   : > { %v1341_v11 = vsel %vm874_vm3, %v5013_v62, 0.0  ;;  %v1497_v21 = vpop.permute.xlu1 %1496 }
 0x8da   : > { %1342 = vadd.xlane.f32.xlu0 %v1341_v11 }
 0x8f0   : > { %1350 = vrot.lane.b32.xlu0 %v5665_v18, %s5292_s5 }
 0x8f4   : > { %1446 = vrot.lane.b32.xlu0 %v5647_v8, %s5293_s23  ;;  %v1454_v8 = vsel %vm767_vm1, %v1449_v6, 0 }
 0x963   : > { %v1340_v63 = vpop.xlane.xlu0 %1339 }
 0x964   : > { %5014 = vrcp.f32 %v1340_v63 }
 0x967   : > { %v1343_v0 = vpop.xlane.xlu0 %1342 }
 0x968   : > { %5016 = vrcp.f32 %v1343_v0 }
 0x96b   : > { %v1351_v1 = vpop.permute.xlu0 %1350 }
 0x96c   : > { %v1356_v4 = vsel %vm902_vm2, %v1351_v1, 0 }
 0x96d   : > { %4521 = vmatpush3.bf16.msra.mxu0 %v1356_v4 }
 0x96e   : > { %v5015_v5 = vpop.eup %5014  ;;  %4532 = vmatprep.subr.bf16.mxu0 %v5288_v29 }
 0x96f   : > { %v1346_v9 = vmul.f32 %v5015_v5, %v5011_v3  ;;  %v1447_v19 = vpop.permute.xlu0 %1446 }
 0x971   : > { %v1348_v10 = vpack.c.bf16 %v1346_v9, %v1346_v9  ;;  %v4866_v9 = vld [vmem:[%s5562_s22 + $0xc] ss:$48 sps:$4 sm:$0xff]  }
 0x972   : > { %v5017_v13 = vpop.eup %5016 }
 0x973   : > { %v1347_v14 = vmul.f32 %v5017_v13, %v5013_v62  ;;  %4523 = vmatmul.mubr.msk.bf16.vlgmr.msra.gmra.mrb[16].mxu0 %vm874_vm3, %v1348_v10  ;;  %v4867_v10 = vld [vmem:[%s5562_s22 + $0x6c] ss:$48 sps:$4 sm:$0xff]  }
 0x974   : > { %4534 = vmatprep.mubr.msk.bf16.mxu0 %vm5289_vm0, %v5288_v29  ;;  %v4868_v13 = vld [vmem:[%s5562_s22 + $0xcc] ss:$48 sps:$4 sm:$0xff]  }
 0x975   : > { %v1349_v16 = vpack.c.bf16 %v1347_v14, %v1347_v14  ;;  %v4869_v14 = vld [vmem:[%s5562_s22 + $0x12c] ss:$48 sps:$4 sm:$0xff]  }
 0x976   : > { %4533 = vmatpush3.bf16.xpose.msra.mxu0 %v1454_v8  ;;  %v4871_v8 = vld [vmem:[%s5562_s22 + $0x1ec] ss:$48 sps:$4 sm:$0xff]  }
 0x977   : > { %4529 = vmatmul.mubr.msk.bf16.vlgmr.msra.gmra.mrb[32].mxu1 %vm874_vm3, %v1349_v16  ;;  %4544 = vmatprep.subr.bf16.mxu0 %v5288_v29  ;;  %v4872_v16 = vld [vmem:[%s5562_s22 + $0x24c] ss:$48 sps:$4 sm:$0xff]  }
 0x978   : > { %4539 = vmatpush3.bf16.xpose.msra.mxu1 %v1504_v17  ;;  %4540 = vmatprep.mubr.msk.bf16.mxu1 %vm5289_vm0, %v5288_v29  ;;  %v4873_v17 = vld [vmem:[%s5562_s22 + $0x2ac] ss:$48 sps:$4 sm:$0xff]  }
 0x979   : > { %4550 = vmatprep.subr.bf16.mxu1 %v5288_v29 }
 0x97d   : > { %4535 = vmatmul.mubr.msk.bf16.vlgmr.msra.gmra.mrb[20].mxu0 %vm767_vm1, %v1447_v19 }
 0x97e   : > { %4546 = vmatprep.mubr.msk.bf16.mxu0 %vm5289_vm0, %v5288_v29 }
 0x97f   : > { %4541 = vmatmul.mubr.msk.bf16.vlgmr.msra.gmra.mrb[36].mxu1 %vm767_vm1, %v1497_v21 }
 0x980   : > { %4552 = vmatprep.mubr.msk.bf16.mxu1 %vm5289_vm0, %v5288_v29 }
 0xa46   : > { %v1392_v23 = vpop.f32.mrb[16].mxu0 }
 0xa47   : > { %v4524_v24 = vpop.f32.mrb[17].mxu0 }
 0xa48   : > { %v1395_v25 = vpop.f32.mrb[18].mxu0 }
 0xa49   : > { %v4525_v30 = vpop.f32.mrb[19].mxu0 }
 0xa4a   : > { %v1440_v32 = vpop.f32.mrb[32].mxu1 }
 0xa4b   : > { %v4809_v33 = vpack.i.bf16 %v1440_v32, %v1392_v23  ;;  %v4530_v35 = vpop.f32.mrb[33].mxu1 }
 0xa4c   : > { %v1443_v36 = vpop.f32.mrb[34].mxu1 }
 0xa4d   : > { %v4531_v37 = vpop.f32.mrb[35].mxu1 }
 0xa50   : > { %v1490_v38 = vpop.f32.mrb[20].mxu0 }
 0xa51   : > { %v1546_v39 = vmul.f32 0.17677669, %v1490_v38  ;;  %v4536_v41 = vpop.f32.mrb[21].mxu0 }
 0xa52   : > { %v1493_v42 = vpop.f32.mrb[22].mxu0  ;;  %v1540_v43 = vpop.f32.mrb[36].mxu1 }
 0xa53   : > { %v1547_v44 = vmul.f32 0.17677669, %v1540_v43  ;;  %v4537_v45 = vpop.f32.mrb[23].mxu0  ;;  %v4542_v46 = vpop.f32.mrb[37].mxu1  ;;  %v1548_v47 = vadd.f32 %v1546_v39, %v5675_v31 }
 0xa54   : > { %v1543_v48 = vpop.f32.mrb[38].mxu1 }
 0xa55   : > { %v4543_v49 = vpop.f32.mrb[39].mxu1  ;;  %v1550_v50 = vsel %vm874_vm3, %v1548_v47, -inf  ;;  %v1549_v51 = vadd.f32 %v1547_v44, %v5680_v40 }
 0xa56   : > { %1551 = vmax.xlane.f32.xlu0 %v1550_v50 }
 0xa57   : > { %v1553_v52 = vsel %vm874_vm3, %v1549_v51, -inf }
 0xa58   : > { %1554 = vmax.xlane.f32.xlu1 %v1553_v52 }
 0xa69   : > { %1622 = vrot.lane.b32.xlu1 %v5696_v2, %s5293_s23 }
 0xa6d   : > { %4805 = vrot.lane.b32.xlu1 %v4804_v27, %s5293_s23 }
 0xa71   : > { %4810 = vrot.lane.b32.xlu1 %v4809_v33, %s5292_s5 }
 0xae3   : > { %v1552_v31 = vpop.xlane.xlu0 %1551 }
 0xae4   : > { %v1556_v53 = vsub.f32 %v1548_v47, %v1552_v31 }
 0xae5   : > { %v1555_v54 = vpop.xlane.xlu1 %1554 }
 0xae6   : > { %v1558_v58 = vmul.f32 1.442695, %v1556_v53  ;;  %v1557_v59 = vsub.f32 %v1549_v51, %v1555_v54 }
 0xae8   : > { %5018 = vpow2.f32 %v1558_v58  ;;  %v1560_v40 = vmul.f32 1.442695, %v1557_v59 }
 0xae9   : > { %v1623_v61 = vpop.permute.xlu1 %1622 }
 0xaea   : > { %5020 = vpow2.f32 %v1560_v40  ;;  %v1628_v3 = vsel %vm902_vm2, %v1623_v61, 0  ;;  %v5086_v40 = vld [vmem:[#allocation2] sm:$0xff] }
 0xaeb   : > { %4551 = vmatpush3.bf16.msra.mxu1 %v1628_v3  ;;  %v5087_v3 = vld [vmem:[#allocation2 + $0x8] sm:$0xff] }
 0xaec   : > { %4576 = vmatprep.subr.bf16.mxu1 %v5288_v29 }
 0xaed   : > { %v4806_v36 = vpop.permute.xlu1 %4805 }
 0xaee   : > { %v4808_v38 = vunpack.i.h.bf16 %v4806_v36  ;;  %v4807_v39 = vunpack.i.l.bf16 %v4806_v36  ;;  %v474_v36 = vld [vmem:[%s6278_s1 + $0x8] sm:$0xff] }
 0xaf0   : > { %v1695_v44 = vsel %vm767_vm1, %v5719_v34, %v4808_v38  ;;  %v1694_v45 = vsel %vm767_vm1, %v5715_v20, %v4807_v39  ;;  %v4162_v34 = vld [vmem:[%s5577_s20 + $0x3] ss:$0 sm:$0xff] }
 0xaf1   : > { %v4811_v37 = vpop.permute.xlu1 %4810  ;;  %v4904_v39 = vld [vmem:[%s5562_s22 + $0x250] ss:$48 sps:$4 sm:$0xff]  }
 0xaf2   : > { %v5019_v2 = vpop.eup %5018  ;;  %v4813_v41 = vunpack.i.h.bf16 %v4811_v37  ;;  %v4812_v42 = vunpack.i.l.bf16 %v4811_v37  ;;  %v4903_v37 = vld [vmem:[%s5562_s22 + $0x1f0] ss:$48 sps:$4 sm:$0xff]  }
 0xaf3   : > { %v1562_v22 = vsel %vm874_vm3, %v5019_v2, 0.0 }
 0xaf4   : > { %v5021_v26 = vpop.eup %5020  ;;  %1563 = vadd.xlane.f32.xlu0 %v1562_v22  ;;  %v1697_v48 = vsel %vm1696_vm4, %v1694_v45, %v4812_v42  ;;  %v1698_v49 = vsel %vm1696_vm4, %v1695_v44, %v4813_v41  ;;  %v4874_v22 = vld [vmem:[%s5562_s22 + $0x14] ss:$48 sps:$4 sm:$0xff]   ;;  %v4905_v41 = vld [vmem:[%s5562_s22 + $0x2b0] ss:$48 sps:$4 sm:$0xff]  }
 0xaf5   : > { %v1565_v27 = vsel %vm874_vm3, %v5021_v26, 0.0 }
 0xaf8   : > { %1566 = vadd.xlane.f32.xlu0 %v1565_v27  ;;  %v4879_v27 = vld [vmem:[%s5562_s22 + $0x78] ss:$48 sps:$4 sm:$0xff]  }
 0xb0e   : > { %1574 = vrot.lane.b32.xlu0 %v5665_v18, %s5293_s23 }
 0xb81   : > { %v1564_v7 = vpop.xlane.xlu0 %1563 }
 0xb82   : > { %5022 = vrcp.f32 %v1564_v7  ;;  %v4883_v7 = vld [vmem:[%s5562_s22 + $0x10] ss:$48 sps:$4 sm:$0xff]  }
 0xb85   : > { %v1567_v62 = vpop.xlane.xlu0 %1566 }
 0xb86   : > { %5024 = vrcp.f32 %v1567_v62  ;;  %v4877_v62 = vld [vmem:[%s5562_s22 + $0x74] ss:$48 sps:$4 sm:$0xff]  }
 0xb89   : > { %v1575_v11 = vpop.permute.xlu0 %1574 }
 0xb8a   : > { %v1580_v63 = vsel %vm902_vm2, %v1575_v11, 0  ;;  %v4882_v11 = vld [vmem:[%s5562_s22 + $0xd8] ss:$48 sps:$4 sm:$0xff]  }
 0xb8b   : > { %4545 = vmatpush3.bf16.msra.mxu0 %v1580_v63  ;;  %v4880_v63 = vld [vmem:[%s5562_s22 + $0xd4] ss:$48 sps:$4 sm:$0xff]  }
 0xb8c   : > { %v5023_v0 = vpop.eup %5022  ;;  %4556 = vmatprep.subr.bf16.mxu0 %v5288_v29 }
 0xb8d   : > { %v1570_v1 = vmul.f32 %v5023_v0, %v5019_v2  ;;  %v4886_v0 = vld [vmem:[%s5562_s22 + $0x138] ss:$48 sps:$4 sm:$0xff]  }
 0xb8f   : > { %v1572_v4 = vpack.c.bf16 %v1570_v1, %v1570_v1  ;;  %v4884_v1 = vld [vmem:[%s5562_s22 + $0x134] ss:$48 sps:$4 sm:$0xff]  }
 0xb90   : > { %v5025_v5 = vpop.eup %5024 }
 0xb91   : > { %v1571_v6 = vmul.f32 %v5025_v5, %v5021_v26  ;;  %4547 = vmatmul.mubr.msk.bf16.vlgmr.msra.gmra.mrb[24].mxu0 %vm874_vm3, %v1572_v4  ;;  %v4876_v26 = vld [vmem:[%s5562_s22 + $0x18] ss:$48 sps:$4 sm:$0xff]  }
 0xb92   : > { %4572 = vmatprep.mubr.msk.bf16.mxu0 %vm5289_vm0, %v5288_v29  ;;  %4557 = vmatpush3.bf16.msra.mxu0 %v4866_v9 }
 0xb93   : > { %v1573_v18 = vpack.c.bf16 %v1571_v6, %v1571_v6  ;;  %4558 = vmatprep.subr.bf16.mxu0 %v5288_v29 }
 0xb95   : > { %4553 = vmatmul.mubr.msk.bf16.vlgmr.msra.gmra.mrb[40].mxu1 %vm874_vm3, %v1573_v18 }
 0xb96   : > { %4592 = vmatprep.mubr.msk.bf16.mxu1 %vm5289_vm0, %v5288_v29  ;;  %4559 = vmatpush3.bf16.msra.mxu0 %v4867_v10 }
 0xb97   : > { %4560 = vmatprep.subr.bf16.mxu0 %v5288_v29  ;;  %4577 = vmatpush3.bf16.msra.mxu1 %v4883_v7 }
 0xb98   : > { %4578 = vmatprep.subr.bf16.mxu1 %v5288_v29 }
 0xb9a   : > { %4561 = vmatpush3.bf16.msra.mxu0 %v4868_v13 }
 0xb9b   : > { %4562 = vmatprep.subr.bf16.mxu0 %v5288_v29 }
 0xb9e   : > { %4563 = vmatpush3.bf16.msra.mxu0 %v4869_v14 }
 0xb9f   : > { %4564 = vmatprep.subr.bf16.mxu0 %v5288_v29 }
 0xba2   : > { %4565 = vmatpush3.bf16.msra.mxu0 %v4870_v15  ;;  %v4887_v15 = vld [vmem:[%s5562_s22 + $0x70] ss:$48 sps:$4 sm:$0xff]  }
 0xba3   : > { %4566 = vmatprep.subr.bf16.mxu0 %v5288_v29  ;;  %4579 = vmatpush3.bf16.msra.mxu1 %v4887_v15 }
 0xba4   : > { %4580 = vmatprep.subr.bf16.mxu1 %v5288_v29 }
 0xba6   : > { %4567 = vmatpush3.bf16.msra.mxu0 %v4871_v8  ;;  %v4890_v8 = vld [vmem:[%s5562_s22 + $0x198] ss:$48 sps:$4 sm:$0xff]  }
 0xba7   : > { %4568 = vmatprep.subr.bf16.mxu0 %v5288_v29 }
 0xbaa   : > { %4569 = vmatpush3.bf16.msra.mxu0 %v4872_v16  ;;  %v4888_v16 = vld [vmem:[%s5562_s22 + $0x194] ss:$48 sps:$4 sm:$0xff]  }
 0xbab   : > { %4570 = vmatprep.subr.bf16.mxu0 %v5288_v29 }
 0xbae   : > { %4571 = vmatpush3.bf16.msra.mxu0 %v4873_v17  ;;  %v4891_v17 = vld [vmem:[%s5562_s22 + $0xd0] ss:$48 sps:$4 sm:$0xff]  }
 0xbaf   : > { %2080 = vmatprep.subr.bf16.mxu0 %v4876_v26  ;;  %4581 = vmatpush3.bf16.msra.mxu1 %v4891_v17 }
 0xbb0   : > { %4582 = vmatprep.subr.bf16.mxu1 %v5288_v29 }
 0xc64   : > { %v1616_v19 = vpop.f32.mrb[24].mxu0 }
 0xc65   : > { %v4548_v21 = vpop.f32.mrb[25].mxu0 }
 0xc66   : > { %v1619_v23 = vpop.f32.mrb[26].mxu0  ;;  %v4892_v21 = vld [vmem:[%s5562_s22 + $0x1f4] ss:$48 sps:$4 sm:$0xff]  }
 0xc67   : > { %v4549_v24 = vpop.f32.mrb[27].mxu0  ;;  %v4895_v23 = vld [vmem:[%s5562_s22 + $0x130] ss:$48 sps:$4 sm:$0xff]  }
 0xc68   : > { %v1664_v25 = vpop.f32.mrb[40].mxu1  ;;  %v4898_v24 = vld [vmem:[%s5562_s22 + $0x258] ss:$48 sps:$4 sm:$0xff]   ;;  %4583 = vmatpush3.bf16.msra.mxu1 %v4895_v23  ;;  %v5294_v23 = vmov -1e+09  }
 0xc69   : > { %v4814_v30 = vpack.i.bf16 %v1664_v25, %v1616_v19  ;;  %v4554_v32 = vpop.f32.mrb[41].mxu1  ;;  %v4894_v19 = vld [vmem:[%s5562_s22 + $0x1f8] ss:$48 sps:$4 sm:$0xff]   ;;  %v4896_v25 = vld [vmem:[%s5562_s22 + $0x254] ss:$48 sps:$4 sm:$0xff]   ;;  %4584 = vmatprep.subr.bf16.mxu1 %v5288_v29 }
 0xc6a   : > { %v1667_v33 = vpop.f32.mrb[42].mxu1  ;;  %v4902_v32 = vld [vmem:[%s5562_s22 + $0x2b8] ss:$48 sps:$4 sm:$0xff]  }
 0xc6b   : > { %4815 = vrot.lane.b32.xlu0 %v4814_v30, %s5291_s17  ;;  %v4555_v35 = vpop.f32.mrb[43].mxu1  ;;  %v4899_v30 = vld [vmem:[%s5562_s22 + $0x190] ss:$48 sps:$4 sm:$0xff]   ;;  %v4900_v33 = vld [vmem:[%s5562_s22 + $0x2b4] ss:$48 sps:$4 sm:$0xff]  }
 0xc6c   : > { %4585 = vmatpush3.bf16.msra.mxu1 %v4899_v30  ;;  %v473_v35 = vld [vmem:[%s6278_s1] sm:$0xff] }
 0xc6d   : > { %4586 = vmatprep.subr.bf16.mxu1 %v5288_v29  ;;  %v1987_v38 = vpack.c.bf16 %v474_v36, %v473_v35 }
 0xc70   : > { %4587 = vmatpush3.bf16.msra.mxu1 %v4903_v37 }
 0xc71   : > { %4588 = vmatprep.subr.bf16.mxu1 %v5288_v29 }
 0xc74   : > { %4589 = vmatpush3.bf16.msra.mxu1 %v4904_v39 }
 0xc75   : > { %4590 = vmatprep.subr.bf16.mxu1 %v5288_v29 }
 0xc78   : > { %4591 = vmatpush3.bf16.msra.mxu1 %v4905_v41 }
 0xc79   : > { %4596 = vmatprep.subr.bf16.mxu1 %v5288_v29 }
 0xcdd   : > { %v4816_v43 = vpop.permute.xlu0 %4815 }
 0xcde   : > { %v4818_v46 = vunpack.i.h.bf16 %v4816_v43  ;;  %v4817_v47 = vunpack.i.l.bf16 %v4816_v43 }
 0xce0   : > { %v1701_v50 = vsel %vm1699_vm5, %v1698_v49, %v4818_v46  ;;  %v1700_v51 = vsel %vm1699_vm5, %v1697_v48, %v4817_v47 }
 0xce1   : > { %v1718_v52 = vpack.c.bf16 %v1701_v50, %v1700_v51  ;;  %v4171_v50 = vld [vmem:[%s5577_s20 + $0x4] ss:$0 sm:$0xff] }
 0xce3   : > { %4573 = vmatmul.mubr.bf16.vlgmr.msra.gmra.mrb[28].mxu0 %v1718_v52 }
 0xce4   : > { %2112 = vmatprep.mubr.bf16.mxu0 %v5287_v28  ;;  %2081 = vmatpush1.bf16.msra.mxu0 %v4874_v22 }
 0xce5   : > { %2082 = vmatprep.subr.bf16.mxu0 %v4879_v27 }
 0xce8   : > { %2083 = vmatpush1.bf16.msra.mxu0 %v4877_v62 }
 0xce9   : > { %2084 = vmatprep.subr.bf16.mxu0 %v4882_v11 }
 0xcec   : > { %2085 = vmatpush1.bf16.msra.mxu0 %v4880_v63 }
 0xced   : > { %2086 = vmatprep.subr.bf16.mxu0 %v4886_v0  ;;  %v4173_v0 = vld [vmem:[%s5577_s20 + $0x6] ss:$0 sm:$0xff] }
 0xcf0   : > { %2087 = vmatpush1.bf16.msra.mxu0 %v4884_v1 }
 0xcf1   : > { %2088 = vmatprep.subr.bf16.mxu0 %v4890_v8 }
 0xcf4   : > { %2089 = vmatpush1.bf16.msra.mxu0 %v4888_v16 }
 0xcf5   : > { %2090 = vmatprep.subr.bf16.mxu0 %v4894_v19  ;;  %v2124_v19 = vand.u32 127, %v510_v55 }
 0xcf7   : > { %vm2125_vm6 = vcmp.lt.s32.totalorder %v2124_v19, 5 }
 0xcf8   : > { %2091 = vmatpush1.bf16.msra.mxu0 %v4892_v21 }
 0xcf9   : > { %2092 = vmatprep.subr.bf16.mxu0 %v4898_v24  ;;  %v5937_v24 = vsel %vm2125_vm6, 0.0, %v5294_v23 }
 0xcfc   : > { %2093 = vmatpush1.bf16.msra.mxu0 %v4896_v25 }
 0xcfd   : > { %2094 = vmatprep.subr.bf16.mxu0 %v4902_v32 }
 0xd00   : > { %2095 = vmatpush1.bf16.msra.mxu0 %v4900_v33 }
 0xd01   : > { %4620 = vmatprep.subr.bf16.mxu0 %v5288_v29 }
 0xd03   : > { %2113 = vmatmul.mubr.bf16.vlgmr.msra.gmra.mrb[32].mxu0 %v1987_v38 }
 0xd04   : > { %4622 = vmatprep.mubr.msk.bf16.mxu0 %vm5289_vm0, %v5288_v29 }
 0xdb6   : > { %v1808_v31 = vpop.f32.mrb[28].mxu0 }
 0xdb7   : > { %v1809_v20 = vadd.f32 %v4162_v34, %v1808_v31  ;;  %v4574_v53 = vpop.f32.mrb[29].mxu0  ;;  %v4172_v31 = vld [vmem:[%s5577_s20 + $0x5] ss:$0 sm:$0xff] }
 0xdb8   : > { %v1811_v54 = vpop.f32.mrb[30].mxu0 }
 0xdb9   : > { %v1812_v58 = vadd.f32 %v4162_v34, %v1811_v54  ;;  %v4575_v59 = vpop.f32.mrb[31].mxu0  ;;  %v1815_v61 = vadd.f32 %v5086_v40, %v1809_v20 }
 0xdba   : > { %v1988_v59 = vld [vmem:[%s5577_s20 + $0x7] sm:$0x3] }
 0xdbb   : > { %1819 = vadd.xlane.f32.xlu1 %v1815_v61  ;;  %v1816_v2 = vadd.f32 %v5087_v3, %v1812_v58  ;;  %v1993_v40 = vrot.slane %v1988_v59, %v5637_v60  ;;  %v1997_v3 = vrot.slane %v1988_v59, %v5632_v57 }
 0xdbd   : > { %1821 = vadd.xlane.f32.xlu0 %v1816_v2 }
 0xe48   : > { %v1820_v4 = vpop.xlane.xlu1 %1819 }
 0xe49   : > { %v1824_v5 = vmul.f32 0.0078125, %v1820_v4 }
 0xe4a   : > { %v1822_v6 = vpop.xlane.xlu0 %1821 }
 0xe4b   : > { %v1826_v18 = vsub.f32 %v1815_v61, %v1824_v5  ;;  %v1825_v9 = vmul.f32 0.0078125, %v1822_v6  ;;  %v2114_v61 = vpop.f32.mrb[32].mxu0 }
 0xe4c   : > { %v2116_v22 = vpop.f32.mrb[33].mxu0 }
 0xe4d   : > { %v1827_v10 = vsub.f32 %v1816_v2, %v1825_v9  ;;  %v1828_v13 = vmul.f32 %v1826_v18, %v1826_v18  ;;  %v2115_v2 = vadd.f32 %v2114_v61, %v1993_v40  ;;  %v2118_v26 = vpop.f32.mrb[34].mxu0 }
 0xe4e   : > { %v2119_v7 = vadd.f32 %v2118_v26, %v1993_v40  ;;  %v2120_v62 = vpop.f32.mrb[35].mxu0 }
 0xe4f   : > { %1830 = vadd.xlane.f32.xlu0 %v1828_v13  ;;  %v1829_v14 = vmul.f32 %v1827_v10, %v1827_v10  ;;  %v5906_v27 = vpack.c.bf16 %v2115_v2, %v2115_v2  ;;  %v5908_v11 = vadd.f32 %v2120_v62, %v1997_v3  ;;  %v2117_v13 = vadd.f32 %v2116_v22, %v1997_v3 }
 0xe50   : > { %v5914_v4 = vpack.c.bf16 %v2119_v7, %v2119_v7 }
 0xe51   : > { %v2137_v63 = vsel %vm767_vm1, %v5906_v27, 0  ;;  %v5925_v8 = vpack.c.bf16 %v2117_v13, %v2117_v13  ;;  %v5957_v61 = vpack.c.bf16 %v5908_v11, %v5908_v11 }
 0xe53   : > { %1832 = vadd.xlane.f32.xlu0 %v1829_v14  ;;  %v2183_v14 = vsel %vm767_vm1, %v5914_v4, 0  ;;  %v2257_v17 = vsel %vm902_vm2, %v5925_v8, 0  ;;  %v2303_v26 = vsel %vm902_vm2, %v5957_v61, 0 }
 0xedc   : > { %v1831_v42 = vpop.xlane.xlu0 %1830 }
 0xedd   : > { %v1834_v43 = vmul.f32 0.0078125, %v1831_v42 }
 0xedf   : > { %v1836_v44 = vadd.f32 1e-12, %v1834_v43 }
 0xee0   : > { %v1833_v45 = vpop.xlane.xlu0 %1832 }
 0xee1   : > { %5026 = vrsqrt.f32 %v1836_v44  ;;  %v1835_v46 = vmul.f32 0.0078125, %v1833_v45 }
 0xee3   : > { %v1837_v47 = vadd.f32 1e-12, %v1835_v46 }
 0xee5   : > { %5028 = vrsqrt.f32 %v1837_v47 }
 0xeeb   : > { %v5027_v48 = vpop.eup %5026 }
 0xeec   : > { %v1840_v49 = vmul.f32 %v5027_v48, %v1826_v18 }
 0xeee   : > { %v1848_v34 = vmul.f32 %v4171_v50, %v1840_v49 }
 0xeef   : > { %v5029_v51 = vpop.eup %5028 }
 0xef0   : > { %v1841_v52 = vmul.f32 %v5029_v51, %v1827_v10  ;;  %v5895_v53 = vadd.f32 %v4172_v31, %v1848_v34 }
 0xef2   : > { %v1849_v20 = vmul.f32 %v4171_v50, %v1841_v52 }
 0xef4   : > { %v5897_v54 = vadd.f32 %v4172_v31, %v1849_v20 }
 0xef6   : > { %v1874_v58 = vpack.c.bf16 %v5897_v54, %v5895_v53 }
 0xef8   : > { %4593 = vmatmul.mubr.bf16.vlgmr.msra.gmra.mrb[44].mxu1 %v1874_v58 }
 0xef9   : > { %4598 = vmatprep.mubr.msk.bf16.mxu1 %vm5289_vm0, %v5288_v29  ;;  %4597 = vmatpush3.bf16.xpose.msra.mxu1 %v2137_v63 }
 0xefa   : > { %4602 = vmatprep.subr.bf16.mxu1 %v5288_v29 }
 0xfcb   : > { %v1964_v1 = vpop.f32.mrb[44].mxu1 }
 0xfcc   : > { %v1965_v5 = vadd.f32 %v4173_v0, %v1964_v1  ;;  %v4594_v6 = vpop.f32.mrb[45].mxu1 }
 0xfcd   : > { %v1967_v18 = vpop.f32.mrb[46].mxu1 }
 0xfce   : > { %v5916_v9 = vpack.c.bf16 %v1965_v5, %v1965_v5  ;;  %v4595_v10 = vpop.f32.mrb[47].mxu1  ;;  %v1968_v15 = vadd.f32 %v4173_v0, %v1967_v18 }
 0xfd0   : > { %4599 = vmatmul.mubr.msk.bf16.vlgmr.msra.gmra.mrb[48].mxu1 %vm767_vm1, %v5916_v9  ;;  %v5927_v16 = vpack.c.bf16 %v1968_v15, %v1968_v15 }
 0xfd1   : > { %4603 = vmatpush3.bf16.xpose.msra.mxu1 %v2183_v14  ;;  %4604 = vmatprep.mubr.msk.bf16.mxu1 %vm5289_vm0, %v5288_v29 }
 0xfd2   : > { %4608 = vmatprep.subr.bf16.mxu1 %v5288_v29 }
 0xfd8   : > { %4605 = vmatmul.mubr.msk.bf16.vlgmr.msra.gmra.mrb[52].mxu1 %vm767_vm1, %v5927_v16 }
 0xfd9   : > { %4609 = vmatpush3.bf16.msra.mxu1 %v2257_v17  ;;  %4610 = vmatprep.mubr.msk.bf16.mxu1 %vm5289_vm0, %v5288_v29 }
 0xfda   : > { %4614 = vmatprep.subr.bf16.mxu1 %v5288_v29 }
0x10a3   : > { %v2173_v21 = vpop.f32.mrb[48].mxu1 }
0x10a4   : > { %v2225_v25 = vmul.f32 0.17677669, %v2173_v21  ;;  %v4600_v30 = vpop.f32.mrb[49].mxu1 }
0x10a5   : > { %v2176_v32 = vpop.f32.mrb[50].mxu1 }
0x10a6   : > { %v4601_v33 = vpop.f32.mrb[51].mxu1  ;;  %v2227_v35 = vadd.f32 %v2225_v25, %v5937_v24 }
0x10a8   : > { %v2229_v36 = vsel %vm874_vm3, %v2227_v35, -inf }
0x10a9   : > { %2230 = vmax.xlane.f32.xlu1 %v2229_v36 }
0x10ab   : > { %v2219_v37 = vpop.f32.mrb[52].mxu1 }
0x10ac   : > { %v2226_v38 = vmul.f32 0.17677669, %v2219_v37  ;;  %v4606_v39 = vpop.f32.mrb[53].mxu1 }
0x10ad   : > { %v2222_v41 = vpop.f32.mrb[54].mxu1 }
0x10ae   : > { %v4607_v42 = vpop.f32.mrb[55].mxu1  ;;  %v2228_v55 = vadd.f32 %v2226_v38, %v5937_v24 }
0x10b0   : > { %v2232_v43 = vsel %vm874_vm3, %v2228_v55, -inf }
0x10b1   : > { %2233 = vmax.xlane.f32.xlu0 %v2232_v43 }
0x1136   : > { %v2231_v44 = vpop.xlane.xlu1 %2230 }
0x1137   : > { %v2235_v45 = vsub.f32 %v2227_v35, %v2231_v44 }
0x1139   : > { %v2237_v46 = vmul.f32 1.442695, %v2235_v45 }
0x113b   : > { %5030 = vpow2.f32 %v2237_v46 }
0x113e   : > { %v2234_v47 = vpop.xlane.xlu0 %2233 }
0x113f   : > { %v2236_v48 = vsub.f32 %v2228_v55, %v2234_v47 }
0x1141   : > { %v2239_v49 = vmul.f32 1.442695, %v2236_v48 }
0x1143   : > { %5032 = vpow2.f32 %v2239_v49 }
0x1145   : > { %v5031_v50 = vpop.eup %5030 }
0x1146   : > { %v2241_v51 = vsel %vm874_vm3, %v5031_v50, 0.0 }
0x1147   : > { %2242 = vadd.xlane.f32.xlu1 %v2241_v51 }
0x114d   : > { %v5033_v52 = vpop.eup %5032 }
0x114e   : > { %v2244_v34 = vsel %vm874_vm3, %v5033_v52, 0.0 }
0x114f   : > { %2245 = vadd.xlane.f32.xlu0 %v2244_v34 }
0x1158   : > { %2349 = vrot.lane.b32.xlu1 %v5906_v27, %s5291_s17 }
0x115c   : > { %2346 = vrot.lane.b32.xlu1 %v5916_v9, %s5291_s17 }
0x1160   : > { %2398 = vrot.lane.b32.xlu1 %v5927_v16, %s5291_s17 }
0x1165   : > { %2401 = vrot.lane.b32.xlu0 %v5914_v4, %s5291_s17 }
0x11d4   : > { %v2243_v31 = vpop.xlane.xlu1 %2242 }
0x11d5   : > { %5034 = vrcp.f32 %v2243_v31 }
0x11d8   : > { %v2350_v20 = vpop.permute.xlu1 %2349 }
0x11d9   : > { %v2355_v58 = vsel %vm767_vm1, %v2350_v20, 0 }
0x11da   : > { %4621 = vmatpush3.bf16.xpose.msra.mxu0 %v2355_v58 }
0x11db   : > { %4632 = vmatprep.subr.bf16.mxu0 %v5288_v29 }
0x11dc   : > { %v2246_v59 = vpop.xlane.xlu0 %2245  ;;  %v2347_v2 = vpop.permute.xlu1 %2346 }
0x11dd   : > { %5036 = vrcp.f32 %v2246_v59 }
0x11df   : > { %v5035_v40 = vpop.eup %5034 }
0x11e0   : > { %v2249_v3 = vmul.f32 %v5035_v40, %v5031_v50  ;;  %v2402_v11 = vpop.permute.xlu0 %2401  ;;  %v2399_v1 = vpop.permute.xlu1 %2398 }
0x11e1   : > { %4623 = vmatmul.mubr.msk.bf16.vlgmr.msra.gmra.mrb[36].mxu0 %vm767_vm1, %v2347_v2  ;;  %v2407_v0 = vsel %vm767_vm1, %v2402_v11, 0 }
0x11e2   : > { %v2251_v22 = vpack.c.bf16 %v2249_v3, %v2249_v3  ;;  %4634 = vmatprep.mubr.msk.bf16.mxu0 %vm5289_vm0, %v5288_v29 }
0x11e4   : > { %4611 = vmatmul.mubr.msk.bf16.vlgmr.msra.gmra.mrb[56].mxu1 %vm874_vm3, %v2251_v22 }
0x11e5   : > { %4615 = vmatpush3.bf16.msra.mxu1 %v2303_v26  ;;  %4616 = vmatprep.mubr.msk.bf16.mxu1 %vm5289_vm0, %v5288_v29 }
0x11e6   : > { %4626 = vmatprep.subr.bf16.mxu1 %v5288_v29 }
0x11e7   : > { %v5037_v7 = vpop.eup %5036 }
0x11e8   : > { %v2250_v62 = vmul.f32 %v5037_v7, %v5033_v52 }
0x11ea   : > { %v2252_v63 = vpack.c.bf16 %v2250_v62, %v2250_v62 }
0x11ec   : > { %4617 = vmatmul.mubr.msk.bf16.vlgmr.msra.gmra.mrb[60].mxu1 %vm874_vm3, %v2252_v63 }
0x11ed   : > { %4628 = vmatprep.mubr.msk.bf16.mxu1 %vm5289_vm0, %v5288_v29 }
0x11ee   : > { %4627 = vmatpush3.bf16.xpose.msra.mxu1 %v2407_v0 }
0x11ef   : > { %4638 = vmatprep.subr.bf16.mxu1 %v5288_v29 }
0x11f5   : > { %4629 = vmatmul.mubr.msk.bf16.vlgmr.msra.gmra.mrb[64].mxu1 %vm767_vm1, %v2399_v1 }
0x11f6   : > { %4640 = vmatprep.mubr.msk.bf16.mxu1 %vm5289_vm0, %v5288_v29 }
0x12b4   : > { %v2391_v5 = vpop.f32.mrb[36].mxu0 }
0x12b5   : > { %v2449_v6 = vmul.f32 0.17677669, %v2391_v5  ;;  %v4624_v18 = vpop.f32.mrb[37].mxu0 }
0x12b6   : > { %v2394_v10 = vpop.f32.mrb[38].mxu0 }
0x12b7   : > { %v5976_v13 = vpop.f32.mrb[56].mxu1  ;;  %v4625_v14 = vpop.f32.mrb[39].mxu0  ;;  %v2451_v15 = vadd.f32 %v2449_v6, %v5937_v24 }
0x12b8   : > { %v4612_v17 = vpop.f32.mrb[57].mxu1 }
0x12b9   : > { %v2296_v19 = vpop.f32.mrb[58].mxu1  ;;  %v2453_v21 = vsel %vm874_vm3, %v2451_v15, -inf }
0x12ba   : > { %2454 = vmax.xlane.f32.xlu1 %v2453_v21  ;;  %v4613_v23 = vpop.f32.mrb[59].mxu1 }
0x12bf   : > { %v5980_v25 = vpop.f32.mrb[60].mxu1 }
0x12c0   : > { %v4618_v30 = vpop.f32.mrb[61].mxu1 }
0x12c1   : > { %v2342_v32 = vpop.f32.mrb[62].mxu1 }
0x12c2   : > { %v4619_v33 = vpop.f32.mrb[63].mxu1 }
0x12c8   : > { %v2443_v35 = vpop.f32.mrb[64].mxu1 }
0x12c9   : > { %v2450_v36 = vmul.f32 0.17677669, %v2443_v35  ;;  %v4630_v37 = vpop.f32.mrb[65].mxu1 }
0x12ca   : > { %v2446_v38 = vpop.f32.mrb[66].mxu1 }
0x12cb   : > { %v4631_v39 = vpop.f32.mrb[67].mxu1  ;;  %2478 = vrot.lane.b32.xlu1 %v5925_v8, %s5291_s17  ;;  %v2452_v41 = vadd.f32 %v2450_v36, %v5937_v24 }
0x12cd   : > { %v2456_v42 = vsel %vm874_vm3, %v2452_v41, -inf }
0x12ce   : > { %2457 = vmax.xlane.f32.xlu0 %v2456_v42 }
0x12cf   : > { %2577 = vrot.lane.b32.xlu1 %v5906_v27, %s5292_s5 }
0x12d3   : > { %2627 = vrot.lane.b32.xlu1 %v5914_v4, %s5292_s5 }
0x12d7   : > { %2575 = vrot.lane.b32.xlu1 %v5916_v9, %s5292_s5 }
0x1347   : > { %v2455_v55 = vpop.xlane.xlu1 %2454 }
0x1348   : > { %v2459_v43 = vsub.f32 %v2451_v15, %v2455_v55 }
0x134a   : > { %v2461_v44 = vmul.f32 1.442695, %v2459_v43 }
0x134b   : > { %v2479_v45 = vpop.permute.xlu1 %2478 }
0x134c   : > { %5038 = vpow2.f32 %v2461_v44  ;;  %v2484_v46 = vsel %vm902_vm2, %v2479_v45, 0 }
0x134d   : > { %4633 = vmatpush3.bf16.msra.mxu0 %v2484_v46 }
0x134e   : > { %4644 = vmatprep.subr.bf16.mxu0 %v5288_v29 }
0x134f   : > { %v2578_v58 = vpop.permute.xlu1 %2577 }
0x1350   : > { %v2583_v3 = vsel %vm767_vm1, %v2578_v58, 0 }
0x1353   : > { %v2628_v2 = vpop.permute.xlu1 %2627 }
0x1354   : > { %v2633_v1 = vsel %vm767_vm1, %v2628_v2, 0 }
0x1356   : > { %v5039_v47 = vpop.eup %5038 }
0x1357   : > { %v2465_v48 = vsel %vm874_vm3, %v5039_v47, 0.0  ;;  %v2576_v26 = vpop.permute.xlu1 %2575 }
0x1358   : > { %2466 = vadd.xlane.f32.xlu0 %v2465_v48 }
0x135b   : > { %v2458_v49 = vpop.xlane.xlu0 %2457 }
0x135c   : > { %v2460_v50 = vsub.f32 %v2452_v41, %v2458_v49 }
0x135e   : > { %v2463_v51 = vmul.f32 1.442695, %v2460_v50 }
0x1360   : > { %5040 = vpow2.f32 %v2463_v51 }
0x136a   : > { %v5041_v52 = vpop.eup %5040 }
0x136b   : > { %v2468_v34 = vsel %vm874_vm3, %v5041_v52, 0.0 }
0x136c   : > { %2469 = vadd.xlane.f32.xlu0 %v2468_v34 }
0x1382   : > { %2527 = vrot.lane.b32.xlu0 %v5957_v61, %s5291_s17 }
0x1386   : > { %2625 = vrot.lane.b32.xlu0 %v5927_v16, %s5292_s5 }
0x13e5   : > { %v2467_v31 = vpop.xlane.xlu0 %2466 }
0x13e6   : > { %5042 = vrcp.f32 %v2467_v31 }
0x13f0   : > { %v5043_v20 = vpop.eup %5042 }
0x13f1   : > { %v2473_v59 = vmul.f32 %v5043_v20, %v5039_v47 }
0x13f3   : > { %v2475_v40 = vpack.c.bf16 %v2473_v59, %v2473_v59 }
0x13f5   : > { %4635 = vmatmul.mubr.msk.bf16.vlgmr.msra.gmra.mrb[40].mxu0 %vm874_vm3, %v2475_v40 }
0x13f6   : > { %4645 = vmatpush3.bf16.xpose.msra.mxu0 %v2583_v3  ;;  %4646 = vmatprep.mubr.msk.bf16.mxu0 %vm5289_vm0, %v5288_v29 }
0x13f7   : > { %4656 = vmatprep.subr.bf16.mxu0 %v5288_v29 }
0x13f9   : > { %v2470_v22 = vpop.xlane.xlu0 %2469 }
0x13fa   : > { %5044 = vrcp.f32 %v2470_v22 }
0x13fd   : > { %v2528_v7 = vpop.permute.xlu0 %2527  ;;  %4647 = vmatmul.mubr.msk.bf16.vlgmr.msra.gmra.mrb[44].mxu0 %vm767_vm1, %v2576_v26 }
0x13fe   : > { %v2533_v62 = vsel %vm902_vm2, %v2528_v7, 0  ;;  %4658 = vmatprep.mubr.msk.bf16.mxu0 %vm5289_vm0, %v5288_v29 }
0x13ff   : > { %4639 = vmatpush3.bf16.msra.mxu1 %v2533_v62 }
0x1400   : > { %4650 = vmatprep.subr.bf16.mxu1 %v5288_v29 }
0x1401   : > { %v2626_v5 = vpop.permute.xlu0 %2625 }
0x1404   : > { %v5045_v11 = vpop.eup %5044 }
0x1405   : > { %v2474_v63 = vmul.f32 %v5045_v11, %v5041_v52 }
0x1407   : > { %v2476_v0 = vpack.c.bf16 %v2474_v63, %v2474_v63 }
0x1409   : > { %4641 = vmatmul.mubr.msk.bf16.vlgmr.msra.gmra.mrb[68].mxu1 %vm874_vm3, %v2476_v0 }
0x140a   : > { %4651 = vmatpush3.bf16.xpose.msra.mxu1 %v2633_v1  ;;  %4652 = vmatprep.mubr.msk.bf16.mxu1 %vm5289_vm0, %v5288_v29 }
0x140b   : > { %4662 = vmatprep.subr.bf16.mxu1 %v5288_v29 }
0x1411   : > { %4653 = vmatmul.mubr.msk.bf16.vlgmr.msra.gmra.mrb[72].mxu1 %vm767_vm1, %v2626_v5 }
0x1412   : > { %4664 = vmatprep.mubr.msk.bf16.mxu1 %vm5289_vm0, %v5288_v29 }
0x14c8   : > { %v6018_v6 = vpop.f32.mrb[40].mxu0 }
0x14c9   : > { %v4636_v18 = vpop.f32.mrb[41].mxu0 }
0x14ca   : > { %v2523_v10 = vpop.f32.mrb[42].mxu0 }
0x14cb   : > { %v4637_v14 = vpop.f32.mrb[43].mxu0 }
0x14d0   : > { %v2619_v15 = vpop.f32.mrb[44].mxu0 }
0x14d1   : > { %v2675_v17 = vmul.f32 0.17677669, %v2619_v15  ;;  %v4648_v19 = vpop.f32.mrb[45].mxu0 }
0x14d2   : > { %v2622_v21 = vpop.f32.mrb[46].mxu0 }
0x14d3   : > { %v4649_v23 = vpop.f32.mrb[47].mxu0  ;;  %v2677_v30 = vadd.f32 %v2675_v17, %v5937_v24 }
0x14d5   : > { %v2679_v32 = vsel %vm874_vm3, %v2677_v30, -inf }
0x14d6   : > { %2680 = vmax.xlane.f32.xlu1 %v2679_v32 }
0x14dc   : > { %v6022_v33 = vpop.f32.mrb[68].mxu1 }
0x14dd   : > { %v4819_v35 = vpack.i.bf16 %v6022_v33, %v6018_v6  ;;  %v4642_v36 = vpop.f32.mrb[69].mxu1 }
0x14de   : > { %v2572_v37 = vpop.f32.mrb[70].mxu1 }
0x14df   : > { %v4643_v38 = vpop.f32.mrb[71].mxu1 }
0x14e4   : > { %v2669_v39 = vpop.f32.mrb[72].mxu1 }
0x14e5   : > { %v2676_v41 = vmul.f32 0.17677669, %v2669_v39  ;;  %v4654_v42 = vpop.f32.mrb[73].mxu1 }
0x14e6   : > { %v2672_v55 = vpop.f32.mrb[74].mxu1 }
0x14e7   : > { %v4655_v43 = vpop.f32.mrb[75].mxu1  ;;  %2703 = vrot.lane.b32.xlu1 %v5925_v8, %s5292_s5  ;;  %v2678_v44 = vadd.f32 %v2676_v41, %v5937_v24 }
0x14e9   : > { %v2682_v45 = vsel %vm874_vm3, %v2678_v44, -inf }
0x14ea   : > { %2683 = vmax.xlane.f32.xlu0 %v2682_v45 }
0x14eb   : > { %2801 = vrot.lane.b32.xlu1 %v5906_v27, %s5293_s23 }
0x14ef   : > { %2851 = vrot.lane.b32.xlu1 %v5914_v4, %s5293_s23 }
0x14f3   : > { %2799 = vrot.lane.b32.xlu1 %v5916_v9, %s5293_s23 }
0x1563   : > { %v2681_v46 = vpop.xlane.xlu1 %2680 }
0x1564   : > { %v2685_v47 = vsub.f32 %v2677_v30, %v2681_v46 }
0x1566   : > { %v2687_v48 = vmul.f32 1.442695, %v2685_v47 }
0x1567   : > { %v2704_v49 = vpop.permute.xlu1 %2703 }
0x1568   : > { %5046 = vpow2.f32 %v2687_v48  ;;  %v2709_v50 = vsel %vm902_vm2, %v2704_v49, 0 }
0x1569   : > { %4657 = vmatpush3.bf16.msra.mxu0 %v2709_v50 }
0x156a   : > { %4668 = vmatprep.subr.bf16.mxu0 %v5288_v29 }
0x156b   : > { %v2802_v59 = vpop.permute.xlu1 %2801 }
0x156c   : > { %v2807_v2 = vsel %vm767_vm1, %v2802_v59, 0 }
0x156f   : > { %v2852_v22 = vpop.permute.xlu1 %2851 }
0x1570   : > { %v2857_v1 = vsel %vm767_vm1, %v2852_v22, 0 }
0x1572   : > { %v5047_v51 = vpop.eup %5046 }
0x1573   : > { %v2691_v52 = vsel %vm874_vm3, %v5047_v51, 0.0 }
0x1574   : > { %2692 = vadd.xlane.f32.xlu0 %v2691_v52 }
0x1577   : > { %v2684_v27 = vpop.xlane.xlu0 %2683 }
0x1578   : > { %v2686_v34 = vsub.f32 %v2678_v44, %v2684_v27 }
0x157a   : > { %v2689_v4 = vmul.f32 1.442695, %v2686_v34 }
0x157c   : > { %5048 = vpow2.f32 %v2689_v4 }
0x1586   : > { %v5049_v31 = vpop.eup %5048 }
0x1587   : > { %v2694_v9 = vsel %vm874_vm3, %v5049_v31, 0.0 }
0x1588   : > { %2695 = vadd.xlane.f32.xlu0 %v2694_v9 }
0x159e   : > { %2751 = vrot.lane.b32.xlu0 %v5957_v61, %s5292_s5 }
0x15a2   : > { %2849 = vrot.lane.b32.xlu0 %v5927_v16, %s5293_s23  ;;  %v2800_v16 = vpop.permute.xlu1 %2799 }
0x1601   : > { %v2693_v20 = vpop.xlane.xlu0 %2692 }
0x1602   : > { %5050 = vrcp.f32 %v2693_v20 }
0x160c   : > { %v5051_v58 = vpop.eup %5050 }
0x160d   : > { %v2699_v40 = vmul.f32 %v5051_v58, %v5047_v51 }
0x160f   : > { %v2701_v3 = vpack.c.bf16 %v2699_v40, %v2699_v40 }
0x1611   : > { %4659 = vmatmul.mubr.msk.bf16.vlgmr.msra.gmra.mrb[48].mxu0 %vm874_vm3, %v2701_v3 }
0x1612   : > { %4669 = vmatpush3.bf16.xpose.msra.mxu0 %v2807_v2  ;;  %4670 = vmatprep.mubr.msk.bf16.mxu0 %vm5289_vm0, %v5288_v29 }
0x1613   : > { %4680 = vmatprep.subr.bf16.mxu0 %v5288_v29 }
0x1615   : > { %v2696_v26 = vpop.xlane.xlu0 %2695 }
0x1616   : > { %5052 = vrcp.f32 %v2696_v26  ;;  %v4906_v26 = vld [vmem:[%s5562_s22 + $0x1c] ss:$48 sps:$4 sm:$0xff]  }
0x1619   : > { %v2752_v7 = vpop.permute.xlu0 %2751  ;;  %4671 = vmatmul.mubr.msk.bf16.vlgmr.msra.gmra.mrb[52].mxu0 %vm767_vm1, %v2800_v16  ;;  %v4907_v16 = vld [vmem:[%s5562_s22 + $0x7c] ss:$48 sps:$4 sm:$0xff]  }
0x161a   : > { %v2757_v62 = vsel %vm902_vm2, %v2752_v7, 0  ;;  %4682 = vmatprep.mubr.msk.bf16.mxu0 %vm5289_vm0, %v5288_v29  ;;  %v4908_v7 = vld [vmem:[%s5562_s22 + $0xdc] ss:$48 sps:$4 sm:$0xff]  }
0x161b   : > { %4663 = vmatpush3.bf16.msra.mxu1 %v2757_v62  ;;  %v4909_v62 = vld [vmem:[%s5562_s22 + $0x13c] ss:$48 sps:$4 sm:$0xff]  }
0x161c   : > { %4674 = vmatprep.subr.bf16.mxu1 %v5288_v29 }
0x161d   : > { %v2850_v5 = vpop.permute.xlu0 %2849 }
0x1620   : > { %v5053_v11 = vpop.eup %5052 }
0x1621   : > { %v2700_v63 = vmul.f32 %v5053_v11, %v5049_v31  ;;  %v4910_v11 = vld [vmem:[%s5562_s22 + $0x19c] ss:$48 sps:$4 sm:$0xff]  }
0x1623   : > { %v2702_v0 = vpack.c.bf16 %v2700_v63, %v2700_v63  ;;  %v4911_v63 = vld [vmem:[%s5562_s22 + $0x1fc] ss:$48 sps:$4 sm:$0xff]  }
0x1625   : > { %4665 = vmatmul.mubr.msk.bf16.vlgmr.msra.gmra.mrb[76].mxu1 %vm874_vm3, %v2702_v0  ;;  %v4912_v0 = vld [vmem:[%s5562_s22 + $0x25c] ss:$48 sps:$4 sm:$0xff]  }
0x1626   : > { %4675 = vmatpush3.bf16.xpose.msra.mxu1 %v2857_v1  ;;  %4676 = vmatprep.mubr.msk.bf16.mxu1 %vm5289_vm0, %v5288_v29 }
0x1627   : > { %4686 = vmatprep.subr.bf16.mxu1 %v5288_v29 }
0x162d   : > { %4677 = vmatmul.mubr.msk.bf16.vlgmr.msra.gmra.mrb[80].mxu1 %vm767_vm1, %v2850_v5 }
0x162e   : > { %4688 = vmatprep.mubr.msk.bf16.mxu1 %vm5289_vm0, %v5288_v29 }
0x16e4   : > { %v2745_v18 = vpop.f32.mrb[48].mxu0 }
0x16e5   : > { %v4660_v10 = vpop.f32.mrb[49].mxu0 }
0x16e6   : > { %v2748_v14 = vpop.f32.mrb[50].mxu0 }
0x16e7   : > { %v4661_v15 = vpop.f32.mrb[51].mxu0  ;;  %v4913_v14 = vld [vmem:[%s5562_s22 + $0x2bc] ss:$48 sps:$4 sm:$0xff]  }
0x16ec   : > { %v2843_v17 = vpop.f32.mrb[52].mxu0 }
0x16ed   : > { %v2899_v19 = vmul.f32 0.17677669, %v2843_v17  ;;  %v4672_v21 = vpop.f32.mrb[53].mxu0 }
0x16ee   : > { %v2846_v23 = vpop.f32.mrb[54].mxu0 }
0x16ef   : > { %v4673_v30 = vpop.f32.mrb[55].mxu0  ;;  %v2901_v32 = vadd.f32 %v2899_v19, %v5937_v24 }
0x16f1   : > { %v2903_v36 = vsel %vm874_vm3, %v2901_v32, -inf }
0x16f2   : > { %2904 = vmax.xlane.f32.xlu1 %v2903_v36 }
0x16f8   : > { %v2793_v37 = vpop.f32.mrb[76].mxu1 }
0x16f9   : > { %v4824_v38 = vpack.i.bf16 %v2793_v37, %v2745_v18  ;;  %v4666_v39 = vpop.f32.mrb[77].mxu1 }
0x16fa   : > { %v2796_v41 = vpop.f32.mrb[78].mxu1 }
0x16fb   : > { %v4667_v42 = vpop.f32.mrb[79].mxu1 }
0x1700   : > { %v2893_v55 = vpop.f32.mrb[80].mxu1 }
0x1701   : > { %v2900_v43 = vmul.f32 0.17677669, %v2893_v55  ;;  %v4678_v44 = vpop.f32.mrb[81].mxu1 }
0x1702   : > { %v2896_v45 = vpop.f32.mrb[82].mxu1 }
0x1703   : > { %v4679_v46 = vpop.f32.mrb[83].mxu1  ;;  %2927 = vrot.lane.b32.xlu1 %v5925_v8, %s5293_s23  ;;  %v2902_v47 = vadd.f32 %v2900_v43, %v5937_v24 }
0x1705   : > { %v2906_v48 = vsel %vm874_vm3, %v2902_v47, -inf }
0x1706   : > { %2907 = vmax.xlane.f32.xlu0 %v2906_v48 }
0x1707   : > { %4820 = vrot.lane.b32.xlu1 %v4819_v35, %s5293_s23 }
0x170b   : > { %4825 = vrot.lane.b32.xlu1 %v4824_v38, %s5292_s5 }
0x177f   : > { %v2905_v49 = vpop.xlane.xlu1 %2904 }
0x1780   : > { %v2909_v50 = vsub.f32 %v2901_v32, %v2905_v49 }
0x1782   : > { %v2911_v51 = vmul.f32 1.442695, %v2909_v50 }
0x1783   : > { %v2928_v52 = vpop.permute.xlu1 %2927 }
0x1784   : > { %5054 = vpow2.f32 %v2911_v51  ;;  %v2933_v27 = vsel %vm902_vm2, %v2928_v52, 0 }
0x1785   : > { %4681 = vmatpush3.bf16.msra.mxu0 %v2933_v27 }
0x1786   : > { %4692 = vmatprep.subr.bf16.mxu0 %v5288_v29 }
0x1787   : > { %v4821_v30 = vpop.permute.xlu1 %4820 }
0x1788   : > { %v4823_v36 = vunpack.i.h.bf16 %v4821_v30  ;;  %v4822_v37 = vunpack.i.l.bf16 %v4821_v30  ;;  %v4953_v30 = vld [vmem:[%s5562_s22 + $0x268] ss:$48 sps:$4 sm:$0xff]  }
0x178a   : > { %v3048_v41 = vsel %vm767_vm1, %v5980_v25, %v4823_v36  ;;  %v3047_v42 = vsel %vm767_vm1, %v5976_v13, %v4822_v37  ;;  %v4214_v13 = vld [vmem:[%s5577_s20 + $0x9] ss:$0 sm:$0xff]  ;;  %v4956_v37 = vld [vmem:[%s5562_s22 + $0x2c0] ss:$48 sps:$4 sm:$0xff]  }
0x178b   : > { %v4826_v32 = vpop.permute.xlu1 %4825  ;;  %v4961_v36 = vld [vmem:[%s5562_s22 + $0x2cc] ss:$48 sps:$4 sm:$0xff]  }
0x178c   : > { %v4828_v38 = vunpack.i.h.bf16 %v4826_v32 }
0x178e   : > { %v5055_v8 = vpop.eup %5054  ;;  %v3050_v44 = vsel %vm1696_vm4, %v3048_v41, %v4828_v38  ;;  %v4959_v38 = vld [vmem:[%s5562_s22 + $0x2c8] ss:$48 sps:$4 sm:$0xff]  }
0x178f   : > { %v2915_v24 = vsel %vm874_vm3, %v5055_v8, 0.0 }
0x1790   : > { %2916 = vadd.xlane.f32.xlu0 %v2915_v24 }
0x1793   : > { %v2908_v34 = vpop.xlane.xlu0 %2907 }
0x1794   : > { %v2910_v4 = vsub.f32 %v2902_v47, %v2908_v34  ;;  %v4914_v34 = vld [vmem:[%s5562_s22 + $0x20] ss:$48 sps:$4 sm:$0xff]  }
0x1796   : > { %v2913_v6 = vmul.f32 1.442695, %v2910_v4  ;;  %v4916_v4 = vld [vmem:[%s5562_s22 + $0x24] ss:$48 sps:$4 sm:$0xff]  }
0x1798   : > { %5056 = vpow2.f32 %v2913_v6  ;;  %v4919_v6 = vld [vmem:[%s5562_s22 + $0x2c] ss:$48 sps:$4 sm:$0xff]  }
0x17a2   : > { %v5057_v33 = vpop.eup %5056 }
0x17a3   : > { %v2918_v35 = vsel %vm874_vm3, %v5057_v33, 0.0 }
0x17a4   : > { %2919 = vadd.xlane.f32.xlu0 %v2918_v35  ;;  %v4925_v35 = vld [vmem:[%s5562_s22 + $0x8c] ss:$48 sps:$4 sm:$0xff]  }
0x17ba   : > { %2975 = vrot.lane.b32.xlu0 %v5957_v61, %s5293_s23 }
0x181d   : > { %v2917_v31 = vpop.xlane.xlu0 %2916 }
0x181e   : > { %5058 = vrcp.f32 %v2917_v31  ;;  %v4920_v31 = vld [vmem:[%s5562_s22 + $0x80] ss:$48 sps:$4 sm:$0xff]  }
0x1828   : > { %v5059_v9 = vpop.eup %5058 }
0x1829   : > { %v2923_v20 = vmul.f32 %v5059_v9, %v5055_v8 }
0x182b   : > { %v2925_v58 = vpack.c.bf16 %v2923_v20, %v2923_v20 }
0x182d   : > { %4683 = vmatmul.mubr.msk.bf16.vlgmr.msra.gmra.mrb[56].mxu0 %vm874_vm3, %v2925_v58 }
0x182e   : > { %4708 = vmatprep.mubr.msk.bf16.mxu0 %vm5289_vm0, %v5288_v29  ;;  %4693 = vmatpush3.bf16.msra.mxu0 %v4906_v26  ;;  %v4926_v26 = vld [vmem:[%s5562_s22 + $0xe0] ss:$48 sps:$4 sm:$0xff]  }
0x182f   : > { %4694 = vmatprep.subr.bf16.mxu0 %v5288_v29 }
0x1831   : > { %v2920_v59 = vpop.xlane.xlu0 %2919 }
0x1832   : > { %5060 = vrcp.f32 %v2920_v59  ;;  %4695 = vmatpush3.bf16.msra.mxu0 %v4907_v16  ;;  %v4929_v16 = vld [vmem:[%s5562_s22 + $0xe8] ss:$48 sps:$4 sm:$0xff]  }
0x1833   : > { %4696 = vmatprep.subr.bf16.mxu0 %v5288_v29 }
0x1835   : > { %v2976_v40 = vpop.permute.xlu0 %2975 }
0x1836   : > { %v2981_v3 = vsel %vm902_vm2, %v2976_v40, 0  ;;  %4697 = vmatpush3.bf16.msra.mxu0 %v4908_v7  ;;  %v4934_v7 = vld [vmem:[%s5562_s22 + $0x144] ss:$48 sps:$4 sm:$0xff]  }
0x1837   : > { %4687 = vmatpush3.bf16.msra.mxu1 %v2981_v3  ;;  %4698 = vmatprep.subr.bf16.mxu0 %v5288_v29 }
0x1838   : > { %3423 = vmatprep.subr.bf16.mxu1 %v4916_v4  ;;  %v4966_v4 = vld [vmem:[%s5575_s27 + $0x48] sm:$0xff]  }
0x183a   : > { %4699 = vmatpush3.bf16.msra.mxu0 %v4909_v62  ;;  %v4937_v62 = vld [vmem:[%s5562_s22 + $0x14c] ss:$48 sps:$4 sm:$0xff]  }
0x183b   : > { %4700 = vmatprep.subr.bf16.mxu0 %v5288_v29 }
0x183c   : > { %v5061_v61 = vpop.eup %5060 }
0x183d   : > { %v2924_v2 = vmul.f32 %v5061_v61, %v5057_v33  ;;  %v4922_v33 = vld [vmem:[%s5562_s22 + $0x84] ss:$48 sps:$4 sm:$0xff]  }
0x183e   : > { %4701 = vmatpush3.bf16.msra.mxu0 %v4910_v11  ;;  %v4932_v11 = vld [vmem:[%s5562_s22 + $0x140] ss:$48 sps:$4 sm:$0xff]  }
0x183f   : > { %v2926_v22 = vpack.c.bf16 %v2924_v2, %v2924_v2  ;;  %4702 = vmatprep.subr.bf16.mxu0 %v5288_v29  ;;  %v4928_v2 = vld [vmem:[%s5562_s22 + $0xe4] ss:$48 sps:$4 sm:$0xff]  }
0x1841   : > { %4689 = vmatmul.mubr.msk.bf16.vlgmr.msra.gmra.mrb[84].mxu1 %vm874_vm3, %v2926_v22  ;;  %v4931_v22 = vld [vmem:[%s5562_s22 + $0xec] ss:$48 sps:$4 sm:$0xff]  }
0x1842   : > { %3455 = vmatprep.mubr.bf16.mxu1 %v5287_v28  ;;  %4703 = vmatpush3.bf16.msra.mxu0 %v4911_v63  ;;  %v4935_v63 = vld [vmem:[%s5562_s22 + $0x148] ss:$48 sps:$4 sm:$0xff]  }
0x1843   : > { %4704 = vmatprep.subr.bf16.mxu0 %v5288_v29  ;;  %3424 = vmatpush1.bf16.msra.mxu1 %v4914_v34  ;;  %v4965_v34 = vld [vmem:[%s5575_s27 + $0x80] sm:$0xff]  }
0x1844   : > { %3425 = vmatprep.subr.bf16.mxu1 %v4922_v33  ;;  %v4969_v33 = vld [vmem:[%s5575_s27 + $0x88] sm:$0xff]  }
0x1846   : > { %4705 = vmatpush3.bf16.msra.mxu0 %v4912_v0  ;;  %v4940_v0 = vld [vmem:[%s5562_s22 + $0x1a4] ss:$48 sps:$4 sm:$0xff]  }
0x1847   : > { %4706 = vmatprep.subr.bf16.mxu0 %v5288_v29  ;;  %v4827_v29 = vunpack.i.l.bf16 %v4826_v32  ;;  %3426 = vmatpush1.bf16.msra.mxu1 %v4920_v31  ;;  %v4958_v32 = vld [vmem:[%s5562_s22 + $0x2c4] ss:$48 sps:$4 sm:$0xff]  }
0x1848   : > { %3427 = vmatprep.subr.bf16.mxu1 %v4928_v2  ;;  %v4971_v31 = vld [vmem:[%s5575_s27 + $0xd0] sm:$0xff]   ;;  %v4981_v2 = vld [vmem:[%s5575_s27 + $0xa0] sm:$0xff]  }
0x1849   : > { %v3049_v45 = vsel %vm1696_vm4, %v3047_v42, %v4827_v29 }
0x184a   : > { %4707 = vmatpush3.bf16.msra.mxu0 %v4913_v14  ;;  %v4949_v14 = vld [vmem:[%s5562_s22 + $0x20c] ss:$48 sps:$4 sm:$0xff]  }
0x184b   : > { %3466 = vmatprep.subr.bf16.mxu0 %v4919_v6  ;;  %3428 = vmatpush1.bf16.msra.mxu1 %v4926_v26  ;;  %v4968_v6 = vld [vmem:[%s5575_s27 + $0x8] sm:$0xff]  }
0x184c   : > { %3429 = vmatprep.subr.bf16.mxu1 %v4934_v7  ;;  %v4983_v26 = vld [vmem:[%s5575_s27 + $0xe8] sm:$0xff]  }
0x184d   : > { %v4985_v7 = vld [vmem:[%s5575_s27 + $0xa8] sm:$0xff]  }
0x184f   : > { %3430 = vmatpush1.bf16.msra.mxu1 %v4932_v11  ;;  %v4987_v11 = vld [vmem:[%s5575_s27 + $0xf0] sm:$0xff]  }
0x1850   : > { %3431 = vmatprep.subr.bf16.mxu1 %v4940_v0  ;;  %v4989_v0 = vld [vmem:[%s5575_s27 + $0xb0] sm:$0xff]  }
0x1900   : > { %v2969_v1 = vpop.f32.mrb[56].mxu0 }
0x1901   : > { %v4684_v5 = vpop.f32.mrb[57].mxu0 }
0x1902   : > { %v2972_v18 = vpop.f32.mrb[58].mxu0  ;;  %v4938_v5 = vld [vmem:[%s5562_s22 + $0x1a0] ss:$48 sps:$4 sm:$0xff]  }
0x1903   : > { %v4685_v10 = vpop.f32.mrb[59].mxu0  ;;  %v4941_v18 = vld [vmem:[%s5562_s22 + $0x1a8] ss:$48 sps:$4 sm:$0xff]   ;;  %3432 = vmatpush1.bf16.msra.mxu1 %v4938_v5 }
0x1904   : > { %v4946_v10 = vld [vmem:[%s5562_s22 + $0x204] ss:$48 sps:$4 sm:$0xff]   ;;  %v4991_v5 = vld [vmem:[%s5575_s27 + $0xf8] sm:$0xff]  }
0x1905   : > { %3433 = vmatprep.subr.bf16.mxu1 %v4946_v10  ;;  %v4993_v10 = vld [vmem:[%s5575_s27 + $0xb8] sm:$0xff]  }
0x1914   : > { %v3017_v15 = vpop.f32.mrb[84].mxu1 }
0x1915   : > { %v4829_v17 = vpack.i.bf16 %v3017_v15, %v2969_v1  ;;  %v4690_v19 = vpop.f32.mrb[85].mxu1  ;;  %v4943_v1 = vld [vmem:[%s5562_s22 + $0x1ac] ss:$48 sps:$4 sm:$0xff]   ;;  %v4944_v15 = vld [vmem:[%s5562_s22 + $0x200] ss:$48 sps:$4 sm:$0xff]  }
0x1916   : > { %v3020_v21 = vpop.f32.mrb[86].mxu1  ;;  %3434 = vmatpush1.bf16.msra.mxu1 %v4944_v15  ;;  %v4952_v19 = vld [vmem:[%s5562_s22 + $0x264] ss:$48 sps:$4 sm:$0xff]   ;;  %v3257_v15 = vsub.s32 3, %v5629_v56 }
0x1917   : > { %4830 = vrot.lane.b32.xlu1 %v4829_v17, %s5291_s17  ;;  %v4691_v23 = vpop.f32.mrb[87].mxu1  ;;  %v4947_v17 = vld [vmem:[%s5562_s22 + $0x208] ss:$48 sps:$4 sm:$0xff]   ;;  %v4955_v21 = vld [vmem:[%s5562_s22 + $0x26c] ss:$48 sps:$4 sm:$0xff]   ;;  %3435 = vmatprep.subr.bf16.mxu1 %v4952_v19 }
0x1918   : > { %v4950_v23 = vld [vmem:[%s5562_s22 + $0x260] ss:$48 sps:$4 sm:$0xff]  }
0x191a   : > { %3436 = vmatpush1.bf16.msra.mxu1 %v4950_v23 }
0x191b   : > { %3437 = vmatprep.subr.bf16.mxu1 %v4958_v32 }
0x191e   : > { %3438 = vmatpush1.bf16.msra.mxu1 %v4956_v37 }
0x1989   : > { %v4831_v39 = vpop.permute.xlu1 %4830 }
0x198a   : > { %v4833_v55 = vunpack.i.h.bf16 %v4831_v39  ;;  %v4832_v43 = vunpack.i.l.bf16 %v4831_v39 }
0x198c   : > { %v3052_v46 = vsel %vm1699_vm5, %v3050_v44, %v4833_v55  ;;  %v3051_v47 = vsel %vm1699_vm5, %v3049_v45, %v4832_v43 }
0x198d   : > { %v3069_v48 = vpack.c.bf16 %v3052_v46, %v3051_v47  ;;  %v4223_v46 = vld [vmem:[%s5577_s20 + $0xa] ss:$0 sm:$0xff] }
0x198f   : > { %4709 = vmatmul.mubr.bf16.vlgmr.msra.gmra.mrb[60].mxu0 %v3069_v48 }
0x1990   : > { %3498 = vmatprep.mubr.bf16.mxu0 %v5287_v28  ;;  %v4917_v28 = vld [vmem:[%s5562_s22 + $0x28] ss:$48 sps:$4 sm:$0xff]  }
0x1991   : > { %3467 = vmatpush1.bf16.msra.mxu0 %v4917_v28  ;;  %v4967_v28 = vld [vmem:[%s5575_s27 + $0xc8] sm:$0xff]  }
0x1992   : > { %3468 = vmatprep.subr.bf16.mxu0 %v4925_v35  ;;  %v4970_v35 = vld [vmem:[%s5575_s27 + $0x50] sm:$0xff]  }
0x1a62   : > { %v3159_v25 = vpop.f32.mrb[60].mxu0 }
0x1a63   : > { %v3160_v49 = vadd.f32 %v4214_v13, %v3159_v25  ;;  %v4710_v50 = vpop.f32.mrb[61].mxu0  ;;  %v4224_v25 = vld [vmem:[%s5577_s20 + $0xb] ss:$0 sm:$0xff] }
0x1a64   : > { %v3162_v51 = vpop.f32.mrb[62].mxu0 }
0x1a65   : > { %v3163_v52 = vadd.f32 %v4214_v13, %v3162_v51  ;;  %v4711_v27 = vpop.f32.mrb[63].mxu0  ;;  %v3166_v8 = vadd.f32 %v3160_v49, %v5895_v53  ;;  %v4923_v53 = vld [vmem:[%s5562_s22 + $0x88] ss:$48 sps:$4 sm:$0xff]  }
0x1a66   : > { %3469 = vmatpush1.bf16.msra.mxu0 %v4923_v53  ;;  %v4962_v27 = vld [vmem:[%s5575_s27 + $0x40] sm:$0xff]   ;;  %v4972_v53 = vld [vmem:[%s5575_s27 + $0x10] sm:$0xff]  }
0x1a67   : > { %3170 = vadd.xlane.f32.xlu0 %v3166_v8  ;;  %v3167_v24 = vadd.f32 %v3163_v52, %v5897_v54  ;;  %3470 = vmatprep.subr.bf16.mxu0 %v4931_v22  ;;  %v4982_v22 = vld [vmem:[%s5575_s27 + $0x68] sm:$0xff]  }
0x1a68   : > { %4396 = vmatprep.subr.bf16.mxu1 %v4962_v27 }
0x1a69   : > { %3172 = vadd.xlane.f32.xlu1 %v3167_v24 }
0x1a6a   : > { %3471 = vmatpush1.bf16.msra.mxu0 %v4929_v16  ;;  %v4984_v16 = vld [vmem:[%s5575_s27 + $0x28] sm:$0xff]  }
0x1a6b   : > { %3472 = vmatprep.subr.bf16.mxu0 %v4937_v62  ;;  %v4986_v62 = vld [vmem:[%s5575_s27 + $0x70] sm:$0xff]  }
0x1a6e   : > { %3473 = vmatpush1.bf16.msra.mxu0 %v4935_v63  ;;  %v4988_v63 = vld [vmem:[%s5575_s27 + $0x30] sm:$0xff]  }
0x1a6f   : > { %3474 = vmatprep.subr.bf16.mxu0 %v4943_v1  ;;  %v4990_v1 = vld [vmem:[%s5575_s27 + $0x78] sm:$0xff]  }
0x1a72   : > { %3475 = vmatpush1.bf16.msra.mxu0 %v4941_v18  ;;  %v4992_v18 = vld [vmem:[%s5575_s27 + $0x38] sm:$0xff]  }
0x1a73   : > { %3476 = vmatprep.subr.bf16.mxu0 %v4949_v14  ;;  %v3241_v14 = vld [vmem:[%s5577_s20 + $0xc] sm:$0xf] }
0x1a74   : > { %v3254_v19 = vrot.slane %v3241_v14, %v520_v12  ;;  %v3258_v23 = vrot.slane %v3241_v14, %v3257_v15 }
0x1a76   : > { %3477 = vmatpush1.bf16.msra.mxu0 %v4947_v17  ;;  %v3246_v17 = vrot.slane %v3241_v14, %v5637_v60 }
0x1a77   : > { %3478 = vmatprep.subr.bf16.mxu0 %v4955_v21  ;;  %v3250_v21 = vrot.slane %v3241_v14, %v5632_v57 }
0x1a7a   : > { %3479 = vmatpush1.bf16.msra.mxu0 %v4953_v30 }
0x1a7b   : > { %3480 = vmatprep.subr.bf16.mxu0 %v4961_v36 }
0x1a7e   : > { %3481 = vmatpush1.bf16.msra.mxu0 %v4959_v38 }
0x1af4   : > { %v3171_v54 = vpop.xlane.xlu0 %3170 }
0x1af5   : > { %v3174_v9 = vmul.f32 0.0078125, %v3171_v54  ;;  %v4973_v54 = vld [vmem:[%s5575_s27 + $0x90] sm:$0xff]  }
0x1af6   : > { %v3173_v20 = vpop.xlane.xlu1 %3172 }
0x1af7   : > { %v6121_v58 = vsub.f32 %v3166_v8, %v3174_v9  ;;  %v3175_v59 = vmul.f32 0.0078125, %v3173_v20  ;;  %v4963_v8 = vld [vmem:[%s5575_s27 + $0xc0] sm:$0xff]   ;;  %v4974_v9 = vld [vmem:[%s5575_s27 + $0x58] sm:$0xff]  }
0x1af8   : > { %4418 = vmatprep.subr.bf16.mxu0 %v4963_v8  ;;  %v4975_v20 = vld [vmem:[%s5575_s27 + $0xd8] sm:$0xff]  }
0x1af9   : > { %v6123_v40 = vsub.f32 %v3167_v24, %v3175_v59  ;;  %v3178_v3 = vmul.f32 %v6121_v58, %v6121_v58  ;;  %v4964_v24 = vld [vmem:[%s5575_s27] sm:$0xff]   ;;  %v4977_v59 = vld [vmem:[%s5575_s27 + $0x98] sm:$0xff]  }
0x1afb   : > { %3180 = vadd.xlane.f32.xlu0 %v3178_v3  ;;  %v3179_v61 = vmul.f32 %v6123_v40, %v6123_v40  ;;  %v4979_v3 = vld [vmem:[%s5575_s27 + $0xe0] sm:$0xff]  }
0x1aff   : > { %3182 = vadd.xlane.f32.xlu0 %v3179_v61  ;;  %v4980_v61 = vld [vmem:[%s5575_s27 + $0x20] sm:$0xff]  }
0x1b88   : > { %v3181_v29 = vpop.xlane.xlu0 %3180 }
0x1b89   : > { %v3184_v39 = vmul.f32 0.0078125, %v3181_v29 }
0x1b8b   : > { %v3186_v41 = vadd.f32 1e-12, %v3184_v39 }
0x1b8c   : > { %v3183_v42 = vpop.xlane.xlu0 %3182 }
0x1b8d   : > { %5062 = vrsqrt.f32 %v3186_v41  ;;  %v3185_v55 = vmul.f32 0.0078125, %v3183_v42 }
0x1b8f   : > { %v3187_v43 = vadd.f32 1e-12, %v3185_v55 }
0x1b91   : > { %5064 = vrsqrt.f32 %v3187_v43 }
0x1b97   : > { %v5063_v44 = vpop.eup %5062 }
0x1b98   : > { %v3190_v45 = vmul.f32 %v5063_v44, %v6121_v58  ;;  %v4976_v58 = vld [vmem:[%s5575_s27 + $0x18] sm:$0xff]  }
0x1b9a   : > { %v3198_v13 = vmul.f32 %v4223_v46, %v3190_v45 }
0x1b9b   : > { %v5065_v47 = vpop.eup %5064 }
0x1b9c   : > { %v3191_v48 = vmul.f32 %v5065_v47, %v6123_v40  ;;  %v6157_v50 = vadd.f32 %v4224_v25, %v3198_v13  ;;  %v4978_v40 = vld [vmem:[%s5575_s27 + $0x60] sm:$0xff]  }
0x1b9e   : > { %v3199_v49 = vmul.f32 %v4223_v46, %v3191_v48 }
0x1ba0   : > { %v6159_v51 = vadd.f32 %v4224_v25, %v3199_v49 }
0x1ba2   : > { %v3240_v52 = vpack.c.bf16 %v6159_v51, %v6157_v50 }
0x1ba4   : > { %3456 = vmatmul.mubr.bf16.vlgmr.msra.gmra.mrb[88].mxu1 %v3240_v52  ;;  %3499 = vmatmul.mubr.bf16.vlgmr.msra.gmra.mrb[64].mxu0 %v3240_v52 }
0x1ba5   : > { %4397 = vmatpush3.bf16.msra.mxu1 %v4964_v24  ;;  %4419 = vmatpush3.bf16.msra.mxu0 %v4965_v34 }
0x1ba6   : > { %4398 = vmatprep.subr.bf16.mxu1 %v4966_v4  ;;  %4420 = vmatprep.subr.bf16.mxu0 %v4967_v28 }
0x1ba9   : > { %4399 = vmatpush3.bf16.msra.mxu1 %v4968_v6  ;;  %4421 = vmatpush3.bf16.msra.mxu0 %v4969_v33 }
0x1baa   : > { %4400 = vmatprep.subr.bf16.mxu1 %v4970_v35  ;;  %4422 = vmatprep.subr.bf16.mxu0 %v4971_v31 }
0x1bad   : > { %4401 = vmatpush3.bf16.msra.mxu1 %v4972_v53  ;;  %4423 = vmatpush3.bf16.msra.mxu0 %v4973_v54 }
0x1bae   : > { %4402 = vmatprep.subr.bf16.mxu1 %v4974_v9  ;;  %4424 = vmatprep.subr.bf16.mxu0 %v4975_v20 }
0x1bb1   : > { %4403 = vmatpush3.bf16.msra.mxu1 %v4976_v58  ;;  %4425 = vmatpush3.bf16.msra.mxu0 %v4977_v59 }
0x1bb2   : > { %4404 = vmatprep.subr.bf16.mxu1 %v4978_v40  ;;  %4426 = vmatprep.subr.bf16.mxu0 %v4979_v3 }
0x1bb5   : > { %4405 = vmatpush3.bf16.msra.mxu1 %v4980_v61  ;;  %4427 = vmatpush3.bf16.msra.mxu0 %v4981_v2 }
0x1bb6   : > { %4406 = vmatprep.subr.bf16.mxu1 %v4982_v22  ;;  %4428 = vmatprep.subr.bf16.mxu0 %v4983_v26 }
0x1bb9   : > { %4407 = vmatpush3.bf16.msra.mxu1 %v4984_v16  ;;  %4429 = vmatpush3.bf16.msra.mxu0 %v4985_v7 }
0x1bba   : > { %4408 = vmatprep.subr.bf16.mxu1 %v4986_v62  ;;  %4430 = vmatprep.subr.bf16.mxu0 %v4987_v11 }
0x1bbd   : > { %4409 = vmatpush3.bf16.msra.mxu1 %v4988_v63  ;;  %4431 = vmatpush3.bf16.msra.mxu0 %v4989_v0 }
0x1bbe   : > { %4410 = vmatprep.subr.bf16.mxu1 %v4990_v1  ;;  %4432 = vmatprep.subr.bf16.mxu0 %v4991_v5 }
0x1bc1   : > { %4411 = vmatpush3.bf16.msra.mxu1 %v4992_v18  ;;  %4433 = vmatpush3.bf16.msra.mxu0 %v4993_v10 }
0x1c77   : > { %v3457_v30 = vpop.f32.mrb[88].mxu1  ;;  %v3500_v32 = vpop.f32.mrb[64].mxu0 }
0x1c78   : > { %v6201_v36 = vadd.f32 %v3457_v30, %v3246_v17  ;;  %v6203_v37 = vadd.f32 %v3500_v32, %v3254_v19  ;;  %v3459_v38 = vpop.f32.mrb[89].mxu1  ;;  %v3502_v29 = vpop.f32.mrb[65].mxu0 }
0x1c79   : > { %v6205_v39 = vadd.f32 %v3459_v38, %v3250_v21  ;;  %v6207_v41 = vadd.f32 %v3502_v29, %v3258_v23  ;;  %v3461_v42 = vpop.f32.mrb[90].mxu1  ;;  %v3504_v60 = vpop.f32.mrb[66].mxu0 }
0x1c7a   : > { %v3509_v56 = vmul.f32 %v6201_v36, %v6201_v36  ;;  %v3511_v57 = vmul.f32 %v6203_v37, %v6203_v37  ;;  %v6213_v12 = vadd.f32 %v3461_v42, %v3246_v17  ;;  %v6215_v55 = vadd.f32 %v3504_v60, %v3254_v19  ;;  %v3463_v43 = vpop.f32.mrb[91].mxu1  ;;  %v3506_v44 = vpop.f32.mrb[67].mxu0 }
0x1c7b   : > { %v3510_v45 = vmul.f32 %v6205_v39, %v6205_v39  ;;  %v3512_v46 = vmul.f32 %v6207_v41, %v6207_v41  ;;  %v6221_v47 = vadd.f32 %v3463_v43, %v3250_v21  ;;  %v6223_v48 = vadd.f32 %v3506_v44, %v3258_v23 }
0x1c7c   : > { %v3517_v13 = vmul.f32 %v3509_v56, %v6201_v36  ;;  %v3519_v25 = vmul.f32 %v3511_v57, %v6203_v37  ;;  %v3513_v49 = vmul.f32 %v6213_v12, %v6213_v12  ;;  %v3515_v52 = vmul.f32 %v6215_v55, %v6215_v55 }
0x1c7d   : > { %v3518_v27 = vmul.f32 %v3510_v45, %v6205_v39  ;;  %v3520_v8 = vmul.f32 %v3512_v46, %v6207_v41  ;;  %v3514_v24 = vmul.f32 %v6221_v47, %v6221_v47  ;;  %v3516_v34 = vmul.f32 %v6223_v48, %v6223_v48 }
0x1c7e   : > { %v3525_v4 = vmul.f32 0.044715, %v3517_v13  ;;  %v3527_v28 = vmul.f32 0.044715, %v3519_v25  ;;  %v3521_v6 = vmul.f32 %v3513_v49, %v6213_v12  ;;  %v3523_v33 = vmul.f32 %v3515_v52, %v6215_v55 }
0x1c7f   : > { %v3526_v35 = vmul.f32 0.044715, %v3518_v27  ;;  %v3528_v31 = vmul.f32 0.044715, %v3520_v8  ;;  %v3522_v53 = vmul.f32 %v3514_v24, %v6221_v47  ;;  %v3524_v54 = vmul.f32 %v3516_v34, %v6223_v48 }
0x1c80   : > { %v3533_v9 = vadd.f32 %v3525_v4, %v6201_v36  ;;  %v3535_v20 = vadd.f32 %v3527_v28, %v6203_v37  ;;  %v3529_v58 = vmul.f32 0.044715, %v3521_v6  ;;  %v3531_v59 = vmul.f32 0.044715, %v3523_v33 }
0x1c81   : > { %v3534_v40 = vadd.f32 %v3526_v35, %v6205_v39  ;;  %v3536_v3 = vadd.f32 %v3528_v31, %v6207_v41  ;;  %v3530_v61 = vmul.f32 0.044715, %v3522_v53  ;;  %v3532_v2 = vmul.f32 0.044715, %v3524_v54 }
0x1c82   : > { %v3541_v22 = vmul.f32 0.7978846, %v3533_v9  ;;  %v3543_v26 = vmul.f32 0.7978846, %v3535_v20  ;;  %v3537_v16 = vadd.f32 %v3529_v58, %v6213_v12  ;;  %v3539_v7 = vadd.f32 %v3531_v59, %v6215_v55 }
0x1c83   : > { %v3542_v62 = vmul.f32 0.7978846, %v3534_v40  ;;  %v3544_v11 = vmul.f32 0.7978846, %v3536_v3  ;;  %v3538_v63 = vadd.f32 %v3530_v61, %v6221_v47  ;;  %v3540_v0 = vadd.f32 %v3532_v2, %v6223_v48 }
0x1c84   : > { %5066 = vtanh.f32 %v3541_v22  ;;  %v3545_v1 = vmul.f32 0.7978846, %v3537_v16  ;;  %v3547_v5 = vmul.f32 0.7978846, %v3539_v7 }
0x1c85   : > { %5068 = vtanh.f32 %v3543_v26  ;;  %v3546_v18 = vmul.f32 0.7978846, %v3538_v63  ;;  %v3548_v10 = vmul.f32 0.7978846, %v3540_v0 }
0x1c86   : > { %5070 = vtanh.f32 %v3542_v62 }
0x1c87   : > { %5072 = vtanh.f32 %v3544_v11 }
0x1c88   : > { %5074 = vtanh.f32 %v3545_v1 }
0x1c89   : > { %5076 = vtanh.f32 %v3547_v5 }
0x1c8a   : > { %5078 = vtanh.f32 %v3546_v18 }
0x1c8b   : > { %5080 = vtanh.f32 %v3548_v10 }
0x1c8e   : > { %v5067_v14 = vpop.eup %5066 }
0x1c8f   : > { %v5069_v15 = vpop.eup %5068  ;;  %v3557_v17 = vadd.f32 1.0, %v5067_v14 }
0x1c90   : > { %v5071_v19 = vpop.eup %5070  ;;  %v3559_v21 = vadd.f32 1.0, %v5069_v15 }
0x1c91   : > { %v5073_v23 = vpop.eup %5072  ;;  %v3558_v30 = vadd.f32 1.0, %v5071_v19  ;;  %v3565_v42 = vmul.f32 0.5, %v3557_v17 }
0x1c92   : > { %v5075_v32 = vpop.eup %5074  ;;  %v3560_v38 = vadd.f32 1.0, %v5073_v23  ;;  %v3567_v57 = vmul.f32 0.5, %v3559_v21 }
0x1c93   : > { %v5077_v29 = vpop.eup %5076  ;;  %v3561_v60 = vadd.f32 1.0, %v5075_v32  ;;  %v3566_v13 = vmul.f32 0.5, %v3558_v30  ;;  %v3573_v27 = vmul.f32 %v3565_v42, %v6201_v36  ;;  %v4290_v30 = vld [vmem:[%s5577_s20 + $0x11] ss:$0 sm:$0xff] }
0x1c94   : > { %v5079_v56 = vpop.eup %5078  ;;  %v3563_v43 = vadd.f32 1.0, %v5077_v29  ;;  %v3568_v52 = vmul.f32 0.5, %v3560_v38  ;;  %v3575_v34 = vmul.f32 %v3567_v57, %v6203_v37  ;;  %v4291_v29 = vld [vmem:[%s5577_s20 + $0x12] ss:$0 sm:$0xff] }
0x1c95   : > { %v5081_v44 = vpop.eup %5080  ;;  %v3569_v45 = vmul.f32 0.5, %v3561_v60  ;;  %v3562_v46 = vadd.f32 1.0, %v5079_v56  ;;  %v3574_v6 = vmul.f32 %v3566_v13, %v6205_v39 }
0x1c96   : > { %v3571_v25 = vmul.f32 0.5, %v3563_v43  ;;  %v3564_v49 = vadd.f32 1.0, %v5081_v44  ;;  %v3576_v31 = vmul.f32 %v3568_v52, %v6207_v41 }
0x1c97   : > { %v3577_v8 = vmul.f32 %v3569_v45, %v6213_v12  ;;  %v3570_v24 = vmul.f32 0.5, %v3562_v46 }
0x1c98   : > { %v3579_v4 = vmul.f32 %v3571_v25, %v6215_v55  ;;  %v3572_v28 = vmul.f32 0.5, %v3564_v49  ;;  %v4257_v55 = vld [vmem:[%s5577_s20 + $0x10] ss:$0 sm:$0xff] }
0x1c99   : > { %v3578_v33 = vmul.f32 %v3570_v24, %v6221_v47  ;;  %v3645_v35 = vpack.c.bf16 %v3577_v8, %v3573_v27 }
0x1c9a   : > { %v3580_v53 = vmul.f32 %v3572_v28, %v6223_v48  ;;  %v3647_v54 = vpack.c.bf16 %v3579_v4, %v3575_v34 }
0x1c9b   : > { %v3646_v36 = vpack.c.bf16 %v3578_v33, %v3574_v6 }
0x1c9c   : > { %v3648_v9 = vpack.c.bf16 %v3580_v53, %v3576_v31 }
0x1c9d   : > { %3880 = vmatprep.mubr.bf16.mxu1 %v3646_v36 }
0x1c9e   : > { %3921 = vmatprep.mubr.bf16.mxu0 %v3648_v9  ;;  %3881 = vmatmul.mubr.bf16.vlgmr.msra.gmra.mrb[92].mxu1 %v3645_v35 }
0x1c9f   : > { %3922 = vmatmul.mubr.bf16.vlgmr.msra.gmra.mrb[68].mxu0 %v3647_v54 }
0x1d71   : > { %v4412_v37 = vpop.f32.mrb[92].mxu1 }
0x1d72   : > { %v4434_v12 = vpop.f32.mrb[68].mxu0  ;;  %v4413_v20 = vpop.f32.mrb[93].mxu1 }
0x1d73   : > { %v4414_v58 = vadd.f32 %v4413_v20, %v4412_v37  ;;  %v4435_v39 = vpop.f32.mrb[69].mxu0  ;;  %v4415_v59 = vpop.f32.mrb[94].mxu1 }
0x1d74   : > { %v4436_v47 = vadd.f32 %v4435_v39, %v4434_v12  ;;  %v4437_v40 = vpop.f32.mrb[70].mxu0  ;;  %v4416_v3 = vpop.f32.mrb[95].mxu1 }
0x1d75   : > { %v3883_v41 = vadd.f32 %v4414_v58, %v4257_v55  ;;  %v4417_v61 = vadd.f32 %v4416_v3, %v4415_v59  ;;  %v4438_v48 = vpop.f32.mrb[71].mxu0 }
0x1d76   : > { %v4439_v2 = vadd.f32 %v4438_v48, %v4437_v40 }
0x1d77   : > { %v3924_v22 = vadd.f32 %v4436_v47, %v3883_v41  ;;  %v3886_v26 = vadd.f32 %v4417_v61, %v4257_v55 }
0x1d79   : > { %v3927_v16 = vadd.f32 %v4439_v2, %v3886_v26  ;;  %v3930_v7 = vadd.f32 %v3924_v22, %v6157_v50 }
0x1d7b   : > { %3934 = vadd.xlane.f32.xlu0 %v3930_v7  ;;  %v3931_v62 = vadd.f32 %v3927_v16, %v6159_v51 }
0x1d7d   : > { %3936 = vadd.xlane.f32.xlu1 %v3931_v62 }
0x1e08   : > { %v3935_v11 = vpop.xlane.xlu0 %3934 }
0x1e09   : > { %v3938_v63 = vmul.f32 0.0078125, %v3935_v11 }
0x1e0a   : > { %v3937_v0 = vpop.xlane.xlu1 %3936 }
0x1e0b   : > { %v3940_v1 = vsub.f32 %v3930_v7, %v3938_v63  ;;  %v3939_v5 = vmul.f32 0.0078125, %v3937_v0 }
0x1e0d   : > { %v3941_v18 = vsub.f32 %v3931_v62, %v3939_v5  ;;  %v3942_v10 = vmul.f32 %v3940_v1, %v3940_v1 }
0x1e0f   : > { %3944 = vadd.xlane.f32.xlu0 %v3942_v10  ;;  %v3943_v14 = vmul.f32 %v3941_v18, %v3941_v18 }
0x1e11   : > { %3946 = vadd.xlane.f32.xlu1 %v3943_v14 }
0x1e9c   : > { %v3945_v15 = vpop.xlane.xlu0 %3944 }
0x1e9d   : > { %v3948_v17 = vmul.f32 0.0078125, %v3945_v15 }
0x1e9e   : > { %v3947_v19 = vpop.xlane.xlu1 %3946 }
0x1e9f   : > { %v3950_v50 = vadd.f32 1e-12, %v3948_v17  ;;  %v3949_v21 = vmul.f32 0.0078125, %v3947_v19 }
0x1ea1   : > { %5082 = vrsqrt.f32 %v3950_v50  ;;  %v3951_v51 = vadd.f32 1e-12, %v3949_v21 }
0x1ea3   : > { %5084 = vrsqrt.f32 %v3951_v51 }
0x1eab   : > { %v5083_v23 = vpop.eup %5082 }
0x1eac   : > { %v3954_v32 = vmul.f32 %v5083_v23, %v3940_v1 }
0x1ead   : > { %v5085_v38 = vpop.eup %5084 }
0x1eae   : > { %v3962_v42 = vmul.f32 %v4290_v30, %v3954_v32  ;;  %v3955_v60 = vmul.f32 %v5085_v38, %v3941_v18 }
0x1eb0   : > { %v3970_v56 = vadd.f32 %v4291_v29, %v3962_v42  ;;  %v3963_v57 = vmul.f32 %v4290_v30, %v3955_v60 }
0x1eb2   : > { %3972 = vst [vmem:[#allocation2] sm:$0xff] %v3970_v56  ;;  %3974 = vst [vmem:[%s5573_s12] sm:$0xff] %v3970_v56  ;;  %v3971_v43 = vadd.f32 %v4291_v29, %v3963_v57 }
0x1eb4   : > { %3973 = vst [vmem:[#allocation2 + $0x8] sm:$0xff] %v3971_v43  ;;  %3975 = vst [vmem:[%s5573_s12 + $0x8] sm:$0xff] %v3971_v43 }
0x1eb5 PF: > { %s6328_s30 = sld [smem:[#allocation14_spill]]  ;;  %s6329_s16 = sld [smem:[#allocation13_spill]] }
0x1eb6   : > { %s6330_s29 = sld [smem:[#allocation15_spill]]  ;;  %s6331_s27 = smov %s5268_s28 }
0x1ebb   : > { %p17_p6 = scmp.ge.s32.totalorder %s6328_s30, 10   ;;  %s6332_s28 = smov %s6329_s16 }
0x1ebd   :  { %19 = sbr.rel (!%p17_p6) target bundleno = 7 (0x7), region = 125 }
0x1ec4   :  { %3997 = vsyncpa [#allocation4], 1 }
0x1ec5   :  { %3999 = vsyncpa [#allocation4 + $0x1], 1 }
0x1ec6   :  { %4000 = vsyncpa [#allocation6], 1 }

</bundles_post_ra>
